<compile_context>
chip_gen: v7x
topology: tpu7x:2x2x1
jax: 0.10.0
libtpu: 0.0.40
codegen_flags: <defaults>
</compile_context>

<pallas_src>
import functools

import jax
import jax.numpy as jnp
from jax.experimental import pallas as pl
from jax.experimental.pallas import tpu as pltpu

LINK_STATE_DIM = 32
PATH_STATE_DIM = 32
HSIZE = 32
READOUT_DIM = 8
OUTPUT_UNITS = 1
OUT_PAD = 128          # lane-dense padded output width (sliced back to 1 in wrapper)
T_STEPS = 8

_VMEM = pl.BlockSpec(memory_space=pltpu.MemorySpace.VMEM)


# ----------------------------------------------------------------------------
# Fused RouteNet kernel: T rounds of (path GRU seq -> scatter -> link GRU)
# plus the readout MLP, all states resident on-chip.
# ----------------------------------------------------------------------------
def routenet_fused_kernel(
    g_ref, gt_ref,                    # [S, P, L] / [S, L, P] one-hot incidence
    link0_ref, path0_ref,             # [L, 32] / [P, 32] initial states
    p_wr, p_wz, p_win, p_whn, p_br, p_bz, p_bin, p_bhn,     # path GRU (gate-split)
    l_wr, l_wz, l_win, l_whn, l_br, l_bz, l_bin, l_bhn,     # link GRU (gate-split)
    r_w1, r_b1, r_w2, r_b2, r_w3p, r_b3p,                   # readout (layer 3 lane-padded)
    y_ref,                            # [P, OUT_PAD]
):
    S, P, L = g_ref.shape
    H = HSIZE
    f32 = jnp.float32

    # ---- hoist weight loads / bias broadcasts out of all loops ---------------
    pWr, pWz, pWin, pWhn = p_wr[...], p_wz[...], p_win[...], p_whn[...]
    pBr = jnp.broadcast_to(p_br[...], (P, H))
    pBz = jnp.broadcast_to(p_bz[...], (P, H))
    pBin = jnp.broadcast_to(p_bin[...], (P, H))
    pBhn = jnp.broadcast_to(p_bhn[...], (P, H))

    lWr, lWz, lWin, lWhn = l_wr[...], l_wz[...], l_win[...], l_whn[...]
    lBr = jnp.broadcast_to(l_br[...], (L, H))
    lBz = jnp.broadcast_to(l_bz[...], (L, H))
    lBin = jnp.broadcast_to(l_bin[...], (L, H))
    lBhn = jnp.broadcast_to(l_bhn[...], (L, H))

    # per-timestep incidence matrices (loop-invariant over the T outer rounds)
    G = [g_ref[s] for s in range(S)]       # each [P, L]
    Gt = [gt_ref[s] for s in range(S)]     # each [L, P]

    def gru_step(x, h, Wr, Wz, Win, Whn, Br, Bz, Bin, Bhn):
        # PyTorch nn.GRU semantics (gate order r, z, n); gate-separated outputs;
        # r/z gates share one K=(D+H) contraction of concat([x, h]).
        xh = jnp.concatenate([x, h], axis=-1)
        r = jax.nn.sigmoid(jnp.dot(xh, Wr, preferred_element_type=f32) + Br)
        z = jax.nn.sigmoid(jnp.dot(xh, Wz, preferred_element_type=f32) + Bz)
        n = jnp.tanh(jnp.dot(x, Win, preferred_element_type=f32) + Bin
                     + r * (jnp.dot(h, Whn, preferred_element_type=f32) + Bhn))
        return (1.0 - z) * n + z * h

    link_state = link0_ref[...]
    path_state = path0_ref[...]

    # T message-passing rounds, fully on-chip (static unroll: T and S are small/fixed).
    # TODO(synk): per-(t,path) validity mask (select h_new vs h) for variable-length
    #             paths to match PyTorch packed-sequence semantics; demo paths are
    #             uniform length so behavior matches the reference module here.
    for _ in range(T_STEPS):
        h = path_state
        agg = jnp.zeros((L, H), f32)
        for s in range(S):
            # gather link states onto (path, seq) slots — one-hot contraction on MXU
            x_s = jnp.dot(G[s], link_state, preferred_element_type=f32)       # [P, H]
            h = gru_step(x_s, h, pWr, pWz, pWin, pWhn, pBr, pBz, pBin, pBhn)  # [P, H]
            # scatter-add messages back onto links — one-hot contraction on MXU
            agg = agg + jnp.dot(Gt[s], h, preferred_element_type=f32)         # [L, H]
        path_state = h
        link_state = gru_step(agg, link_state,
                              lWr, lWz, lWin, lWhn, lBr, lBz, lBin, lBhn)

    # fused readout MLP; final layer padded so the store is lane-dense (128 wide)
    a = jnp.maximum(jnp.dot(path_state, r_w1[...], preferred_element_type=f32)
                    + r_b1[...], 0.0)
    a = jnp.maximum(jnp.dot(a, r_w2[...], preferred_element_type=f32)
                    + r_b2[...], 0.0)
    y_ref[...] = jnp.dot(a, r_w3p[...], preferred_element_type=f32) + r_b3p[...]


# ----------------------------------------------------------------------------
# parameter init (PyTorch nn.GRU / nn.Linear shapes, stored transposed) and
# gate-split repacking for the kernel
# ----------------------------------------------------------------------------
def init_params(key):
    def _w(k, shape):
        return jax.random.normal(k, shape, dtype=jnp.float32) * 0.1

    ks = jax.random.split(key, 14)
    return {
        # link GRU l_U : input 32 -> hidden 32 ; stored transposed [D, 3H] / [H, 3H]
        "l_wih": _w(ks[0], (LINK_STATE_DIM, 3 * HSIZE)),
        "l_whh": _w(ks[1], (HSIZE, 3 * HSIZE)),
        "l_bih": _w(ks[2], (1, 3 * HSIZE)),
        "l_bhh": _w(ks[3], (1, 3 * HSIZE)),
        # path GRU p_U : input 32 -> hidden 32
        "p_wih": _w(ks[4], (PATH_STATE_DIM, 3 * HSIZE)),
        "p_whh": _w(ks[5], (HSIZE, 3 * HSIZE)),
        "p_bih": _w(ks[6], (1, 3 * HSIZE)),
        "p_bhh": _w(ks[7], (1, 3 * HSIZE)),
        # readout MLP
        "r_w1": _w(ks[8], (HSIZE, READOUT_DIM)),
        "r_b1": _w(ks[9], (1, READOUT_DIM)),
        "r_w2": _w(ks[10], (READOUT_DIM, READOUT_DIM)),
        "r_b2": _w(ks[11], (1, READOUT_DIM)),
        "r_w3": _w(ks[12], (READOUT_DIM, OUTPUT_UNITS)),
        "r_b3": _w(ks[13], (1, OUTPUT_UNITS)),
    }


def _split_gru_params(wih, whh, bih, bhh):
    """Repack (wih[D,3H], whh[H,3H], biases) into gate-separated, r/z-concatenated form."""
    H = HSIZE
    wr = jnp.concatenate([wih[:, :H], whh[:, :H]], axis=0)              # [D+H, H]
    wz = jnp.concatenate([wih[:, H:2 * H], whh[:, H:2 * H]], axis=0)    # [D+H, H]
    win = wih[:, 2 * H:]                                                # [D, H]
    whn = whh[:, 2 * H:]                                                # [H, H]
    br = bih[:, :H] + bhh[:, :H]
    bz = bih[:, H:2 * H] + bhh[:, H:2 * H]
    bin_ = bih[:, 2 * H:]
    bhn = bhh[:, 2 * H:]
    return wr, wz, win, whn, br, bz, bin_, bhn


# ----------------------------------------------------------------------------
# RouteNet forward (single fused pallas_call)
# ----------------------------------------------------------------------------
@functools.partial(jax.jit, static_argnames=("n_links", "n_paths", "max_seq_len"))
def route_net_forward(params, link_capacity, bandwidth, links, paths, seqs,
                      *, n_links, n_paths, max_seq_len):
    f32 = jnp.float32
    # initial states: first feature = capacity / bandwidth, rest zeros
    link_state0 = jnp.concatenate(
        [link_capacity[:, None], jnp.zeros((n_links, LINK_STATE_DIM - 1), f32)], axis=1)
    path_state0 = jnp.concatenate(
        [bandwidth[:, None], jnp.zeros((n_paths, PATH_STATE_DIM - 1), f32)], axis=1)

    # one-hot incidence: G[s, p, l] = 1 iff path p's s-th hop is link l.
    # Gather and scatter-add inside the kernel become MXU contractions with G / G^T.
    G = jnp.zeros((max_seq_len, n_paths, n_links), f32)
    G = G.at[seqs, paths, links].set(1.0)
    Gt = jnp.transpose(G, (0, 2, 1))

    p_split = _split_gru_params(params["p_wih"], params["p_whh"],
                                params["p_bih"], params["p_bhh"])
    l_split = _split_gru_params(params["l_wih"], params["l_whh"],
                                params["l_bih"], params["l_bhh"])

    # pad the last readout layer to 128 output lanes so the kernel store is lane-dense
    r_w3p = jnp.zeros((READOUT_DIM, OUT_PAD), f32).at[:, :OUTPUT_UNITS].set(params["r_w3"])
    r_b3p = jnp.zeros((1, OUT_PAD), f32).at[:, :OUTPUT_UNITS].set(params["r_b3"])

    n_inputs = 4 + 8 + 8 + 6
    # TODO(synk): at production scale (n_paths >> 1k), add a ("parallel",) grid over
    #             the path dimension (megacore on v7x), cap vmem_limit_bytes for
    #             v7x's 64 MiB VMEM, and cast matmul operands to bf16 on v6e/v7x.
    y_pad = pl.pallas_call(
        routenet_fused_kernel,
        out_shape=jax.ShapeDtypeStruct((n_paths, OUT_PAD), f32),
        in_specs=[_VMEM] * n_inputs,
        out_specs=_VMEM,
    )(G, Gt, link_state0, path_state0,
      *p_split, *l_split,
      params["r_w1"], params["r_b1"], params["r_w2"], params["r_b2"], r_w3p, r_b3p)

    return y_pad[:, :OUTPUT_UNITS]


# ----------------------------------------------------------------------------
# pure-JAX reference (mirrors the original module's gather / scatter-add form)
# ----------------------------------------------------------------------------
def route_net_reference(params, link_capacity, bandwidth, links, paths, seqs,
                        n_links, n_paths, max_seq_len):
    H = HSIZE

    def gru_step(x, h, wih, whh, bih, bhh):
        gi = x @ wih + bih
        gh = h @ whh + bhh
        r = jax.nn.sigmoid(gi[:, :H] + gh[:, :H])
        z = jax.nn.sigmoid(gi[:, H:2 * H] + gh[:, H:2 * H])
        n = jnp.tanh(gi[:, 2 * H:] + r * gh[:, 2 * H:])
        return (1.0 - z) * n + z * h

    link_state = jnp.concatenate(
        [link_capacity[:, None], jnp.zeros((n_links, LINK_STATE_DIM - 1), jnp.float32)], 1)
    path_state = jnp.concatenate(
        [bandwidth[:, None], jnp.zeros((n_paths, PATH_STATE_DIM - 1), jnp.float32)], 1)

    for _ in range(T_STEPS):
        msgs = jnp.take(link_state, links, axis=0)
        x_seq = jnp.zeros((max_seq_len, n_paths, LINK_STATE_DIM), jnp.float32)
        x_seq = x_seq.at[seqs, paths, :].set(msgs)
        h = path_state
        hs = []
        for s in range(max_seq_len):
            h = gru_step(x_seq[s], h, params["p_wih"], params["p_whh"],
                         params["p_bih"], params["p_bhh"])
            hs.append(h)
        hs = jnp.stack(hs)
        path_state = h
        link_msgs = hs[seqs, paths, :]
        agg = jnp.zeros((n_links, LINK_STATE_DIM), jnp.float32).at[links].add(link_msgs)
        link_state = gru_step(agg, link_state, params["l_wih"], params["l_whh"],
                              params["l_bih"], params["l_bhh"])

    a = jnp.maximum(path_state @ params["r_w1"] + params["r_b1"], 0.0)
    a = jnp.maximum(a @ params["r_w2"] + params["r_b2"], 0.0)
    return a @ params["r_w3"] + params["r_b3"]


# ----------------------------------------------------------------------------
if __name__ == "__main__":
    key = jax.random.PRNGKey(0)
    k_param, k_cap, k_bw = jax.random.split(key, 3)

    n_links = 8
    n_paths = 4
    seq_len = 4          # links per path
    max_seq_len = seq_len

    # each path traverses `seq_len` links (deterministic topology)
    links = jnp.array([(p * 3 + s) % n_links
                       for p in range(n_paths) for s in range(seq_len)], dtype=jnp.int32)
    paths = jnp.array([p for p in range(n_paths) for _ in range(seq_len)], dtype=jnp.int32)
    seqs = jnp.array([s for _ in range(n_paths) for s in range(seq_len)], dtype=jnp.int32)

    link_capacity = jax.random.uniform(k_cap, (n_links,), jnp.float32,
                                       minval=1.0, maxval=10.0)
    bandwidth = jax.random.uniform(k_bw, (n_paths,), jnp.float32,
                                   minval=0.5, maxval=5.0)

    params = init_params(k_param)

    y = route_net_forward(params, link_capacity, bandwidth, links, paths, seqs,
                          n_links=n_links, n_paths=n_paths, max_seq_len=max_seq_len)
    y = jax.block_until_ready(y)
    assert y.shape == (n_paths, OUTPUT_UNITS)
    assert bool(jnp.all(jnp.isfinite(y)))

    y_ref = route_net_reference(params, link_capacity, bandwidth, links, paths, seqs,
                                n_links, n_paths, max_seq_len)
    assert jnp.allclose(y, y_ref, atol=5e-2, rtol=5e-2), (y, y_ref)

    print("KERNEL_OK")
</pallas_src>

<mosaic_0001>
module attributes {stable_mosaic.version = 11 : i64} {
  func.func @routenet_fused_kernel(%arg0: memref<4x4x8xf32, #tpu.memory_space<vmem>>, %arg1: memref<4x8x4xf32, #tpu.memory_space<vmem>>, %arg2: memref<8x32xf32, #tpu.memory_space<vmem>>, %arg3: memref<4x32xf32, #tpu.memory_space<vmem>>, %arg4: memref<64x32xf32, #tpu.memory_space<vmem>>, %arg5: memref<64x32xf32, #tpu.memory_space<vmem>>, %arg6: memref<32x32xf32, #tpu.memory_space<vmem>>, %arg7: memref<32x32xf32, #tpu.memory_space<vmem>>, %arg8: memref<1x32xf32, #tpu.memory_space<vmem>>, %arg9: memref<1x32xf32, #tpu.memory_space<vmem>>, %arg10: memref<1x32xf32, #tpu.memory_space<vmem>>, %arg11: memref<1x32xf32, #tpu.memory_space<vmem>>, %arg12: memref<64x32xf32, #tpu.memory_space<vmem>>, %arg13: memref<64x32xf32, #tpu.memory_space<vmem>>, %arg14: memref<32x32xf32, #tpu.memory_space<vmem>>, %arg15: memref<32x32xf32, #tpu.memory_space<vmem>>, %arg16: memref<1x32xf32, #tpu.memory_space<vmem>>, %arg17: memref<1x32xf32, #tpu.memory_space<vmem>>, %arg18: memref<1x32xf32, #tpu.memory_space<vmem>>, %arg19: memref<1x32xf32, #tpu.memory_space<vmem>>, %arg20: memref<32x8xf32, #tpu.memory_space<vmem>>, %arg21: memref<1x8xf32, #tpu.memory_space<vmem>>, %arg22: memref<8x8xf32, #tpu.memory_space<vmem>>, %arg23: memref<1x8xf32, #tpu.memory_space<vmem>>, %arg24: memref<8x128xf32, #tpu.memory_space<vmem>>, %arg25: memref<1x128xf32, #tpu.memory_space<vmem>>, %arg26: memref<4x128xf32, #tpu.memory_space<vmem>>) attributes {dimension_semantics = [], scalar_prefetch = 0 : i64, scratch_operands = 0 : i64, tpu.core_type = #tpu.core_type<tc>} {
    %c0 = arith.constant 0 : index
    %c0_0 = arith.constant 0 : index
    %0 = vector.load %arg4[%c0, %c0_0] : memref<64x32xf32, #tpu.memory_space<vmem>>, vector<64x32xf32>
    %c0_1 = arith.constant 0 : index
    %c0_2 = arith.constant 0 : index
    %1 = vector.load %arg5[%c0_1, %c0_2] : memref<64x32xf32, #tpu.memory_space<vmem>>, vector<64x32xf32>
    %c0_3 = arith.constant 0 : index
    %c0_4 = arith.constant 0 : index
    %2 = vector.load %arg6[%c0_3, %c0_4] : memref<32x32xf32, #tpu.memory_space<vmem>>, vector<32x32xf32>
    %c0_5 = arith.constant 0 : index
    %c0_6 = arith.constant 0 : index
    %3 = vector.load %arg7[%c0_5, %c0_6] : memref<32x32xf32, #tpu.memory_space<vmem>>, vector<32x32xf32>
    %c0_7 = arith.constant 0 : index
    %c0_8 = arith.constant 0 : index
    %4 = vector.load %arg8[%c0_7, %c0_8] : memref<1x32xf32, #tpu.memory_space<vmem>>, vector<1x32xf32>
    %5 = vector.shape_cast %4 : vector<1x32xf32> to vector<1x32xf32>
    %6 = vector.broadcast %5 : vector<1x32xf32> to vector<4x32xf32>
    %c0_9 = arith.constant 0 : index
    %c0_10 = arith.constant 0 : index
    %7 = vector.load %arg9[%c0_9, %c0_10] : memref<1x32xf32, #tpu.memory_space<vmem>>, vector<1x32xf32>
    %8 = vector.shape_cast %7 : vector<1x32xf32> to vector<1x32xf32>
    %9 = vector.broadcast %8 : vector<1x32xf32> to vector<4x32xf32>
    %c0_11 = arith.constant 0 : index
    %c0_12 = arith.constant 0 : index
    %10 = vector.load %arg10[%c0_11, %c0_12] : memref<1x32xf32, #tpu.memory_space<vmem>>, vector<1x32xf32>
    %11 = vector.shape_cast %10 : vector<1x32xf32> to vector<1x32xf32>
    %12 = vector.broadcast %11 : vector<1x32xf32> to vector<4x32xf32>
    %c0_13 = arith.constant 0 : index
    %c0_14 = arith.constant 0 : index
    %13 = vector.load %arg11[%c0_13, %c0_14] : memref<1x32xf32, #tpu.memory_space<vmem>>, vector<1x32xf32>
    %14 = vector.shape_cast %13 : vector<1x32xf32> to vector<1x32xf32>
    %15 = vector.broadcast %14 : vector<1x32xf32> to vector<4x32xf32>
    %c0_15 = arith.constant 0 : index
    %c0_16 = arith.constant 0 : index
    %16 = vector.load %arg12[%c0_15, %c0_16] : memref<64x32xf32, #tpu.memory_space<vmem>>, vector<64x32xf32>
    %c0_17 = arith.constant 0 : index
    %c0_18 = arith.constant 0 : index
    %17 = vector.load %arg13[%c0_17, %c0_18] : memref<64x32xf32, #tpu.memory_space<vmem>>, vector<64x32xf32>
    %c0_19 = arith.constant 0 : index
    %c0_20 = arith.constant 0 : index
    %18 = vector.load %arg14[%c0_19, %c0_20] : memref<32x32xf32, #tpu.memory_space<vmem>>, vector<32x32xf32>
    %c0_21 = arith.constant 0 : index
    %c0_22 = arith.constant 0 : index
    %19 = vector.load %arg15[%c0_21, %c0_22] : memref<32x32xf32, #tpu.memory_space<vmem>>, vector<32x32xf32>
    %c0_23 = arith.constant 0 : index
    %c0_24 = arith.constant 0 : index
    %20 = vector.load %arg16[%c0_23, %c0_24] : memref<1x32xf32, #tpu.memory_space<vmem>>, vector<1x32xf32>
    %21 = vector.shape_cast %20 : vector<1x32xf32> to vector<1x32xf32>
    %22 = vector.broadcast %21 : vector<1x32xf32> to vector<8x32xf32>
    %c0_25 = arith.constant 0 : index
    %c0_26 = arith.constant 0 : index
    %23 = vector.load %arg17[%c0_25, %c0_26] : memref<1x32xf32, #tpu.memory_space<vmem>>, vector<1x32xf32>
    %24 = vector.shape_cast %23 : vector<1x32xf32> to vector<1x32xf32>
    %25 = vector.broadcast %24 : vector<1x32xf32> to vector<8x32xf32>
    %c0_27 = arith.constant 0 : index
    %c0_28 = arith.constant 0 : index
    %26 = vector.load %arg18[%c0_27, %c0_28] : memref<1x32xf32, #tpu.memory_space<vmem>>, vector<1x32xf32>
    %27 = vector.shape_cast %26 : vector<1x32xf32> to vector<1x32xf32>
    %28 = vector.broadcast %27 : vector<1x32xf32> to vector<8x32xf32>
    %c0_29 = arith.constant 0 : index
    %c0_30 = arith.constant 0 : index
    %29 = vector.load %arg19[%c0_29, %c0_30] : memref<1x32xf32, #tpu.memory_space<vmem>>, vector<1x32xf32>
    %30 = vector.shape_cast %29 : vector<1x32xf32> to vector<1x32xf32>
    %31 = vector.broadcast %30 : vector<1x32xf32> to vector<8x32xf32>
    %c0_31 = arith.constant 0 : index
    %c0_32 = arith.constant 0 : index
    %c0_33 = arith.constant 0 : index
    %32 = vector.load %arg0[%c0_31, %c0_32, %c0_33] : memref<4x4x8xf32, #tpu.memory_space<vmem>>, vector<1x4x8xf32>
    %33 = vector.shape_cast %32 : vector<1x4x8xf32> to vector<4x8xf32>
    %c1 = arith.constant 1 : index
    %c0_34 = arith.constant 0 : index
    %c0_35 = arith.constant 0 : index
    %34 = vector.load %arg0[%c1, %c0_34, %c0_35] : memref<4x4x8xf32, #tpu.memory_space<vmem>>, vector<1x4x8xf32>
    %35 = vector.shape_cast %34 : vector<1x4x8xf32> to vector<4x8xf32>
    %c2 = arith.constant 2 : index
    %c0_36 = arith.constant 0 : index
    %c0_37 = arith.constant 0 : index
    %36 = vector.load %arg0[%c2, %c0_36, %c0_37] : memref<4x4x8xf32, #tpu.memory_space<vmem>>, vector<1x4x8xf32>
    %37 = vector.shape_cast %36 : vector<1x4x8xf32> to vector<4x8xf32>
    %c3 = arith.constant 3 : index
    %c0_38 = arith.constant 0 : index
    %c0_39 = arith.constant 0 : index
    %38 = vector.load %arg0[%c3, %c0_38, %c0_39] : memref<4x4x8xf32, #tpu.memory_space<vmem>>, vector<1x4x8xf32>
    %39 = vector.shape_cast %38 : vector<1x4x8xf32> to vector<4x8xf32>
    %c0_40 = arith.constant 0 : index
    %c0_41 = arith.constant 0 : index
    %c0_42 = arith.constant 0 : index
    %40 = vector.load %arg1[%c0_40, %c0_41, %c0_42] : memref<4x8x4xf32, #tpu.memory_space<vmem>>, vector<1x8x4xf32>
    %41 = vector.shape_cast %40 : vector<1x8x4xf32> to vector<8x4xf32>
    %c1_43 = arith.constant 1 : index
    %c0_44 = arith.constant 0 : index
    %c0_45 = arith.constant 0 : index
    %42 = vector.load %arg1[%c1_43, %c0_44, %c0_45] : memref<4x8x4xf32, #tpu.memory_space<vmem>>, vector<1x8x4xf32>
    %43 = vector.shape_cast %42 : vector<1x8x4xf32> to vector<8x4xf32>
    %c2_46 = arith.constant 2 : index
    %c0_47 = arith.constant 0 : index
    %c0_48 = arith.constant 0 : index
    %44 = vector.load %arg1[%c2_46, %c0_47, %c0_48] : memref<4x8x4xf32, #tpu.memory_space<vmem>>, vector<1x8x4xf32>
    %45 = vector.shape_cast %44 : vector<1x8x4xf32> to vector<8x4xf32>
    %c3_49 = arith.constant 3 : index
    %c0_50 = arith.constant 0 : index
    %c0_51 = arith.constant 0 : index
    %46 = vector.load %arg1[%c3_49, %c0_50, %c0_51] : memref<4x8x4xf32, #tpu.memory_space<vmem>>, vector<1x8x4xf32>
    %47 = vector.shape_cast %46 : vector<1x8x4xf32> to vector<8x4xf32>
    %c0_52 = arith.constant 0 : index
    %c0_53 = arith.constant 0 : index
    %48 = vector.load %arg2[%c0_52, %c0_53] : memref<8x32xf32, #tpu.memory_space<vmem>>, vector<8x32xf32>
    %c0_54 = arith.constant 0 : index
    %c0_55 = arith.constant 0 : index
    %49 = vector.load %arg3[%c0_54, %c0_55] : memref<4x32xf32, #tpu.memory_space<vmem>>, vector<4x32xf32>
    %cst = arith.constant 0.000000e+00 : f32
    %50 = vector.broadcast %cst : f32 to vector<8x32xf32>
    %cst_56 = arith.constant dense<0.000000e+00> : vector<4x32xf32>
    %51 = tpu.matmul %33, %48, %cst_56 {dimension_numbers = #tpu.dot_dimension_numbers<[1], [0], [0], [1], [0, 0, 1, 1], [], []>} : vector<4x8xf32>, vector<8x32xf32>, vector<4x32xf32> -> vector<4x32xf32>
    %52 = tpu.concatenate %51, %49 in 1 : vector<4x32xf32>, vector<4x32xf32> -> vector<4x64xf32>
    %cst_57 = arith.constant dense<0.000000e+00> : vector<4x32xf32>
    %53 = tpu.matmul %52, %0, %cst_57 {dimension_numbers = #tpu.dot_dimension_numbers<[1], [0], [0], [1], [0, 0, 1, 1], [], []>} : vector<4x64xf32>, vector<64x32xf32>, vector<4x32xf32> -> vector<4x32xf32>
    %54 = arith.addf %53, %6 : vector<4x32xf32>
    %55 = arith.negf %54 : vector<4x32xf32>
    %56 = math.exp %55 : vector<4x32xf32>
    %cst_58 = arith.constant 1.000000e+00 : f32
    %57 = vector.broadcast %cst_58 : f32 to vector<4x32xf32>
    %58 = arith.addf %57, %56 : vector<4x32xf32>
    %59 = arith.divf %57, %58 : vector<4x32xf32>
    %cst_59 = arith.constant dense<0.000000e+00> : vector<4x32xf32>
    %60 = tpu.matmul %52, %1, %cst_59 {dimension_numbers = #tpu.dot_dimension_numbers<[1], [0], [0], [1], [0, 0, 1, 1], [], []>} : vector<4x64xf32>, vector<64x32xf32>, vector<4x32xf32> -> vector<4x32xf32>
    %61 = arith.addf %60, %9 : vector<4x32xf32>
    %62 = arith.negf %61 : vector<4x32xf32>
    %63 = math.exp %62 : vector<4x32xf32>
    %cst_60 = arith.constant 1.000000e+00 : f32
    %64 = vector.broadcast %cst_60 : f32 to vector<4x32xf32>
    %65 = arith.addf %64, %63 : vector<4x32xf32>
    %66 = arith.divf %64, %65 : vector<4x32xf32>
    %cst_61 = arith.constant dense<0.000000e+00> : vector<4x32xf32>
    %67 = tpu.matmul %51, %2, %cst_61 {dimension_numbers = #tpu.dot_dimension_numbers<[1], [0], [0], [1], [0, 0, 1, 1], [], []>} : vector<4x32xf32>, vector<32x32xf32>, vector<4x32xf32> -> vector<4x32xf32>
    %68 = arith.addf %67, %12 : vector<4x32xf32>
    %cst_62 = arith.constant dense<0.000000e+00> : vector<4x32xf32>
    %69 = tpu.matmul %49, %3, %cst_62 {dimension_numbers = #tpu.dot_dimension_numbers<[1], [0], [0], [1], [0, 0, 1, 1], [], []>} : vector<4x32xf32>, vector<32x32xf32>, vector<4x32xf32> -> vector<4x32xf32>
    %70 = arith.addf %69, %15 : vector<4x32xf32>
    %71 = arith.mulf %59, %70 : vector<4x32xf32>
    %72 = arith.addf %68, %71 : vector<4x32xf32>
    %73 = math.tanh %72 : vector<4x32xf32>
    %cst_63 = arith.constant 1.000000e+00 : f32
    %74 = vector.broadcast %cst_63 : f32 to vector<4x32xf32>
    %75 = arith.subf %74, %66 : vector<4x32xf32>
    %76 = arith.mulf %75, %73 : vector<4x32xf32>
    %77 = arith.mulf %66, %49 : vector<4x32xf32>
    %78 = arith.addf %76, %77 : vector<4x32xf32>
    %cst_64 = arith.constant dense<0.000000e+00> : vector<8x32xf32>
    %79 = tpu.matmul %41, %78, %cst_64 {dimension_numbers = #tpu.dot_dimension_numbers<[1], [0], [0], [1], [0, 0, 1, 1], [], []>} : vector<8x4xf32>, vector<4x32xf32>, vector<8x32xf32> -> vector<8x32xf32>
    %80 = arith.addf %50, %79 : vector<8x32xf32>
    %cst_65 = arith.constant dense<0.000000e+00> : vector<4x32xf32>
    %81 = tpu.matmul %35, %48, %cst_65 {dimension_numbers = #tpu.dot_dimension_numbers<[1], [0], [0], [1], [0, 0, 1, 1], [], []>} : vector<4x8xf32>, vector<8x32xf32>, vector<4x32xf32> -> vector<4x32xf32>
    %82 = tpu.concatenate %81, %78 in 1 : vector<4x32xf32>, vector<4x32xf32> -> vector<4x64xf32>
    %cst_66 = arith.constant dense<0.000000e+00> : vector<4x32xf32>
    %83 = tpu.matmul %82, %0, %cst_66 {dimension_numbers = #tpu.dot_dimension_numbers<[1], [0], [0], [1], [0, 0, 1, 1], [], []>} : vector<4x64xf32>, vector<64x32xf32>, vector<4x32xf32> -> vector<4x32xf32>
    %84 = arith.addf %83, %6 : vector<4x32xf32>
    %85 = arith.negf %84 : vector<4x32xf32>
    %86 = math.exp %85 : vector<4x32xf32>
    %cst_67 = arith.constant 1.000000e+00 : f32
    %87 = vector.broadcast %cst_67 : f32 to vector<4x32xf32>
    %88 = arith.addf %87, %86 : vector<4x32xf32>
    %89 = arith.divf %87, %88 : vector<4x32xf32>
    %cst_68 = arith.constant dense<0.000000e+00> : vector<4x32xf32>
    %90 = tpu.matmul %82, %1, %cst_68 {dimension_numbers = #tpu.dot_dimension_numbers<[1], [0], [0], [1], [0, 0, 1, 1], [], []>} : vector<4x64xf32>, vector<64x32xf32>, vector<4x32xf32> -> vector<4x32xf32>
    %91 = arith.addf %90, %9 : vector<4x32xf32>
    %92 = arith.negf %91 : vector<4x32xf32>
    %93 = math.exp %92 : vector<4x32xf32>
    %cst_69 = arith.constant 1.000000e+00 : f32
    %94 = vector.broadcast %cst_69 : f32 to vector<4x32xf32>
    %95 = arith.addf %94, %93 : vector<4x32xf32>
    %96 = arith.divf %94, %95 : vector<4x32xf32>
    %cst_70 = arith.constant dense<0.000000e+00> : vector<4x32xf32>
    %97 = tpu.matmul %81, %2, %cst_70 {dimension_numbers = #tpu.dot_dimension_numbers<[1], [0], [0], [1], [0, 0, 1, 1], [], []>} : vector<4x32xf32>, vector<32x32xf32>, vector<4x32xf32> -> vector<4x32xf32>
    %98 = arith.addf %97, %12 : vector<4x32xf32>
    %cst_71 = arith.constant dense<0.000000e+00> : vector<4x32xf32>
    %99 = tpu.matmul %78, %3, %cst_71 {dimension_numbers = #tpu.dot_dimension_numbers<[1], [0], [0], [1], [0, 0, 1, 1], [], []>} : vector<4x32xf32>, vector<32x32xf32>, vector<4x32xf32> -> vector<4x32xf32>
    %100 = arith.addf %99, %15 : vector<4x32xf32>
    %101 = arith.mulf %89, %100 : vector<4x32xf32>
    %102 = arith.addf %98, %101 : vector<4x32xf32>
    %103 = math.tanh %102 : vector<4x32xf32>
    %cst_72 = arith.constant 1.000000e+00 : f32
    %104 = vector.broadcast %cst_72 : f32 to vector<4x32xf32>
    %105 = arith.subf %104, %96 : vector<4x32xf32>
    %106 = arith.mulf %105, %103 : vector<4x32xf32>
    %107 = arith.mulf %96, %78 : vector<4x32xf32>
    %108 = arith.addf %106, %107 : vector<4x32xf32>
    %cst_73 = arith.constant dense<0.000000e+00> : vector<8x32xf32>
    %109 = tpu.matmul %43, %108, %cst_73 {dimension_numbers = #tpu.dot_dimension_numbers<[1], [0], [0], [1], [0, 0, 1, 1], [], []>} : vector<8x4xf32>, vector<4x32xf32>, vector<8x32xf32> -> vector<8x32xf32>
    %110 = arith.addf %80, %109 : vector<8x32xf32>
    %cst_74 = arith.constant dense<0.000000e+00> : vector<4x32xf32>
    %111 = tpu.matmul %37, %48, %cst_74 {dimension_numbers = #tpu.dot_dimension_numbers<[1], [0], [0], [1], [0, 0, 1, 1], [], []>} : vector<4x8xf32>, vector<8x32xf32>, vector<4x32xf32> -> vector<4x32xf32>
    %112 = tpu.concatenate %111, %108 in 1 : vector<4x32xf32>, vector<4x32xf32> -> vector<4x64xf32>
    %cst_75 = arith.constant dense<0.000000e+00> : vector<4x32xf32>
    %113 = tpu.matmul %112, %0, %cst_75 {dimension_numbers = #tpu.dot_dimension_numbers<[1], [0], [0], [1], [0, 0, 1, 1], [], []>} : vector<4x64xf32>, vector<64x32xf32>, vector<4x32xf32> -> vector<4x32xf32>
    %114 = arith.addf %113, %6 : vector<4x32xf32>
    %115 = arith.negf %114 : vector<4x32xf32>
    %116 = math.exp %115 : vector<4x32xf32>
    %cst_76 = arith.constant 1.000000e+00 : f32
    %117 = vector.broadcast %cst_76 : f32 to vector<4x32xf32>
    %118 = arith.addf %117, %116 : vector<4x32xf32>
    %119 = arith.divf %117, %118 : vector<4x32xf32>
    %cst_77 = arith.constant dense<0.000000e+00> : vector<4x32xf32>
    %120 = tpu.matmul %112, %1, %cst_77 {dimension_numbers = #tpu.dot_dimension_numbers<[1], [0], [0], [1], [0, 0, 1, 1], [], []>} : vector<4x64xf32>, vector<64x32xf32>, vector<4x32xf32> -> vector<4x32xf32>
    %121 = arith.addf %120, %9 : vector<4x32xf32>
    %122 = arith.negf %121 : vector<4x32xf32>
    %123 = math.exp %122 : vector<4x32xf32>
    %cst_78 = arith.constant 1.000000e+00 : f32
    %124 = vector.broadcast %cst_78 : f32 to vector<4x32xf32>
    %125 = arith.addf %124, %123 : vector<4x32xf32>
    %126 = arith.divf %124, %125 : vector<4x32xf32>
    %cst_79 = arith.constant dense<0.000000e+00> : vector<4x32xf32>
    %127 = tpu.matmul %111, %2, %cst_79 {dimension_numbers = #tpu.dot_dimension_numbers<[1], [0], [0], [1], [0, 0, 1, 1], [], []>} : vector<4x32xf32>, vector<32x32xf32>, vector<4x32xf32> -> vector<4x32xf32>
    %128 = arith.addf %127, %12 : vector<4x32xf32>
    %cst_80 = arith.constant dense<0.000000e+00> : vector<4x32xf32>
    %129 = tpu.matmul %108, %3, %cst_80 {dimension_numbers = #tpu.dot_dimension_numbers<[1], [0], [0], [1], [0, 0, 1, 1], [], []>} : vector<4x32xf32>, vector<32x32xf32>, vector<4x32xf32> -> vector<4x32xf32>
    %130 = arith.addf %129, %15 : vector<4x32xf32>
    %131 = arith.mulf %119, %130 : vector<4x32xf32>
    %132 = arith.addf %128, %131 : vector<4x32xf32>
    %133 = math.tanh %132 : vector<4x32xf32>
    %cst_81 = arith.constant 1.000000e+00 : f32
    %134 = vector.broadcast %cst_81 : f32 to vector<4x32xf32>
    %135 = arith.subf %134, %126 : vector<4x32xf32>
    %136 = arith.mulf %135, %133 : vector<4x32xf32>
    %137 = arith.mulf %126, %108 : vector<4x32xf32>
    %138 = arith.addf %136, %137 : vector<4x32xf32>
    %cst_82 = arith.constant dense<0.000000e+00> : vector<8x32xf32>
    %139 = tpu.matmul %45, %138, %cst_82 {dimension_numbers = #tpu.dot_dimension_numbers<[1], [0], [0], [1], [0, 0, 1, 1], [], []>} : vector<8x4xf32>, vector<4x32xf32>, vector<8x32xf32> -> vector<8x32xf32>
    %140 = arith.addf %110, %139 : vector<8x32xf32>
    %cst_83 = arith.constant dense<0.000000e+00> : vector<4x32xf32>
    %141 = tpu.matmul %39, %48, %cst_83 {dimension_numbers = #tpu.dot_dimension_numbers<[1], [0], [0], [1], [0, 0, 1, 1], [], []>} : vector<4x8xf32>, vector<8x32xf32>, vector<4x32xf32> -> vector<4x32xf32>
    %142 = tpu.concatenate %141, %138 in 1 : vector<4x32xf32>, vector<4x32xf32> -> vector<4x64xf32>
    %cst_84 = arith.constant dense<0.000000e+00> : vector<4x32xf32>
    %143 = tpu.matmul %142, %0, %cst_84 {dimension_numbers = #tpu.dot_dimension_numbers<[1], [0], [0], [1], [0, 0, 1, 1], [], []>} : vector<4x64xf32>, vector<64x32xf32>, vector<4x32xf32> -> vector<4x32xf32>
    %144 = arith.addf %143, %6 : vector<4x32xf32>
    %145 = arith.negf %144 : vector<4x32xf32>
    %146 = math.exp %145 : vector<4x32xf32>
    %cst_85 = arith.constant 1.000000e+00 : f32
    %147 = vector.broadcast %cst_85 : f32 to vector<4x32xf32>
    %148 = arith.addf %147, %146 : vector<4x32xf32>
    %149 = arith.divf %147, %148 : vector<4x32xf32>
    %cst_86 = arith.constant dense<0.000000e+00> : vector<4x32xf32>
    %150 = tpu.matmul %142, %1, %cst_86 {dimension_numbers = #tpu.dot_dimension_numbers<[1], [0], [0], [1], [0, 0, 1, 1], [], []>} : vector<4x64xf32>, vector<64x32xf32>, vector<4x32xf32> -> vector<4x32xf32>
    %151 = arith.addf %150, %9 : vector<4x32xf32>
    %152 = arith.negf %151 : vector<4x32xf32>
    %153 = math.exp %152 : vector<4x32xf32>
    %cst_87 = arith.constant 1.000000e+00 : f32
    %154 = vector.broadcast %cst_87 : f32 to vector<4x32xf32>
    %155 = arith.addf %154, %153 : vector<4x32xf32>
    %156 = arith.divf %154, %155 : vector<4x32xf32>
    %cst_88 = arith.constant dense<0.000000e+00> : vector<4x32xf32>
    %157 = tpu.matmul %141, %2, %cst_88 {dimension_numbers = #tpu.dot_dimension_numbers<[1], [0], [0], [1], [0, 0, 1, 1], [], []>} : vector<4x32xf32>, vector<32x32xf32>, vector<4x32xf32> -> vector<4x32xf32>
    %158 = arith.addf %157, %12 : vector<4x32xf32>
    %cst_89 = arith.constant dense<0.000000e+00> : vector<4x32xf32>
    %159 = tpu.matmul %138, %3, %cst_89 {dimension_numbers = #tpu.dot_dimension_numbers<[1], [0], [0], [1], [0, 0, 1, 1], [], []>} : vector<4x32xf32>, vector<32x32xf32>, vector<4x32xf32> -> vector<4x32xf32>
    %160 = arith.addf %159, %15 : vector<4x32xf32>
    %161 = arith.mulf %149, %160 : vector<4x32xf32>
    %162 = arith.addf %158, %161 : vector<4x32xf32>
    %163 = math.tanh %162 : vector<4x32xf32>
    %cst_90 = arith.constant 1.000000e+00 : f32
    %164 = vector.broadcast %cst_90 : f32 to vector<4x32xf32>
    %165 = arith.subf %164, %156 : vector<4x32xf32>
    %166 = arith.mulf %165, %163 : vector<4x32xf32>
    %167 = arith.mulf %156, %138 : vector<4x32xf32>
    %168 = arith.addf %166, %167 : vector<4x32xf32>
    %cst_91 = arith.constant dense<0.000000e+00> : vector<8x32xf32>
    %169 = tpu.matmul %47, %168, %cst_91 {dimension_numbers = #tpu.dot_dimension_numbers<[1], [0], [0], [1], [0, 0, 1, 1], [], []>} : vector<8x4xf32>, vector<4x32xf32>, vector<8x32xf32> -> vector<8x32xf32>
    %170 = arith.addf %140, %169 : vector<8x32xf32>
    %171 = tpu.concatenate %170, %48 in 1 : vector<8x32xf32>, vector<8x32xf32> -> vector<8x64xf32>
    %cst_92 = arith.constant dense<0.000000e+00> : vector<8x32xf32>
    %172 = tpu.matmul %171, %16, %cst_92 {dimension_numbers = #tpu.dot_dimension_numbers<[1], [0], [0], [1], [0, 0, 1, 1], [], []>} : vector<8x64xf32>, vector<64x32xf32>, vector<8x32xf32> -> vector<8x32xf32>
    %173 = arith.addf %172, %22 : vector<8x32xf32>
    %174 = arith.negf %173 : vector<8x32xf32>
    %175 = math.exp %174 : vector<8x32xf32>
    %cst_93 = arith.constant 1.000000e+00 : f32
    %176 = vector.broadcast %cst_93 : f32 to vector<8x32xf32>
    %177 = arith.addf %176, %175 : vector<8x32xf32>
    %178 = arith.divf %176, %177 : vector<8x32xf32>
    %cst_94 = arith.constant dense<0.000000e+00> : vector<8x32xf32>
    %179 = tpu.matmul %171, %17, %cst_94 {dimension_numbers = #tpu.dot_dimension_numbers<[1], [0], [0], [1], [0, 0, 1, 1], [], []>} : vector<8x64xf32>, vector<64x32xf32>, vector<8x32xf32> -> vector<8x32xf32>
    %180 = arith.addf %179, %25 : vector<8x32xf32>
    %181 = arith.negf %180 : vector<8x32xf32>
    %182 = math.exp %181 : vector<8x32xf32>
    %cst_95 = arith.constant 1.000000e+00 : f32
    %183 = vector.broadcast %cst_95 : f32 to vector<8x32xf32>
    %184 = arith.addf %183, %182 : vector<8x32xf32>
    %185 = arith.divf %183, %184 : vector<8x32xf32>
    %cst_96 = arith.constant dense<0.000000e+00> : vector<8x32xf32>
    %186 = tpu.matmul %170, %18, %cst_96 {dimension_numbers = #tpu.dot_dimension_numbers<[1], [0], [0], [1], [0, 0, 1, 1], [], []>} : vector<8x32xf32>, vector<32x32xf32>, vector<8x32xf32> -> vector<8x32xf32>
    %187 = arith.addf %186, %28 : vector<8x32xf32>
    %cst_97 = arith.constant dense<0.000000e+00> : vector<8x32xf32>
    %188 = tpu.matmul %48, %19, %cst_97 {dimension_numbers = #tpu.dot_dimension_numbers<[1], [0], [0], [1], [0, 0, 1, 1], [], []>} : vector<8x32xf32>, vector<32x32xf32>, vector<8x32xf32> -> vector<8x32xf32>
    %189 = arith.addf %188, %31 : vector<8x32xf32>
    %190 = arith.mulf %178, %189 : vector<8x32xf32>
    %191 = arith.addf %187, %190 : vector<8x32xf32>
    %192 = math.tanh %191 : vector<8x32xf32>
    %cst_98 = arith.constant 1.000000e+00 : f32
    %193 = vector.broadcast %cst_98 : f32 to vector<8x32xf32>
    %194 = arith.subf %193, %185 : vector<8x32xf32>
    %195 = arith.mulf %194, %192 : vector<8x32xf32>
    %196 = arith.mulf %185, %48 : vector<8x32xf32>
    %197 = arith.addf %195, %196 : vector<8x32xf32>
    %cst_99 = arith.constant 0.000000e+00 : f32
    %198 = vector.broadcast %cst_99 : f32 to vector<8x32xf32>
    %cst_100 = arith.constant dense<0.000000e+00> : vector<4x32xf32>
    %199 = tpu.matmul %33, %197, %cst_100 {dimension_numbers = #tpu.dot_dimension_numbers<[1], [0], [0], [1], [0, 0, 1, 1], [], []>} : vector<4x8xf32>, vector<8x32xf32>, vector<4x32xf32> -> vector<4x32xf32>
    %200 = tpu.concatenate %199, %168 in 1 : vector<4x32xf32>, vector<4x32xf32> -> vector<4x64xf32>
    %cst_101 = arith.constant dense<0.000000e+00> : vector<4x32xf32>
    %201 = tpu.matmul %200, %0, %cst_101 {dimension_numbers = #tpu.dot_dimension_numbers<[1], [0], [0], [1], [0, 0, 1, 1], [], []>} : vector<4x64xf32>, vector<64x32xf32>, vector<4x32xf32> -> vector<4x32xf32>
    %202 = arith.addf %201, %6 : vector<4x32xf32>
    %203 = arith.negf %202 : vector<4x32xf32>
    %204 = math.exp %203 : vector<4x32xf32>
    %cst_102 = arith.constant 1.000000e+00 : f32
    %205 = vector.broadcast %cst_102 : f32 to vector<4x32xf32>
    %206 = arith.addf %205, %204 : vector<4x32xf32>
    %207 = arith.divf %205, %206 : vector<4x32xf32>
    %cst_103 = arith.constant dense<0.000000e+00> : vector<4x32xf32>
    %208 = tpu.matmul %200, %1, %cst_103 {dimension_numbers = #tpu.dot_dimension_numbers<[1], [0], [0], [1], [0, 0, 1, 1], [], []>} : vector<4x64xf32>, vector<64x32xf32>, vector<4x32xf32> -> vector<4x32xf32>
    %209 = arith.addf %208, %9 : vector<4x32xf32>
    %210 = arith.negf %209 : vector<4x32xf32>
    %211 = math.exp %210 : vector<4x32xf32>
    %cst_104 = arith.constant 1.000000e+00 : f32
    %212 = vector.broadcast %cst_104 : f32 to vector<4x32xf32>
    %213 = arith.addf %212, %211 : vector<4x32xf32>
    %214 = arith.divf %212, %213 : vector<4x32xf32>
    %cst_105 = arith.constant dense<0.000000e+00> : vector<4x32xf32>
    %215 = tpu.matmul %199, %2, %cst_105 {dimension_numbers = #tpu.dot_dimension_numbers<[1], [0], [0], [1], [0, 0, 1, 1], [], []>} : vector<4x32xf32>, vector<32x32xf32>, vector<4x32xf32> -> vector<4x32xf32>
    %216 = arith.addf %215, %12 : vector<4x32xf32>
    %cst_106 = arith.constant dense<0.000000e+00> : vector<4x32xf32>
    %217 = tpu.matmul %168, %3, %cst_106 {dimension_numbers = #tpu.dot_dimension_numbers<[1], [0], [0], [1], [0, 0, 1, 1], [], []>} : vector<4x32xf32>, vector<32x32xf32>, vector<4x32xf32> -> vector<4x32xf32>
    %218 = arith.addf %217, %15 : vector<4x32xf32>
    %219 = arith.mulf %207, %218 : vector<4x32xf32>
    %220 = arith.addf %216, %219 : vector<4x32xf32>
    %221 = math.tanh %220 : vector<4x32xf32>
    %cst_107 = arith.constant 1.000000e+00 : f32
    %222 = vector.broadcast %cst_107 : f32 to vector<4x32xf32>
    %223 = arith.subf %222, %214 : vector<4x32xf32>
    %224 = arith.mulf %223, %221 : vector<4x32xf32>
    %225 = arith.mulf %214, %168 : vector<4x32xf32>
    %226 = arith.addf %224, %225 : vector<4x32xf32>
    %cst_108 = arith.constant dense<0.000000e+00> : vector<8x32xf32>
    %227 = tpu.matmul %41, %226, %cst_108 {dimension_numbers = #tpu.dot_dimension_numbers<[1], [0], [0], [1], [0, 0, 1, 1], [], []>} : vector<8x4xf32>, vector<4x32xf32>, vector<8x32xf32> -> vector<8x32xf32>
    %228 = arith.addf %198, %227 : vector<8x32xf32>
    %cst_109 = arith.constant dense<0.000000e+00> : vector<4x32xf32>
    %229 = tpu.matmul %35, %197, %cst_109 {dimension_numbers = #tpu.dot_dimension_numbers<[1], [0], [0], [1], [0, 0, 1, 1], [], []>} : vector<4x8xf32>, vector<8x32xf32>, vector<4x32xf32> -> vector<4x32xf32>
    %230 = tpu.concatenate %229, %226 in 1 : vector<4x32xf32>, vector<4x32xf32> -> vector<4x64xf32>
    %cst_110 = arith.constant dense<0.000000e+00> : vector<4x32xf32>
    %231 = tpu.matmul %230, %0, %cst_110 {dimension_numbers = #tpu.dot_dimension_numbers<[1], [0], [0], [1], [0, 0, 1, 1], [], []>} : vector<4x64xf32>, vector<64x32xf32>, vector<4x32xf32> -> vector<4x32xf32>
    %232 = arith.addf %231, %6 : vector<4x32xf32>
    %233 = arith.negf %232 : vector<4x32xf32>
    %234 = math.exp %233 : vector<4x32xf32>
    %cst_111 = arith.constant 1.000000e+00 : f32
    %235 = vector.broadcast %cst_111 : f32 to vector<4x32xf32>
    %236 = arith.addf %235, %234 : vector<4x32xf32>
    %237 = arith.divf %235, %236 : vector<4x32xf32>
    %cst_112 = arith.constant dense<0.000000e+00> : vector<4x32xf32>
    %238 = tpu.matmul %230, %1, %cst_112 {dimension_numbers = #tpu.dot_dimension_numbers<[1], [0], [0], [1], [0, 0, 1, 1], [], []>} : vector<4x64xf32>, vector<64x32xf32>, vector<4x32xf32> -> vector<4x32xf32>
    %239 = arith.addf %238, %9 : vector<4x32xf32>
    %240 = arith.negf %239 : vector<4x32xf32>
    %241 = math.exp %240 : vector<4x32xf32>
    %cst_113 = arith.constant 1.000000e+00 : f32
    %242 = vector.broadcast %cst_113 : f32 to vector<4x32xf32>
    %243 = arith.addf %242, %241 : vector<4x32xf32>
    %244 = arith.divf %242, %243 : vector<4x32xf32>
    %cst_114 = arith.constant dense<0.000000e+00> : vector<4x32xf32>
    %245 = tpu.matmul %229, %2, %cst_114 {dimension_numbers = #tpu.dot_dimension_numbers<[1], [0], [0], [1], [0, 0, 1, 1], [], []>} : vector<4x32xf32>, vector<32x32xf32>, vector<4x32xf32> -> vector<4x32xf32>
    %246 = arith.addf %245, %12 : vector<4x32xf32>
    %cst_115 = arith.constant dense<0.000000e+00> : vector<4x32xf32>
    %247 = tpu.matmul %226, %3, %cst_115 {dimension_numbers = #tpu.dot_dimension_numbers<[1], [0], [0], [1], [0, 0, 1, 1], [], []>} : vector<4x32xf32>, vector<32x32xf32>, vector<4x32xf32> -> vector<4x32xf32>
    %248 = arith.addf %247, %15 : vector<4x32xf32>
    %249 = arith.mulf %237, %248 : vector<4x32xf32>
    %250 = arith.addf %246, %249 : vector<4x32xf32>
    %251 = math.tanh %250 : vector<4x32xf32>
    %cst_116 = arith.constant 1.000000e+00 : f32
    %252 = vector.broadcast %cst_116 : f32 to vector<4x32xf32>
    %253 = arith.subf %252, %244 : vector<4x32xf32>
    %254 = arith.mulf %253, %251 : vector<4x32xf32>
    %255 = arith.mulf %244, %226 : vector<4x32xf32>
    %256 = arith.addf %254, %255 : vector<4x32xf32>
    %cst_117 = arith.constant dense<0.000000e+00> : vector<8x32xf32>
    %257 = tpu.matmul %43, %256, %cst_117 {dimension_numbers = #tpu.dot_dimension_numbers<[1], [0], [0], [1], [0, 0, 1, 1], [], []>} : vector<8x4xf32>, vector<4x32xf32>, vector<8x32xf32> -> vector<8x32xf32>
    %258 = arith.addf %228, %257 : vector<8x32xf32>
    %cst_118 = arith.constant dense<0.000000e+00> : vector<4x32xf32>
    %259 = tpu.matmul %37, %197, %cst_118 {dimension_numbers = #tpu.dot_dimension_numbers<[1], [0], [0], [1], [0, 0, 1, 1], [], []>} : vector<4x8xf32>, vector<8x32xf32>, vector<4x32xf32> -> vector<4x32xf32>
    %260 = tpu.concatenate %259, %256 in 1 : vector<4x32xf32>, vector<4x32xf32> -> vector<4x64xf32>
    %cst_119 = arith.constant dense<0.000000e+00> : vector<4x32xf32>
    %261 = tpu.matmul %260, %0, %cst_119 {dimension_numbers = #tpu.dot_dimension_numbers<[1], [0], [0], [1], [0, 0, 1, 1], [], []>} : vector<4x64xf32>, vector<64x32xf32>, vector<4x32xf32> -> vector<4x32xf32>
    %262 = arith.addf %261, %6 : vector<4x32xf32>
    %263 = arith.negf %262 : vector<4x32xf32>
    %264 = math.exp %263 : vector<4x32xf32>
    %cst_120 = arith.constant 1.000000e+00 : f32
    %265 = vector.broadcast %cst_120 : f32 to vector<4x32xf32>
    %266 = arith.addf %265, %264 : vector<4x32xf32>
    %267 = arith.divf %265, %266 : vector<4x32xf32>
    %cst_121 = arith.constant dense<0.000000e+00> : vector<4x32xf32>
    %268 = tpu.matmul %260, %1, %cst_121 {dimension_numbers = #tpu.dot_dimension_numbers<[1], [0], [0], [1], [0, 0, 1, 1], [], []>} : vector<4x64xf32>, vector<64x32xf32>, vector<4x32xf32> -> vector<4x32xf32>
    %269 = arith.addf %268, %9 : vector<4x32xf32>
    %270 = arith.negf %269 : vector<4x32xf32>
    %271 = math.exp %270 : vector<4x32xf32>
    %cst_122 = arith.constant 1.000000e+00 : f32
    %272 = vector.broadcast %cst_122 : f32 to vector<4x32xf32>
    %273 = arith.addf %272, %271 : vector<4x32xf32>
    %274 = arith.divf %272, %273 : vector<4x32xf32>
    %cst_123 = arith.constant dense<0.000000e+00> : vector<4x32xf32>
    %275 = tpu.matmul %259, %2, %cst_123 {dimension_numbers = #tpu.dot_dimension_numbers<[1], [0], [0], [1], [0, 0, 1, 1], [], []>} : vector<4x32xf32>, vector<32x32xf32>, vector<4x32xf32> -> vector<4x32xf32>
    %276 = arith.addf %275, %12 : vector<4x32xf32>
    %cst_124 = arith.constant dense<0.000000e+00> : vector<4x32xf32>
    %277 = tpu.matmul %256, %3, %cst_124 {dimension_numbers = #tpu.dot_dimension_numbers<[1], [0], [0], [1], [0, 0, 1, 1], [], []>} : vector<4x32xf32>, vector<32x32xf32>, vector<4x32xf32> -> vector<4x32xf32>
    %278 = arith.addf %277, %15 : vector<4x32xf32>
    %279 = arith.mulf %267, %278 : vector<4x32xf32>
    %280 = arith.addf %276, %279 : vector<4x32xf32>
    %281 = math.tanh %280 : vector<4x32xf32>
    %cst_125 = arith.constant 1.000000e+00 : f32
    %282 = vector.broadcast %cst_125 : f32 to vector<4x32xf32>
    %283 = arith.subf %282, %274 : vector<4x32xf32>
    %284 = arith.mulf %283, %281 : vector<4x32xf32>
    %285 = arith.mulf %274, %256 : vector<4x32xf32>
    %286 = arith.addf %284, %285 : vector<4x32xf32>
    %cst_126 = arith.constant dense<0.000000e+00> : vector<8x32xf32>
    %287 = tpu.matmul %45, %286, %cst_126 {dimension_numbers = #tpu.dot_dimension_numbers<[1], [0], [0], [1], [0, 0, 1, 1], [], []>} : vector<8x4xf32>, vector<4x32xf32>, vector<8x32xf32> -> vector<8x32xf32>
    %288 = arith.addf %258, %287 : vector<8x32xf32>
    %cst_127 = arith.constant dense<0.000000e+00> : vector<4x32xf32>
    %289 = tpu.matmul %39, %197, %cst_127 {dimension_numbers = #tpu.dot_dimension_numbers<[1], [0], [0], [1], [0, 0, 1, 1], [], []>} : vector<4x8xf32>, vector<8x32xf32>, vector<4x32xf32> -> vector<4x32xf32>
    %290 = tpu.concatenate %289, %286 in 1 : vector<4x32xf32>, vector<4x32xf32> -> vector<4x64xf32>
    %cst_128 = arith.constant dense<0.000000e+00> : vector<4x32xf32>
    %291 = tpu.matmul %290, %0, %cst_128 {dimension_numbers = #tpu.dot_dimension_numbers<[1], [0], [0], [1], [0, 0, 1, 1], [], []>} : vector<4x64xf32>, vector<64x32xf32>, vector<4x32xf32> -> vector<4x32xf32>
    %292 = arith.addf %291, %6 : vector<4x32xf32>
    %293 = arith.negf %292 : vector<4x32xf32>
    %294 = math.exp %293 : vector<4x32xf32>
    %cst_129 = arith.constant 1.000000e+00 : f32
    %295 = vector.broadcast %cst_129 : f32 to vector<4x32xf32>
    %296 = arith.addf %295, %294 : vector<4x32xf32>
    %297 = arith.divf %295, %296 : vector<4x32xf32>
    %cst_130 = arith.constant dense<0.000000e+00> : vector<4x32xf32>
    %298 = tpu.matmul %290, %1, %cst_130 {dimension_numbers = #tpu.dot_dimension_numbers<[1], [0], [0], [1], [0, 0, 1, 1], [], []>} : vector<4x64xf32>, vector<64x32xf32>, vector<4x32xf32> -> vector<4x32xf32>
    %299 = arith.addf %298, %9 : vector<4x32xf32>
    %300 = arith.negf %299 : vector<4x32xf32>
    %301 = math.exp %300 : vector<4x32xf32>
    %cst_131 = arith.constant 1.000000e+00 : f32
    %302 = vector.broadcast %cst_131 : f32 to vector<4x32xf32>
    %303 = arith.addf %302, %301 : vector<4x32xf32>
    %304 = arith.divf %302, %303 : vector<4x32xf32>
    %cst_132 = arith.constant dense<0.000000e+00> : vector<4x32xf32>
    %305 = tpu.matmul %289, %2, %cst_132 {dimension_numbers = #tpu.dot_dimension_numbers<[1], [0], [0], [1], [0, 0, 1, 1], [], []>} : vector<4x32xf32>, vector<32x32xf32>, vector<4x32xf32> -> vector<4x32xf32>
    %306 = arith.addf %305, %12 : vector<4x32xf32>
    %cst_133 = arith.constant dense<0.000000e+00> : vector<4x32xf32>
    %307 = tpu.matmul %286, %3, %cst_133 {dimension_numbers = #tpu.dot_dimension_numbers<[1], [0], [0], [1], [0, 0, 1, 1], [], []>} : vector<4x32xf32>, vector<32x32xf32>, vector<4x32xf32> -> vector<4x32xf32>
    %308 = arith.addf %307, %15 : vector<4x32xf32>
    %309 = arith.mulf %297, %308 : vector<4x32xf32>
    %310 = arith.addf %306, %309 : vector<4x32xf32>
    %311 = math.tanh %310 : vector<4x32xf32>
    %cst_134 = arith.constant 1.000000e+00 : f32
    %312 = vector.broadcast %cst_134 : f32 to vector<4x32xf32>
    %313 = arith.subf %312, %304 : vector<4x32xf32>
    %314 = arith.mulf %313, %311 : vector<4x32xf32>
    %315 = arith.mulf %304, %286 : vector<4x32xf32>
    %316 = arith.addf %314, %315 : vector<4x32xf32>
    %cst_135 = arith.constant dense<0.000000e+00> : vector<8x32xf32>
    %317 = tpu.matmul %47, %316, %cst_135 {dimension_numbers = #tpu.dot_dimension_numbers<[1], [0], [0], [1], [0, 0, 1, 1], [], []>} : vector<8x4xf32>, vector<4x32xf32>, vector<8x32xf32> -> vector<8x32xf32>
    %318 = arith.addf %288, %317 : vector<8x32xf32>
    %319 = tpu.concatenate %318, %197 in 1 : vector<8x32xf32>, vector<8x32xf32> -> vector<8x64xf32>
    %cst_136 = arith.constant dense<0.000000e+00> : vector<8x32xf32>
    %320 = tpu.matmul %319, %16, %cst_136 {dimension_numbers = #tpu.dot_dimension_numbers<[1], [0], [0], [1], [0, 0, 1, 1], [], []>} : vector<8x64xf32>, vector<64x32xf32>, vector<8x32xf32> -> vector<8x32xf32>
    %321 = arith.addf %320, %22 : vector<8x32xf32>
    %322 = arith.negf %321 : vector<8x32xf32>
    %323 = math.exp %322 : vector<8x32xf32>
    %cst_137 = arith.constant 1.000000e+00 : f32
    %324 = vector.broadcast %cst_137 : f32 to vector<8x32xf32>
    %325 = arith.addf %324, %323 : vector<8x32xf32>
    %326 = arith.divf %324, %325 : vector<8x32xf32>
    %cst_138 = arith.constant dense<0.000000e+00> : vector<8x32xf32>
    %327 = tpu.matmul %319, %17, %cst_138 {dimension_numbers = #tpu.dot_dimension_numbers<[1], [0], [0], [1], [0, 0, 1, 1], [], []>} : vector<8x64xf32>, vector<64x32xf32>, vector<8x32xf32> -> vector<8x32xf32>
    %328 = arith.addf %327, %25 : vector<8x32xf32>
    %329 = arith.negf %328 : vector<8x32xf32>
    %330 = math.exp %329 : vector<8x32xf32>
    %cst_139 = arith.constant 1.000000e+00 : f32
    %331 = vector.broadcast %cst_139 : f32 to vector<8x32xf32>
    %332 = arith.addf %331, %330 : vector<8x32xf32>
    %333 = arith.divf %331, %332 : vector<8x32xf32>
    %cst_140 = arith.constant dense<0.000000e+00> : vector<8x32xf32>
    %334 = tpu.matmul %318, %18, %cst_140 {dimension_numbers = #tpu.dot_dimension_numbers<[1], [0], [0], [1], [0, 0, 1, 1], [], []>} : vector<8x32xf32>, vector<32x32xf32>, vector<8x32xf32> -> vector<8x32xf32>
    %335 = arith.addf %334, %28 : vector<8x32xf32>
    %cst_141 = arith.constant dense<0.000000e+00> : vector<8x32xf32>
    %336 = tpu.matmul %197, %19, %cst_141 {dimension_numbers = #tpu.dot_dimension_numbers<[1], [0], [0], [1], [0, 0, 1, 1], [], []>} : vector<8x32xf32>, vector<32x32xf32>, vector<8x32xf32> -> vector<8x32xf32>
    %337 = arith.addf %336, %31 : vector<8x32xf32>
    %338 = arith.mulf %326, %337 : vector<8x32xf32>
    %339 = arith.addf %335, %338 : vector<8x32xf32>
    %340 = math.tanh %339 : vector<8x32xf32>
    %cst_142 = arith.constant 1.000000e+00 : f32
    %341 = vector.broadcast %cst_142 : f32 to vector<8x32xf32>
    %342 = arith.subf %341, %333 : vector<8x32xf32>
    %343 = arith.mulf %342, %340 : vector<8x32xf32>
    %344 = arith.mulf %333, %197 : vector<8x32xf32>
    %345 = arith.addf %343, %344 : vector<8x32xf32>
    %cst_143 = arith.constant 0.000000e+00 : f32
    %346 = vector.broadcast %cst_143 : f32 to vector<8x32xf32>
    %cst_144 = arith.constant dense<0.000000e+00> : vector<4x32xf32>
    %347 = tpu.matmul %33, %345, %cst_144 {dimension_numbers = #tpu.dot_dimension_numbers<[1], [0], [0], [1], [0, 0, 1, 1], [], []>} : vector<4x8xf32>, vector<8x32xf32>, vector<4x32xf32> -> vector<4x32xf32>
    %348 = tpu.concatenate %347, %316 in 1 : vector<4x32xf32>, vector<4x32xf32> -> vector<4x64xf32>
    %cst_145 = arith.constant dense<0.000000e+00> : vector<4x32xf32>
    %349 = tpu.matmul %348, %0, %cst_145 {dimension_numbers = #tpu.dot_dimension_numbers<[1], [0], [0], [1], [0, 0, 1, 1], [], []>} : vector<4x64xf32>, vector<64x32xf32>, vector<4x32xf32> -> vector<4x32xf32>
    %350 = arith.addf %349, %6 : vector<4x32xf32>
    %351 = arith.negf %350 : vector<4x32xf32>
    %352 = math.exp %351 : vector<4x32xf32>
    %cst_146 = arith.constant 1.000000e+00 : f32
    %353 = vector.broadcast %cst_146 : f32 to vector<4x32xf32>
    %354 = arith.addf %353, %352 : vector<4x32xf32>
    %355 = arith.divf %353, %354 : vector<4x32xf32>
    %cst_147 = arith.constant dense<0.000000e+00> : vector<4x32xf32>
    %356 = tpu.matmul %348, %1, %cst_147 {dimension_numbers = #tpu.dot_dimension_numbers<[1], [0], [0], [1], [0, 0, 1, 1], [], []>} : vector<4x64xf32>, vector<64x32xf32>, vector<4x32xf32> -> vector<4x32xf32>
    %357 = arith.addf %356, %9 : vector<4x32xf32>
    %358 = arith.negf %357 : vector<4x32xf32>
    %359 = math.exp %358 : vector<4x32xf32>
    %cst_148 = arith.constant 1.000000e+00 : f32
    %360 = vector.broadcast %cst_148 : f32 to vector<4x32xf32>
    %361 = arith.addf %360, %359 : vector<4x32xf32>
    %362 = arith.divf %360, %361 : vector<4x32xf32>
    %cst_149 = arith.constant dense<0.000000e+00> : vector<4x32xf32>
    %363 = tpu.matmul %347, %2, %cst_149 {dimension_numbers = #tpu.dot_dimension_numbers<[1], [0], [0], [1], [0, 0, 1, 1], [], []>} : vector<4x32xf32>, vector<32x32xf32>, vector<4x32xf32> -> vector<4x32xf32>
    %364 = arith.addf %363, %12 : vector<4x32xf32>
    %cst_150 = arith.constant dense<0.000000e+00> : vector<4x32xf32>
    %365 = tpu.matmul %316, %3, %cst_150 {dimension_numbers = #tpu.dot_dimension_numbers<[1], [0], [0], [1], [0, 0, 1, 1], [], []>} : vector<4x32xf32>, vector<32x32xf32>, vector<4x32xf32> -> vector<4x32xf32>
    %366 = arith.addf %365, %15 : vector<4x32xf32>
    %367 = arith.mulf %355, %366 : vector<4x32xf32>
    %368 = arith.addf %364, %367 : vector<4x32xf32>
    %369 = math.tanh %368 : vector<4x32xf32>
    %cst_151 = arith.constant 1.000000e+00 : f32
    %370 = vector.broadcast %cst_151 : f32 to vector<4x32xf32>
    %371 = arith.subf %370, %362 : vector<4x32xf32>
    %372 = arith.mulf %371, %369 : vector<4x32xf32>
    %373 = arith.mulf %362, %316 : vector<4x32xf32>
    %374 = arith.addf %372, %373 : vector<4x32xf32>
    %cst_152 = arith.constant dense<0.000000e+00> : vector<8x32xf32>
    %375 = tpu.matmul %41, %374, %cst_152 {dimension_numbers = #tpu.dot_dimension_numbers<[1], [0], [0], [1], [0, 0, 1, 1], [], []>} : vector<8x4xf32>, vector<4x32xf32>, vector<8x32xf32> -> vector<8x32xf32>
    %376 = arith.addf %346, %375 : vector<8x32xf32>
    %cst_153 = arith.constant dense<0.000000e+00> : vector<4x32xf32>
    %377 = tpu.matmul %35, %345, %cst_153 {dimension_numbers = #tpu.dot_dimension_numbers<[1], [0], [0], [1], [0, 0, 1, 1], [], []>} : vector<4x8xf32>, vector<8x32xf32>, vector<4x32xf32> -> vector<4x32xf32>
    %378 = tpu.concatenate %377, %374 in 1 : vector<4x32xf32>, vector<4x32xf32> -> vector<4x64xf32>
    %cst_154 = arith.constant dense<0.000000e+00> : vector<4x32xf32>
    %379 = tpu.matmul %378, %0, %cst_154 {dimension_numbers = #tpu.dot_dimension_numbers<[1], [0], [0], [1], [0, 0, 1, 1], [], []>} : vector<4x64xf32>, vector<64x32xf32>, vector<4x32xf32> -> vector<4x32xf32>
    %380 = arith.addf %379, %6 : vector<4x32xf32>
    %381 = arith.negf %380 : vector<4x32xf32>
    %382 = math.exp %381 : vector<4x32xf32>
    %cst_155 = arith.constant 1.000000e+00 : f32
    %383 = vector.broadcast %cst_155 : f32 to vector<4x32xf32>
    %384 = arith.addf %383, %382 : vector<4x32xf32>
    %385 = arith.divf %383, %384 : vector<4x32xf32>
    %cst_156 = arith.constant dense<0.000000e+00> : vector<4x32xf32>
    %386 = tpu.matmul %378, %1, %cst_156 {dimension_numbers = #tpu.dot_dimension_numbers<[1], [0], [0], [1], [0, 0, 1, 1], [], []>} : vector<4x64xf32>, vector<64x32xf32>, vector<4x32xf32> -> vector<4x32xf32>
    %387 = arith.addf %386, %9 : vector<4x32xf32>
    %388 = arith.negf %387 : vector<4x32xf32>
    %389 = math.exp %388 : vector<4x32xf32>
    %cst_157 = arith.constant 1.000000e+00 : f32
    %390 = vector.broadcast %cst_157 : f32 to vector<4x32xf32>
    %391 = arith.addf %390, %389 : vector<4x32xf32>
    %392 = arith.divf %390, %391 : vector<4x32xf32>
    %cst_158 = arith.constant dense<0.000000e+00> : vector<4x32xf32>
    %393 = tpu.matmul %377, %2, %cst_158 {dimension_numbers = #tpu.dot_dimension_numbers<[1], [0], [0], [1], [0, 0, 1, 1], [], []>} : vector<4x32xf32>, vector<32x32xf32>, vector<4x32xf32> -> vector<4x32xf32>
    %394 = arith.addf %393, %12 : vector<4x32xf32>
    %cst_159 = arith.constant dense<0.000000e+00> : vector<4x32xf32>
    %395 = tpu.matmul %374, %3, %cst_159 {dimension_numbers = #tpu.dot_dimension_numbers<[1], [0], [0], [1], [0, 0, 1, 1], [], []>} : vector<4x32xf32>, vector<32x32xf32>, vector<4x32xf32> -> vector<4x32xf32>
    %396 = arith.addf %395, %15 : vector<4x32xf32>
    %397 = arith.mulf %385, %396 : vector<4x32xf32>
    %398 = arith.addf %394, %397 : vector<4x32xf32>
    %399 = math.tanh %398 : vector<4x32xf32>
    %cst_160 = arith.constant 1.000000e+00 : f32
    %400 = vector.broadcast %cst_160 : f32 to vector<4x32xf32>
    %401 = arith.subf %400, %392 : vector<4x32xf32>
    %402 = arith.mulf %401, %399 : vector<4x32xf32>
    %403 = arith.mulf %392, %374 : vector<4x32xf32>
    %404 = arith.addf %402, %403 : vector<4x32xf32>
    %cst_161 = arith.constant dense<0.000000e+00> : vector<8x32xf32>
    %405 = tpu.matmul %43, %404, %cst_161 {dimension_numbers = #tpu.dot_dimension_numbers<[1], [0], [0], [1], [0, 0, 1, 1], [], []>} : vector<8x4xf32>, vector<4x32xf32>, vector<8x32xf32> -> vector<8x32xf32>
    %406 = arith.addf %376, %405 : vector<8x32xf32>
    %cst_162 = arith.constant dense<0.000000e+00> : vector<4x32xf32>
    %407 = tpu.matmul %37, %345, %cst_162 {dimension_numbers = #tpu.dot_dimension_numbers<[1], [0], [0], [1], [0, 0, 1, 1], [], []>} : vector<4x8xf32>, vector<8x32xf32>, vector<4x32xf32> -> vector<4x32xf32>
    %408 = tpu.concatenate %407, %404 in 1 : vector<4x32xf32>, vector<4x32xf32> -> vector<4x64xf32>
    %cst_163 = arith.constant dense<0.000000e+00> : vector<4x32xf32>
    %409 = tpu.matmul %408, %0, %cst_163 {dimension_numbers = #tpu.dot_dimension_numbers<[1], [0], [0], [1], [0, 0, 1, 1], [], []>} : vector<4x64xf32>, vector<64x32xf32>, vector<4x32xf32> -> vector<4x32xf32>
    %410 = arith.addf %409, %6 : vector<4x32xf32>
    %411 = arith.negf %410 : vector<4x32xf32>
    %412 = math.exp %411 : vector<4x32xf32>
    %cst_164 = arith.constant 1.000000e+00 : f32
    %413 = vector.broadcast %cst_164 : f32 to vector<4x32xf32>
    %414 = arith.addf %413, %412 : vector<4x32xf32>
    %415 = arith.divf %413, %414 : vector<4x32xf32>
    %cst_165 = arith.constant dense<0.000000e+00> : vector<4x32xf32>
    %416 = tpu.matmul %408, %1, %cst_165 {dimension_numbers = #tpu.dot_dimension_numbers<[1], [0], [0], [1], [0, 0, 1, 1], [], []>} : vector<4x64xf32>, vector<64x32xf32>, vector<4x32xf32> -> vector<4x32xf32>
    %417 = arith.addf %416, %9 : vector<4x32xf32>
    %418 = arith.negf %417 : vector<4x32xf32>
    %419 = math.exp %418 : vector<4x32xf32>
    %cst_166 = arith.constant 1.000000e+00 : f32
    %420 = vector.broadcast %cst_166 : f32 to vector<4x32xf32>
    %421 = arith.addf %420, %419 : vector<4x32xf32>
    %422 = arith.divf %420, %421 : vector<4x32xf32>
    %cst_167 = arith.constant dense<0.000000e+00> : vector<4x32xf32>
    %423 = tpu.matmul %407, %2, %cst_167 {dimension_numbers = #tpu.dot_dimension_numbers<[1], [0], [0], [1], [0, 0, 1, 1], [], []>} : vector<4x32xf32>, vector<32x32xf32>, vector<4x32xf32> -> vector<4x32xf32>
    %424 = arith.addf %423, %12 : vector<4x32xf32>
    %cst_168 = arith.constant dense<0.000000e+00> : vector<4x32xf32>
    %425 = tpu.matmul %404, %3, %cst_168 {dimension_numbers = #tpu.dot_dimension_numbers<[1], [0], [0], [1], [0, 0, 1, 1], [], []>} : vector<4x32xf32>, vector<32x32xf32>, vector<4x32xf32> -> vector<4x32xf32>
    %426 = arith.addf %425, %15 : vector<4x32xf32>
    %427 = arith.mulf %415, %426 : vector<4x32xf32>
    %428 = arith.addf %424, %427 : vector<4x32xf32>
    %429 = math.tanh %428 : vector<4x32xf32>
    %cst_169 = arith.constant 1.000000e+00 : f32
    %430 = vector.broadcast %cst_169 : f32 to vector<4x32xf32>
    %431 = arith.subf %430, %422 : vector<4x32xf32>
    %432 = arith.mulf %431, %429 : vector<4x32xf32>
    %433 = arith.mulf %422, %404 : vector<4x32xf32>
    %434 = arith.addf %432, %433 : vector<4x32xf32>
    %cst_170 = arith.constant dense<0.000000e+00> : vector<8x32xf32>
    %435 = tpu.matmul %45, %434, %cst_170 {dimension_numbers = #tpu.dot_dimension_numbers<[1], [0], [0], [1], [0, 0, 1, 1], [], []>} : vector<8x4xf32>, vector<4x32xf32>, vector<8x32xf32> -> vector<8x32xf32>
    %436 = arith.addf %406, %435 : vector<8x32xf32>
    %cst_171 = arith.constant dense<0.000000e+00> : vector<4x32xf32>
    %437 = tpu.matmul %39, %345, %cst_171 {dimension_numbers = #tpu.dot_dimension_numbers<[1], [0], [0], [1], [0, 0, 1, 1], [], []>} : vector<4x8xf32>, vector<8x32xf32>, vector<4x32xf32> -> vector<4x32xf32>
    %438 = tpu.concatenate %437, %434 in 1 : vector<4x32xf32>, vector<4x32xf32> -> vector<4x64xf32>
    %cst_172 = arith.constant dense<0.000000e+00> : vector<4x32xf32>
    %439 = tpu.matmul %438, %0, %cst_172 {dimension_numbers = #tpu.dot_dimension_numbers<[1], [0], [0], [1], [0, 0, 1, 1], [], []>} : vector<4x64xf32>, vector<64x32xf32>, vector<4x32xf32> -> vector<4x32xf32>
    %440 = arith.addf %439, %6 : vector<4x32xf32>
    %441 = arith.negf %440 : vector<4x32xf32>
    %442 = math.exp %441 : vector<4x32xf32>
    %cst_173 = arith.constant 1.000000e+00 : f32
    %443 = vector.broadcast %cst_173 : f32 to vector<4x32xf32>
    %444 = arith.addf %443, %442 : vector<4x32xf32>
    %445 = arith.divf %443, %444 : vector<4x32xf32>
    %cst_174 = arith.constant dense<0.000000e+00> : vector<4x32xf32>
    %446 = tpu.matmul %438, %1, %cst_174 {dimension_numbers = #tpu.dot_dimension_numbers<[1], [0], [0], [1], [0, 0, 1, 1], [], []>} : vector<4x64xf32>, vector<64x32xf32>, vector<4x32xf32> -> vector<4x32xf32>
    %447 = arith.addf %446, %9 : vector<4x32xf32>
    %448 = arith.negf %447 : vector<4x32xf32>
    %449 = math.exp %448 : vector<4x32xf32>
    %cst_175 = arith.constant 1.000000e+00 : f32
    %450 = vector.broadcast %cst_175 : f32 to vector<4x32xf32>
    %451 = arith.addf %450, %449 : vector<4x32xf32>
    %452 = arith.divf %450, %451 : vector<4x32xf32>
    %cst_176 = arith.constant dense<0.000000e+00> : vector<4x32xf32>
    %453 = tpu.matmul %437, %2, %cst_176 {dimension_numbers = #tpu.dot_dimension_numbers<[1], [0], [0], [1], [0, 0, 1, 1], [], []>} : vector<4x32xf32>, vector<32x32xf32>, vector<4x32xf32> -> vector<4x32xf32>
    %454 = arith.addf %453, %12 : vector<4x32xf32>
    %cst_177 = arith.constant dense<0.000000e+00> : vector<4x32xf32>
    %455 = tpu.matmul %434, %3, %cst_177 {dimension_numbers = #tpu.dot_dimension_numbers<[1], [0], [0], [1], [0, 0, 1, 1], [], []>} : vector<4x32xf32>, vector<32x32xf32>, vector<4x32xf32> -> vector<4x32xf32>
    %456 = arith.addf %455, %15 : vector<4x32xf32>
    %457 = arith.mulf %445, %456 : vector<4x32xf32>
    %458 = arith.addf %454, %457 : vector<4x32xf32>
    %459 = math.tanh %458 : vector<4x32xf32>
    %cst_178 = arith.constant 1.000000e+00 : f32
    %460 = vector.broadcast %cst_178 : f32 to vector<4x32xf32>
    %461 = arith.subf %460, %452 : vector<4x32xf32>
    %462 = arith.mulf %461, %459 : vector<4x32xf32>
    %463 = arith.mulf %452, %434 : vector<4x32xf32>
    %464 = arith.addf %462, %463 : vector<4x32xf32>
    %cst_179 = arith.constant dense<0.000000e+00> : vector<8x32xf32>
    %465 = tpu.matmul %47, %464, %cst_179 {dimension_numbers = #tpu.dot_dimension_numbers<[1], [0], [0], [1], [0, 0, 1, 1], [], []>} : vector<8x4xf32>, vector<4x32xf32>, vector<8x32xf32> -> vector<8x32xf32>
    %466 = arith.addf %436, %465 : vector<8x32xf32>
    %467 = tpu.concatenate %466, %345 in 1 : vector<8x32xf32>, vector<8x32xf32> -> vector<8x64xf32>
    %cst_180 = arith.constant dense<0.000000e+00> : vector<8x32xf32>
    %468 = tpu.matmul %467, %16, %cst_180 {dimension_numbers = #tpu.dot_dimension_numbers<[1], [0], [0], [1], [0, 0, 1, 1], [], []>} : vector<8x64xf32>, vector<64x32xf32>, vector<8x32xf32> -> vector<8x32xf32>
    %469 = arith.addf %468, %22 : vector<8x32xf32>
    %470 = arith.negf %469 : vector<8x32xf32>
    %471 = math.exp %470 : vector<8x32xf32>
    %cst_181 = arith.constant 1.000000e+00 : f32
    %472 = vector.broadcast %cst_181 : f32 to vector<8x32xf32>
    %473 = arith.addf %472, %471 : vector<8x32xf32>
    %474 = arith.divf %472, %473 : vector<8x32xf32>
    %cst_182 = arith.constant dense<0.000000e+00> : vector<8x32xf32>
    %475 = tpu.matmul %467, %17, %cst_182 {dimension_numbers = #tpu.dot_dimension_numbers<[1], [0], [0], [1], [0, 0, 1, 1], [], []>} : vector<8x64xf32>, vector<64x32xf32>, vector<8x32xf32> -> vector<8x32xf32>
    %476 = arith.addf %475, %25 : vector<8x32xf32>
    %477 = arith.negf %476 : vector<8x32xf32>
    %478 = math.exp %477 : vector<8x32xf32>
    %cst_183 = arith.constant 1.000000e+00 : f32
    %479 = vector.broadcast %cst_183 : f32 to vector<8x32xf32>
    %480 = arith.addf %479, %478 : vector<8x32xf32>
    %481 = arith.divf %479, %480 : vector<8x32xf32>
    %cst_184 = arith.constant dense<0.000000e+00> : vector<8x32xf32>
    %482 = tpu.matmul %466, %18, %cst_184 {dimension_numbers = #tpu.dot_dimension_numbers<[1], [0], [0], [1], [0, 0, 1, 1], [], []>} : vector<8x32xf32>, vector<32x32xf32>, vector<8x32xf32> -> vector<8x32xf32>
    %483 = arith.addf %482, %28 : vector<8x32xf32>
    %cst_185 = arith.constant dense<0.000000e+00> : vector<8x32xf32>
    %484 = tpu.matmul %345, %19, %cst_185 {dimension_numbers = #tpu.dot_dimension_numbers<[1], [0], [0], [1], [0, 0, 1, 1], [], []>} : vector<8x32xf32>, vector<32x32xf32>, vector<8x32xf32> -> vector<8x32xf32>
    %485 = arith.addf %484, %31 : vector<8x32xf32>
    %486 = arith.mulf %474, %485 : vector<8x32xf32>
    %487 = arith.addf %483, %486 : vector<8x32xf32>
    %488 = math.tanh %487 : vector<8x32xf32>
    %cst_186 = arith.constant 1.000000e+00 : f32
    %489 = vector.broadcast %cst_186 : f32 to vector<8x32xf32>
    %490 = arith.subf %489, %481 : vector<8x32xf32>
    %491 = arith.mulf %490, %488 : vector<8x32xf32>
    %492 = arith.mulf %481, %345 : vector<8x32xf32>
    %493 = arith.addf %491, %492 : vector<8x32xf32>
    %cst_187 = arith.constant 0.000000e+00 : f32
    %494 = vector.broadcast %cst_187 : f32 to vector<8x32xf32>
    %cst_188 = arith.constant dense<0.000000e+00> : vector<4x32xf32>
    %495 = tpu.matmul %33, %493, %cst_188 {dimension_numbers = #tpu.dot_dimension_numbers<[1], [0], [0], [1], [0, 0, 1, 1], [], []>} : vector<4x8xf32>, vector<8x32xf32>, vector<4x32xf32> -> vector<4x32xf32>
    %496 = tpu.concatenate %495, %464 in 1 : vector<4x32xf32>, vector<4x32xf32> -> vector<4x64xf32>
    %cst_189 = arith.constant dense<0.000000e+00> : vector<4x32xf32>
    %497 = tpu.matmul %496, %0, %cst_189 {dimension_numbers = #tpu.dot_dimension_numbers<[1], [0], [0], [1], [0, 0, 1, 1], [], []>} : vector<4x64xf32>, vector<64x32xf32>, vector<4x32xf32> -> vector<4x32xf32>
    %498 = arith.addf %497, %6 : vector<4x32xf32>
    %499 = arith.negf %498 : vector<4x32xf32>
    %500 = math.exp %499 : vector<4x32xf32>
    %cst_190 = arith.constant 1.000000e+00 : f32
    %501 = vector.broadcast %cst_190 : f32 to vector<4x32xf32>
    %502 = arith.addf %501, %500 : vector<4x32xf32>
    %503 = arith.divf %501, %502 : vector<4x32xf32>
    %cst_191 = arith.constant dense<0.000000e+00> : vector<4x32xf32>
    %504 = tpu.matmul %496, %1, %cst_191 {dimension_numbers = #tpu.dot_dimension_numbers<[1], [0], [0], [1], [0, 0, 1, 1], [], []>} : vector<4x64xf32>, vector<64x32xf32>, vector<4x32xf32> -> vector<4x32xf32>
    %505 = arith.addf %504, %9 : vector<4x32xf32>
    %506 = arith.negf %505 : vector<4x32xf32>
    %507 = math.exp %506 : vector<4x32xf32>
    %cst_192 = arith.constant 1.000000e+00 : f32
    %508 = vector.broadcast %cst_192 : f32 to vector<4x32xf32>
    %509 = arith.addf %508, %507 : vector<4x32xf32>
    %510 = arith.divf %508, %509 : vector<4x32xf32>
    %cst_193 = arith.constant dense<0.000000e+00> : vector<4x32xf32>
    %511 = tpu.matmul %495, %2, %cst_193 {dimension_numbers = #tpu.dot_dimension_numbers<[1], [0], [0], [1], [0, 0, 1, 1], [], []>} : vector<4x32xf32>, vector<32x32xf32>, vector<4x32xf32> -> vector<4x32xf32>
    %512 = arith.addf %511, %12 : vector<4x32xf32>
    %cst_194 = arith.constant dense<0.000000e+00> : vector<4x32xf32>
    %513 = tpu.matmul %464, %3, %cst_194 {dimension_numbers = #tpu.dot_dimension_numbers<[1], [0], [0], [1], [0, 0, 1, 1], [], []>} : vector<4x32xf32>, vector<32x32xf32>, vector<4x32xf32> -> vector<4x32xf32>
    %514 = arith.addf %513, %15 : vector<4x32xf32>
    %515 = arith.mulf %503, %514 : vector<4x32xf32>
    %516 = arith.addf %512, %515 : vector<4x32xf32>
    %517 = math.tanh %516 : vector<4x32xf32>
    %cst_195 = arith.constant 1.000000e+00 : f32
    %518 = vector.broadcast %cst_195 : f32 to vector<4x32xf32>
    %519 = arith.subf %518, %510 : vector<4x32xf32>
    %520 = arith.mulf %519, %517 : vector<4x32xf32>
    %521 = arith.mulf %510, %464 : vector<4x32xf32>
    %522 = arith.addf %520, %521 : vector<4x32xf32>
    %cst_196 = arith.constant dense<0.000000e+00> : vector<8x32xf32>
    %523 = tpu.matmul %41, %522, %cst_196 {dimension_numbers = #tpu.dot_dimension_numbers<[1], [0], [0], [1], [0, 0, 1, 1], [], []>} : vector<8x4xf32>, vector<4x32xf32>, vector<8x32xf32> -> vector<8x32xf32>
    %524 = arith.addf %494, %523 : vector<8x32xf32>
    %cst_197 = arith.constant dense<0.000000e+00> : vector<4x32xf32>
    %525 = tpu.matmul %35, %493, %cst_197 {dimension_numbers = #tpu.dot_dimension_numbers<[1], [0], [0], [1], [0, 0, 1, 1], [], []>} : vector<4x8xf32>, vector<8x32xf32>, vector<4x32xf32> -> vector<4x32xf32>
    %526 = tpu.concatenate %525, %522 in 1 : vector<4x32xf32>, vector<4x32xf32> -> vector<4x64xf32>
    %cst_198 = arith.constant dense<0.000000e+00> : vector<4x32xf32>
    %527 = tpu.matmul %526, %0, %cst_198 {dimension_numbers = #tpu.dot_dimension_numbers<[1], [0], [0], [1], [0, 0, 1, 1], [], []>} : vector<4x64xf32>, vector<64x32xf32>, vector<4x32xf32> -> vector<4x32xf32>
    %528 = arith.addf %527, %6 : vector<4x32xf32>
    %529 = arith.negf %528 : vector<4x32xf32>
    %530 = math.exp %529 : vector<4x32xf32>
    %cst_199 = arith.constant 1.000000e+00 : f32
    %531 = vector.broadcast %cst_199 : f32 to vector<4x32xf32>
    %532 = arith.addf %531, %530 : vector<4x32xf32>
    %533 = arith.divf %531, %532 : vector<4x32xf32>
    %cst_200 = arith.constant dense<0.000000e+00> : vector<4x32xf32>
    %534 = tpu.matmul %526, %1, %cst_200 {dimension_numbers = #tpu.dot_dimension_numbers<[1], [0], [0], [1], [0, 0, 1, 1], [], []>} : vector<4x64xf32>, vector<64x32xf32>, vector<4x32xf32> -> vector<4x32xf32>
    %535 = arith.addf %534, %9 : vector<4x32xf32>
    %536 = arith.negf %535 : vector<4x32xf32>
    %537 = math.exp %536 : vector<4x32xf32>
    %cst_201 = arith.constant 1.000000e+00 : f32
    %538 = vector.broadcast %cst_201 : f32 to vector<4x32xf32>
    %539 = arith.addf %538, %537 : vector<4x32xf32>
    %540 = arith.divf %538, %539 : vector<4x32xf32>
    %cst_202 = arith.constant dense<0.000000e+00> : vector<4x32xf32>
    %541 = tpu.matmul %525, %2, %cst_202 {dimension_numbers = #tpu.dot_dimension_numbers<[1], [0], [0], [1], [0, 0, 1, 1], [], []>} : vector<4x32xf32>, vector<32x32xf32>, vector<4x32xf32> -> vector<4x32xf32>
    %542 = arith.addf %541, %12 : vector<4x32xf32>
    %cst_203 = arith.constant dense<0.000000e+00> : vector<4x32xf32>
    %543 = tpu.matmul %522, %3, %cst_203 {dimension_numbers = #tpu.dot_dimension_numbers<[1], [0], [0], [1], [0, 0, 1, 1], [], []>} : vector<4x32xf32>, vector<32x32xf32>, vector<4x32xf32> -> vector<4x32xf32>
    %544 = arith.addf %543, %15 : vector<4x32xf32>
    %545 = arith.mulf %533, %544 : vector<4x32xf32>
    %546 = arith.addf %542, %545 : vector<4x32xf32>
    %547 = math.tanh %546 : vector<4x32xf32>
    %cst_204 = arith.constant 1.000000e+00 : f32
    %548 = vector.broadcast %cst_204 : f32 to vector<4x32xf32>
    %549 = arith.subf %548, %540 : vector<4x32xf32>
    %550 = arith.mulf %549, %547 : vector<4x32xf32>
    %551 = arith.mulf %540, %522 : vector<4x32xf32>
    %552 = arith.addf %550, %551 : vector<4x32xf32>
    %cst_205 = arith.constant dense<0.000000e+00> : vector<8x32xf32>
    %553 = tpu.matmul %43, %552, %cst_205 {dimension_numbers = #tpu.dot_dimension_numbers<[1], [0], [0], [1], [0, 0, 1, 1], [], []>} : vector<8x4xf32>, vector<4x32xf32>, vector<8x32xf32> -> vector<8x32xf32>
    %554 = arith.addf %524, %553 : vector<8x32xf32>
    %cst_206 = arith.constant dense<0.000000e+00> : vector<4x32xf32>
    %555 = tpu.matmul %37, %493, %cst_206 {dimension_numbers = #tpu.dot_dimension_numbers<[1], [0], [0], [1], [0, 0, 1, 1], [], []>} : vector<4x8xf32>, vector<8x32xf32>, vector<4x32xf32> -> vector<4x32xf32>
    %556 = tpu.concatenate %555, %552 in 1 : vector<4x32xf32>, vector<4x32xf32> -> vector<4x64xf32>
    %cst_207 = arith.constant dense<0.000000e+00> : vector<4x32xf32>
    %557 = tpu.matmul %556, %0, %cst_207 {dimension_numbers = #tpu.dot_dimension_numbers<[1], [0], [0], [1], [0, 0, 1, 1], [], []>} : vector<4x64xf32>, vector<64x32xf32>, vector<4x32xf32> -> vector<4x32xf32>
    %558 = arith.addf %557, %6 : vector<4x32xf32>
    %559 = arith.negf %558 : vector<4x32xf32>
    %560 = math.exp %559 : vector<4x32xf32>
    %cst_208 = arith.constant 1.000000e+00 : f32
    %561 = vector.broadcast %cst_208 : f32 to vector<4x32xf32>
    %562 = arith.addf %561, %560 : vector<4x32xf32>
    %563 = arith.divf %561, %562 : vector<4x32xf32>
    %cst_209 = arith.constant dense<0.000000e+00> : vector<4x32xf32>
    %564 = tpu.matmul %556, %1, %cst_209 {dimension_numbers = #tpu.dot_dimension_numbers<[1], [0], [0], [1], [0, 0, 1, 1], [], []>} : vector<4x64xf32>, vector<64x32xf32>, vector<4x32xf32> -> vector<4x32xf32>
    %565 = arith.addf %564, %9 : vector<4x32xf32>
    %566 = arith.negf %565 : vector<4x32xf32>
    %567 = math.exp %566 : vector<4x32xf32>
    %cst_210 = arith.constant 1.000000e+00 : f32
    %568 = vector.broadcast %cst_210 : f32 to vector<4x32xf32>
    %569 = arith.addf %568, %567 : vector<4x32xf32>
    %570 = arith.divf %568, %569 : vector<4x32xf32>
    %cst_211 = arith.constant dense<0.000000e+00> : vector<4x32xf32>
    %571 = tpu.matmul %555, %2, %cst_211 {dimension_numbers = #tpu.dot_dimension_numbers<[1], [0], [0], [1], [0, 0, 1, 1], [], []>} : vector<4x32xf32>, vector<32x32xf32>, vector<4x32xf32> -> vector<4x32xf32>
    %572 = arith.addf %571, %12 : vector<4x32xf32>
    %cst_212 = arith.constant dense<0.000000e+00> : vector<4x32xf32>
    %573 = tpu.matmul %552, %3, %cst_212 {dimension_numbers = #tpu.dot_dimension_numbers<[1], [0], [0], [1], [0, 0, 1, 1], [], []>} : vector<4x32xf32>, vector<32x32xf32>, vector<4x32xf32> -> vector<4x32xf32>
    %574 = arith.addf %573, %15 : vector<4x32xf32>
    %575 = arith.mulf %563, %574 : vector<4x32xf32>
    %576 = arith.addf %572, %575 : vector<4x32xf32>
    %577 = math.tanh %576 : vector<4x32xf32>
    %cst_213 = arith.constant 1.000000e+00 : f32
    %578 = vector.broadcast %cst_213 : f32 to vector<4x32xf32>
    %579 = arith.subf %578, %570 : vector<4x32xf32>
    %580 = arith.mulf %579, %577 : vector<4x32xf32>
    %581 = arith.mulf %570, %552 : vector<4x32xf32>
    %582 = arith.addf %580, %581 : vector<4x32xf32>
    %cst_214 = arith.constant dense<0.000000e+00> : vector<8x32xf32>
    %583 = tpu.matmul %45, %582, %cst_214 {dimension_numbers = #tpu.dot_dimension_numbers<[1], [0], [0], [1], [0, 0, 1, 1], [], []>} : vector<8x4xf32>, vector<4x32xf32>, vector<8x32xf32> -> vector<8x32xf32>
    %584 = arith.addf %554, %583 : vector<8x32xf32>
    %cst_215 = arith.constant dense<0.000000e+00> : vector<4x32xf32>
    %585 = tpu.matmul %39, %493, %cst_215 {dimension_numbers = #tpu.dot_dimension_numbers<[1], [0], [0], [1], [0, 0, 1, 1], [], []>} : vector<4x8xf32>, vector<8x32xf32>, vector<4x32xf32> -> vector<4x32xf32>
    %586 = tpu.concatenate %585, %582 in 1 : vector<4x32xf32>, vector<4x32xf32> -> vector<4x64xf32>
    %cst_216 = arith.constant dense<0.000000e+00> : vector<4x32xf32>
    %587 = tpu.matmul %586, %0, %cst_216 {dimension_numbers = #tpu.dot_dimension_numbers<[1], [0], [0], [1], [0, 0, 1, 1], [], []>} : vector<4x64xf32>, vector<64x32xf32>, vector<4x32xf32> -> vector<4x32xf32>
    %588 = arith.addf %587, %6 : vector<4x32xf32>
    %589 = arith.negf %588 : vector<4x32xf32>
    %590 = math.exp %589 : vector<4x32xf32>
    %cst_217 = arith.constant 1.000000e+00 : f32
    %591 = vector.broadcast %cst_217 : f32 to vector<4x32xf32>
    %592 = arith.addf %591, %590 : vector<4x32xf32>
    %593 = arith.divf %591, %592 : vector<4x32xf32>
    %cst_218 = arith.constant dense<0.000000e+00> : vector<4x32xf32>
    %594 = tpu.matmul %586, %1, %cst_218 {dimension_numbers = #tpu.dot_dimension_numbers<[1], [0], [0], [1], [0, 0, 1, 1], [], []>} : vector<4x64xf32>, vector<64x32xf32>, vector<4x32xf32> -> vector<4x32xf32>
    %595 = arith.addf %594, %9 : vector<4x32xf32>
    %596 = arith.negf %595 : vector<4x32xf32>
    %597 = math.exp %596 : vector<4x32xf32>
    %cst_219 = arith.constant 1.000000e+00 : f32
    %598 = vector.broadcast %cst_219 : f32 to vector<4x32xf32>
    %599 = arith.addf %598, %597 : vector<4x32xf32>
    %600 = arith.divf %598, %599 : vector<4x32xf32>
    %cst_220 = arith.constant dense<0.000000e+00> : vector<4x32xf32>
    %601 = tpu.matmul %585, %2, %cst_220 {dimension_numbers = #tpu.dot_dimension_numbers<[1], [0], [0], [1], [0, 0, 1, 1], [], []>} : vector<4x32xf32>, vector<32x32xf32>, vector<4x32xf32> -> vector<4x32xf32>
    %602 = arith.addf %601, %12 : vector<4x32xf32>
    %cst_221 = arith.constant dense<0.000000e+00> : vector<4x32xf32>
    %603 = tpu.matmul %582, %3, %cst_221 {dimension_numbers = #tpu.dot_dimension_numbers<[1], [0], [0], [1], [0, 0, 1, 1], [], []>} : vector<4x32xf32>, vector<32x32xf32>, vector<4x32xf32> -> vector<4x32xf32>
    %604 = arith.addf %603, %15 : vector<4x32xf32>
    %605 = arith.mulf %593, %604 : vector<4x32xf32>
    %606 = arith.addf %602, %605 : vector<4x32xf32>
    %607 = math.tanh %606 : vector<4x32xf32>
    %cst_222 = arith.constant 1.000000e+00 : f32
    %608 = vector.broadcast %cst_222 : f32 to vector<4x32xf32>
    %609 = arith.subf %608, %600 : vector<4x32xf32>
    %610 = arith.mulf %609, %607 : vector<4x32xf32>
    %611 = arith.mulf %600, %582 : vector<4x32xf32>
    %612 = arith.addf %610, %611 : vector<4x32xf32>
    %cst_223 = arith.constant dense<0.000000e+00> : vector<8x32xf32>
    %613 = tpu.matmul %47, %612, %cst_223 {dimension_numbers = #tpu.dot_dimension_numbers<[1], [0], [0], [1], [0, 0, 1, 1], [], []>} : vector<8x4xf32>, vector<4x32xf32>, vector<8x32xf32> -> vector<8x32xf32>
    %614 = arith.addf %584, %613 : vector<8x32xf32>
    %615 = tpu.concatenate %614, %493 in 1 : vector<8x32xf32>, vector<8x32xf32> -> vector<8x64xf32>
    %cst_224 = arith.constant dense<0.000000e+00> : vector<8x32xf32>
    %616 = tpu.matmul %615, %16, %cst_224 {dimension_numbers = #tpu.dot_dimension_numbers<[1], [0], [0], [1], [0, 0, 1, 1], [], []>} : vector<8x64xf32>, vector<64x32xf32>, vector<8x32xf32> -> vector<8x32xf32>
    %617 = arith.addf %616, %22 : vector<8x32xf32>
    %618 = arith.negf %617 : vector<8x32xf32>
    %619 = math.exp %618 : vector<8x32xf32>
    %cst_225 = arith.constant 1.000000e+00 : f32
    %620 = vector.broadcast %cst_225 : f32 to vector<8x32xf32>
    %621 = arith.addf %620, %619 : vector<8x32xf32>
    %622 = arith.divf %620, %621 : vector<8x32xf32>
    %cst_226 = arith.constant dense<0.000000e+00> : vector<8x32xf32>
    %623 = tpu.matmul %615, %17, %cst_226 {dimension_numbers = #tpu.dot_dimension_numbers<[1], [0], [0], [1], [0, 0, 1, 1], [], []>} : vector<8x64xf32>, vector<64x32xf32>, vector<8x32xf32> -> vector<8x32xf32>
    %624 = arith.addf %623, %25 : vector<8x32xf32>
    %625 = arith.negf %624 : vector<8x32xf32>
    %626 = math.exp %625 : vector<8x32xf32>
    %cst_227 = arith.constant 1.000000e+00 : f32
    %627 = vector.broadcast %cst_227 : f32 to vector<8x32xf32>
    %628 = arith.addf %627, %626 : vector<8x32xf32>
    %629 = arith.divf %627, %628 : vector<8x32xf32>
    %cst_228 = arith.constant dense<0.000000e+00> : vector<8x32xf32>
    %630 = tpu.matmul %614, %18, %cst_228 {dimension_numbers = #tpu.dot_dimension_numbers<[1], [0], [0], [1], [0, 0, 1, 1], [], []>} : vector<8x32xf32>, vector<32x32xf32>, vector<8x32xf32> -> vector<8x32xf32>
    %631 = arith.addf %630, %28 : vector<8x32xf32>
    %cst_229 = arith.constant dense<0.000000e+00> : vector<8x32xf32>
    %632 = tpu.matmul %493, %19, %cst_229 {dimension_numbers = #tpu.dot_dimension_numbers<[1], [0], [0], [1], [0, 0, 1, 1], [], []>} : vector<8x32xf32>, vector<32x32xf32>, vector<8x32xf32> -> vector<8x32xf32>
    %633 = arith.addf %632, %31 : vector<8x32xf32>
    %634 = arith.mulf %622, %633 : vector<8x32xf32>
    %635 = arith.addf %631, %634 : vector<8x32xf32>
    %636 = math.tanh %635 : vector<8x32xf32>
    %cst_230 = arith.constant 1.000000e+00 : f32
    %637 = vector.broadcast %cst_230 : f32 to vector<8x32xf32>
    %638 = arith.subf %637, %629 : vector<8x32xf32>
    %639 = arith.mulf %638, %636 : vector<8x32xf32>
    %640 = arith.mulf %629, %493 : vector<8x32xf32>
    %641 = arith.addf %639, %640 : vector<8x32xf32>
    %cst_231 = arith.constant 0.000000e+00 : f32
    %642 = vector.broadcast %cst_231 : f32 to vector<8x32xf32>
    %cst_232 = arith.constant dense<0.000000e+00> : vector<4x32xf32>
    %643 = tpu.matmul %33, %641, %cst_232 {dimension_numbers = #tpu.dot_dimension_numbers<[1], [0], [0], [1], [0, 0, 1, 1], [], []>} : vector<4x8xf32>, vector<8x32xf32>, vector<4x32xf32> -> vector<4x32xf32>
    %644 = tpu.concatenate %643, %612 in 1 : vector<4x32xf32>, vector<4x32xf32> -> vector<4x64xf32>
    %cst_233 = arith.constant dense<0.000000e+00> : vector<4x32xf32>
    %645 = tpu.matmul %644, %0, %cst_233 {dimension_numbers = #tpu.dot_dimension_numbers<[1], [0], [0], [1], [0, 0, 1, 1], [], []>} : vector<4x64xf32>, vector<64x32xf32>, vector<4x32xf32> -> vector<4x32xf32>
    %646 = arith.addf %645, %6 : vector<4x32xf32>
    %647 = arith.negf %646 : vector<4x32xf32>
    %648 = math.exp %647 : vector<4x32xf32>
    %cst_234 = arith.constant 1.000000e+00 : f32
    %649 = vector.broadcast %cst_234 : f32 to vector<4x32xf32>
    %650 = arith.addf %649, %648 : vector<4x32xf32>
    %651 = arith.divf %649, %650 : vector<4x32xf32>
    %cst_235 = arith.constant dense<0.000000e+00> : vector<4x32xf32>
    %652 = tpu.matmul %644, %1, %cst_235 {dimension_numbers = #tpu.dot_dimension_numbers<[1], [0], [0], [1], [0, 0, 1, 1], [], []>} : vector<4x64xf32>, vector<64x32xf32>, vector<4x32xf32> -> vector<4x32xf32>
    %653 = arith.addf %652, %9 : vector<4x32xf32>
    %654 = arith.negf %653 : vector<4x32xf32>
    %655 = math.exp %654 : vector<4x32xf32>
    %cst_236 = arith.constant 1.000000e+00 : f32
    %656 = vector.broadcast %cst_236 : f32 to vector<4x32xf32>
    %657 = arith.addf %656, %655 : vector<4x32xf32>
    %658 = arith.divf %656, %657 : vector<4x32xf32>
    %cst_237 = arith.constant dense<0.000000e+00> : vector<4x32xf32>
    %659 = tpu.matmul %643, %2, %cst_237 {dimension_numbers = #tpu.dot_dimension_numbers<[1], [0], [0], [1], [0, 0, 1, 1], [], []>} : vector<4x32xf32>, vector<32x32xf32>, vector<4x32xf32> -> vector<4x32xf32>
    %660 = arith.addf %659, %12 : vector<4x32xf32>
    %cst_238 = arith.constant dense<0.000000e+00> : vector<4x32xf32>
    %661 = tpu.matmul %612, %3, %cst_238 {dimension_numbers = #tpu.dot_dimension_numbers<[1], [0], [0], [1], [0, 0, 1, 1], [], []>} : vector<4x32xf32>, vector<32x32xf32>, vector<4x32xf32> -> vector<4x32xf32>
    %662 = arith.addf %661, %15 : vector<4x32xf32>
    %663 = arith.mulf %651, %662 : vector<4x32xf32>
    %664 = arith.addf %660, %663 : vector<4x32xf32>
    %665 = math.tanh %664 : vector<4x32xf32>
    %cst_239 = arith.constant 1.000000e+00 : f32
    %666 = vector.broadcast %cst_239 : f32 to vector<4x32xf32>
    %667 = arith.subf %666, %658 : vector<4x32xf32>
    %668 = arith.mulf %667, %665 : vector<4x32xf32>
    %669 = arith.mulf %658, %612 : vector<4x32xf32>
    %670 = arith.addf %668, %669 : vector<4x32xf32>
    %cst_240 = arith.constant dense<0.000000e+00> : vector<8x32xf32>
    %671 = tpu.matmul %41, %670, %cst_240 {dimension_numbers = #tpu.dot_dimension_numbers<[1], [0], [0], [1], [0, 0, 1, 1], [], []>} : vector<8x4xf32>, vector<4x32xf32>, vector<8x32xf32> -> vector<8x32xf32>
    %672 = arith.addf %642, %671 : vector<8x32xf32>
    %cst_241 = arith.constant dense<0.000000e+00> : vector<4x32xf32>
    %673 = tpu.matmul %35, %641, %cst_241 {dimension_numbers = #tpu.dot_dimension_numbers<[1], [0], [0], [1], [0, 0, 1, 1], [], []>} : vector<4x8xf32>, vector<8x32xf32>, vector<4x32xf32> -> vector<4x32xf32>
    %674 = tpu.concatenate %673, %670 in 1 : vector<4x32xf32>, vector<4x32xf32> -> vector<4x64xf32>
    %cst_242 = arith.constant dense<0.000000e+00> : vector<4x32xf32>
    %675 = tpu.matmul %674, %0, %cst_242 {dimension_numbers = #tpu.dot_dimension_numbers<[1], [0], [0], [1], [0, 0, 1, 1], [], []>} : vector<4x64xf32>, vector<64x32xf32>, vector<4x32xf32> -> vector<4x32xf32>
    %676 = arith.addf %675, %6 : vector<4x32xf32>
    %677 = arith.negf %676 : vector<4x32xf32>
    %678 = math.exp %677 : vector<4x32xf32>
    %cst_243 = arith.constant 1.000000e+00 : f32
    %679 = vector.broadcast %cst_243 : f32 to vector<4x32xf32>
    %680 = arith.addf %679, %678 : vector<4x32xf32>
    %681 = arith.divf %679, %680 : vector<4x32xf32>
    %cst_244 = arith.constant dense<0.000000e+00> : vector<4x32xf32>
    %682 = tpu.matmul %674, %1, %cst_244 {dimension_numbers = #tpu.dot_dimension_numbers<[1], [0], [0], [1], [0, 0, 1, 1], [], []>} : vector<4x64xf32>, vector<64x32xf32>, vector<4x32xf32> -> vector<4x32xf32>
    %683 = arith.addf %682, %9 : vector<4x32xf32>
    %684 = arith.negf %683 : vector<4x32xf32>
    %685 = math.exp %684 : vector<4x32xf32>
    %cst_245 = arith.constant 1.000000e+00 : f32
    %686 = vector.broadcast %cst_245 : f32 to vector<4x32xf32>
    %687 = arith.addf %686, %685 : vector<4x32xf32>
    %688 = arith.divf %686, %687 : vector<4x32xf32>
    %cst_246 = arith.constant dense<0.000000e+00> : vector<4x32xf32>
    %689 = tpu.matmul %673, %2, %cst_246 {dimension_numbers = #tpu.dot_dimension_numbers<[1], [0], [0], [1], [0, 0, 1, 1], [], []>} : vector<4x32xf32>, vector<32x32xf32>, vector<4x32xf32> -> vector<4x32xf32>
    %690 = arith.addf %689, %12 : vector<4x32xf32>
    %cst_247 = arith.constant dense<0.000000e+00> : vector<4x32xf32>
    %691 = tpu.matmul %670, %3, %cst_247 {dimension_numbers = #tpu.dot_dimension_numbers<[1], [0], [0], [1], [0, 0, 1, 1], [], []>} : vector<4x32xf32>, vector<32x32xf32>, vector<4x32xf32> -> vector<4x32xf32>
    %692 = arith.addf %691, %15 : vector<4x32xf32>
    %693 = arith.mulf %681, %692 : vector<4x32xf32>
    %694 = arith.addf %690, %693 : vector<4x32xf32>
    %695 = math.tanh %694 : vector<4x32xf32>
    %cst_248 = arith.constant 1.000000e+00 : f32
    %696 = vector.broadcast %cst_248 : f32 to vector<4x32xf32>
    %697 = arith.subf %696, %688 : vector<4x32xf32>
    %698 = arith.mulf %697, %695 : vector<4x32xf32>
    %699 = arith.mulf %688, %670 : vector<4x32xf32>
    %700 = arith.addf %698, %699 : vector<4x32xf32>
    %cst_249 = arith.constant dense<0.000000e+00> : vector<8x32xf32>
    %701 = tpu.matmul %43, %700, %cst_249 {dimension_numbers = #tpu.dot_dimension_numbers<[1], [0], [0], [1], [0, 0, 1, 1], [], []>} : vector<8x4xf32>, vector<4x32xf32>, vector<8x32xf32> -> vector<8x32xf32>
    %702 = arith.addf %672, %701 : vector<8x32xf32>
    %cst_250 = arith.constant dense<0.000000e+00> : vector<4x32xf32>
    %703 = tpu.matmul %37, %641, %cst_250 {dimension_numbers = #tpu.dot_dimension_numbers<[1], [0], [0], [1], [0, 0, 1, 1], [], []>} : vector<4x8xf32>, vector<8x32xf32>, vector<4x32xf32> -> vector<4x32xf32>
    %704 = tpu.concatenate %703, %700 in 1 : vector<4x32xf32>, vector<4x32xf32> -> vector<4x64xf32>
    %cst_251 = arith.constant dense<0.000000e+00> : vector<4x32xf32>
    %705 = tpu.matmul %704, %0, %cst_251 {dimension_numbers = #tpu.dot_dimension_numbers<[1], [0], [0], [1], [0, 0, 1, 1], [], []>} : vector<4x64xf32>, vector<64x32xf32>, vector<4x32xf32> -> vector<4x32xf32>
    %706 = arith.addf %705, %6 : vector<4x32xf32>
    %707 = arith.negf %706 : vector<4x32xf32>
    %708 = math.exp %707 : vector<4x32xf32>
    %cst_252 = arith.constant 1.000000e+00 : f32
    %709 = vector.broadcast %cst_252 : f32 to vector<4x32xf32>
    %710 = arith.addf %709, %708 : vector<4x32xf32>
    %711 = arith.divf %709, %710 : vector<4x32xf32>
    %cst_253 = arith.constant dense<0.000000e+00> : vector<4x32xf32>
    %712 = tpu.matmul %704, %1, %cst_253 {dimension_numbers = #tpu.dot_dimension_numbers<[1], [0], [0], [1], [0, 0, 1, 1], [], []>} : vector<4x64xf32>, vector<64x32xf32>, vector<4x32xf32> -> vector<4x32xf32>
    %713 = arith.addf %712, %9 : vector<4x32xf32>
    %714 = arith.negf %713 : vector<4x32xf32>
    %715 = math.exp %714 : vector<4x32xf32>
    %cst_254 = arith.constant 1.000000e+00 : f32
    %716 = vector.broadcast %cst_254 : f32 to vector<4x32xf32>
    %717 = arith.addf %716, %715 : vector<4x32xf32>
    %718 = arith.divf %716, %717 : vector<4x32xf32>
    %cst_255 = arith.constant dense<0.000000e+00> : vector<4x32xf32>
    %719 = tpu.matmul %703, %2, %cst_255 {dimension_numbers = #tpu.dot_dimension_numbers<[1], [0], [0], [1], [0, 0, 1, 1], [], []>} : vector<4x32xf32>, vector<32x32xf32>, vector<4x32xf32> -> vector<4x32xf32>
    %720 = arith.addf %719, %12 : vector<4x32xf32>
    %cst_256 = arith.constant dense<0.000000e+00> : vector<4x32xf32>
    %721 = tpu.matmul %700, %3, %cst_256 {dimension_numbers = #tpu.dot_dimension_numbers<[1], [0], [0], [1], [0, 0, 1, 1], [], []>} : vector<4x32xf32>, vector<32x32xf32>, vector<4x32xf32> -> vector<4x32xf32>
    %722 = arith.addf %721, %15 : vector<4x32xf32>
    %723 = arith.mulf %711, %722 : vector<4x32xf32>
    %724 = arith.addf %720, %723 : vector<4x32xf32>
    %725 = math.tanh %724 : vector<4x32xf32>
    %cst_257 = arith.constant 1.000000e+00 : f32
    %726 = vector.broadcast %cst_257 : f32 to vector<4x32xf32>
    %727 = arith.subf %726, %718 : vector<4x32xf32>
    %728 = arith.mulf %727, %725 : vector<4x32xf32>
    %729 = arith.mulf %718, %700 : vector<4x32xf32>
    %730 = arith.addf %728, %729 : vector<4x32xf32>
    %cst_258 = arith.constant dense<0.000000e+00> : vector<8x32xf32>
    %731 = tpu.matmul %45, %730, %cst_258 {dimension_numbers = #tpu.dot_dimension_numbers<[1], [0], [0], [1], [0, 0, 1, 1], [], []>} : vector<8x4xf32>, vector<4x32xf32>, vector<8x32xf32> -> vector<8x32xf32>
    %732 = arith.addf %702, %731 : vector<8x32xf32>
    %cst_259 = arith.constant dense<0.000000e+00> : vector<4x32xf32>
    %733 = tpu.matmul %39, %641, %cst_259 {dimension_numbers = #tpu.dot_dimension_numbers<[1], [0], [0], [1], [0, 0, 1, 1], [], []>} : vector<4x8xf32>, vector<8x32xf32>, vector<4x32xf32> -> vector<4x32xf32>
    %734 = tpu.concatenate %733, %730 in 1 : vector<4x32xf32>, vector<4x32xf32> -> vector<4x64xf32>
    %cst_260 = arith.constant dense<0.000000e+00> : vector<4x32xf32>
    %735 = tpu.matmul %734, %0, %cst_260 {dimension_numbers = #tpu.dot_dimension_numbers<[1], [0], [0], [1], [0, 0, 1, 1], [], []>} : vector<4x64xf32>, vector<64x32xf32>, vector<4x32xf32> -> vector<4x32xf32>
    %736 = arith.addf %735, %6 : vector<4x32xf32>
    %737 = arith.negf %736 : vector<4x32xf32>
    %738 = math.exp %737 : vector<4x32xf32>
    %cst_261 = arith.constant 1.000000e+00 : f32
    %739 = vector.broadcast %cst_261 : f32 to vector<4x32xf32>
    %740 = arith.addf %739, %738 : vector<4x32xf32>
    %741 = arith.divf %739, %740 : vector<4x32xf32>
    %cst_262 = arith.constant dense<0.000000e+00> : vector<4x32xf32>
    %742 = tpu.matmul %734, %1, %cst_262 {dimension_numbers = #tpu.dot_dimension_numbers<[1], [0], [0], [1], [0, 0, 1, 1], [], []>} : vector<4x64xf32>, vector<64x32xf32>, vector<4x32xf32> -> vector<4x32xf32>
    %743 = arith.addf %742, %9 : vector<4x32xf32>
    %744 = arith.negf %743 : vector<4x32xf32>
    %745 = math.exp %744 : vector<4x32xf32>
    %cst_263 = arith.constant 1.000000e+00 : f32
    %746 = vector.broadcast %cst_263 : f32 to vector<4x32xf32>
    %747 = arith.addf %746, %745 : vector<4x32xf32>
    %748 = arith.divf %746, %747 : vector<4x32xf32>
    %cst_264 = arith.constant dense<0.000000e+00> : vector<4x32xf32>
    %749 = tpu.matmul %733, %2, %cst_264 {dimension_numbers = #tpu.dot_dimension_numbers<[1], [0], [0], [1], [0, 0, 1, 1], [], []>} : vector<4x32xf32>, vector<32x32xf32>, vector<4x32xf32> -> vector<4x32xf32>
    %750 = arith.addf %749, %12 : vector<4x32xf32>
    %cst_265 = arith.constant dense<0.000000e+00> : vector<4x32xf32>
    %751 = tpu.matmul %730, %3, %cst_265 {dimension_numbers = #tpu.dot_dimension_numbers<[1], [0], [0], [1], [0, 0, 1, 1], [], []>} : vector<4x32xf32>, vector<32x32xf32>, vector<4x32xf32> -> vector<4x32xf32>
    %752 = arith.addf %751, %15 : vector<4x32xf32>
    %753 = arith.mulf %741, %752 : vector<4x32xf32>
    %754 = arith.addf %750, %753 : vector<4x32xf32>
    %755 = math.tanh %754 : vector<4x32xf32>
    %cst_266 = arith.constant 1.000000e+00 : f32
    %756 = vector.broadcast %cst_266 : f32 to vector<4x32xf32>
    %757 = arith.subf %756, %748 : vector<4x32xf32>
    %758 = arith.mulf %757, %755 : vector<4x32xf32>
    %759 = arith.mulf %748, %730 : vector<4x32xf32>
    %760 = arith.addf %758, %759 : vector<4x32xf32>
    %cst_267 = arith.constant dense<0.000000e+00> : vector<8x32xf32>
    %761 = tpu.matmul %47, %760, %cst_267 {dimension_numbers = #tpu.dot_dimension_numbers<[1], [0], [0], [1], [0, 0, 1, 1], [], []>} : vector<8x4xf32>, vector<4x32xf32>, vector<8x32xf32> -> vector<8x32xf32>
    %762 = arith.addf %732, %761 : vector<8x32xf32>
    %763 = tpu.concatenate %762, %641 in 1 : vector<8x32xf32>, vector<8x32xf32> -> vector<8x64xf32>
    %cst_268 = arith.constant dense<0.000000e+00> : vector<8x32xf32>
    %764 = tpu.matmul %763, %16, %cst_268 {dimension_numbers = #tpu.dot_dimension_numbers<[1], [0], [0], [1], [0, 0, 1, 1], [], []>} : vector<8x64xf32>, vector<64x32xf32>, vector<8x32xf32> -> vector<8x32xf32>
    %765 = arith.addf %764, %22 : vector<8x32xf32>
    %766 = arith.negf %765 : vector<8x32xf32>
    %767 = math.exp %766 : vector<8x32xf32>
    %cst_269 = arith.constant 1.000000e+00 : f32
    %768 = vector.broadcast %cst_269 : f32 to vector<8x32xf32>
    %769 = arith.addf %768, %767 : vector<8x32xf32>
    %770 = arith.divf %768, %769 : vector<8x32xf32>
    %cst_270 = arith.constant dense<0.000000e+00> : vector<8x32xf32>
    %771 = tpu.matmul %763, %17, %cst_270 {dimension_numbers = #tpu.dot_dimension_numbers<[1], [0], [0], [1], [0, 0, 1, 1], [], []>} : vector<8x64xf32>, vector<64x32xf32>, vector<8x32xf32> -> vector<8x32xf32>
    %772 = arith.addf %771, %25 : vector<8x32xf32>
    %773 = arith.negf %772 : vector<8x32xf32>
    %774 = math.exp %773 : vector<8x32xf32>
    %cst_271 = arith.constant 1.000000e+00 : f32
    %775 = vector.broadcast %cst_271 : f32 to vector<8x32xf32>
    %776 = arith.addf %775, %774 : vector<8x32xf32>
    %777 = arith.divf %775, %776 : vector<8x32xf32>
    %cst_272 = arith.constant dense<0.000000e+00> : vector<8x32xf32>
    %778 = tpu.matmul %762, %18, %cst_272 {dimension_numbers = #tpu.dot_dimension_numbers<[1], [0], [0], [1], [0, 0, 1, 1], [], []>} : vector<8x32xf32>, vector<32x32xf32>, vector<8x32xf32> -> vector<8x32xf32>
    %779 = arith.addf %778, %28 : vector<8x32xf32>
    %cst_273 = arith.constant dense<0.000000e+00> : vector<8x32xf32>
    %780 = tpu.matmul %641, %19, %cst_273 {dimension_numbers = #tpu.dot_dimension_numbers<[1], [0], [0], [1], [0, 0, 1, 1], [], []>} : vector<8x32xf32>, vector<32x32xf32>, vector<8x32xf32> -> vector<8x32xf32>
    %781 = arith.addf %780, %31 : vector<8x32xf32>
    %782 = arith.mulf %770, %781 : vector<8x32xf32>
    %783 = arith.addf %779, %782 : vector<8x32xf32>
    %784 = math.tanh %783 : vector<8x32xf32>
    %cst_274 = arith.constant 1.000000e+00 : f32
    %785 = vector.broadcast %cst_274 : f32 to vector<8x32xf32>
    %786 = arith.subf %785, %777 : vector<8x32xf32>
    %787 = arith.mulf %786, %784 : vector<8x32xf32>
    %788 = arith.mulf %777, %641 : vector<8x32xf32>
    %789 = arith.addf %787, %788 : vector<8x32xf32>
    %cst_275 = arith.constant 0.000000e+00 : f32
    %790 = vector.broadcast %cst_275 : f32 to vector<8x32xf32>
    %cst_276 = arith.constant dense<0.000000e+00> : vector<4x32xf32>
    %791 = tpu.matmul %33, %789, %cst_276 {dimension_numbers = #tpu.dot_dimension_numbers<[1], [0], [0], [1], [0, 0, 1, 1], [], []>} : vector<4x8xf32>, vector<8x32xf32>, vector<4x32xf32> -> vector<4x32xf32>
    %792 = tpu.concatenate %791, %760 in 1 : vector<4x32xf32>, vector<4x32xf32> -> vector<4x64xf32>
    %cst_277 = arith.constant dense<0.000000e+00> : vector<4x32xf32>
    %793 = tpu.matmul %792, %0, %cst_277 {dimension_numbers = #tpu.dot_dimension_numbers<[1], [0], [0], [1], [0, 0, 1, 1], [], []>} : vector<4x64xf32>, vector<64x32xf32>, vector<4x32xf32> -> vector<4x32xf32>
    %794 = arith.addf %793, %6 : vector<4x32xf32>
    %795 = arith.negf %794 : vector<4x32xf32>
    %796 = math.exp %795 : vector<4x32xf32>
    %cst_278 = arith.constant 1.000000e+00 : f32
    %797 = vector.broadcast %cst_278 : f32 to vector<4x32xf32>
    %798 = arith.addf %797, %796 : vector<4x32xf32>
    %799 = arith.divf %797, %798 : vector<4x32xf32>
    %cst_279 = arith.constant dense<0.000000e+00> : vector<4x32xf32>
    %800 = tpu.matmul %792, %1, %cst_279 {dimension_numbers = #tpu.dot_dimension_numbers<[1], [0], [0], [1], [0, 0, 1, 1], [], []>} : vector<4x64xf32>, vector<64x32xf32>, vector<4x32xf32> -> vector<4x32xf32>
    %801 = arith.addf %800, %9 : vector<4x32xf32>
    %802 = arith.negf %801 : vector<4x32xf32>
    %803 = math.exp %802 : vector<4x32xf32>
    %cst_280 = arith.constant 1.000000e+00 : f32
    %804 = vector.broadcast %cst_280 : f32 to vector<4x32xf32>
    %805 = arith.addf %804, %803 : vector<4x32xf32>
    %806 = arith.divf %804, %805 : vector<4x32xf32>
    %cst_281 = arith.constant dense<0.000000e+00> : vector<4x32xf32>
    %807 = tpu.matmul %791, %2, %cst_281 {dimension_numbers = #tpu.dot_dimension_numbers<[1], [0], [0], [1], [0, 0, 1, 1], [], []>} : vector<4x32xf32>, vector<32x32xf32>, vector<4x32xf32> -> vector<4x32xf32>
    %808 = arith.addf %807, %12 : vector<4x32xf32>
    %cst_282 = arith.constant dense<0.000000e+00> : vector<4x32xf32>
    %809 = tpu.matmul %760, %3, %cst_282 {dimension_numbers = #tpu.dot_dimension_numbers<[1], [0], [0], [1], [0, 0, 1, 1], [], []>} : vector<4x32xf32>, vector<32x32xf32>, vector<4x32xf32> -> vector<4x32xf32>
    %810 = arith.addf %809, %15 : vector<4x32xf32>
    %811 = arith.mulf %799, %810 : vector<4x32xf32>
    %812 = arith.addf %808, %811 : vector<4x32xf32>
    %813 = math.tanh %812 : vector<4x32xf32>
    %cst_283 = arith.constant 1.000000e+00 : f32
    %814 = vector.broadcast %cst_283 : f32 to vector<4x32xf32>
    %815 = arith.subf %814, %806 : vector<4x32xf32>
    %816 = arith.mulf %815, %813 : vector<4x32xf32>
    %817 = arith.mulf %806, %760 : vector<4x32xf32>
    %818 = arith.addf %816, %817 : vector<4x32xf32>
    %cst_284 = arith.constant dense<0.000000e+00> : vector<8x32xf32>
    %819 = tpu.matmul %41, %818, %cst_284 {dimension_numbers = #tpu.dot_dimension_numbers<[1], [0], [0], [1], [0, 0, 1, 1], [], []>} : vector<8x4xf32>, vector<4x32xf32>, vector<8x32xf32> -> vector<8x32xf32>
    %820 = arith.addf %790, %819 : vector<8x32xf32>
    %cst_285 = arith.constant dense<0.000000e+00> : vector<4x32xf32>
    %821 = tpu.matmul %35, %789, %cst_285 {dimension_numbers = #tpu.dot_dimension_numbers<[1], [0], [0], [1], [0, 0, 1, 1], [], []>} : vector<4x8xf32>, vector<8x32xf32>, vector<4x32xf32> -> vector<4x32xf32>
    %822 = tpu.concatenate %821, %818 in 1 : vector<4x32xf32>, vector<4x32xf32> -> vector<4x64xf32>
    %cst_286 = arith.constant dense<0.000000e+00> : vector<4x32xf32>
    %823 = tpu.matmul %822, %0, %cst_286 {dimension_numbers = #tpu.dot_dimension_numbers<[1], [0], [0], [1], [0, 0, 1, 1], [], []>} : vector<4x64xf32>, vector<64x32xf32>, vector<4x32xf32> -> vector<4x32xf32>
    %824 = arith.addf %823, %6 : vector<4x32xf32>
    %825 = arith.negf %824 : vector<4x32xf32>
    %826 = math.exp %825 : vector<4x32xf32>
    %cst_287 = arith.constant 1.000000e+00 : f32
    %827 = vector.broadcast %cst_287 : f32 to vector<4x32xf32>
    %828 = arith.addf %827, %826 : vector<4x32xf32>
    %829 = arith.divf %827, %828 : vector<4x32xf32>
    %cst_288 = arith.constant dense<0.000000e+00> : vector<4x32xf32>
    %830 = tpu.matmul %822, %1, %cst_288 {dimension_numbers = #tpu.dot_dimension_numbers<[1], [0], [0], [1], [0, 0, 1, 1], [], []>} : vector<4x64xf32>, vector<64x32xf32>, vector<4x32xf32> -> vector<4x32xf32>
    %831 = arith.addf %830, %9 : vector<4x32xf32>
    %832 = arith.negf %831 : vector<4x32xf32>
    %833 = math.exp %832 : vector<4x32xf32>
    %cst_289 = arith.constant 1.000000e+00 : f32
    %834 = vector.broadcast %cst_289 : f32 to vector<4x32xf32>
    %835 = arith.addf %834, %833 : vector<4x32xf32>
    %836 = arith.divf %834, %835 : vector<4x32xf32>
    %cst_290 = arith.constant dense<0.000000e+00> : vector<4x32xf32>
    %837 = tpu.matmul %821, %2, %cst_290 {dimension_numbers = #tpu.dot_dimension_numbers<[1], [0], [0], [1], [0, 0, 1, 1], [], []>} : vector<4x32xf32>, vector<32x32xf32>, vector<4x32xf32> -> vector<4x32xf32>
    %838 = arith.addf %837, %12 : vector<4x32xf32>
    %cst_291 = arith.constant dense<0.000000e+00> : vector<4x32xf32>
    %839 = tpu.matmul %818, %3, %cst_291 {dimension_numbers = #tpu.dot_dimension_numbers<[1], [0], [0], [1], [0, 0, 1, 1], [], []>} : vector<4x32xf32>, vector<32x32xf32>, vector<4x32xf32> -> vector<4x32xf32>
    %840 = arith.addf %839, %15 : vector<4x32xf32>
    %841 = arith.mulf %829, %840 : vector<4x32xf32>
    %842 = arith.addf %838, %841 : vector<4x32xf32>
    %843 = math.tanh %842 : vector<4x32xf32>
    %cst_292 = arith.constant 1.000000e+00 : f32
    %844 = vector.broadcast %cst_292 : f32 to vector<4x32xf32>
    %845 = arith.subf %844, %836 : vector<4x32xf32>
    %846 = arith.mulf %845, %843 : vector<4x32xf32>
    %847 = arith.mulf %836, %818 : vector<4x32xf32>
    %848 = arith.addf %846, %847 : vector<4x32xf32>
    %cst_293 = arith.constant dense<0.000000e+00> : vector<8x32xf32>
    %849 = tpu.matmul %43, %848, %cst_293 {dimension_numbers = #tpu.dot_dimension_numbers<[1], [0], [0], [1], [0, 0, 1, 1], [], []>} : vector<8x4xf32>, vector<4x32xf32>, vector<8x32xf32> -> vector<8x32xf32>
    %850 = arith.addf %820, %849 : vector<8x32xf32>
    %cst_294 = arith.constant dense<0.000000e+00> : vector<4x32xf32>
    %851 = tpu.matmul %37, %789, %cst_294 {dimension_numbers = #tpu.dot_dimension_numbers<[1], [0], [0], [1], [0, 0, 1, 1], [], []>} : vector<4x8xf32>, vector<8x32xf32>, vector<4x32xf32> -> vector<4x32xf32>
    %852 = tpu.concatenate %851, %848 in 1 : vector<4x32xf32>, vector<4x32xf32> -> vector<4x64xf32>
    %cst_295 = arith.constant dense<0.000000e+00> : vector<4x32xf32>
    %853 = tpu.matmul %852, %0, %cst_295 {dimension_numbers = #tpu.dot_dimension_numbers<[1], [0], [0], [1], [0, 0, 1, 1], [], []>} : vector<4x64xf32>, vector<64x32xf32>, vector<4x32xf32> -> vector<4x32xf32>
    %854 = arith.addf %853, %6 : vector<4x32xf32>
    %855 = arith.negf %854 : vector<4x32xf32>
    %856 = math.exp %855 : vector<4x32xf32>
    %cst_296 = arith.constant 1.000000e+00 : f32
    %857 = vector.broadcast %cst_296 : f32 to vector<4x32xf32>
    %858 = arith.addf %857, %856 : vector<4x32xf32>
    %859 = arith.divf %857, %858 : vector<4x32xf32>
    %cst_297 = arith.constant dense<0.000000e+00> : vector<4x32xf32>
    %860 = tpu.matmul %852, %1, %cst_297 {dimension_numbers = #tpu.dot_dimension_numbers<[1], [0], [0], [1], [0, 0, 1, 1], [], []>} : vector<4x64xf32>, vector<64x32xf32>, vector<4x32xf32> -> vector<4x32xf32>
    %861 = arith.addf %860, %9 : vector<4x32xf32>
    %862 = arith.negf %861 : vector<4x32xf32>
    %863 = math.exp %862 : vector<4x32xf32>
    %cst_298 = arith.constant 1.000000e+00 : f32
    %864 = vector.broadcast %cst_298 : f32 to vector<4x32xf32>
    %865 = arith.addf %864, %863 : vector<4x32xf32>
    %866 = arith.divf %864, %865 : vector<4x32xf32>
    %cst_299 = arith.constant dense<0.000000e+00> : vector<4x32xf32>
    %867 = tpu.matmul %851, %2, %cst_299 {dimension_numbers = #tpu.dot_dimension_numbers<[1], [0], [0], [1], [0, 0, 1, 1], [], []>} : vector<4x32xf32>, vector<32x32xf32>, vector<4x32xf32> -> vector<4x32xf32>
    %868 = arith.addf %867, %12 : vector<4x32xf32>
    %cst_300 = arith.constant dense<0.000000e+00> : vector<4x32xf32>
    %869 = tpu.matmul %848, %3, %cst_300 {dimension_numbers = #tpu.dot_dimension_numbers<[1], [0], [0], [1], [0, 0, 1, 1], [], []>} : vector<4x32xf32>, vector<32x32xf32>, vector<4x32xf32> -> vector<4x32xf32>
    %870 = arith.addf %869, %15 : vector<4x32xf32>
    %871 = arith.mulf %859, %870 : vector<4x32xf32>
    %872 = arith.addf %868, %871 : vector<4x32xf32>
    %873 = math.tanh %872 : vector<4x32xf32>
    %cst_301 = arith.constant 1.000000e+00 : f32
    %874 = vector.broadcast %cst_301 : f32 to vector<4x32xf32>
    %875 = arith.subf %874, %866 : vector<4x32xf32>
    %876 = arith.mulf %875, %873 : vector<4x32xf32>
    %877 = arith.mulf %866, %848 : vector<4x32xf32>
    %878 = arith.addf %876, %877 : vector<4x32xf32>
    %cst_302 = arith.constant dense<0.000000e+00> : vector<8x32xf32>
    %879 = tpu.matmul %45, %878, %cst_302 {dimension_numbers = #tpu.dot_dimension_numbers<[1], [0], [0], [1], [0, 0, 1, 1], [], []>} : vector<8x4xf32>, vector<4x32xf32>, vector<8x32xf32> -> vector<8x32xf32>
    %880 = arith.addf %850, %879 : vector<8x32xf32>
    %cst_303 = arith.constant dense<0.000000e+00> : vector<4x32xf32>
    %881 = tpu.matmul %39, %789, %cst_303 {dimension_numbers = #tpu.dot_dimension_numbers<[1], [0], [0], [1], [0, 0, 1, 1], [], []>} : vector<4x8xf32>, vector<8x32xf32>, vector<4x32xf32> -> vector<4x32xf32>
    %882 = tpu.concatenate %881, %878 in 1 : vector<4x32xf32>, vector<4x32xf32> -> vector<4x64xf32>
    %cst_304 = arith.constant dense<0.000000e+00> : vector<4x32xf32>
    %883 = tpu.matmul %882, %0, %cst_304 {dimension_numbers = #tpu.dot_dimension_numbers<[1], [0], [0], [1], [0, 0, 1, 1], [], []>} : vector<4x64xf32>, vector<64x32xf32>, vector<4x32xf32> -> vector<4x32xf32>
    %884 = arith.addf %883, %6 : vector<4x32xf32>
    %885 = arith.negf %884 : vector<4x32xf32>
    %886 = math.exp %885 : vector<4x32xf32>
    %cst_305 = arith.constant 1.000000e+00 : f32
    %887 = vector.broadcast %cst_305 : f32 to vector<4x32xf32>
    %888 = arith.addf %887, %886 : vector<4x32xf32>
    %889 = arith.divf %887, %888 : vector<4x32xf32>
    %cst_306 = arith.constant dense<0.000000e+00> : vector<4x32xf32>
    %890 = tpu.matmul %882, %1, %cst_306 {dimension_numbers = #tpu.dot_dimension_numbers<[1], [0], [0], [1], [0, 0, 1, 1], [], []>} : vector<4x64xf32>, vector<64x32xf32>, vector<4x32xf32> -> vector<4x32xf32>
    %891 = arith.addf %890, %9 : vector<4x32xf32>
    %892 = arith.negf %891 : vector<4x32xf32>
    %893 = math.exp %892 : vector<4x32xf32>
    %cst_307 = arith.constant 1.000000e+00 : f32
    %894 = vector.broadcast %cst_307 : f32 to vector<4x32xf32>
    %895 = arith.addf %894, %893 : vector<4x32xf32>
    %896 = arith.divf %894, %895 : vector<4x32xf32>
    %cst_308 = arith.constant dense<0.000000e+00> : vector<4x32xf32>
    %897 = tpu.matmul %881, %2, %cst_308 {dimension_numbers = #tpu.dot_dimension_numbers<[1], [0], [0], [1], [0, 0, 1, 1], [], []>} : vector<4x32xf32>, vector<32x32xf32>, vector<4x32xf32> -> vector<4x32xf32>
    %898 = arith.addf %897, %12 : vector<4x32xf32>
    %cst_309 = arith.constant dense<0.000000e+00> : vector<4x32xf32>
    %899 = tpu.matmul %878, %3, %cst_309 {dimension_numbers = #tpu.dot_dimension_numbers<[1], [0], [0], [1], [0, 0, 1, 1], [], []>} : vector<4x32xf32>, vector<32x32xf32>, vector<4x32xf32> -> vector<4x32xf32>
    %900 = arith.addf %899, %15 : vector<4x32xf32>
    %901 = arith.mulf %889, %900 : vector<4x32xf32>
    %902 = arith.addf %898, %901 : vector<4x32xf32>
    %903 = math.tanh %902 : vector<4x32xf32>
    %cst_310 = arith.constant 1.000000e+00 : f32
    %904 = vector.broadcast %cst_310 : f32 to vector<4x32xf32>
    %905 = arith.subf %904, %896 : vector<4x32xf32>
    %906 = arith.mulf %905, %903 : vector<4x32xf32>
    %907 = arith.mulf %896, %878 : vector<4x32xf32>
    %908 = arith.addf %906, %907 : vector<4x32xf32>
    %cst_311 = arith.constant dense<0.000000e+00> : vector<8x32xf32>
    %909 = tpu.matmul %47, %908, %cst_311 {dimension_numbers = #tpu.dot_dimension_numbers<[1], [0], [0], [1], [0, 0, 1, 1], [], []>} : vector<8x4xf32>, vector<4x32xf32>, vector<8x32xf32> -> vector<8x32xf32>
    %910 = arith.addf %880, %909 : vector<8x32xf32>
    %911 = tpu.concatenate %910, %789 in 1 : vector<8x32xf32>, vector<8x32xf32> -> vector<8x64xf32>
    %cst_312 = arith.constant dense<0.000000e+00> : vector<8x32xf32>
    %912 = tpu.matmul %911, %16, %cst_312 {dimension_numbers = #tpu.dot_dimension_numbers<[1], [0], [0], [1], [0, 0, 1, 1], [], []>} : vector<8x64xf32>, vector<64x32xf32>, vector<8x32xf32> -> vector<8x32xf32>
    %913 = arith.addf %912, %22 : vector<8x32xf32>
    %914 = arith.negf %913 : vector<8x32xf32>
    %915 = math.exp %914 : vector<8x32xf32>
    %cst_313 = arith.constant 1.000000e+00 : f32
    %916 = vector.broadcast %cst_313 : f32 to vector<8x32xf32>
    %917 = arith.addf %916, %915 : vector<8x32xf32>
    %918 = arith.divf %916, %917 : vector<8x32xf32>
    %cst_314 = arith.constant dense<0.000000e+00> : vector<8x32xf32>
    %919 = tpu.matmul %911, %17, %cst_314 {dimension_numbers = #tpu.dot_dimension_numbers<[1], [0], [0], [1], [0, 0, 1, 1], [], []>} : vector<8x64xf32>, vector<64x32xf32>, vector<8x32xf32> -> vector<8x32xf32>
    %920 = arith.addf %919, %25 : vector<8x32xf32>
    %921 = arith.negf %920 : vector<8x32xf32>
    %922 = math.exp %921 : vector<8x32xf32>
    %cst_315 = arith.constant 1.000000e+00 : f32
    %923 = vector.broadcast %cst_315 : f32 to vector<8x32xf32>
    %924 = arith.addf %923, %922 : vector<8x32xf32>
    %925 = arith.divf %923, %924 : vector<8x32xf32>
    %cst_316 = arith.constant dense<0.000000e+00> : vector<8x32xf32>
    %926 = tpu.matmul %910, %18, %cst_316 {dimension_numbers = #tpu.dot_dimension_numbers<[1], [0], [0], [1], [0, 0, 1, 1], [], []>} : vector<8x32xf32>, vector<32x32xf32>, vector<8x32xf32> -> vector<8x32xf32>
    %927 = arith.addf %926, %28 : vector<8x32xf32>
    %cst_317 = arith.constant dense<0.000000e+00> : vector<8x32xf32>
    %928 = tpu.matmul %789, %19, %cst_317 {dimension_numbers = #tpu.dot_dimension_numbers<[1], [0], [0], [1], [0, 0, 1, 1], [], []>} : vector<8x32xf32>, vector<32x32xf32>, vector<8x32xf32> -> vector<8x32xf32>
    %929 = arith.addf %928, %31 : vector<8x32xf32>
    %930 = arith.mulf %918, %929 : vector<8x32xf32>
    %931 = arith.addf %927, %930 : vector<8x32xf32>
    %932 = math.tanh %931 : vector<8x32xf32>
    %cst_318 = arith.constant 1.000000e+00 : f32
    %933 = vector.broadcast %cst_318 : f32 to vector<8x32xf32>
    %934 = arith.subf %933, %925 : vector<8x32xf32>
    %935 = arith.mulf %934, %932 : vector<8x32xf32>
    %936 = arith.mulf %925, %789 : vector<8x32xf32>
    %937 = arith.addf %935, %936 : vector<8x32xf32>
    %cst_319 = arith.constant 0.000000e+00 : f32
    %938 = vector.broadcast %cst_319 : f32 to vector<8x32xf32>
    %cst_320 = arith.constant dense<0.000000e+00> : vector<4x32xf32>
    %939 = tpu.matmul %33, %937, %cst_320 {dimension_numbers = #tpu.dot_dimension_numbers<[1], [0], [0], [1], [0, 0, 1, 1], [], []>} : vector<4x8xf32>, vector<8x32xf32>, vector<4x32xf32> -> vector<4x32xf32>
    %940 = tpu.concatenate %939, %908 in 1 : vector<4x32xf32>, vector<4x32xf32> -> vector<4x64xf32>
    %cst_321 = arith.constant dense<0.000000e+00> : vector<4x32xf32>
    %941 = tpu.matmul %940, %0, %cst_321 {dimension_numbers = #tpu.dot_dimension_numbers<[1], [0], [0], [1], [0, 0, 1, 1], [], []>} : vector<4x64xf32>, vector<64x32xf32>, vector<4x32xf32> -> vector<4x32xf32>
    %942 = arith.addf %941, %6 : vector<4x32xf32>
    %943 = arith.negf %942 : vector<4x32xf32>
    %944 = math.exp %943 : vector<4x32xf32>
    %cst_322 = arith.constant 1.000000e+00 : f32
    %945 = vector.broadcast %cst_322 : f32 to vector<4x32xf32>
    %946 = arith.addf %945, %944 : vector<4x32xf32>
    %947 = arith.divf %945, %946 : vector<4x32xf32>
    %cst_323 = arith.constant dense<0.000000e+00> : vector<4x32xf32>
    %948 = tpu.matmul %940, %1, %cst_323 {dimension_numbers = #tpu.dot_dimension_numbers<[1], [0], [0], [1], [0, 0, 1, 1], [], []>} : vector<4x64xf32>, vector<64x32xf32>, vector<4x32xf32> -> vector<4x32xf32>
    %949 = arith.addf %948, %9 : vector<4x32xf32>
    %950 = arith.negf %949 : vector<4x32xf32>
    %951 = math.exp %950 : vector<4x32xf32>
    %cst_324 = arith.constant 1.000000e+00 : f32
    %952 = vector.broadcast %cst_324 : f32 to vector<4x32xf32>
    %953 = arith.addf %952, %951 : vector<4x32xf32>
    %954 = arith.divf %952, %953 : vector<4x32xf32>
    %cst_325 = arith.constant dense<0.000000e+00> : vector<4x32xf32>
    %955 = tpu.matmul %939, %2, %cst_325 {dimension_numbers = #tpu.dot_dimension_numbers<[1], [0], [0], [1], [0, 0, 1, 1], [], []>} : vector<4x32xf32>, vector<32x32xf32>, vector<4x32xf32> -> vector<4x32xf32>
    %956 = arith.addf %955, %12 : vector<4x32xf32>
    %cst_326 = arith.constant dense<0.000000e+00> : vector<4x32xf32>
    %957 = tpu.matmul %908, %3, %cst_326 {dimension_numbers = #tpu.dot_dimension_numbers<[1], [0], [0], [1], [0, 0, 1, 1], [], []>} : vector<4x32xf32>, vector<32x32xf32>, vector<4x32xf32> -> vector<4x32xf32>
    %958 = arith.addf %957, %15 : vector<4x32xf32>
    %959 = arith.mulf %947, %958 : vector<4x32xf32>
    %960 = arith.addf %956, %959 : vector<4x32xf32>
    %961 = math.tanh %960 : vector<4x32xf32>
    %cst_327 = arith.constant 1.000000e+00 : f32
    %962 = vector.broadcast %cst_327 : f32 to vector<4x32xf32>
    %963 = arith.subf %962, %954 : vector<4x32xf32>
    %964 = arith.mulf %963, %961 : vector<4x32xf32>
    %965 = arith.mulf %954, %908 : vector<4x32xf32>
    %966 = arith.addf %964, %965 : vector<4x32xf32>
    %cst_328 = arith.constant dense<0.000000e+00> : vector<8x32xf32>
    %967 = tpu.matmul %41, %966, %cst_328 {dimension_numbers = #tpu.dot_dimension_numbers<[1], [0], [0], [1], [0, 0, 1, 1], [], []>} : vector<8x4xf32>, vector<4x32xf32>, vector<8x32xf32> -> vector<8x32xf32>
    %968 = arith.addf %938, %967 : vector<8x32xf32>
    %cst_329 = arith.constant dense<0.000000e+00> : vector<4x32xf32>
    %969 = tpu.matmul %35, %937, %cst_329 {dimension_numbers = #tpu.dot_dimension_numbers<[1], [0], [0], [1], [0, 0, 1, 1], [], []>} : vector<4x8xf32>, vector<8x32xf32>, vector<4x32xf32> -> vector<4x32xf32>
    %970 = tpu.concatenate %969, %966 in 1 : vector<4x32xf32>, vector<4x32xf32> -> vector<4x64xf32>
    %cst_330 = arith.constant dense<0.000000e+00> : vector<4x32xf32>
    %971 = tpu.matmul %970, %0, %cst_330 {dimension_numbers = #tpu.dot_dimension_numbers<[1], [0], [0], [1], [0, 0, 1, 1], [], []>} : vector<4x64xf32>, vector<64x32xf32>, vector<4x32xf32> -> vector<4x32xf32>
    %972 = arith.addf %971, %6 : vector<4x32xf32>
    %973 = arith.negf %972 : vector<4x32xf32>
    %974 = math.exp %973 : vector<4x32xf32>
    %cst_331 = arith.constant 1.000000e+00 : f32
    %975 = vector.broadcast %cst_331 : f32 to vector<4x32xf32>
    %976 = arith.addf %975, %974 : vector<4x32xf32>
    %977 = arith.divf %975, %976 : vector<4x32xf32>
    %cst_332 = arith.constant dense<0.000000e+00> : vector<4x32xf32>
    %978 = tpu.matmul %970, %1, %cst_332 {dimension_numbers = #tpu.dot_dimension_numbers<[1], [0], [0], [1], [0, 0, 1, 1], [], []>} : vector<4x64xf32>, vector<64x32xf32>, vector<4x32xf32> -> vector<4x32xf32>
    %979 = arith.addf %978, %9 : vector<4x32xf32>
    %980 = arith.negf %979 : vector<4x32xf32>
    %981 = math.exp %980 : vector<4x32xf32>
    %cst_333 = arith.constant 1.000000e+00 : f32
    %982 = vector.broadcast %cst_333 : f32 to vector<4x32xf32>
    %983 = arith.addf %982, %981 : vector<4x32xf32>
    %984 = arith.divf %982, %983 : vector<4x32xf32>
    %cst_334 = arith.constant dense<0.000000e+00> : vector<4x32xf32>
    %985 = tpu.matmul %969, %2, %cst_334 {dimension_numbers = #tpu.dot_dimension_numbers<[1], [0], [0], [1], [0, 0, 1, 1], [], []>} : vector<4x32xf32>, vector<32x32xf32>, vector<4x32xf32> -> vector<4x32xf32>
    %986 = arith.addf %985, %12 : vector<4x32xf32>
    %cst_335 = arith.constant dense<0.000000e+00> : vector<4x32xf32>
    %987 = tpu.matmul %966, %3, %cst_335 {dimension_numbers = #tpu.dot_dimension_numbers<[1], [0], [0], [1], [0, 0, 1, 1], [], []>} : vector<4x32xf32>, vector<32x32xf32>, vector<4x32xf32> -> vector<4x32xf32>
    %988 = arith.addf %987, %15 : vector<4x32xf32>
    %989 = arith.mulf %977, %988 : vector<4x32xf32>
    %990 = arith.addf %986, %989 : vector<4x32xf32>
    %991 = math.tanh %990 : vector<4x32xf32>
    %cst_336 = arith.constant 1.000000e+00 : f32
    %992 = vector.broadcast %cst_336 : f32 to vector<4x32xf32>
    %993 = arith.subf %992, %984 : vector<4x32xf32>
    %994 = arith.mulf %993, %991 : vector<4x32xf32>
    %995 = arith.mulf %984, %966 : vector<4x32xf32>
    %996 = arith.addf %994, %995 : vector<4x32xf32>
    %cst_337 = arith.constant dense<0.000000e+00> : vector<8x32xf32>
    %997 = tpu.matmul %43, %996, %cst_337 {dimension_numbers = #tpu.dot_dimension_numbers<[1], [0], [0], [1], [0, 0, 1, 1], [], []>} : vector<8x4xf32>, vector<4x32xf32>, vector<8x32xf32> -> vector<8x32xf32>
    %998 = arith.addf %968, %997 : vector<8x32xf32>
    %cst_338 = arith.constant dense<0.000000e+00> : vector<4x32xf32>
    %999 = tpu.matmul %37, %937, %cst_338 {dimension_numbers = #tpu.dot_dimension_numbers<[1], [0], [0], [1], [0, 0, 1, 1], [], []>} : vector<4x8xf32>, vector<8x32xf32>, vector<4x32xf32> -> vector<4x32xf32>
    %1000 = tpu.concatenate %999, %996 in 1 : vector<4x32xf32>, vector<4x32xf32> -> vector<4x64xf32>
    %cst_339 = arith.constant dense<0.000000e+00> : vector<4x32xf32>
    %1001 = tpu.matmul %1000, %0, %cst_339 {dimension_numbers = #tpu.dot_dimension_numbers<[1], [0], [0], [1], [0, 0, 1, 1], [], []>} : vector<4x64xf32>, vector<64x32xf32>, vector<4x32xf32> -> vector<4x32xf32>
    %1002 = arith.addf %1001, %6 : vector<4x32xf32>
    %1003 = arith.negf %1002 : vector<4x32xf32>
    %1004 = math.exp %1003 : vector<4x32xf32>
    %cst_340 = arith.constant 1.000000e+00 : f32
    %1005 = vector.broadcast %cst_340 : f32 to vector<4x32xf32>
    %1006 = arith.addf %1005, %1004 : vector<4x32xf32>
    %1007 = arith.divf %1005, %1006 : vector<4x32xf32>
    %cst_341 = arith.constant dense<0.000000e+00> : vector<4x32xf32>
    %1008 = tpu.matmul %1000, %1, %cst_341 {dimension_numbers = #tpu.dot_dimension_numbers<[1], [0], [0], [1], [0, 0, 1, 1], [], []>} : vector<4x64xf32>, vector<64x32xf32>, vector<4x32xf32> -> vector<4x32xf32>
    %1009 = arith.addf %1008, %9 : vector<4x32xf32>
    %1010 = arith.negf %1009 : vector<4x32xf32>
    %1011 = math.exp %1010 : vector<4x32xf32>
    %cst_342 = arith.constant 1.000000e+00 : f32
    %1012 = vector.broadcast %cst_342 : f32 to vector<4x32xf32>
    %1013 = arith.addf %1012, %1011 : vector<4x32xf32>
    %1014 = arith.divf %1012, %1013 : vector<4x32xf32>
    %cst_343 = arith.constant dense<0.000000e+00> : vector<4x32xf32>
    %1015 = tpu.matmul %999, %2, %cst_343 {dimension_numbers = #tpu.dot_dimension_numbers<[1], [0], [0], [1], [0, 0, 1, 1], [], []>} : vector<4x32xf32>, vector<32x32xf32>, vector<4x32xf32> -> vector<4x32xf32>
    %1016 = arith.addf %1015, %12 : vector<4x32xf32>
    %cst_344 = arith.constant dense<0.000000e+00> : vector<4x32xf32>
    %1017 = tpu.matmul %996, %3, %cst_344 {dimension_numbers = #tpu.dot_dimension_numbers<[1], [0], [0], [1], [0, 0, 1, 1], [], []>} : vector<4x32xf32>, vector<32x32xf32>, vector<4x32xf32> -> vector<4x32xf32>
    %1018 = arith.addf %1017, %15 : vector<4x32xf32>
    %1019 = arith.mulf %1007, %1018 : vector<4x32xf32>
    %1020 = arith.addf %1016, %1019 : vector<4x32xf32>
    %1021 = math.tanh %1020 : vector<4x32xf32>
    %cst_345 = arith.constant 1.000000e+00 : f32
    %1022 = vector.broadcast %cst_345 : f32 to vector<4x32xf32>
    %1023 = arith.subf %1022, %1014 : vector<4x32xf32>
    %1024 = arith.mulf %1023, %1021 : vector<4x32xf32>
    %1025 = arith.mulf %1014, %996 : vector<4x32xf32>
    %1026 = arith.addf %1024, %1025 : vector<4x32xf32>
    %cst_346 = arith.constant dense<0.000000e+00> : vector<8x32xf32>
    %1027 = tpu.matmul %45, %1026, %cst_346 {dimension_numbers = #tpu.dot_dimension_numbers<[1], [0], [0], [1], [0, 0, 1, 1], [], []>} : vector<8x4xf32>, vector<4x32xf32>, vector<8x32xf32> -> vector<8x32xf32>
    %1028 = arith.addf %998, %1027 : vector<8x32xf32>
    %cst_347 = arith.constant dense<0.000000e+00> : vector<4x32xf32>
    %1029 = tpu.matmul %39, %937, %cst_347 {dimension_numbers = #tpu.dot_dimension_numbers<[1], [0], [0], [1], [0, 0, 1, 1], [], []>} : vector<4x8xf32>, vector<8x32xf32>, vector<4x32xf32> -> vector<4x32xf32>
    %1030 = tpu.concatenate %1029, %1026 in 1 : vector<4x32xf32>, vector<4x32xf32> -> vector<4x64xf32>
    %cst_348 = arith.constant dense<0.000000e+00> : vector<4x32xf32>
    %1031 = tpu.matmul %1030, %0, %cst_348 {dimension_numbers = #tpu.dot_dimension_numbers<[1], [0], [0], [1], [0, 0, 1, 1], [], []>} : vector<4x64xf32>, vector<64x32xf32>, vector<4x32xf32> -> vector<4x32xf32>
    %1032 = arith.addf %1031, %6 : vector<4x32xf32>
    %1033 = arith.negf %1032 : vector<4x32xf32>
    %1034 = math.exp %1033 : vector<4x32xf32>
    %cst_349 = arith.constant 1.000000e+00 : f32
    %1035 = vector.broadcast %cst_349 : f32 to vector<4x32xf32>
    %1036 = arith.addf %1035, %1034 : vector<4x32xf32>
    %1037 = arith.divf %1035, %1036 : vector<4x32xf32>
    %cst_350 = arith.constant dense<0.000000e+00> : vector<4x32xf32>
    %1038 = tpu.matmul %1030, %1, %cst_350 {dimension_numbers = #tpu.dot_dimension_numbers<[1], [0], [0], [1], [0, 0, 1, 1], [], []>} : vector<4x64xf32>, vector<64x32xf32>, vector<4x32xf32> -> vector<4x32xf32>
    %1039 = arith.addf %1038, %9 : vector<4x32xf32>
    %1040 = arith.negf %1039 : vector<4x32xf32>
    %1041 = math.exp %1040 : vector<4x32xf32>
    %cst_351 = arith.constant 1.000000e+00 : f32
    %1042 = vector.broadcast %cst_351 : f32 to vector<4x32xf32>
    %1043 = arith.addf %1042, %1041 : vector<4x32xf32>
    %1044 = arith.divf %1042, %1043 : vector<4x32xf32>
    %cst_352 = arith.constant dense<0.000000e+00> : vector<4x32xf32>
    %1045 = tpu.matmul %1029, %2, %cst_352 {dimension_numbers = #tpu.dot_dimension_numbers<[1], [0], [0], [1], [0, 0, 1, 1], [], []>} : vector<4x32xf32>, vector<32x32xf32>, vector<4x32xf32> -> vector<4x32xf32>
    %1046 = arith.addf %1045, %12 : vector<4x32xf32>
    %cst_353 = arith.constant dense<0.000000e+00> : vector<4x32xf32>
    %1047 = tpu.matmul %1026, %3, %cst_353 {dimension_numbers = #tpu.dot_dimension_numbers<[1], [0], [0], [1], [0, 0, 1, 1], [], []>} : vector<4x32xf32>, vector<32x32xf32>, vector<4x32xf32> -> vector<4x32xf32>
    %1048 = arith.addf %1047, %15 : vector<4x32xf32>
    %1049 = arith.mulf %1037, %1048 : vector<4x32xf32>
    %1050 = arith.addf %1046, %1049 : vector<4x32xf32>
    %1051 = math.tanh %1050 : vector<4x32xf32>
    %cst_354 = arith.constant 1.000000e+00 : f32
    %1052 = vector.broadcast %cst_354 : f32 to vector<4x32xf32>
    %1053 = arith.subf %1052, %1044 : vector<4x32xf32>
    %1054 = arith.mulf %1053, %1051 : vector<4x32xf32>
    %1055 = arith.mulf %1044, %1026 : vector<4x32xf32>
    %1056 = arith.addf %1054, %1055 : vector<4x32xf32>
    %cst_355 = arith.constant dense<0.000000e+00> : vector<8x32xf32>
    %1057 = tpu.matmul %47, %1056, %cst_355 {dimension_numbers = #tpu.dot_dimension_numbers<[1], [0], [0], [1], [0, 0, 1, 1], [], []>} : vector<8x4xf32>, vector<4x32xf32>, vector<8x32xf32> -> vector<8x32xf32>
    %1058 = arith.addf %1028, %1057 : vector<8x32xf32>
    %1059 = tpu.concatenate %1058, %937 in 1 : vector<8x32xf32>, vector<8x32xf32> -> vector<8x64xf32>
    %cst_356 = arith.constant dense<0.000000e+00> : vector<8x32xf32>
    %1060 = tpu.matmul %1059, %16, %cst_356 {dimension_numbers = #tpu.dot_dimension_numbers<[1], [0], [0], [1], [0, 0, 1, 1], [], []>} : vector<8x64xf32>, vector<64x32xf32>, vector<8x32xf32> -> vector<8x32xf32>
    %1061 = arith.addf %1060, %22 : vector<8x32xf32>
    %1062 = arith.negf %1061 : vector<8x32xf32>
    %1063 = math.exp %1062 : vector<8x32xf32>
    %cst_357 = arith.constant 1.000000e+00 : f32
    %1064 = vector.broadcast %cst_357 : f32 to vector<8x32xf32>
    %1065 = arith.addf %1064, %1063 : vector<8x32xf32>
    %1066 = arith.divf %1064, %1065 : vector<8x32xf32>
    %cst_358 = arith.constant dense<0.000000e+00> : vector<8x32xf32>
    %1067 = tpu.matmul %1059, %17, %cst_358 {dimension_numbers = #tpu.dot_dimension_numbers<[1], [0], [0], [1], [0, 0, 1, 1], [], []>} : vector<8x64xf32>, vector<64x32xf32>, vector<8x32xf32> -> vector<8x32xf32>
    %1068 = arith.addf %1067, %25 : vector<8x32xf32>
    %1069 = arith.negf %1068 : vector<8x32xf32>
    %1070 = math.exp %1069 : vector<8x32xf32>
    %cst_359 = arith.constant 1.000000e+00 : f32
    %1071 = vector.broadcast %cst_359 : f32 to vector<8x32xf32>
    %1072 = arith.addf %1071, %1070 : vector<8x32xf32>
    %1073 = arith.divf %1071, %1072 : vector<8x32xf32>
    %cst_360 = arith.constant dense<0.000000e+00> : vector<8x32xf32>
    %1074 = tpu.matmul %1058, %18, %cst_360 {dimension_numbers = #tpu.dot_dimension_numbers<[1], [0], [0], [1], [0, 0, 1, 1], [], []>} : vector<8x32xf32>, vector<32x32xf32>, vector<8x32xf32> -> vector<8x32xf32>
    %1075 = arith.addf %1074, %28 : vector<8x32xf32>
    %cst_361 = arith.constant dense<0.000000e+00> : vector<8x32xf32>
    %1076 = tpu.matmul %937, %19, %cst_361 {dimension_numbers = #tpu.dot_dimension_numbers<[1], [0], [0], [1], [0, 0, 1, 1], [], []>} : vector<8x32xf32>, vector<32x32xf32>, vector<8x32xf32> -> vector<8x32xf32>
    %1077 = arith.addf %1076, %31 : vector<8x32xf32>
    %1078 = arith.mulf %1066, %1077 : vector<8x32xf32>
    %1079 = arith.addf %1075, %1078 : vector<8x32xf32>
    %1080 = math.tanh %1079 : vector<8x32xf32>
    %cst_362 = arith.constant 1.000000e+00 : f32
    %1081 = vector.broadcast %cst_362 : f32 to vector<8x32xf32>
    %1082 = arith.subf %1081, %1073 : vector<8x32xf32>
    %1083 = arith.mulf %1082, %1080 : vector<8x32xf32>
    %1084 = arith.mulf %1073, %937 : vector<8x32xf32>
    %1085 = arith.addf %1083, %1084 : vector<8x32xf32>
    %cst_363 = arith.constant dense<0.000000e+00> : vector<4x32xf32>
    %1086 = tpu.matmul %33, %1085, %cst_363 {dimension_numbers = #tpu.dot_dimension_numbers<[1], [0], [0], [1], [0, 0, 1, 1], [], []>} : vector<4x8xf32>, vector<8x32xf32>, vector<4x32xf32> -> vector<4x32xf32>
    %1087 = tpu.concatenate %1086, %1056 in 1 : vector<4x32xf32>, vector<4x32xf32> -> vector<4x64xf32>
    %cst_364 = arith.constant dense<0.000000e+00> : vector<4x32xf32>
    %1088 = tpu.matmul %1087, %0, %cst_364 {dimension_numbers = #tpu.dot_dimension_numbers<[1], [0], [0], [1], [0, 0, 1, 1], [], []>} : vector<4x64xf32>, vector<64x32xf32>, vector<4x32xf32> -> vector<4x32xf32>
    %1089 = arith.addf %1088, %6 : vector<4x32xf32>
    %1090 = arith.negf %1089 : vector<4x32xf32>
    %1091 = math.exp %1090 : vector<4x32xf32>
    %cst_365 = arith.constant 1.000000e+00 : f32
    %1092 = vector.broadcast %cst_365 : f32 to vector<4x32xf32>
    %1093 = arith.addf %1092, %1091 : vector<4x32xf32>
    %1094 = arith.divf %1092, %1093 : vector<4x32xf32>
    %cst_366 = arith.constant dense<0.000000e+00> : vector<4x32xf32>
    %1095 = tpu.matmul %1087, %1, %cst_366 {dimension_numbers = #tpu.dot_dimension_numbers<[1], [0], [0], [1], [0, 0, 1, 1], [], []>} : vector<4x64xf32>, vector<64x32xf32>, vector<4x32xf32> -> vector<4x32xf32>
    %1096 = arith.addf %1095, %9 : vector<4x32xf32>
    %1097 = arith.negf %1096 : vector<4x32xf32>
    %1098 = math.exp %1097 : vector<4x32xf32>
    %cst_367 = arith.constant 1.000000e+00 : f32
    %1099 = vector.broadcast %cst_367 : f32 to vector<4x32xf32>
    %1100 = arith.addf %1099, %1098 : vector<4x32xf32>
    %1101 = arith.divf %1099, %1100 : vector<4x32xf32>
    %cst_368 = arith.constant dense<0.000000e+00> : vector<4x32xf32>
    %1102 = tpu.matmul %1086, %2, %cst_368 {dimension_numbers = #tpu.dot_dimension_numbers<[1], [0], [0], [1], [0, 0, 1, 1], [], []>} : vector<4x32xf32>, vector<32x32xf32>, vector<4x32xf32> -> vector<4x32xf32>
    %1103 = arith.addf %1102, %12 : vector<4x32xf32>
    %cst_369 = arith.constant dense<0.000000e+00> : vector<4x32xf32>
    %1104 = tpu.matmul %1056, %3, %cst_369 {dimension_numbers = #tpu.dot_dimension_numbers<[1], [0], [0], [1], [0, 0, 1, 1], [], []>} : vector<4x32xf32>, vector<32x32xf32>, vector<4x32xf32> -> vector<4x32xf32>
    %1105 = arith.addf %1104, %15 : vector<4x32xf32>
    %1106 = arith.mulf %1094, %1105 : vector<4x32xf32>
    %1107 = arith.addf %1103, %1106 : vector<4x32xf32>
    %1108 = math.tanh %1107 : vector<4x32xf32>
    %cst_370 = arith.constant 1.000000e+00 : f32
    %1109 = vector.broadcast %cst_370 : f32 to vector<4x32xf32>
    %1110 = arith.subf %1109, %1101 : vector<4x32xf32>
    %1111 = arith.mulf %1110, %1108 : vector<4x32xf32>
    %1112 = arith.mulf %1101, %1056 : vector<4x32xf32>
    %1113 = arith.addf %1111, %1112 : vector<4x32xf32>
    %cst_371 = arith.constant dense<0.000000e+00> : vector<4x32xf32>
    %1114 = tpu.matmul %35, %1085, %cst_371 {dimension_numbers = #tpu.dot_dimension_numbers<[1], [0], [0], [1], [0, 0, 1, 1], [], []>} : vector<4x8xf32>, vector<8x32xf32>, vector<4x32xf32> -> vector<4x32xf32>
    %1115 = tpu.concatenate %1114, %1113 in 1 : vector<4x32xf32>, vector<4x32xf32> -> vector<4x64xf32>
    %cst_372 = arith.constant dense<0.000000e+00> : vector<4x32xf32>
    %1116 = tpu.matmul %1115, %0, %cst_372 {dimension_numbers = #tpu.dot_dimension_numbers<[1], [0], [0], [1], [0, 0, 1, 1], [], []>} : vector<4x64xf32>, vector<64x32xf32>, vector<4x32xf32> -> vector<4x32xf32>
    %1117 = arith.addf %1116, %6 : vector<4x32xf32>
    %1118 = arith.negf %1117 : vector<4x32xf32>
    %1119 = math.exp %1118 : vector<4x32xf32>
    %cst_373 = arith.constant 1.000000e+00 : f32
    %1120 = vector.broadcast %cst_373 : f32 to vector<4x32xf32>
    %1121 = arith.addf %1120, %1119 : vector<4x32xf32>
    %1122 = arith.divf %1120, %1121 : vector<4x32xf32>
    %cst_374 = arith.constant dense<0.000000e+00> : vector<4x32xf32>
    %1123 = tpu.matmul %1115, %1, %cst_374 {dimension_numbers = #tpu.dot_dimension_numbers<[1], [0], [0], [1], [0, 0, 1, 1], [], []>} : vector<4x64xf32>, vector<64x32xf32>, vector<4x32xf32> -> vector<4x32xf32>
    %1124 = arith.addf %1123, %9 : vector<4x32xf32>
    %1125 = arith.negf %1124 : vector<4x32xf32>
    %1126 = math.exp %1125 : vector<4x32xf32>
    %cst_375 = arith.constant 1.000000e+00 : f32
    %1127 = vector.broadcast %cst_375 : f32 to vector<4x32xf32>
    %1128 = arith.addf %1127, %1126 : vector<4x32xf32>
    %1129 = arith.divf %1127, %1128 : vector<4x32xf32>
    %cst_376 = arith.constant dense<0.000000e+00> : vector<4x32xf32>
    %1130 = tpu.matmul %1114, %2, %cst_376 {dimension_numbers = #tpu.dot_dimension_numbers<[1], [0], [0], [1], [0, 0, 1, 1], [], []>} : vector<4x32xf32>, vector<32x32xf32>, vector<4x32xf32> -> vector<4x32xf32>
    %1131 = arith.addf %1130, %12 : vector<4x32xf32>
    %cst_377 = arith.constant dense<0.000000e+00> : vector<4x32xf32>
    %1132 = tpu.matmul %1113, %3, %cst_377 {dimension_numbers = #tpu.dot_dimension_numbers<[1], [0], [0], [1], [0, 0, 1, 1], [], []>} : vector<4x32xf32>, vector<32x32xf32>, vector<4x32xf32> -> vector<4x32xf32>
    %1133 = arith.addf %1132, %15 : vector<4x32xf32>
    %1134 = arith.mulf %1122, %1133 : vector<4x32xf32>
    %1135 = arith.addf %1131, %1134 : vector<4x32xf32>
    %1136 = math.tanh %1135 : vector<4x32xf32>
    %cst_378 = arith.constant 1.000000e+00 : f32
    %1137 = vector.broadcast %cst_378 : f32 to vector<4x32xf32>
    %1138 = arith.subf %1137, %1129 : vector<4x32xf32>
    %1139 = arith.mulf %1138, %1136 : vector<4x32xf32>
    %1140 = arith.mulf %1129, %1113 : vector<4x32xf32>
    %1141 = arith.addf %1139, %1140 : vector<4x32xf32>
    %cst_379 = arith.constant dense<0.000000e+00> : vector<4x32xf32>
    %1142 = tpu.matmul %37, %1085, %cst_379 {dimension_numbers = #tpu.dot_dimension_numbers<[1], [0], [0], [1], [0, 0, 1, 1], [], []>} : vector<4x8xf32>, vector<8x32xf32>, vector<4x32xf32> -> vector<4x32xf32>
    %1143 = tpu.concatenate %1142, %1141 in 1 : vector<4x32xf32>, vector<4x32xf32> -> vector<4x64xf32>
    %cst_380 = arith.constant dense<0.000000e+00> : vector<4x32xf32>
    %1144 = tpu.matmul %1143, %0, %cst_380 {dimension_numbers = #tpu.dot_dimension_numbers<[1], [0], [0], [1], [0, 0, 1, 1], [], []>} : vector<4x64xf32>, vector<64x32xf32>, vector<4x32xf32> -> vector<4x32xf32>
    %1145 = arith.addf %1144, %6 : vector<4x32xf32>
    %1146 = arith.negf %1145 : vector<4x32xf32>
    %1147 = math.exp %1146 : vector<4x32xf32>
    %cst_381 = arith.constant 1.000000e+00 : f32
    %1148 = vector.broadcast %cst_381 : f32 to vector<4x32xf32>
    %1149 = arith.addf %1148, %1147 : vector<4x32xf32>
    %1150 = arith.divf %1148, %1149 : vector<4x32xf32>
    %cst_382 = arith.constant dense<0.000000e+00> : vector<4x32xf32>
    %1151 = tpu.matmul %1143, %1, %cst_382 {dimension_numbers = #tpu.dot_dimension_numbers<[1], [0], [0], [1], [0, 0, 1, 1], [], []>} : vector<4x64xf32>, vector<64x32xf32>, vector<4x32xf32> -> vector<4x32xf32>
    %1152 = arith.addf %1151, %9 : vector<4x32xf32>
    %1153 = arith.negf %1152 : vector<4x32xf32>
    %1154 = math.exp %1153 : vector<4x32xf32>
    %cst_383 = arith.constant 1.000000e+00 : f32
    %1155 = vector.broadcast %cst_383 : f32 to vector<4x32xf32>
    %1156 = arith.addf %1155, %1154 : vector<4x32xf32>
    %1157 = arith.divf %1155, %1156 : vector<4x32xf32>
    %cst_384 = arith.constant dense<0.000000e+00> : vector<4x32xf32>
    %1158 = tpu.matmul %1142, %2, %cst_384 {dimension_numbers = #tpu.dot_dimension_numbers<[1], [0], [0], [1], [0, 0, 1, 1], [], []>} : vector<4x32xf32>, vector<32x32xf32>, vector<4x32xf32> -> vector<4x32xf32>
    %1159 = arith.addf %1158, %12 : vector<4x32xf32>
    %cst_385 = arith.constant dense<0.000000e+00> : vector<4x32xf32>
    %1160 = tpu.matmul %1141, %3, %cst_385 {dimension_numbers = #tpu.dot_dimension_numbers<[1], [0], [0], [1], [0, 0, 1, 1], [], []>} : vector<4x32xf32>, vector<32x32xf32>, vector<4x32xf32> -> vector<4x32xf32>
    %1161 = arith.addf %1160, %15 : vector<4x32xf32>
    %1162 = arith.mulf %1150, %1161 : vector<4x32xf32>
    %1163 = arith.addf %1159, %1162 : vector<4x32xf32>
    %1164 = math.tanh %1163 : vector<4x32xf32>
    %cst_386 = arith.constant 1.000000e+00 : f32
    %1165 = vector.broadcast %cst_386 : f32 to vector<4x32xf32>
    %1166 = arith.subf %1165, %1157 : vector<4x32xf32>
    %1167 = arith.mulf %1166, %1164 : vector<4x32xf32>
    %1168 = arith.mulf %1157, %1141 : vector<4x32xf32>
    %1169 = arith.addf %1167, %1168 : vector<4x32xf32>
    %cst_387 = arith.constant dense<0.000000e+00> : vector<4x32xf32>
    %1170 = tpu.matmul %39, %1085, %cst_387 {dimension_numbers = #tpu.dot_dimension_numbers<[1], [0], [0], [1], [0, 0, 1, 1], [], []>} : vector<4x8xf32>, vector<8x32xf32>, vector<4x32xf32> -> vector<4x32xf32>
    %1171 = tpu.concatenate %1170, %1169 in 1 : vector<4x32xf32>, vector<4x32xf32> -> vector<4x64xf32>
    %cst_388 = arith.constant dense<0.000000e+00> : vector<4x32xf32>
    %1172 = tpu.matmul %1171, %0, %cst_388 {dimension_numbers = #tpu.dot_dimension_numbers<[1], [0], [0], [1], [0, 0, 1, 1], [], []>} : vector<4x64xf32>, vector<64x32xf32>, vector<4x32xf32> -> vector<4x32xf32>
    %1173 = arith.addf %1172, %6 : vector<4x32xf32>
    %1174 = arith.negf %1173 : vector<4x32xf32>
    %1175 = math.exp %1174 : vector<4x32xf32>
    %cst_389 = arith.constant 1.000000e+00 : f32
    %1176 = vector.broadcast %cst_389 : f32 to vector<4x32xf32>
    %1177 = arith.addf %1176, %1175 : vector<4x32xf32>
    %1178 = arith.divf %1176, %1177 : vector<4x32xf32>
    %cst_390 = arith.constant dense<0.000000e+00> : vector<4x32xf32>
    %1179 = tpu.matmul %1171, %1, %cst_390 {dimension_numbers = #tpu.dot_dimension_numbers<[1], [0], [0], [1], [0, 0, 1, 1], [], []>} : vector<4x64xf32>, vector<64x32xf32>, vector<4x32xf32> -> vector<4x32xf32>
    %1180 = arith.addf %1179, %9 : vector<4x32xf32>
    %1181 = arith.negf %1180 : vector<4x32xf32>
    %1182 = math.exp %1181 : vector<4x32xf32>
    %cst_391 = arith.constant 1.000000e+00 : f32
    %1183 = vector.broadcast %cst_391 : f32 to vector<4x32xf32>
    %1184 = arith.addf %1183, %1182 : vector<4x32xf32>
    %1185 = arith.divf %1183, %1184 : vector<4x32xf32>
    %cst_392 = arith.constant dense<0.000000e+00> : vector<4x32xf32>
    %1186 = tpu.matmul %1170, %2, %cst_392 {dimension_numbers = #tpu.dot_dimension_numbers<[1], [0], [0], [1], [0, 0, 1, 1], [], []>} : vector<4x32xf32>, vector<32x32xf32>, vector<4x32xf32> -> vector<4x32xf32>
    %1187 = arith.addf %1186, %12 : vector<4x32xf32>
    %cst_393 = arith.constant dense<0.000000e+00> : vector<4x32xf32>
    %1188 = tpu.matmul %1169, %3, %cst_393 {dimension_numbers = #tpu.dot_dimension_numbers<[1], [0], [0], [1], [0, 0, 1, 1], [], []>} : vector<4x32xf32>, vector<32x32xf32>, vector<4x32xf32> -> vector<4x32xf32>
    %1189 = arith.addf %1188, %15 : vector<4x32xf32>
    %1190 = arith.mulf %1178, %1189 : vector<4x32xf32>
    %1191 = arith.addf %1187, %1190 : vector<4x32xf32>
    %1192 = math.tanh %1191 : vector<4x32xf32>
    %cst_394 = arith.constant 1.000000e+00 : f32
    %1193 = vector.broadcast %cst_394 : f32 to vector<4x32xf32>
    %1194 = arith.subf %1193, %1185 : vector<4x32xf32>
    %1195 = arith.mulf %1194, %1192 : vector<4x32xf32>
    %1196 = arith.mulf %1185, %1169 : vector<4x32xf32>
    %1197 = arith.addf %1195, %1196 : vector<4x32xf32>
    %c0_395 = arith.constant 0 : index
    %c0_396 = arith.constant 0 : index
    %1198 = vector.load %arg20[%c0_395, %c0_396] : memref<32x8xf32, #tpu.memory_space<vmem>>, vector<32x8xf32>
    %cst_397 = arith.constant dense<0.000000e+00> : vector<4x8xf32>
    %1199 = tpu.matmul %1197, %1198, %cst_397 {dimension_numbers = #tpu.dot_dimension_numbers<[1], [0], [0], [1], [0, 0, 1, 1], [], []>} : vector<4x32xf32>, vector<32x8xf32>, vector<4x8xf32> -> vector<4x8xf32>
    %c0_398 = arith.constant 0 : index
    %c0_399 = arith.constant 0 : index
    %1200 = vector.load %arg21[%c0_398, %c0_399] : memref<1x8xf32, #tpu.memory_space<vmem>>, vector<1x8xf32>
    %1201 = vector.broadcast %1200 : vector<1x8xf32> to vector<4x8xf32>
    %1202 = arith.addf %1199, %1201 : vector<4x8xf32>
    %cst_400 = arith.constant 0.000000e+00 : f32
    %1203 = vector.broadcast %cst_400 : f32 to vector<4x8xf32>
    %1204 = arith.maximumf %1202, %1203 : vector<4x8xf32>
    %c0_401 = arith.constant 0 : index
    %c0_402 = arith.constant 0 : index
    %1205 = vector.load %arg22[%c0_401, %c0_402] : memref<8x8xf32, #tpu.memory_space<vmem>>, vector<8x8xf32>
    %cst_403 = arith.constant dense<0.000000e+00> : vector<4x8xf32>
    %1206 = tpu.matmul %1204, %1205, %cst_403 {dimension_numbers = #tpu.dot_dimension_numbers<[1], [0], [0], [1], [0, 0, 1, 1], [], []>} : vector<4x8xf32>, vector<8x8xf32>, vector<4x8xf32> -> vector<4x8xf32>
    %c0_404 = arith.constant 0 : index
    %c0_405 = arith.constant 0 : index
    %1207 = vector.load %arg23[%c0_404, %c0_405] : memref<1x8xf32, #tpu.memory_space<vmem>>, vector<1x8xf32>
    %1208 = vector.broadcast %1207 : vector<1x8xf32> to vector<4x8xf32>
    %1209 = arith.addf %1206, %1208 : vector<4x8xf32>
    %cst_406 = arith.constant 0.000000e+00 : f32
    %1210 = vector.broadcast %cst_406 : f32 to vector<4x8xf32>
    %1211 = arith.maximumf %1209, %1210 : vector<4x8xf32>
    %c0_407 = arith.constant 0 : index
    %c0_408 = arith.constant 0 : index
    %1212 = vector.load %arg24[%c0_407, %c0_408] : memref<8x128xf32, #tpu.memory_space<vmem>>, vector<8x128xf32>
    %cst_409 = arith.constant dense<0.000000e+00> : vector<4x128xf32>
    %1213 = tpu.matmul %1211, %1212, %cst_409 {dimension_numbers = #tpu.dot_dimension_numbers<[1], [0], [0], [1], [0, 0, 1, 1], [], []>} : vector<4x8xf32>, vector<8x128xf32>, vector<4x128xf32> -> vector<4x128xf32>
    %c0_410 = arith.constant 0 : index
    %c0_411 = arith.constant 0 : index
    %1214 = vector.load %arg25[%c0_410, %c0_411] : memref<1x128xf32, #tpu.memory_space<vmem>>, vector<1x128xf32>
    %1215 = vector.broadcast %1214 : vector<1x128xf32> to vector<4x128xf32>
    %1216 = arith.addf %1213, %1215 : vector<4x128xf32>
    %c0_412 = arith.constant 0 : index
    %c0_413 = arith.constant 0 : index
    %1217 = vector.load %arg26[%c0_412, %c0_413] : memref<4x128xf32, #tpu.memory_space<vmem>>, vector<4x128xf32>
    tpu.vector_store %arg26[%c0_412, %c0_413], %1216 {strides = array<i32>} : memref<4x128xf32, #tpu.memory_space<vmem>>, vector<4x128xf32>,
    return
  }
}

</mosaic_0001>

<bundles_post_ra>
// kernel: route_net_forward.1
= control target key start
LH: loop header
LB: loop body
LE: loop exit
PB: predicated region body
PF: predicated region fallthrough
CT: control target
= control target key end

     0   :  { %vm203_vm0 = vcmask 64512   ;;  %v23049_v0 = vmov 0.0   ;;  %vm23050_vm1 = vmmov 0   ;;  %s23051_s30 = smov 32   ;;  %v23052_v7 = vmov 0.0|0.0   ;;  %s25979_s2 = inlined_call_operand.vmem [shape: f32[8,32], index: 2, kind: input, shape index: {}]   ;;  %s25980_s0 = inlined_call_operand.vmem [shape: f32[4,4,8], index: 0, kind: input, shape index: {}]   ;;  %s25981_s3 = inlined_call_operand.vmem [shape: f32[4,32], index: 3, kind: input, shape index: {}]   ;;  %s25982_s4 = inlined_call_operand.vmem [shape: f32[64,32], index: 4, kind: input, shape index: {}]   ;;  %s25983_s5 = inlined_call_operand.vmem [shape: f32[64,32], index: 5, kind: input, shape index: {}]   ;;  %s25984_s6 = inlined_call_operand.vmem [shape: f32[32,32], index: 6, kind: input, shape index: {}]   ;;  %s25985_s7 = inlined_call_operand.vmem [shape: f32[32,32], index: 7, kind: input, shape index: {}]   ;;  %s25986_s8 = inlined_call_operand.vmem [shape: f32[1,32], index: 8, kind: input, shape index: {}]   ;;  %s25987_s9 = inlined_call_operand.vmem [shape: f32[1,32], index: 9, kind: input, shape index: {}]   ;;  %s25988_s11 = inlined_call_operand.vmem [shape: f32[1,32], index: 11, kind: input, shape index: {}]   ;;  %s25989_s10 = inlined_call_operand.vmem [shape: f32[1,32], index: 10, kind: input, shape index: {}]   ;;  %s25990_s1 = inlined_call_operand.vmem [shape: f32[4,8,4], index: 1, kind: input, shape index: {}]   ;;  %s25991_s12 = inlined_call_operand.vmem [shape: f32[64,32], index: 12, kind: input, shape index: {}]   ;;  %s25992_s13 = inlined_call_operand.vmem [shape: f32[64,32], index: 13, kind: input, shape index: {}]   ;;  %s25993_s14 = inlined_call_operand.vmem [shape: f32[32,32], index: 14, kind: input, shape index: {}]   ;;  %s25994_s15 = inlined_call_operand.vmem [shape: f32[32,32], index: 15, kind: input, shape index: {}]   ;;  %s25995_s16 = inlined_call_operand.vmem [shape: f32[1,32], index: 16, kind: input, shape index: {}]   ;;  %s25996_s17 = inlined_call_operand.vmem [shape: f32[1,32], index: 17, kind: input, shape index: {}]   ;;  %s25997_s19 = inlined_call_operand.vmem [shape: f32[1,32], index: 19, kind: input, shape index: {}]   ;;  %s25998_s18 = inlined_call_operand.vmem [shape: f32[1,32], index: 18, kind: input, shape index: {}]   ;;  %s25999_s20 = inlined_call_operand.vmem [shape: f32[32,8], index: 20, kind: input, shape index: {}]   ;;  %s26000_s22 = inlined_call_operand.vmem [shape: f32[8,8], index: 22, kind: input, shape index: {}]   ;;  %s26001_s21 = inlined_call_operand.vmem [shape: f32[1,8], index: 21, kind: input, shape index: {}]   ;;  %s26002_s24 = inlined_call_operand.vmem [shape: f32[8,128], index: 24, kind: input, shape index: {}]   ;;  %s26003_s23 = inlined_call_operand.vmem [shape: f32[1,8], index: 23, kind: input, shape index: {}]   ;;  %s26004_s25 = inlined_call_operand.vmem [shape: f32[1,128], index: 25, kind: input, shape index: {}]   ;;  %s26005_s26 = inlined_call_operand.vmem [shape: f32[4,128], index: 26, kind: output, shape index: {}]  }
   0x1   :  { %26015 = sst [smem:[#allocation2_spill]] %s25979_s2  ;;  %18486 = vmatprep.subr.mxu0 %v23049_v0  ;;  %18488 = vmatprep.mubr.msk.f32.mxu0 %vm23050_vm1, %v23049_v0  ;;  %vm281_vm2 = vcmask 261120   ;;  %vm283_vm3 = vcmask 523264   ;;  %vm980_vm4 = vcmask 1043456   ;;  %vm976_vm5 = vcmask 31744  }
   0x2   :  { %26016 = sst [smem:[#allocation3_spill]] %s25980_s0  ;;  %21147 = vmatprep.subr.bf16.mxu1 %v23052_v7  ;;  %18507 = vmatprep.mubr.msk.f32.mxu1 %vm23050_vm1, %v23049_v0 }
   0x3   :  { %26017 = sst [smem:[#allocation4_spill]] %s25981_s3 }
   0x4   :  { %26018 = sst [smem:[#allocation5_spill]] %s25982_s4 }
   0x5   :  { %26019 = sst [smem:[#allocation6_spill]] %s25983_s5  ;;  %s26027_s5 = sld [smem:[#allocation3_spill]] }
   0x6   :  { %26020 = sst [smem:[#allocation7_spill]] %s25984_s6 }
   0x7   :  { %26021 = sst [smem:[#allocation8_spill]] %s25985_s7 }
   0x8   :  { %26022 = sst [smem:[#allocation9_spill]] %s25986_s8  ;;  %s26026_s8 = sld [smem:[#allocation2_spill]] }
   0x9   :  { %26023 = sst [smem:[#allocation10_spill]] %s25987_s9  ;;  %s26032_s27 = sld [smem:[#allocation8_spill]] }
   0xa   :  { %26024 = sst [smem:[#allocation11_spill]] %s25988_s11  ;;  %s26028_s11 = sld [smem:[#allocation4_spill]] }
   0xb   :  { %26025 = sst [smem:[#allocation12_spill]] %s25989_s10  ;;  %v23199_v2 = vld [vmem:[%s26027_s5] sm:$0xf]  ;;  %s26029_s10 = sld [smem:[#allocation5_spill]]  ;;  %v23351_v45 = vld [vmem:[%s26027_s5 + $0x4] sm:$0xf] }
   0xc   :  { %s26033_s28 = sld [smem:[#allocation9_spill]]  ;;  %s26034_s2 = sld [smem:[#allocation10_spill]] }
   0xd   :  { %s26035_s3 = sld [smem:[#allocation11_spill]] }
   0xe   :  { %v23192_v1 = vld [vmem:[%s26026_s8] sm:$0xff]  ;;  %s26030_s8 = sld [smem:[#allocation6_spill]] }
   0xf   :  { %18487 = vmatpush3.msra.mxu0 %v23192_v1  ;;  %v103_v31 = vld [vmem:[%s26032_s27] sm:$0xff]  ;;  %v104_v32 = vld [vmem:[%s26032_s27 + $0x8] sm:$0xff]  ;;  %v105_v41 = vld [vmem:[%s26032_s27 + $0x10] sm:$0xff] }
  0x10   :  { %v23204_v3 = vld [vmem:[%s26028_s11] sm:$0xf]  ;;  %18489 = vmatmul.mubr.msk.f32.vlgmr.msra.gmra.mrb[0].mxu0 %vm203_vm0, %v23199_v2  ;;  %21159 = vmatprep.subr.bf16.mxu0 %v23052_v7  ;;  %s26031_s11 = sld [smem:[#allocation7_spill]]  ;;  %v23317_v38 = vpack.c.bf16 %v104_v32, %v103_v31  ;;  %v106_v42 = vld [vmem:[%s26032_s27 + $0x18] sm:$0xff] }
  0x11   :  { %278 = vrot.lane.b32.xlu0 %v23204_v3, %s23051_s30  ;;  %v83_v4 = vld [vmem:[%s26029_s10] sm:$0xff]  ;;  %v84_v5 = vld [vmem:[%s26029_s10 + $0x8] sm:$0xff]  ;;  %v85_v10 = vld [vmem:[%s26029_s10 + $0x10] sm:$0xff]  ;;  %18526 = vmatprep.mubr.msk.f32.mxu0 %vm23050_vm1, %v23049_v0  ;;  %v23335_v44 = vpack.c.bf16 %v106_v42, %v105_v41 }
  0x12   :  { %v23221_v8 = vpack.c.bf16 %v84_v5, %v83_v4  ;;  %v86_v11 = vld [vmem:[%s26029_s10 + $0x18] sm:$0xff]  ;;  %v87_v17 = vld [vmem:[%s26029_s10 + $0x20] sm:$0xff]  ;;  %v88_v18 = vld [vmem:[%s26029_s10 + $0x28] sm:$0xff] }
  0x13   :  { %v23244_v15 = vpack.c.bf16 %v86_v11, %v85_v10  ;;  %v23266_v21 = vpack.c.bf16 %v88_v18, %v87_v17  ;;  %v89_v23 = vld [vmem:[%s26029_s10 + $0x30] sm:$0xff]  ;;  %v90_v24 = vld [vmem:[%s26029_s10 + $0x38] sm:$0xff]  ;;  %v23381_v46 = vld [vmem:[%s26033_s28] ss:$0 sm:$0xff] }
  0x14   :  { %v91_v6 = vld [vmem:[%s26030_s8] sm:$0xff]  ;;  %v92_v9 = vld [vmem:[%s26030_s8 + $0x8] sm:$0xff]  ;;  %v93_v13 = vld [vmem:[%s26030_s8 + $0x10] sm:$0xff]  ;;  %21149 = vmatpush3.bf16.msra.mxu1 %v23221_v8  ;;  %v23286_v27 = vpack.c.bf16 %v90_v24, %v89_v23 }
  0x15   :  { %v23233_v12 = vpack.c.bf16 %v92_v9, %v91_v6  ;;  %v94_v14 = vld [vmem:[%s26030_s8 + $0x18] sm:$0xff]  ;;  %21150 = vmatprep.subr.bf16.mxu1 %v23052_v7  ;;  %v95_v19 = vld [vmem:[%s26030_s8 + $0x20] sm:$0xff]  ;;  %v96_v20 = vld [vmem:[%s26030_s8 + $0x28] sm:$0xff] }
  0x16   :  { %v23250_v16 = vpack.c.bf16 %v94_v14, %v93_v13  ;;  %v23270_v22 = vpack.c.bf16 %v96_v20, %v95_v19  ;;  %v97_v25 = vld [vmem:[%s26030_s8 + $0x30] sm:$0xff]  ;;  %v98_v26 = vld [vmem:[%s26030_s8 + $0x38] sm:$0xff]  ;;  %v99_v29 = vld [vmem:[%s26031_s11] sm:$0xff] }
  0x17   :  { %21161 = vmatpush3.bf16.msra.mxu0 %v23233_v12  ;;  %v23290_v28 = vpack.c.bf16 %v98_v26, %v97_v25  ;;  %v100_v30 = vld [vmem:[%s26031_s11 + $0x8] sm:$0xff]  ;;  %v101_v36 = vld [vmem:[%s26031_s11 + $0x10] sm:$0xff]  ;;  %v102_v37 = vld [vmem:[%s26031_s11 + $0x18] sm:$0xff]  ;;  %s26036_s11 = sld [smem:[#allocation12_spill]] }
  0x18   :  { %21162 = vmatprep.subr.bf16.mxu0 %v23052_v7  ;;  %21152 = vmatpush3.bf16.msra.mxu1 %v23244_v15  ;;  %v23309_v34 = vpack.c.bf16 %v100_v30, %v99_v29  ;;  %v23329_v43 = vpack.c.bf16 %v102_v37, %v101_v36  ;;  %v23387_v50 = vld [vmem:[%s26034_s2] ss:$0 sm:$0xff] }
  0x19   :  { %21153 = vmatprep.subr.bf16.mxu1 %v23052_v7  ;;  %v23393_v5 = vld [vmem:[%s26035_s3] ss:$0 sm:$0xff] }
  0x1b   :  { %21164 = vmatpush3.bf16.msra.mxu0 %v23250_v16 }
  0x1c   :  { %21165 = vmatprep.subr.bf16.mxu0 %v23052_v7  ;;  %21155 = vmatpush3.bf16.msra.mxu1 %v23266_v21 }
  0x1d   :  { %21156 = vmatprep.subr.bf16.mxu1 %v23052_v7  ;;  %v23399_v10 = vld [vmem:[%s26036_s11] ss:$0 sm:$0xff] }
  0x1f   :  { %21167 = vmatpush3.bf16.msra.mxu0 %v23270_v22 }
  0x20   :  { %21168 = vmatprep.subr.bf16.mxu0 %v23052_v7  ;;  %21158 = vmatpush3.bf16.msra.mxu1 %v23286_v27 }
  0x21   :  { %21171 = vmatprep.subr.bf16.mxu1 %v23052_v7 }
  0x23   :  { %21170 = vmatpush3.bf16.msra.mxu0 %v23290_v28 }
  0x24   :  { %21177 = vmatprep.subr.bf16.mxu0 %v23052_v7 }
  0x83   :  { %v279_v33 = vpop.permute.xlu0 %278 }
  0xe3   :  { %v273_v35 = vpop.f32.mrb[0].mxu0 }
  0xe4   :  { %v282_v39 = vsel %vm281_vm2, %v273_v35, %v279_v33  ;;  %v18490_v40 = vpop.f32.mrb[1].mxu0 }
  0xe5   :  { %18508 = vmatmul.mubr.msk.f32.vlgmr.msra.gmra.mrb[0].mxu1 %vm283_vm3, %v282_v39  ;;  %18527 = vmatmul.mubr.msk.f32.vlgmr.msra.gmra.mrb[2].mxu0 %vm283_vm3, %v282_v39 }
  0xe6   :  { %21173 = vmatpush3.bf16.msra.mxu1 %v23309_v34  ;;  %18537 = vmatprep.mubr.msk.f32.mxu1 %vm23050_vm1, %v23049_v0 }
  0xe7   :  { %21174 = vmatprep.subr.bf16.mxu1 %v23052_v7  ;;  %21179 = vmatpush3.bf16.msra.mxu0 %v23317_v38 }
  0xe8   :  { %21180 = vmatprep.subr.bf16.mxu0 %v23052_v7  ;;  %18548 = vmatprep.mubr.msk.f32.mxu0 %vm23050_vm1, %v23049_v0 }
  0xea   :  { %21176 = vmatpush3.bf16.msra.mxu1 %v23329_v43 }
  0xeb   :  { %21182 = vmatpush3.bf16.msra.mxu0 %v23335_v44  ;;  %18551 = vmatprep.subr.mxu1 %v23049_v0 }
  0xec   :  { %21183 = vmatprep.subr.bf16.mxu0 %v23052_v7 }
  0xed   :  { %18538 = vmatmul.mubr.msk.f32.vlgmr.msra.gmra.mrb[2].mxu1 %vm281_vm2, %v273_v35 }
  0xee   :  { %18549 = vmatmul.mubr.msk.f32.vlgmr.msra.gmra.mrb[4].mxu0 %vm281_vm2, %v23204_v3  ;;  %18552 = vmatpush3.msra.mxu1 %v23192_v1 }
  0xef   :  { %18553 = vmatprep.mubr.msk.f32.mxu1 %vm23050_vm1, %v23049_v0  ;;  %21195 = vmatprep.subr.bf16.mxu1 %v23052_v7 }
  0xf0   :  { %21185 = vmatpush3.bf16.msra.mxu0 %v23221_v8  ;;  %18572 = vmatprep.mubr.msk.f32.mxu0 %vm23050_vm1, %v23049_v0 }
  0xf1   :  { %18554 = vmatmul.mubr.msk.f32.vlgmr.msra.gmra.mrb[4].mxu1 %vm203_vm0, %v23351_v45  ;;  %21186 = vmatprep.subr.bf16.mxu0 %v23052_v7 }
  0xf2   :  { %21197 = vmatpush3.bf16.msra.mxu1 %v23233_v12  ;;  %18591 = vmatprep.mubr.msk.f32.mxu1 %vm23050_vm1, %v23049_v0 }
  0xf3   :  { %21198 = vmatprep.subr.bf16.mxu1 %v23052_v7 }
  0xf4   :  { %21188 = vmatpush3.bf16.msra.mxu0 %v23244_v15 }
  0xf5   :  { %21189 = vmatprep.subr.bf16.mxu0 %v23052_v7 }
  0xf6   :  { %21200 = vmatpush3.bf16.msra.mxu1 %v23250_v16 }
  0xf7   :  { %21201 = vmatprep.subr.bf16.mxu1 %v23052_v7 }
  0xf8   :  { %21191 = vmatpush3.bf16.msra.mxu0 %v23266_v21 }
  0xf9   :  { %21192 = vmatprep.subr.bf16.mxu0 %v23052_v7 }
  0xfa   :  { %21203 = vmatpush3.bf16.msra.mxu1 %v23270_v22 }
  0xfb   :  { %21204 = vmatprep.subr.bf16.mxu1 %v23052_v7 }
  0xfc   :  { %21194 = vmatpush3.bf16.msra.mxu0 %v23286_v27 }
  0xfd   :  { %21207 = vmatprep.subr.bf16.mxu0 %v23052_v7 }
  0xfe   :  { %21206 = vmatpush3.bf16.msra.mxu1 %v23290_v28 }
  0xff   :  { %21213 = vmatprep.subr.bf16.mxu1 %v23052_v7 }
 0x1b8   :  { %v353_v47 = vpop.f32.mrb[0].mxu1  ;;  %v429_v48 = vpop.f32.mrb[2].mxu0 }
 0x1b9   :  { %v354_v49 = vadd.f32 %v23381_v46, %v353_v47  ;;  %v18509_v51 = vpop.f32.mrb[1].mxu1  ;;  %v18528_v52 = vpop.f32.mrb[3].mxu0  ;;  %v430_v54 = vadd.f32 %v23387_v50, %v429_v48 }
 0x1bb   :  { %v16939_v53 = vmul.f32 -1.442695, %v354_v49  ;;  %v16941_v55 = vmul.f32 -1.442695, %v430_v54 }
 0x1bd   :  { %22603 = vpow2.f32 %v16939_v53 }
 0x1be   :  { %22605 = vpow2.f32 %v16941_v55 }
 0x1c0   :  { %v508_v56 = vpop.f32.mrb[2].mxu1 }
 0x1c1   :  { %v18539_v57 = vpop.f32.mrb[3].mxu1  ;;  %v580_v58 = vpop.f32.mrb[4].mxu0  ;;  %v509_v13 = vadd.f32 %v23399_v10, %v508_v56 }
 0x1c2   :  { %v18550_v59 = vpop.f32.mrb[5].mxu0  ;;  %v581_v9 = vadd.f32 %v23393_v5, %v580_v58 }
 0x1c4   :  { %v660_v60 = vpop.f32.mrb[4].mxu1 }
 0x1c5   :  { %v18555_v61 = vpop.f32.mrb[5].mxu1 }
 0x1c7   :  { %v22604_v62 = vpop.eup %22603 }
 0x1c8   :  { %v360_v63 = vadd.f32 1.0, %v22604_v62  ;;  %v22606_v4 = vpop.eup %22605 }
 0x1c9   :  { %v436_v6 = vadd.f32 1.0, %v22606_v4 }
 0x1ca   :  { %22607 = vrcp.f32 %v360_v63 }
 0x1cb   :  { %22609 = vrcp.f32 %v436_v6 }
 0x1d4   :  { %v22608_v11 = vpop.eup %22607 }
 0x1d5   :  { %v584_v14 = vmul.f32 %v22608_v11, %v581_v9  ;;  %v22610_v18 = vpop.eup %22609  ;;  %v23460_v9 = vld [vmem:[%s25990_s1 + $0x8] sm:$0xff]  ;;  %v23477_v11 = vld [vmem:[%s25990_s1] sm:$0xff] }
 0x1d6   :  { %v587_v19 = vsub.f32 1.0, %v22610_v18  ;;  %v589_v24 = vmul.f32 %v22610_v18, %v23204_v3  ;;  %v23433_v3 = vld [vmem:[%s26027_s5 + $0x8] sm:$0xf] }
 0x1d7   :  { %v585_v17 = vadd.f32 %v584_v14, %v509_v13 }
 0x1d9   :  { %22611 = vtanh.f32 %v585_v17  ;;  %v23515_v17 = vld [vmem:[%s26027_s5 + $0xc] sm:$0xf] }
 0x1e3   :  { %v22612_v20 = vpop.eup %22611 }
 0x1e4   :  { %v588_v23 = vmul.f32 %v22612_v20, %v587_v19 }
 0x1e6   :  { %v23403_v25 = vadd.f32 %v589_v24, %v588_v23 }
 0x1e8   :  { %665 = vrot.lane.b32.xlu0 %v23403_v25, %s23051_s30 }
 0x1ec   :  { %2052 = vrot.lane.b32.xlu0 %v23192_v1, %s23051_s30 }
 0x25a   :  { %v666_v26 = vpop.permute.xlu0 %665 }
 0x25b   :  { %v668_v29 = vsel %vm281_vm2, %v660_v60, %v666_v26 }
 0x25c   :  { %18573 = vmatmul.mubr.msk.f32.vlgmr.msra.gmra.mrb[6].mxu0 %vm283_vm3, %v668_v29  ;;  %18592 = vmatmul.mubr.msk.f32.vlgmr.msra.gmra.mrb[6].mxu1 %vm283_vm3, %v668_v29 }
 0x25d   :  { %21209 = vmatpush3.bf16.msra.mxu0 %v23309_v34  ;;  %21215 = vmatpush3.bf16.msra.mxu1 %v23317_v38 }
 0x25e   :  { %21210 = vmatprep.subr.bf16.mxu0 %v23052_v7  ;;  %21216 = vmatprep.subr.bf16.mxu1 %v23052_v7 }
 0x25f   :  { %18602 = vmatprep.mubr.msk.f32.mxu0 %vm23050_vm1, %v23049_v0  ;;  %18613 = vmatprep.mubr.msk.f32.mxu1 %vm23050_vm1, %v23049_v0 }
 0x261   :  { %21212 = vmatpush3.bf16.msra.mxu0 %v23329_v43  ;;  %21218 = vmatpush3.bf16.msra.mxu1 %v23335_v44 }
 0x262   :  { %18626 = vmatprep.subr.mxu1 %v23049_v0  ;;  %18616 = vmatprep.subr.mxu0 %v23049_v0 }
 0x264   :  { %18603 = vmatmul.mubr.msk.f32.vlgmr.msra.gmra.mrb[8].mxu0 %vm281_vm2, %v660_v60  ;;  %18614 = vmatmul.mubr.msk.f32.vlgmr.msra.gmra.mrb[8].mxu1 %vm281_vm2, %v23403_v25 }
 0x265   :  { %18627 = vmatpush3.msra.mxu1 %v23192_v1  ;;  %18628 = vmatprep.mubr.msk.f32.mxu1 %vm23050_vm1, %v23049_v0 }
 0x266   :  { %18618 = vmatprep.mubr.msk.f32.mxu0 %vm23050_vm1, %v23049_v0  ;;  %21219 = vmatprep.subr.bf16.mxu1 %v23052_v7 }
 0x268   :  { %18629 = vmatmul.mubr.msk.f32.vlgmr.msra.gmra.mrb[10].mxu1 %vm203_vm0, %v23433_v3 }
 0x269   :  { %21221 = vmatpush3.bf16.msra.mxu1 %v23221_v8  ;;  %18647 = vmatprep.mubr.msk.f32.mxu1 %vm23050_vm1, %v23049_v0 }
 0x26a   :  { %21222 = vmatprep.subr.bf16.mxu1 %v23052_v7 }
 0x26d   :  { %21224 = vmatpush3.bf16.msra.mxu1 %v23244_v15 }
 0x26e   :  { %21225 = vmatprep.subr.bf16.mxu1 %v23052_v7 }
 0x271   :  { %21227 = vmatpush3.bf16.msra.mxu1 %v23266_v21 }
 0x272   :  { %21228 = vmatprep.subr.bf16.mxu1 %v23052_v7 }
 0x275   :  { %21230 = vmatpush3.bf16.msra.mxu1 %v23286_v27 }
 0x276   :  { %21243 = vmatprep.subr.bf16.mxu1 %v23052_v7 }
 0x32f   :  { %v738_v30 = vpop.f32.mrb[6].mxu0  ;;  %v814_v31 = vpop.f32.mrb[6].mxu1 }
 0x330   :  { %v739_v32 = vadd.f32 %v23381_v46, %v738_v30  ;;  %v18574_v33 = vpop.f32.mrb[7].mxu0  ;;  %v18593_v35 = vpop.f32.mrb[7].mxu1  ;;  %v815_v37 = vadd.f32 %v23387_v50, %v814_v31 }
 0x332   :  { %v16946_v36 = vmul.f32 -1.442695, %v739_v32  ;;  %v16948_v39 = vmul.f32 -1.442695, %v815_v37 }
 0x334   :  { %22613 = vpow2.f32 %v16946_v36 }
 0x335   :  { %22615 = vpow2.f32 %v16948_v39 }
 0x337   :  { %v893_v40 = vpop.f32.mrb[8].mxu0  ;;  %v965_v41 = vpop.f32.mrb[8].mxu1 }
 0x338   :  { %v18604_v42 = vpop.f32.mrb[9].mxu0  ;;  %v18615_v47 = vpop.f32.mrb[9].mxu1  ;;  %v966_v55 = vadd.f32 %v23393_v5, %v965_v41  ;;  %v894_v57 = vadd.f32 %v23399_v10, %v893_v40 }
 0x33b   :  { %v1198_v48 = vpop.f32.mrb[10].mxu1 }
 0x33c   :  { %v18630_v49 = vpop.f32.mrb[11].mxu1 }
 0x33e   :  { %v22614_v51 = vpop.eup %22613 }
 0x33f   :  { %v745_v52 = vadd.f32 1.0, %v22614_v51  ;;  %v22616_v53 = vpop.eup %22615 }
 0x340   :  { %v821_v54 = vadd.f32 1.0, %v22616_v53 }
 0x341   :  { %22617 = vrcp.f32 %v745_v52 }
 0x342   :  { %22619 = vrcp.f32 %v821_v54 }
 0x34b   :  { %v22618_v56 = vpop.eup %22617 }
 0x34c   :  { %v969_v58 = vmul.f32 %v22618_v56, %v966_v55  ;;  %v22620_v60 = vpop.eup %22619 }
 0x34d   :  { %v972_v61 = vsub.f32 1.0, %v22620_v60  ;;  %v974_v4 = vmul.f32 %v22620_v60, %v23403_v25 }
 0x34e   :  { %v970_v59 = vadd.f32 %v969_v58, %v894_v57  ;;  %v23542_v58 = vld [vmem:[%s25990_s1 + $0x10] sm:$0xff] }
 0x350   :  { %22621 = vtanh.f32 %v970_v59 }
 0x35a   :  { %v22622_v62 = vpop.eup %22621 }
 0x35b   :  { %v973_v63 = vmul.f32 %v22622_v62, %v972_v61 }
 0x35d   :  { %v23455_v6 = vadd.f32 %v974_v4, %v973_v63 }
 0x35f   :  { %1202 = vrot.lane.b32.xlu1 %v23455_v6, %s23051_s30  ;;  %18617 = vmatpush3.msk.msra.mxu0 %vm980_vm4, %v23455_v6 }
 0x360   :  { %18621 = vmatprep.subr.mxu0 %v23049_v0  ;;  %18619 = vmatmul.mubr.msk.f32.vlgmr.msra.gmra.mrb[10].mxu0 %vm976_vm5, %v23460_v9 }
 0x361   :  { %18622 = vmatpush3.msk.msra.mxu0 %vm980_vm4, %v23403_v25  ;;  %18623 = vmatprep.mubr.msk.f32.mxu0 %vm23050_vm1, %v23049_v0 }
 0x362   :  { %21231 = vmatprep.subr.bf16.mxu0 %v23052_v7 }
 0x368   :  { %18624 = vmatmul.mubr.msk.f32.vlgmr.msra.gmra.mrb[10].mxu0 %vm976_vm5, %v23477_v11 }
 0x369   :  { %21233 = vmatpush3.bf16.msra.mxu0 %v23233_v12  ;;  %18666 = vmatprep.mubr.msk.f32.mxu0 %vm23050_vm1, %v23049_v0 }
 0x36a   :  { %21234 = vmatprep.subr.bf16.mxu0 %v23052_v7 }
 0x36d   :  { %21236 = vmatpush3.bf16.msra.mxu0 %v23250_v16 }
 0x36e   :  { %21237 = vmatprep.subr.bf16.mxu0 %v23052_v7 }
 0x371   :  { %21239 = vmatpush3.bf16.msra.mxu0 %v23270_v22 }
 0x372   :  { %21240 = vmatprep.subr.bf16.mxu0 %v23052_v7 }
 0x375   :  { %21242 = vmatpush3.bf16.msra.mxu0 %v23290_v28 }
 0x376   :  { %21249 = vmatprep.subr.bf16.mxu0 %v23052_v7 }
 0x3d1   :  { %v1203_v13 = vpop.permute.xlu1 %1202 }
 0x3d2   :  { %v1205_v14 = vsel %vm281_vm2, %v1198_v48, %v1203_v13 }
 0x3d3   :  { %18648 = vmatmul.mubr.msk.f32.vlgmr.msra.gmra.mrb[12].mxu1 %vm283_vm3, %v1205_v14  ;;  %18667 = vmatmul.mubr.msk.f32.vlgmr.msra.gmra.mrb[12].mxu0 %vm283_vm3, %v1205_v14 }
 0x3d4   :  { %21245 = vmatpush3.bf16.msra.mxu1 %v23309_v34  ;;  %21251 = vmatpush3.bf16.msra.mxu0 %v23317_v38 }
 0x3d5   :  { %21246 = vmatprep.subr.bf16.mxu1 %v23052_v7  ;;  %21252 = vmatprep.subr.bf16.mxu0 %v23052_v7 }
 0x3d6   :  { %18677 = vmatprep.mubr.msk.f32.mxu1 %vm23050_vm1, %v23049_v0  ;;  %18688 = vmatprep.mubr.msk.f32.mxu0 %vm23050_vm1, %v23049_v0 }
 0x3d8   :  { %21248 = vmatpush3.bf16.msra.mxu1 %v23329_v43  ;;  %21254 = vmatpush3.bf16.msra.mxu0 %v23335_v44 }
 0x3d9   :  { %18696 = vmatprep.subr.mxu1 %v23049_v0  ;;  %18691 = vmatprep.subr.mxu0 %v23049_v0 }
 0x3db   :  { %18678 = vmatmul.mubr.msk.f32.vlgmr.msra.gmra.mrb[14].mxu1 %vm281_vm2, %v1198_v48  ;;  %18689 = vmatmul.mubr.msk.f32.vlgmr.msra.gmra.mrb[14].mxu0 %vm281_vm2, %v23455_v6 }
 0x3dc   :  { %18697 = vmatpush3.msra.mxu1 %v23192_v1  ;;  %18698 = vmatprep.mubr.msk.f32.mxu1 %vm23050_vm1, %v23049_v0 }
 0x3dd   :  { %18693 = vmatprep.mubr.msk.f32.mxu0 %vm23050_vm1, %v23049_v0  ;;  %21255 = vmatprep.subr.bf16.mxu1 %v23052_v7 }
 0x3df   :  { %18699 = vmatmul.mubr.msk.f32.vlgmr.msra.gmra.mrb[16].mxu1 %vm203_vm0, %v23515_v17 }
 0x3e0   :  { %21257 = vmatpush3.bf16.msra.mxu1 %v23221_v8  ;;  %18717 = vmatprep.mubr.msk.f32.mxu1 %vm23050_vm1, %v23049_v0 }
 0x3e1   :  { %21258 = vmatprep.subr.bf16.mxu1 %v23052_v7 }
 0x3e4   :  { %21260 = vmatpush3.bf16.msra.mxu1 %v23244_v15 }
 0x3e5   :  { %21261 = vmatprep.subr.bf16.mxu1 %v23052_v7 }
 0x3e8   :  { %21263 = vmatpush3.bf16.msra.mxu1 %v23266_v21 }
 0x3e9   :  { %21264 = vmatprep.subr.bf16.mxu1 %v23052_v7 }
 0x3ec   :  { %21266 = vmatpush3.bf16.msra.mxu1 %v23286_v27 }
 0x3ed   :  { %21279 = vmatprep.subr.bf16.mxu1 %v23052_v7 }
 0x4a6   :  { %v1275_v18 = vpop.f32.mrb[12].mxu1  ;;  %v1351_v19 = vpop.f32.mrb[12].mxu0 }
 0x4a7   :  { %v1276_v20 = vadd.f32 %v23381_v46, %v1275_v18  ;;  %v18649_v23 = vpop.f32.mrb[13].mxu1  ;;  %v18668_v24 = vpop.f32.mrb[13].mxu0  ;;  %v1352_v26 = vadd.f32 %v23387_v50, %v1351_v19 }
 0x4a9   :  { %v16957_v25 = vmul.f32 -1.442695, %v1276_v20  ;;  %v16959_v29 = vmul.f32 -1.442695, %v1352_v26 }
 0x4ab   :  { %22623 = vpow2.f32 %v16957_v25 }
 0x4ac   :  { %22625 = vpow2.f32 %v16959_v29 }
 0x4ae   :  { %v1430_v30 = vpop.f32.mrb[14].mxu1  ;;  %v1502_v31 = vpop.f32.mrb[14].mxu0 }
 0x4af   :  { %v18679_v32 = vpop.f32.mrb[15].mxu1  ;;  %v18690_v33 = vpop.f32.mrb[15].mxu0  ;;  %v1503_v42 = vadd.f32 %v23393_v5, %v1502_v31  ;;  %v1431_v48 = vadd.f32 %v23399_v10, %v1430_v30 }
 0x4b2   :  { %v1659_v35 = vpop.f32.mrb[16].mxu1 }
 0x4b3   :  { %v18700_v36 = vpop.f32.mrb[17].mxu1 }
 0x4b5   :  { %v22624_v37 = vpop.eup %22623 }
 0x4b6   :  { %v1282_v39 = vadd.f32 1.0, %v22624_v37  ;;  %v22626_v40 = vpop.eup %22625  ;;  %v135_v37 = vld [vmem:[%s25991_s12] sm:$0xff] }
 0x4b7   :  { %v1358_v41 = vadd.f32 1.0, %v22626_v40 }
 0x4b8   :  { %22627 = vrcp.f32 %v1282_v39  ;;  %v136_v39 = vld [vmem:[%s25991_s12 + $0x8] sm:$0xff] }
 0x4b9   :  { %22629 = vrcp.f32 %v1358_v41  ;;  %v23593_v40 = vpack.c.bf16 %v136_v39, %v135_v37  ;;  %v137_v41 = vld [vmem:[%s25991_s12 + $0x10] sm:$0xff]  ;;  %v154_v39 = vld [vmem:[%s25993_s14 + $0x18] sm:$0xff] }
 0x4ba   :  { %v153_v37 = vld [vmem:[%s25993_s14 + $0x10] sm:$0xff] }
 0x4c2   :  { %v22628_v47 = vpop.eup %22627 }
 0x4c3   :  { %v1506_v49 = vmul.f32 %v22628_v47, %v1503_v42  ;;  %v22630_v52 = vpop.eup %22629  ;;  %v138_v42 = vld [vmem:[%s25991_s12 + $0x18] sm:$0xff] }
 0x4c4   :  { %v1509_v53 = vsub.f32 1.0, %v22630_v52  ;;  %v1511_v56 = vmul.f32 %v22630_v52, %v23455_v6  ;;  %v23602_v47 = vpack.c.bf16 %v138_v42, %v137_v41 }
 0x4c5   :  { %v1507_v51 = vadd.f32 %v1506_v49, %v1431_v48  ;;  %v139_v49 = vld [vmem:[%s25991_s12 + $0x20] sm:$0xff] }
 0x4c7   :  { %22631 = vtanh.f32 %v1507_v51  ;;  %v140_v51 = vld [vmem:[%s25991_s12 + $0x28] sm:$0xff] }
 0x4d1   :  { %v22632_v54 = vpop.eup %22631 }
 0x4d2   :  { %v1510_v55 = vmul.f32 %v22632_v54, %v1509_v53  ;;  %v143_v53 = vld [vmem:[%s25992_s13] sm:$0xff]  ;;  %v23615_v54 = vpack.c.bf16 %v140_v51, %v139_v49  ;;  %v157_v49 = vld [vmem:[%s25994_s15 + $0x10] sm:$0xff]  ;;  %v158_v51 = vld [vmem:[%s25994_s15 + $0x18] sm:$0xff] }
 0x4d4   :  { %v23537_v57 = vadd.f32 %v1511_v56, %v1510_v55  ;;  %v144_v56 = vld [vmem:[%s25992_s13 + $0x8] sm:$0xff] }
 0x4d6   :  { %1663 = vrot.lane.b32.xlu1 %v23537_v57, %s23051_s30  ;;  %18692 = vmatpush3.msk.msra.mxu0 %vm980_vm4, %v23537_v57 }
 0x4d7   :  { %21267 = vmatprep.subr.bf16.mxu0 %v23052_v7  ;;  %18694 = vmatmul.mubr.msk.f32.vlgmr.msra.gmra.mrb[10].mxu0 %vm976_vm5, %v23542_v58 }
 0x4d8   :  { %21269 = vmatpush3.bf16.msra.mxu0 %v23233_v12  ;;  %18736 = vmatprep.mubr.msk.f32.mxu0 %vm23050_vm1, %v23049_v0 }
 0x4d9   :  { %21270 = vmatprep.subr.bf16.mxu0 %v23052_v7 }
 0x4dc   :  { %21272 = vmatpush3.bf16.msra.mxu0 %v23250_v16 }
 0x4dd   :  { %21273 = vmatprep.subr.bf16.mxu0 %v23052_v7 }
 0x4e0   :  { %21275 = vmatpush3.bf16.msra.mxu0 %v23270_v22 }
 0x4e1   :  { %21276 = vmatprep.subr.bf16.mxu0 %v23052_v7 }
 0x4e4   :  { %21278 = vmatpush3.bf16.msra.mxu0 %v23290_v28 }
 0x4e5   :  { %21285 = vmatprep.subr.bf16.mxu0 %v23052_v7 }
 0x548   :  { %v1664_v59 = vpop.permute.xlu1 %1663 }
 0x549   :  { %v1666_v60 = vsel %vm281_vm2, %v1659_v35, %v1664_v59  ;;  %v141_v59 = vld [vmem:[%s25991_s12 + $0x30] sm:$0xff] }
 0x54a   :  { %18718 = vmatmul.mubr.msk.f32.vlgmr.msra.gmra.mrb[18].mxu1 %vm283_vm3, %v1666_v60  ;;  %18737 = vmatmul.mubr.msk.f32.vlgmr.msra.gmra.mrb[16].mxu0 %vm283_vm3, %v1666_v60  ;;  %v142_v60 = vld [vmem:[%s25991_s12 + $0x38] sm:$0xff] }
 0x54b   :  { %21281 = vmatpush3.bf16.msra.mxu1 %v23309_v34  ;;  %21287 = vmatpush3.bf16.msra.mxu0 %v23317_v38 }
 0x54c   :  { %21282 = vmatprep.subr.bf16.mxu1 %v23052_v7  ;;  %21288 = vmatprep.subr.bf16.mxu0 %v23052_v7 }
 0x54d   :  { %18747 = vmatprep.mubr.msk.f32.mxu1 %vm23050_vm1, %v23049_v0  ;;  %18758 = vmatprep.mubr.msk.f32.mxu0 %vm23050_vm1, %v23049_v0 }
 0x54f   :  { %21284 = vmatpush3.bf16.msra.mxu1 %v23329_v43  ;;  %21290 = vmatpush3.bf16.msra.mxu0 %v23335_v44 }
 0x550   :  { %18761 = vmatprep.subr.mxu0 %v23049_v0  ;;  %21291 = vmatprep.subr.bf16.mxu1 %v23052_v7 }
 0x552   :  { %18748 = vmatmul.mubr.msk.f32.vlgmr.msra.gmra.mrb[20].mxu1 %vm281_vm2, %v1659_v35  ;;  %18759 = vmatmul.mubr.msk.f32.vlgmr.msra.gmra.mrb[18].mxu0 %vm281_vm2, %v23537_v57 }
 0x553   :  { %18763 = vmatprep.mubr.msk.f32.mxu0 %vm23050_vm1, %v23049_v0  ;;  %18782 = vmatprep.mubr.msk.f32.mxu1 %vm23050_vm1, %v23049_v0 }
 0x554   :  { %21293 = vmatpush3.bf16.msra.mxu1 %v23593_v40 }
 0x555   :  { %21294 = vmatprep.subr.bf16.mxu1 %v23052_v7 }
 0x558   :  { %21296 = vmatpush3.bf16.msra.mxu1 %v23602_v47 }
 0x559   :  { %21297 = vmatprep.subr.bf16.mxu1 %v23052_v7 }
 0x55c   :  { %21299 = vmatpush3.bf16.msra.mxu1 %v23615_v54 }
 0x55d   :  { %21300 = vmatprep.subr.bf16.mxu1 %v23052_v7 }
 0x61d   :  { %v1736_v61 = vpop.f32.mrb[18].mxu1  ;;  %v1812_v62 = vpop.f32.mrb[16].mxu0 }
 0x61e   :  { %v1737_v63 = vadd.f32 %v23381_v46, %v1736_v61  ;;  %v18719_v4 = vpop.f32.mrb[19].mxu1  ;;  %v18738_v6 = vpop.f32.mrb[17].mxu0  ;;  %v1813_v14 = vadd.f32 %v23387_v50, %v1812_v62 }
 0x61f   :  { %v23633_v4 = vld [vmem:[%s25990_s1 + $0x18] sm:$0xff]  ;;  %v23635_v6 = vpack.c.bf16 %v144_v56, %v143_v53  ;;  %v23722_v53 = vpack.c.bf16 %v158_v51, %v157_v49 }
 0x620   :  { %v16966_v13 = vmul.f32 -1.442695, %v1737_v63  ;;  %v16968_v18 = vmul.f32 -1.442695, %v1813_v14  ;;  %v145_v14 = vld [vmem:[%s25992_s13 + $0x10] sm:$0xff] }
 0x622   :  { %22633 = vpow2.f32 %v16966_v13  ;;  %v23638_v13 = vpack.c.bf16 %v142_v60, %v141_v59 }
 0x623   :  { %22635 = vpow2.f32 %v16968_v18 }
 0x624   :  { %21302 = vmatpush3.bf16.msra.mxu1 %v23638_v13 }
 0x625   :  { %v1891_v19 = vpop.f32.mrb[20].mxu1  ;;  %v1963_v20 = vpop.f32.mrb[18].mxu0  ;;  %21315 = vmatprep.subr.bf16.mxu1 %v23052_v7 }
 0x626   :  { %v18749_v23 = vpop.f32.mrb[21].mxu1  ;;  %v18760_v24 = vpop.f32.mrb[19].mxu0  ;;  %v1964_v31 = vadd.f32 %v23393_v5, %v1963_v20  ;;  %v1892_v33 = vadd.f32 %v23399_v10, %v1891_v19  ;;  %v147_v19 = vld [vmem:[%s25992_s13 + $0x20] sm:$0xff]  ;;  %v148_v20 = vld [vmem:[%s25992_s13 + $0x28] sm:$0xff] }
 0x627   :  { %v23669_v23 = vpack.c.bf16 %v148_v20, %v147_v19  ;;  %v149_v24 = vld [vmem:[%s25992_s13 + $0x30] sm:$0xff] }
 0x62c   :  { %v22634_v25 = vpop.eup %22633 }
 0x62d   :  { %v1743_v26 = vadd.f32 1.0, %v22634_v25  ;;  %v22636_v29 = vpop.eup %22635  ;;  %v150_v25 = vld [vmem:[%s25992_s13 + $0x38] sm:$0xff] }
 0x62e   :  { %v1819_v30 = vadd.f32 1.0, %v22636_v29  ;;  %v151_v29 = vld [vmem:[%s25993_s14] sm:$0xff] }
 0x62f   :  { %22637 = vrcp.f32 %v1743_v26  ;;  %v23679_v26 = vpack.c.bf16 %v150_v25, %v149_v24 }
 0x630   :  { %22639 = vrcp.f32 %v1819_v30  ;;  %v152_v30 = vld [vmem:[%s25993_s14 + $0x8] sm:$0xff] }
 0x639   :  { %v22638_v32 = vpop.eup %22637 }
 0x63a   :  { %v1967_v35 = vmul.f32 %v22638_v32, %v1964_v31  ;;  %v22640_v48 = vpop.eup %22639  ;;  %v155_v31 = vld [vmem:[%s25994_s15] sm:$0xff]  ;;  %v156_v32 = vld [vmem:[%s25994_s15 + $0x8] sm:$0xff] }
 0x63b   :  { %v1970_v52 = vsub.f32 1.0, %v22640_v48  ;;  %v1972_v62 = vmul.f32 %v22640_v48, %v23537_v57  ;;  %v146_v57 = vld [vmem:[%s25992_s13 + $0x18] sm:$0xff]  ;;  %v23704_v41 = vpack.c.bf16 %v156_v32, %v155_v31 }
 0x63c   :  { %v1968_v36 = vadd.f32 %v1967_v35, %v1892_v33  ;;  %v23655_v18 = vpack.c.bf16 %v146_v57, %v145_v14  ;;  %v2053_v33 = vpop.permute.xlu0 %2052  ;;  %v23696_v35 = vpack.c.bf16 %v152_v30, %v151_v29 }
 0x63e   :  { %22641 = vtanh.f32 %v1968_v36 }
 0x648   :  { %v22642_v55 = vpop.eup %22641 }
 0x649   :  { %v1971_v61 = vmul.f32 %v22642_v55, %v1970_v52  ;;  %v23716_v52 = vpack.c.bf16 %v154_v39, %v153_v37  ;;  %v23749_v55 = vld [vmem:[%s25995_s16] ss:$0 sm:$0xff] }
 0x64b   :  { %v23628_v63 = vadd.f32 %v1972_v62, %v1971_v61  ;;  %v23755_v61 = vld [vmem:[%s25996_s17] ss:$0 sm:$0xff] }
 0x64d   :  { %2433 = vrot.lane.b32.xlu1 %v23628_v63, %s23051_s30  ;;  %18762 = vmatpush3.msk.msra.mxu0 %vm980_vm4, %v23628_v63 }
 0x64e   :  { %18764 = vmatmul.mubr.msk.f32.vlgmr.msra.gmra.mrb[10].mxu0 %vm976_vm5, %v23633_v4  ;;  %21303 = vmatprep.subr.bf16.mxu0 %v23052_v7 }
 0x64f   :  { %21305 = vmatpush3.bf16.msra.mxu0 %v23635_v6  ;;  %18801 = vmatprep.mubr.msk.f32.mxu0 %vm23050_vm1, %v23049_v0 }
 0x650   :  { %21306 = vmatprep.subr.bf16.mxu0 %v23052_v7 }
 0x653   :  { %21308 = vmatpush3.bf16.msra.mxu0 %v23655_v18 }
 0x654   :  { %21309 = vmatprep.subr.bf16.mxu0 %v23052_v7 }
 0x657   :  { %21311 = vmatpush3.bf16.msra.mxu0 %v23669_v23 }
 0x658   :  { %21312 = vmatprep.subr.bf16.mxu0 %v23052_v7 }
 0x65b   :  { %21314 = vmatpush3.bf16.msra.mxu0 %v23679_v26 }
 0x65c   :  { %21321 = vmatprep.subr.bf16.mxu0 %v23052_v7 }
 0x721   :  { %v2046_v36 = vpop.f32.mrb[10].mxu0 }
 0x722   :  { %v2055_v42 = vsel %vm281_vm2, %v2046_v36, %v2053_v33  ;;  %v18765_v48 = vpop.f32.mrb[11].mxu0 }
 0x723   :  { %18783 = vmatmul.mubr.msk.f32.vlgmr.msra.gmra.mrb[22].mxu1 %vm283_vm3, %v2055_v42  ;;  %18802 = vmatmul.mubr.msk.f32.vlgmr.msra.gmra.mrb[20].mxu0 %vm283_vm3, %v2055_v42  ;;  %v23767_v42 = vld [vmem:[%s25998_s18] ss:$0 sm:$0xff] }
 0x724   :  { %21317 = vmatpush3.bf16.msra.mxu1 %v23696_v35  ;;  %18812 = vmatprep.mubr.msk.f32.mxu1 %vm23050_vm1, %v23049_v0 }
 0x725   :  { %21318 = vmatprep.subr.bf16.mxu1 %v23052_v7  ;;  %21323 = vmatpush3.bf16.msra.mxu0 %v23704_v41 }
 0x726   :  { %21324 = vmatprep.subr.bf16.mxu0 %v23052_v7  ;;  %18823 = vmatprep.mubr.msk.f32.mxu0 %vm23050_vm1, %v23049_v0 }
 0x728   :  { %21320 = vmatpush3.bf16.msra.mxu1 %v23716_v52 }
 0x729   :  { %21326 = vmatpush3.bf16.msra.mxu0 %v23722_v53  ;;  %18826 = vmatprep.subr.mxu1 %v23049_v0 }
 0x72a   :  { %21339 = vmatprep.subr.bf16.mxu0 %v23052_v7 }
 0x72b   :  { %18813 = vmatmul.mubr.msk.f32.vlgmr.msra.gmra.mrb[24].mxu1 %vm281_vm2, %v2046_v36  ;;  %v23761_v36 = vld [vmem:[%s25997_s19] ss:$0 sm:$0xff] }
 0x72c   :  { %18824 = vmatmul.mubr.msk.f32.vlgmr.msra.gmra.mrb[22].mxu0 %vm281_vm2, %v23192_v1  ;;  %18828 = vmatprep.mubr.msk.f32.mxu1 %vm23050_vm1, %v23049_v0 }
 0x72d   :  { %21341 = vmatpush3.bf16.msra.mxu0 %v23233_v12  ;;  %18866 = vmatprep.mubr.msk.f32.mxu0 %vm23050_vm1, %v23049_v0 }
 0x72e   :  { %21342 = vmatprep.subr.bf16.mxu0 %v23052_v7 }
 0x731   :  { %21344 = vmatpush3.bf16.msra.mxu0 %v23250_v16 }
 0x732   :  { %21345 = vmatprep.subr.bf16.mxu0 %v23052_v7 }
 0x735   :  { %21347 = vmatpush3.bf16.msra.mxu0 %v23270_v22 }
 0x736   :  { %21348 = vmatprep.subr.bf16.mxu0 %v23052_v7 }
 0x739   :  { %21350 = vmatpush3.bf16.msra.mxu0 %v23290_v28 }
 0x73a   :  { %21357 = vmatprep.subr.bf16.mxu0 %v23052_v7 }
 0x7f6   :  { %v2125_v56 = vpop.f32.mrb[22].mxu1  ;;  %v2201_v59 = vpop.f32.mrb[20].mxu0 }
 0x7f7   :  { %v2126_v60 = vadd.f32 %v23749_v55, %v2125_v56  ;;  %v18784_v62 = vpop.f32.mrb[23].mxu1  ;;  %v18803_v14 = vpop.f32.mrb[21].mxu0  ;;  %v2202_v19 = vadd.f32 %v23755_v61, %v2201_v59 }
 0x7f9   :  { %v16974_v57 = vmul.f32 -1.442695, %v2126_v60  ;;  %v16976_v20 = vmul.f32 -1.442695, %v2202_v19 }
 0x7fb   :  { %22643 = vpow2.f32 %v16974_v57 }
 0x7fc   :  { %22645 = vpow2.f32 %v16976_v20 }
 0x7fe   :  { %v2280_v24 = vpop.f32.mrb[24].mxu1 }
 0x7ff   :  { %v18814_v25 = vpop.f32.mrb[25].mxu1  ;;  %v2352_v29 = vpop.f32.mrb[22].mxu0  ;;  %v2281_v49 = vadd.f32 %v23767_v42, %v2280_v24 }
 0x800   :  { %v18825_v30 = vpop.f32.mrb[23].mxu0  ;;  %v2353_v39 = vadd.f32 %v23761_v36, %v2352_v29 }
 0x805   :  { %v22644_v31 = vpop.eup %22643 }
 0x806   :  { %v2132_v32 = vadd.f32 1.0, %v22644_v31  ;;  %v22646_v33 = vpop.eup %22645 }
 0x807   :  { %v2208_v37 = vadd.f32 1.0, %v22646_v33 }
 0x808   :  { %22647 = vrcp.f32 %v2132_v32 }
 0x809   :  { %22649 = vrcp.f32 %v2208_v37 }
 0x812   :  { %v22648_v48 = vpop.eup %22647 }
 0x813   :  { %v2356_v51 = vmul.f32 %v22648_v48, %v2353_v39  ;;  %v22650_v59 = vpop.eup %22649 }
 0x814   :  { %v2359_v60 = vsub.f32 1.0, %v22650_v59  ;;  %v2361_v14 = vmul.f32 %v22650_v59, %v23192_v1  ;;  %v2434_v1 = vpop.permute.xlu1 %2433 }
 0x815   :  { %v2357_v56 = vadd.f32 %v2356_v51, %v2281_v49 }
 0x817   :  { %22651 = vtanh.f32 %v2357_v56 }
 0x821   :  { %v22652_v62 = vpop.eup %22651 }
 0x822   :  { %v2360_v57 = vmul.f32 %v22652_v62, %v2359_v60 }
 0x824   :  { %v23771_v19 = vadd.f32 %v2361_v14, %v2360_v57 }
 0x826   :  { %18827 = vmatpush3.msra.mxu1 %v23771_v19 }
 0x827   :  { %18829 = vmatmul.mubr.msk.f32.vlgmr.msra.gmra.mrb[26].mxu1 %vm203_vm0, %v23199_v2  ;;  %21327 = vmatprep.subr.bf16.mxu1 %v23052_v7 }
 0x828   :  { %21329 = vmatpush3.bf16.msra.mxu1 %v23221_v8  ;;  %18847 = vmatprep.mubr.msk.f32.mxu1 %vm23050_vm1, %v23049_v0 }
 0x829   :  { %21330 = vmatprep.subr.bf16.mxu1 %v23052_v7 }
 0x82c   :  { %21332 = vmatpush3.bf16.msra.mxu1 %v23244_v15 }
 0x82d   :  { %21333 = vmatprep.subr.bf16.mxu1 %v23052_v7 }
 0x830   :  { %21335 = vmatpush3.bf16.msra.mxu1 %v23266_v21 }
 0x831   :  { %21336 = vmatprep.subr.bf16.mxu1 %v23052_v7 }
 0x834   :  { %21338 = vmatpush3.bf16.msra.mxu1 %v23286_v27 }
 0x835   :  { %21351 = vmatprep.subr.bf16.mxu1 %v23052_v7 }
 0x8fa   :  { %v2429_v2 = vpop.f32.mrb[26].mxu1 }
 0x8fb   :  { %v2436_v20 = vsel %vm281_vm2, %v2429_v2, %v2434_v1  ;;  %v18830_v24 = vpop.f32.mrb[27].mxu1 }
 0x8fc   :  { %18848 = vmatmul.mubr.msk.f32.vlgmr.msra.gmra.mrb[28].mxu1 %vm283_vm3, %v2436_v20  ;;  %18867 = vmatmul.mubr.msk.f32.vlgmr.msra.gmra.mrb[24].mxu0 %vm283_vm3, %v2436_v20 }
 0x8fd   :  { %21353 = vmatpush3.bf16.msra.mxu1 %v23309_v34  ;;  %21359 = vmatpush3.bf16.msra.mxu0 %v23317_v38 }
 0x8fe   :  { %21354 = vmatprep.subr.bf16.mxu1 %v23052_v7  ;;  %21360 = vmatprep.subr.bf16.mxu0 %v23052_v7 }
 0x8ff   :  { %18877 = vmatprep.mubr.msk.f32.mxu1 %vm23050_vm1, %v23049_v0  ;;  %18888 = vmatprep.mubr.msk.f32.mxu0 %vm23050_vm1, %v23049_v0 }
 0x901   :  { %21356 = vmatpush3.bf16.msra.mxu1 %v23329_v43  ;;  %21362 = vmatpush3.bf16.msra.mxu0 %v23335_v44 }
 0x902   :  { %18891 = vmatprep.subr.mxu1 %v23049_v0  ;;  %21363 = vmatprep.subr.bf16.mxu0 %v23052_v7 }
 0x904   :  { %18878 = vmatmul.mubr.msk.f32.vlgmr.msra.gmra.mrb[30].mxu1 %vm281_vm2, %v2429_v2  ;;  %18889 = vmatmul.mubr.msk.f32.vlgmr.msra.gmra.mrb[26].mxu0 %vm281_vm2, %v23628_v63 }
 0x905   :  { %18892 = vmatpush3.msra.mxu1 %v23771_v19  ;;  %18893 = vmatprep.mubr.msk.f32.mxu1 %vm23050_vm1, %v23049_v0 }
 0x906   :  { %21375 = vmatprep.subr.bf16.mxu1 %v23052_v7  ;;  %21365 = vmatpush3.bf16.msra.mxu0 %v23221_v8 }
 0x907   :  { %21366 = vmatprep.subr.bf16.mxu0 %v23052_v7  ;;  %18912 = vmatprep.mubr.msk.f32.mxu0 %vm23050_vm1, %v23049_v0 }
 0x908   :  { %18894 = vmatmul.mubr.msk.f32.vlgmr.msra.gmra.mrb[32].mxu1 %vm203_vm0, %v23351_v45 }
 0x909   :  { %21377 = vmatpush3.bf16.msra.mxu1 %v23233_v12  ;;  %18931 = vmatprep.mubr.msk.f32.mxu1 %vm23050_vm1, %v23049_v0 }
 0x90a   :  { %21378 = vmatprep.subr.bf16.mxu1 %v23052_v7  ;;  %21368 = vmatpush3.bf16.msra.mxu0 %v23244_v15 }
 0x90b   :  { %21369 = vmatprep.subr.bf16.mxu0 %v23052_v7 }
 0x90d   :  { %21380 = vmatpush3.bf16.msra.mxu1 %v23250_v16 }
 0x90e   :  { %21381 = vmatprep.subr.bf16.mxu1 %v23052_v7  ;;  %21371 = vmatpush3.bf16.msra.mxu0 %v23266_v21 }
 0x90f   :  { %21372 = vmatprep.subr.bf16.mxu0 %v23052_v7 }
 0x911   :  { %21383 = vmatpush3.bf16.msra.mxu1 %v23270_v22 }
 0x912   :  { %21384 = vmatprep.subr.bf16.mxu1 %v23052_v7  ;;  %21374 = vmatpush3.bf16.msra.mxu0 %v23286_v27 }
 0x913   :  { %21387 = vmatprep.subr.bf16.mxu0 %v23052_v7 }
 0x915   :  { %21386 = vmatpush3.bf16.msra.mxu1 %v23290_v28 }
 0x916   :  { %21393 = vmatprep.subr.bf16.mxu1 %v23052_v7 }
 0x9cf   :  { %v2506_v45 = vpop.f32.mrb[28].mxu1  ;;  %v2582_v25 = vpop.f32.mrb[24].mxu0 }
 0x9d0   :  { %v2507_v29 = vadd.f32 %v23381_v46, %v2506_v45  ;;  %v18849_v30 = vpop.f32.mrb[29].mxu1  ;;  %v18868_v31 = vpop.f32.mrb[25].mxu0  ;;  %v2583_v33 = vadd.f32 %v23387_v50, %v2582_v25 }
 0x9d2   :  { %v16981_v32 = vmul.f32 -1.442695, %v2507_v29  ;;  %v16983_v37 = vmul.f32 -1.442695, %v2583_v33 }
 0x9d4   :  { %22653 = vpow2.f32 %v16981_v32 }
 0x9d5   :  { %22655 = vpow2.f32 %v16983_v37 }
 0x9d7   :  { %v2661_v39 = vpop.f32.mrb[30].mxu1  ;;  %v2733_v48 = vpop.f32.mrb[26].mxu0 }
 0x9d8   :  { %v18879_v49 = vpop.f32.mrb[31].mxu1  ;;  %v18890_v51 = vpop.f32.mrb[27].mxu0  ;;  %v2734_v1 = vadd.f32 %v23393_v5, %v2733_v48  ;;  %v2662_v20 = vadd.f32 %v23399_v10, %v2661_v39 }
 0x9db   :  { %v2810_v56 = vpop.f32.mrb[32].mxu1 }
 0x9dc   :  { %v18895_v59 = vpop.f32.mrb[33].mxu1 }
 0x9de   :  { %v22654_v60 = vpop.eup %22653 }
 0x9df   :  { %v2513_v62 = vadd.f32 1.0, %v22654_v60  ;;  %v22656_v14 = vpop.eup %22655 }
 0x9e0   :  { %v2589_v57 = vadd.f32 1.0, %v22656_v14 }
 0x9e1   :  { %22657 = vrcp.f32 %v2513_v62 }
 0x9e2   :  { %22659 = vrcp.f32 %v2589_v57 }
 0x9eb   :  { %v22658_v2 = vpop.eup %22657 }
 0x9ec   :  { %v2737_v24 = vmul.f32 %v22658_v2, %v2734_v1  ;;  %v22660_v25 = vpop.eup %22659 }
 0x9ed   :  { %v2740_v29 = vsub.f32 1.0, %v22660_v25  ;;  %v2742_v32 = vmul.f32 %v22660_v25, %v23628_v63 }
 0x9ee   :  { %v2738_v45 = vadd.f32 %v2737_v24, %v2662_v20 }
 0x9f0   :  { %22661 = vtanh.f32 %v2738_v45 }
 0x9fa   :  { %v22662_v30 = vpop.eup %22661 }
 0x9fb   :  { %v2741_v31 = vmul.f32 %v22662_v30, %v2740_v29 }
 0x9fd   :  { %v23836_v33 = vadd.f32 %v2742_v32, %v2741_v31 }
 0x9ff   :  { %2815 = vrot.lane.b32.xlu0 %v23836_v33, %s23051_s30 }
 0xa71   :  { %v2816_v37 = vpop.permute.xlu0 %2815 }
 0xa72   :  { %v2818_v48 = vsel %vm281_vm2, %v2810_v56, %v2816_v37 }
 0xa73   :  { %18913 = vmatmul.mubr.msk.f32.vlgmr.msra.gmra.mrb[28].mxu0 %vm283_vm3, %v2818_v48  ;;  %18932 = vmatmul.mubr.msk.f32.vlgmr.msra.gmra.mrb[34].mxu1 %vm283_vm3, %v2818_v48 }
 0xa74   :  { %21389 = vmatpush3.bf16.msra.mxu0 %v23309_v34  ;;  %21395 = vmatpush3.bf16.msra.mxu1 %v23317_v38 }
 0xa75   :  { %21390 = vmatprep.subr.bf16.mxu0 %v23052_v7  ;;  %21396 = vmatprep.subr.bf16.mxu1 %v23052_v7 }
 0xa76   :  { %18942 = vmatprep.mubr.msk.f32.mxu0 %vm23050_vm1, %v23049_v0  ;;  %18953 = vmatprep.mubr.msk.f32.mxu1 %vm23050_vm1, %v23049_v0 }
 0xa78   :  { %21392 = vmatpush3.bf16.msra.mxu0 %v23329_v43  ;;  %21398 = vmatpush3.bf16.msra.mxu1 %v23335_v44 }
 0xa79   :  { %18966 = vmatprep.subr.mxu1 %v23049_v0  ;;  %18956 = vmatprep.subr.mxu0 %v23049_v0 }
 0xa7b   :  { %18943 = vmatmul.mubr.msk.f32.vlgmr.msra.gmra.mrb[30].mxu0 %vm281_vm2, %v2810_v56  ;;  %18954 = vmatmul.mubr.msk.f32.vlgmr.msra.gmra.mrb[36].mxu1 %vm281_vm2, %v23836_v33 }
 0xa7c   :  { %18967 = vmatpush3.msra.mxu1 %v23771_v19  ;;  %18968 = vmatprep.mubr.msk.f32.mxu1 %vm23050_vm1, %v23049_v0 }
 0xa7d   :  { %18958 = vmatprep.mubr.msk.f32.mxu0 %vm23050_vm1, %v23049_v0  ;;  %21399 = vmatprep.subr.bf16.mxu1 %v23052_v7 }
 0xa7f   :  { %18969 = vmatmul.mubr.msk.f32.vlgmr.msra.gmra.mrb[38].mxu1 %vm203_vm0, %v23433_v3 }
 0xa80   :  { %21401 = vmatpush3.bf16.msra.mxu1 %v23221_v8  ;;  %18987 = vmatprep.mubr.msk.f32.mxu1 %vm23050_vm1, %v23049_v0 }
 0xa81   :  { %21402 = vmatprep.subr.bf16.mxu1 %v23052_v7 }
 0xa84   :  { %21404 = vmatpush3.bf16.msra.mxu1 %v23244_v15 }
 0xa85   :  { %21405 = vmatprep.subr.bf16.mxu1 %v23052_v7 }
 0xa88   :  { %21407 = vmatpush3.bf16.msra.mxu1 %v23266_v21 }
 0xa89   :  { %21408 = vmatprep.subr.bf16.mxu1 %v23052_v7 }
 0xa8c   :  { %21410 = vmatpush3.bf16.msra.mxu1 %v23286_v27 }
 0xa8d   :  { %21423 = vmatprep.subr.bf16.mxu1 %v23052_v7 }
 0xb46   :  { %v2888_v3 = vpop.f32.mrb[28].mxu0  ;;  %v2964_v63 = vpop.f32.mrb[34].mxu1 }
 0xb47   :  { %v2889_v39 = vadd.f32 %v23381_v46, %v2888_v3  ;;  %v18914_v49 = vpop.f32.mrb[29].mxu0  ;;  %v18933_v51 = vpop.f32.mrb[35].mxu1  ;;  %v2965_v59 = vadd.f32 %v23387_v50, %v2964_v63 }
 0xb49   :  { %v16988_v56 = vmul.f32 -1.442695, %v2889_v39  ;;  %v16990_v60 = vmul.f32 -1.442695, %v2965_v59 }
 0xb4b   :  { %22663 = vpow2.f32 %v16988_v56 }
 0xb4c   :  { %22665 = vpow2.f32 %v16990_v60  ;;  %v23954_v60 = vld [vmem:[%s26034_s2] ss:$0 sm:$0xff] }
 0xb4e   :  { %v3043_v62 = vpop.f32.mrb[30].mxu0  ;;  %v3115_v14 = vpop.f32.mrb[36].mxu1 }
 0xb4f   :  { %v18944_v57 = vpop.f32.mrb[31].mxu0  ;;  %v18955_v1 = vpop.f32.mrb[37].mxu1  ;;  %v3116_v46 = vadd.f32 %v23393_v5, %v3115_v14  ;;  %v3044_v50 = vadd.f32 %v23399_v10, %v3043_v62 }
 0xb52   :  { %v3337_v2 = vpop.f32.mrb[38].mxu1 }
 0xb53   :  { %v18970_v20 = vpop.f32.mrb[39].mxu1 }
 0xb55   :  { %v22664_v24 = vpop.eup %22663 }
 0xb56   :  { %v2895_v45 = vadd.f32 1.0, %v22664_v24  ;;  %v22666_v25 = vpop.eup %22665 }
 0xb57   :  { %v2971_v29 = vadd.f32 1.0, %v22666_v25 }
 0xb58   :  { %22667 = vrcp.f32 %v2895_v45 }
 0xb59   :  { %22669 = vrcp.f32 %v2971_v29 }
 0xb62   :  { %v22668_v30 = vpop.eup %22667 }
 0xb63   :  { %v3119_v31 = vmul.f32 %v22668_v30, %v3116_v46  ;;  %v22670_v37 = vpop.eup %22669 }
 0xb64   :  { %v3122_v48 = vsub.f32 1.0, %v22670_v37  ;;  %v3124_v39 = vmul.f32 %v22670_v37, %v23836_v33  ;;  %v23966_v37 = vld [vmem:[%s26036_s11] ss:$0 sm:$0xff] }
 0xb65   :  { %v3120_v32 = vadd.f32 %v3119_v31, %v3044_v50  ;;  %v23960_v50 = vld [vmem:[%s26035_s3] ss:$0 sm:$0xff] }
 0xb67   :  { %22671 = vtanh.f32 %v3120_v32 }
 0xb71   :  { %v22672_v3 = vpop.eup %22671 }
 0xb72   :  { %v3123_v63 = vmul.f32 %v22672_v3, %v3122_v48 }
 0xb74   :  { %v23881_v49 = vadd.f32 %v3124_v39, %v3123_v63 }
 0xb76   :  { %3341 = vrot.lane.b32.xlu1 %v23881_v49, %s23051_s30  ;;  %18957 = vmatpush3.msk.msra.mxu0 %vm980_vm4, %v23881_v49 }
 0xb77   :  { %18961 = vmatprep.subr.mxu0 %v23049_v0  ;;  %18959 = vmatmul.mubr.msk.f32.vlgmr.msra.gmra.mrb[32].mxu0 %vm976_vm5, %v23460_v9 }
 0xb78   :  { %18962 = vmatpush3.msk.msra.mxu0 %vm980_vm4, %v23836_v33  ;;  %18963 = vmatprep.mubr.msk.f32.mxu0 %vm23050_vm1, %v23049_v0 }
 0xb79   :  { %21411 = vmatprep.subr.bf16.mxu0 %v23052_v7 }
 0xb7a   :  { %4182 = vrot.lane.b32.xlu1 %v23771_v19, %s23051_s30 }
 0xb7f   :  { %18964 = vmatmul.mubr.msk.f32.vlgmr.msra.gmra.mrb[32].mxu0 %vm976_vm5, %v23477_v11 }
 0xb80   :  { %21413 = vmatpush3.bf16.msra.mxu0 %v23233_v12  ;;  %19006 = vmatprep.mubr.msk.f32.mxu0 %vm23050_vm1, %v23049_v0 }
 0xb81   :  { %21414 = vmatprep.subr.bf16.mxu0 %v23052_v7 }
 0xb84   :  { %21416 = vmatpush3.bf16.msra.mxu0 %v23250_v16 }
 0xb85   :  { %21417 = vmatprep.subr.bf16.mxu0 %v23052_v7 }
 0xb88   :  { %21419 = vmatpush3.bf16.msra.mxu0 %v23270_v22 }
 0xb89   :  { %21420 = vmatprep.subr.bf16.mxu0 %v23052_v7 }
 0xb8c   :  { %21422 = vmatpush3.bf16.msra.mxu0 %v23290_v28 }
 0xb8d   :  { %21429 = vmatprep.subr.bf16.mxu0 %v23052_v7 }
 0xbe8   :  { %v3342_v5 = vpop.permute.xlu1 %3341 }
 0xbe9   :  { %v3344_v10 = vsel %vm281_vm2, %v3337_v2, %v3342_v5 }
 0xbea   :  { %18988 = vmatmul.mubr.msk.f32.vlgmr.msra.gmra.mrb[40].mxu1 %vm283_vm3, %v3344_v10  ;;  %19007 = vmatmul.mubr.msk.f32.vlgmr.msra.gmra.mrb[34].mxu0 %vm283_vm3, %v3344_v10 }
 0xbeb   :  { %21425 = vmatpush3.bf16.msra.mxu1 %v23309_v34  ;;  %21431 = vmatpush3.bf16.msra.mxu0 %v23317_v38 }
 0xbec   :  { %21426 = vmatprep.subr.bf16.mxu1 %v23052_v7  ;;  %21432 = vmatprep.subr.bf16.mxu0 %v23052_v7 }
 0xbed   :  { %19017 = vmatprep.mubr.msk.f32.mxu1 %vm23050_vm1, %v23049_v0  ;;  %19028 = vmatprep.mubr.msk.f32.mxu0 %vm23050_vm1, %v23049_v0 }
 0xbef   :  { %21428 = vmatpush3.bf16.msra.mxu1 %v23329_v43  ;;  %21434 = vmatpush3.bf16.msra.mxu0 %v23335_v44 }
 0xbf0   :  { %19036 = vmatprep.subr.mxu1 %v23049_v0  ;;  %19031 = vmatprep.subr.mxu0 %v23049_v0 }
 0xbf2   :  { %19018 = vmatmul.mubr.msk.f32.vlgmr.msra.gmra.mrb[42].mxu1 %vm281_vm2, %v3337_v2  ;;  %19029 = vmatmul.mubr.msk.f32.vlgmr.msra.gmra.mrb[36].mxu0 %vm281_vm2, %v23881_v49 }
 0xbf3   :  { %19037 = vmatpush3.msra.mxu1 %v23771_v19  ;;  %19038 = vmatprep.mubr.msk.f32.mxu1 %vm23050_vm1, %v23049_v0 }
 0xbf4   :  { %19033 = vmatprep.mubr.msk.f32.mxu0 %vm23050_vm1, %v23049_v0  ;;  %21435 = vmatprep.subr.bf16.mxu1 %v23052_v7 }
 0xbf6   :  { %19039 = vmatmul.mubr.msk.f32.vlgmr.msra.gmra.mrb[44].mxu1 %vm203_vm0, %v23515_v17  ;;  %v23948_v17 = vld [vmem:[%s26033_s28] ss:$0 sm:$0xff] }
 0xbf7   :  { %21437 = vmatpush3.bf16.msra.mxu1 %v23221_v8  ;;  %19057 = vmatprep.mubr.msk.f32.mxu1 %vm23050_vm1, %v23049_v0 }
 0xbf8   :  { %21438 = vmatprep.subr.bf16.mxu1 %v23052_v7 }
 0xbfb   :  { %21440 = vmatpush3.bf16.msra.mxu1 %v23244_v15 }
 0xbfc   :  { %21441 = vmatprep.subr.bf16.mxu1 %v23052_v7 }
 0xbff   :  { %21443 = vmatpush3.bf16.msra.mxu1 %v23266_v21 }
 0xc00   :  { %21444 = vmatprep.subr.bf16.mxu1 %v23052_v7 }
 0xc03   :  { %21446 = vmatpush3.bf16.msra.mxu1 %v23286_v27 }
 0xc04   :  { %21459 = vmatprep.subr.bf16.mxu1 %v23052_v7 }
 0xcbd   :  { %v3414_v9 = vpop.f32.mrb[40].mxu1  ;;  %v3490_v11 = vpop.f32.mrb[34].mxu0 }
 0xcbe   :  { %v3415_v33 = vadd.f32 %v23948_v17, %v3414_v9  ;;  %v18989_v51 = vpop.f32.mrb[41].mxu1  ;;  %v19008_v56 = vpop.f32.mrb[35].mxu0  ;;  %v3491_v62 = vadd.f32 %v23954_v60, %v3490_v11 }
 0xcc0   :  { %v16999_v59 = vmul.f32 -1.442695, %v3415_v33  ;;  %v17001_v14 = vmul.f32 -1.442695, %v3491_v62 }
 0xcc2   :  { %22673 = vpow2.f32 %v16999_v59 }
 0xcc3   :  { %22675 = vpow2.f32 %v17001_v14 }
 0xcc5   :  { %v3569_v57 = vpop.f32.mrb[42].mxu1  ;;  %v3641_v1 = vpop.f32.mrb[36].mxu0 }
 0xcc6   :  { %v19019_v2 = vpop.f32.mrb[43].mxu1  ;;  %v19030_v20 = vpop.f32.mrb[37].mxu0  ;;  %v3642_v31 = vadd.f32 %v23960_v50, %v3641_v1  ;;  %v3570_v48 = vadd.f32 %v23966_v37, %v3569_v57 }
 0xcc9   :  { %v3792_v24 = vpop.f32.mrb[44].mxu1 }
 0xcca   :  { %v19040_v45 = vpop.f32.mrb[45].mxu1 }
 0xccc   :  { %v22674_v25 = vpop.eup %22673 }
 0xccd   :  { %v3421_v29 = vadd.f32 1.0, %v22674_v25  ;;  %v22676_v46 = vpop.eup %22675 }
 0xcce   :  { %v3497_v30 = vadd.f32 1.0, %v22676_v46 }
 0xccf   :  { %22677 = vrcp.f32 %v3421_v29 }
 0xcd0   :  { %22679 = vrcp.f32 %v3497_v30 }
 0xcd9   :  { %v22678_v32 = vpop.eup %22677 }
 0xcda   :  { %v3645_v3 = vmul.f32 %v22678_v32, %v3642_v31  ;;  %v22680_v39 = vpop.eup %22679 }
 0xcdb   :  { %v3648_v5 = vsub.f32 1.0, %v22680_v39  ;;  %v3650_v11 = vmul.f32 %v22680_v39, %v23881_v49 }
 0xcdc   :  { %v3646_v63 = vadd.f32 %v3645_v3, %v3570_v48 }
 0xcde   :  { %22681 = vtanh.f32 %v3646_v63 }
 0xce8   :  { %v22682_v10 = vpop.eup %22681 }
 0xce9   :  { %v3649_v9 = vmul.f32 %v22682_v10, %v3648_v5 }
 0xceb   :  { %v23970_v33 = vadd.f32 %v3650_v11, %v3649_v9 }
 0xced   :  { %3796 = vrot.lane.b32.xlu0 %v23970_v33, %s23051_s30  ;;  %19032 = vmatpush3.msk.msra.mxu0 %vm980_vm4, %v23970_v33 }
 0xcee   :  { %21447 = vmatprep.subr.bf16.mxu0 %v23052_v7  ;;  %19034 = vmatmul.mubr.msk.f32.vlgmr.msra.gmra.mrb[32].mxu0 %vm976_vm5, %v23542_v58 }
 0xcef   :  { %21449 = vmatpush3.bf16.msra.mxu0 %v23233_v12  ;;  %19076 = vmatprep.mubr.msk.f32.mxu0 %vm23050_vm1, %v23049_v0 }
 0xcf0   :  { %21450 = vmatprep.subr.bf16.mxu0 %v23052_v7 }
 0xcf3   :  { %21452 = vmatpush3.bf16.msra.mxu0 %v23250_v16 }
 0xcf4   :  { %21453 = vmatprep.subr.bf16.mxu0 %v23052_v7 }
 0xcf7   :  { %21455 = vmatpush3.bf16.msra.mxu0 %v23270_v22 }
 0xcf8   :  { %21456 = vmatprep.subr.bf16.mxu0 %v23052_v7 }
 0xcfb   :  { %21458 = vmatpush3.bf16.msra.mxu0 %v23290_v28 }
 0xcfc   :  { %21465 = vmatprep.subr.bf16.mxu0 %v23052_v7 }
 0xd5f   :  { %v3797_v58 = vpop.permute.xlu0 %3796 }
 0xd60   :  { %v3799_v49 = vsel %vm281_vm2, %v3792_v24, %v3797_v58 }
 0xd61   :  { %19058 = vmatmul.mubr.msk.f32.vlgmr.msra.gmra.mrb[46].mxu1 %vm283_vm3, %v3799_v49  ;;  %19077 = vmatmul.mubr.msk.f32.vlgmr.msra.gmra.mrb[38].mxu0 %vm283_vm3, %v3799_v49 }
 0xd62   :  { %21461 = vmatpush3.bf16.msra.mxu1 %v23309_v34  ;;  %21467 = vmatpush3.bf16.msra.mxu0 %v23317_v38 }
 0xd63   :  { %21462 = vmatprep.subr.bf16.mxu1 %v23052_v7  ;;  %21468 = vmatprep.subr.bf16.mxu0 %v23052_v7 }
 0xd64   :  { %19087 = vmatprep.mubr.msk.f32.mxu1 %vm23050_vm1, %v23049_v0  ;;  %19098 = vmatprep.mubr.msk.f32.mxu0 %vm23050_vm1, %v23049_v0 }
 0xd66   :  { %21464 = vmatpush3.bf16.msra.mxu1 %v23329_v43  ;;  %21470 = vmatpush3.bf16.msra.mxu0 %v23335_v44 }
 0xd67   :  { %19101 = vmatprep.subr.mxu0 %v23049_v0  ;;  %21471 = vmatprep.subr.bf16.mxu1 %v23052_v7 }
 0xd69   :  { %19088 = vmatmul.mubr.msk.f32.vlgmr.msra.gmra.mrb[48].mxu1 %vm281_vm2, %v3792_v24  ;;  %19099 = vmatmul.mubr.msk.f32.vlgmr.msra.gmra.mrb[40].mxu0 %vm281_vm2, %v23970_v33 }
 0xd6a   :  { %19103 = vmatprep.mubr.msk.f32.mxu0 %vm23050_vm1, %v23049_v0  ;;  %21473 = vmatpush3.bf16.msra.mxu1 %v23593_v40 }
 0xd6b   :  { %21474 = vmatprep.subr.bf16.mxu1 %v23052_v7  ;;  %19122 = vmatprep.mubr.msk.f32.mxu1 %vm23050_vm1, %v23049_v0 }
 0xd6e   :  { %21476 = vmatpush3.bf16.msra.mxu1 %v23602_v47 }
 0xd6f   :  { %21477 = vmatprep.subr.bf16.mxu1 %v23052_v7 }
 0xd72   :  { %21479 = vmatpush3.bf16.msra.mxu1 %v23615_v54 }
 0xd73   :  { %21480 = vmatprep.subr.bf16.mxu1 %v23052_v7 }
 0xd76   :  { %21482 = vmatpush3.bf16.msra.mxu1 %v23638_v13 }
 0xd77   :  { %21495 = vmatprep.subr.bf16.mxu1 %v23052_v7 }
 0xe34   :  { %v3869_v51 = vpop.f32.mrb[46].mxu1  ;;  %v3945_v56 = vpop.f32.mrb[38].mxu0 }
 0xe35   :  { %v3870_v59 = vadd.f32 %v23948_v17, %v3869_v51  ;;  %v19059_v62 = vpop.f32.mrb[47].mxu1  ;;  %v19078_v14 = vpop.f32.mrb[39].mxu0  ;;  %v3946_v1 = vadd.f32 %v23954_v60, %v3945_v56 }
 0xe37   :  { %v17008_v57 = vmul.f32 -1.442695, %v3870_v59  ;;  %v17010_v2 = vmul.f32 -1.442695, %v3946_v1 }
 0xe39   :  { %22683 = vpow2.f32 %v17008_v57 }
 0xe3a   :  { %22685 = vpow2.f32 %v17010_v2 }
 0xe3c   :  { %v4024_v20 = vpop.f32.mrb[48].mxu1  ;;  %v4096_v24 = vpop.f32.mrb[40].mxu0 }
 0xe3d   :  { %v19089_v45 = vpop.f32.mrb[49].mxu1  ;;  %v19100_v25 = vpop.f32.mrb[41].mxu0  ;;  %v4097_v32 = vadd.f32 %v23960_v50, %v4096_v24  ;;  %v4025_v3 = vadd.f32 %v23966_v37, %v4024_v20 }
 0xe43   :  { %v22684_v29 = vpop.eup %22683 }
 0xe44   :  { %v3876_v46 = vadd.f32 1.0, %v22684_v29  ;;  %v22686_v30 = vpop.eup %22685 }
 0xe45   :  { %v3952_v31 = vadd.f32 1.0, %v22686_v30 }
 0xe46   :  { %22687 = vrcp.f32 %v3876_v46 }
 0xe47   :  { %22689 = vrcp.f32 %v3952_v31 }
 0xe50   :  { %v22688_v48 = vpop.eup %22687 }
 0xe51   :  { %v4100_v63 = vmul.f32 %v22688_v48, %v4097_v32  ;;  %v22690_v5 = vpop.eup %22689 }
 0xe52   :  { %v4103_v10 = vsub.f32 1.0, %v22690_v5  ;;  %v4105_v58 = vmul.f32 %v22690_v5, %v23970_v33 }
 0xe53   :  { %v4101_v39 = vadd.f32 %v4100_v63, %v4025_v3 }
 0xe55   :  { %22691 = vtanh.f32 %v4101_v39 }
 0xe5f   :  { %v22692_v9 = vpop.eup %22691 }
 0xe60   :  { %v4104_v11 = vmul.f32 %v22692_v9, %v4103_v10 }
 0xe62   :  { %v24024_v49 = vadd.f32 %v4105_v58, %v4104_v11 }
 0xe64   :  { %4563 = vrot.lane.b32.xlu0 %v24024_v49, %s23051_s30  ;;  %19102 = vmatpush3.msk.msra.mxu0 %vm980_vm4, %v24024_v49 }
 0xe65   :  { %19104 = vmatmul.mubr.msk.f32.vlgmr.msra.gmra.mrb[32].mxu0 %vm976_vm5, %v23633_v4  ;;  %21483 = vmatprep.subr.bf16.mxu0 %v23052_v7  ;;  %v4183_v4 = vpop.permute.xlu1 %4182 }
 0xe66   :  { %21485 = vmatpush3.bf16.msra.mxu0 %v23635_v6  ;;  %19141 = vmatprep.mubr.msk.f32.mxu0 %vm23050_vm1, %v23049_v0 }
 0xe67   :  { %21486 = vmatprep.subr.bf16.mxu0 %v23052_v7 }
 0xe6a   :  { %21488 = vmatpush3.bf16.msra.mxu0 %v23655_v18 }
 0xe6b   :  { %21489 = vmatprep.subr.bf16.mxu0 %v23052_v7 }
 0xe6e   :  { %21491 = vmatpush3.bf16.msra.mxu0 %v23669_v23 }
 0xe6f   :  { %21492 = vmatprep.subr.bf16.mxu0 %v23052_v7 }
 0xe72   :  { %21494 = vmatpush3.bf16.msra.mxu0 %v23679_v26 }
 0xe73   :  { %21501 = vmatprep.subr.bf16.mxu0 %v23052_v7 }
 0xf38   :  { %v4176_v33 = vpop.f32.mrb[32].mxu0 }
 0xf39   :  { %v4185_v51 = vsel %vm281_vm2, %v4176_v33, %v4183_v4  ;;  %v19105_v56 = vpop.f32.mrb[33].mxu0 }
 0xf3a   :  { %19123 = vmatmul.mubr.msk.f32.vlgmr.msra.gmra.mrb[50].mxu1 %vm283_vm3, %v4185_v51  ;;  %19142 = vmatmul.mubr.msk.f32.vlgmr.msra.gmra.mrb[42].mxu0 %vm283_vm3, %v4185_v51  ;;  %v24128_v56 = vld [vmem:[%s26027_s5 + $0x4] sm:$0xf] }
 0xf3b   :  { %21497 = vmatpush3.bf16.msra.mxu1 %v23696_v35  ;;  %21503 = vmatpush3.bf16.msra.mxu0 %v23704_v41 }
 0xf3c   :  { %21498 = vmatprep.subr.bf16.mxu1 %v23052_v7  ;;  %21504 = vmatprep.subr.bf16.mxu0 %v23052_v7 }
 0xf3d   :  { %19152 = vmatprep.mubr.msk.f32.mxu1 %vm23050_vm1, %v23049_v0  ;;  %19163 = vmatprep.mubr.msk.f32.mxu0 %vm23050_vm1, %v23049_v0 }
 0xf3f   :  { %21500 = vmatpush3.bf16.msra.mxu1 %v23716_v52  ;;  %21506 = vmatpush3.bf16.msra.mxu0 %v23722_v53 }
 0xf40   :  { %19166 = vmatprep.subr.mxu1 %v23049_v0  ;;  %21519 = vmatprep.subr.bf16.mxu0 %v23052_v7 }
 0xf42   :  { %19153 = vmatmul.mubr.msk.f32.vlgmr.msra.gmra.mrb[52].mxu1 %vm281_vm2, %v4176_v33  ;;  %19164 = vmatmul.mubr.msk.f32.vlgmr.msra.gmra.mrb[44].mxu0 %vm281_vm2, %v23771_v19 }
 0xf43   :  { %19168 = vmatprep.mubr.msk.f32.mxu1 %vm23050_vm1, %v23049_v0  ;;  %21521 = vmatpush3.bf16.msra.mxu0 %v23233_v12 }
 0xf44   :  { %21522 = vmatprep.subr.bf16.mxu0 %v23052_v7  ;;  %19206 = vmatprep.mubr.msk.f32.mxu0 %vm23050_vm1, %v23049_v0 }
 0xf47   :  { %21524 = vmatpush3.bf16.msra.mxu0 %v23250_v16 }
 0xf48   :  { %21525 = vmatprep.subr.bf16.mxu0 %v23052_v7 }
 0xf4b   :  { %21527 = vmatpush3.bf16.msra.mxu0 %v23270_v22 }
 0xf4c   :  { %21528 = vmatprep.subr.bf16.mxu0 %v23052_v7 }
 0xf4f   :  { %21530 = vmatpush3.bf16.msra.mxu0 %v23290_v28 }
 0xf50   :  { %21537 = vmatprep.subr.bf16.mxu0 %v23052_v7 }
0x100d   :  { %v4255_v59 = vpop.f32.mrb[50].mxu1  ;;  %v4331_v62 = vpop.f32.mrb[42].mxu0 }
0x100e   :  { %v4256_v14 = vadd.f32 %v23749_v55, %v4255_v59  ;;  %v19124_v57 = vpop.f32.mrb[51].mxu1  ;;  %v19143_v1 = vpop.f32.mrb[43].mxu0  ;;  %v4332_v20 = vadd.f32 %v23755_v61, %v4331_v62 }
0x1010   :  { %v17016_v2 = vmul.f32 -1.442695, %v4256_v14  ;;  %v17018_v24 = vmul.f32 -1.442695, %v4332_v20 }
0x1012   :  { %22693 = vpow2.f32 %v17016_v2 }
0x1013   :  { %22695 = vpow2.f32 %v17018_v24 }
0x1015   :  { %v4410_v45 = vpop.f32.mrb[52].mxu1  ;;  %v4482_v25 = vpop.f32.mrb[44].mxu0 }
0x1016   :  { %v19154_v29 = vpop.f32.mrb[53].mxu1  ;;  %v19165_v46 = vpop.f32.mrb[45].mxu0  ;;  %v4483_v3 = vadd.f32 %v23761_v36, %v4482_v25  ;;  %v4411_v63 = vadd.f32 %v23767_v42, %v4410_v45  ;;  %v24084_v36 = vld [vmem:[%s26027_s5] sm:$0xf] }
0x1017   :  { %v4564_v42 = vpop.permute.xlu0 %4563 }
0x101c   :  { %v22694_v30 = vpop.eup %22693 }
0x101d   :  { %v4262_v31 = vadd.f32 1.0, %v22694_v30  ;;  %v22696_v32 = vpop.eup %22695 }
0x101e   :  { %v4338_v48 = vadd.f32 1.0, %v22696_v32 }
0x101f   :  { %22697 = vrcp.f32 %v4262_v31 }
0x1020   :  { %22699 = vrcp.f32 %v4338_v48 }
0x1029   :  { %v22698_v55 = vpop.eup %22697 }
0x102a   :  { %v4486_v39 = vmul.f32 %v22698_v55, %v4483_v3  ;;  %v22700_v5 = vpop.eup %22699 }
0x102b   :  { %v4489_v10 = vsub.f32 1.0, %v22700_v5  ;;  %v4491_v11 = vmul.f32 %v22700_v5, %v23771_v19 }
0x102c   :  { %v4487_v61 = vadd.f32 %v4486_v39, %v4411_v63 }
0x102e   :  { %22701 = vtanh.f32 %v4487_v61 }
0x1038   :  { %v22702_v9 = vpop.eup %22701 }
0x1039   :  { %v4490_v58 = vmul.f32 %v22702_v9, %v4489_v10 }
0x103b   :  { %v24078_v4 = vadd.f32 %v4491_v11, %v4490_v58 }
0x103d   :  { %19167 = vmatpush3.msra.mxu1 %v24078_v4 }
0x103e   :  { %19169 = vmatmul.mubr.msk.f32.vlgmr.msra.gmra.mrb[54].mxu1 %vm203_vm0, %v24084_v36  ;;  %21507 = vmatprep.subr.bf16.mxu1 %v23052_v7 }
0x103f   :  { %21509 = vmatpush3.bf16.msra.mxu1 %v23221_v8  ;;  %19187 = vmatprep.mubr.msk.f32.mxu1 %vm23050_vm1, %v23049_v0 }
0x1040   :  { %21510 = vmatprep.subr.bf16.mxu1 %v23052_v7 }
0x1043   :  { %21512 = vmatpush3.bf16.msra.mxu1 %v23244_v15 }
0x1044   :  { %21513 = vmatprep.subr.bf16.mxu1 %v23052_v7 }
0x1047   :  { %21515 = vmatpush3.bf16.msra.mxu1 %v23266_v21 }
0x1048   :  { %21516 = vmatprep.subr.bf16.mxu1 %v23052_v7 }
0x104b   :  { %21518 = vmatpush3.bf16.msra.mxu1 %v23286_v27 }
0x104c   :  { %21531 = vmatprep.subr.bf16.mxu1 %v23052_v7 }
0x1111   :  { %v4559_v19 = vpop.f32.mrb[54].mxu1 }
0x1112   :  { %v4566_v33 = vsel %vm281_vm2, %v4559_v19, %v4564_v42  ;;  %v19170_v51 = vpop.f32.mrb[55].mxu1 }
0x1113   :  { %19188 = vmatmul.mubr.msk.f32.vlgmr.msra.gmra.mrb[56].mxu1 %vm283_vm3, %v4566_v33  ;;  %19207 = vmatmul.mubr.msk.f32.vlgmr.msra.gmra.mrb[46].mxu0 %vm283_vm3, %v4566_v33 }
0x1114   :  { %21533 = vmatpush3.bf16.msra.mxu1 %v23309_v34  ;;  %21539 = vmatpush3.bf16.msra.mxu0 %v23317_v38 }
0x1115   :  { %21534 = vmatprep.subr.bf16.mxu1 %v23052_v7  ;;  %21540 = vmatprep.subr.bf16.mxu0 %v23052_v7 }
0x1116   :  { %19217 = vmatprep.mubr.msk.f32.mxu1 %vm23050_vm1, %v23049_v0  ;;  %19228 = vmatprep.mubr.msk.f32.mxu0 %vm23050_vm1, %v23049_v0 }
0x1118   :  { %21536 = vmatpush3.bf16.msra.mxu1 %v23329_v43  ;;  %21542 = vmatpush3.bf16.msra.mxu0 %v23335_v44 }
0x1119   :  { %19231 = vmatprep.subr.mxu1 %v23049_v0  ;;  %21543 = vmatprep.subr.bf16.mxu0 %v23052_v7 }
0x111b   :  { %19218 = vmatmul.mubr.msk.f32.vlgmr.msra.gmra.mrb[58].mxu1 %vm281_vm2, %v4559_v19  ;;  %19229 = vmatmul.mubr.msk.f32.vlgmr.msra.gmra.mrb[48].mxu0 %vm281_vm2, %v24024_v49 }
0x111c   :  { %19232 = vmatpush3.msra.mxu1 %v24078_v4  ;;  %19233 = vmatprep.mubr.msk.f32.mxu1 %vm23050_vm1, %v23049_v0 }
0x111d   :  { %21555 = vmatprep.subr.bf16.mxu1 %v23052_v7  ;;  %21545 = vmatpush3.bf16.msra.mxu0 %v23221_v8 }
0x111e   :  { %21546 = vmatprep.subr.bf16.mxu0 %v23052_v7  ;;  %19252 = vmatprep.mubr.msk.f32.mxu0 %vm23050_vm1, %v23049_v0 }
0x111f   :  { %19234 = vmatmul.mubr.msk.f32.vlgmr.msra.gmra.mrb[60].mxu1 %vm203_vm0, %v24128_v56 }
0x1120   :  { %21557 = vmatpush3.bf16.msra.mxu1 %v23233_v12  ;;  %19271 = vmatprep.mubr.msk.f32.mxu1 %vm23050_vm1, %v23049_v0 }
0x1121   :  { %21558 = vmatprep.subr.bf16.mxu1 %v23052_v7  ;;  %21548 = vmatpush3.bf16.msra.mxu0 %v23244_v15 }
0x1122   :  { %21549 = vmatprep.subr.bf16.mxu0 %v23052_v7 }
0x1124   :  { %21560 = vmatpush3.bf16.msra.mxu1 %v23250_v16 }
0x1125   :  { %21561 = vmatprep.subr.bf16.mxu1 %v23052_v7  ;;  %21551 = vmatpush3.bf16.msra.mxu0 %v23266_v21 }
0x1126   :  { %21552 = vmatprep.subr.bf16.mxu0 %v23052_v7 }
0x1128   :  { %21563 = vmatpush3.bf16.msra.mxu1 %v23270_v22 }
0x1129   :  { %21564 = vmatprep.subr.bf16.mxu1 %v23052_v7  ;;  %21554 = vmatpush3.bf16.msra.mxu0 %v23286_v27 }
0x112a   :  { %21567 = vmatprep.subr.bf16.mxu0 %v23052_v7 }
0x112c   :  { %21566 = vmatpush3.bf16.msra.mxu1 %v23290_v28 }
0x112d   :  { %21573 = vmatprep.subr.bf16.mxu1 %v23052_v7 }
0x11e6   :  { %v4636_v59 = vpop.f32.mrb[56].mxu1  ;;  %v4712_v62 = vpop.f32.mrb[46].mxu0 }
0x11e7   :  { %v4637_v14 = vadd.f32 %v23948_v17, %v4636_v59  ;;  %v19189_v57 = vpop.f32.mrb[57].mxu1  ;;  %v19208_v1 = vpop.f32.mrb[47].mxu0  ;;  %v4713_v20 = vadd.f32 %v23954_v60, %v4712_v62 }
0x11e9   :  { %v17023_v2 = vmul.f32 -1.442695, %v4637_v14  ;;  %v17025_v24 = vmul.f32 -1.442695, %v4713_v20 }
0x11eb   :  { %22703 = vpow2.f32 %v17023_v2 }
0x11ec   :  { %22705 = vpow2.f32 %v17025_v24 }
0x11ee   :  { %v4791_v45 = vpop.f32.mrb[58].mxu1  ;;  %v4863_v25 = vpop.f32.mrb[48].mxu0 }
0x11ef   :  { %v19219_v29 = vpop.f32.mrb[59].mxu1  ;;  %v19230_v46 = vpop.f32.mrb[49].mxu0  ;;  %v4864_v63 = vadd.f32 %v23960_v50, %v4863_v25  ;;  %v4792_v61 = vadd.f32 %v23966_v37, %v4791_v45 }
0x11f2   :  { %v4940_v30 = vpop.f32.mrb[60].mxu1 }
0x11f3   :  { %v19235_v31 = vpop.f32.mrb[61].mxu1 }
0x11f5   :  { %v22704_v32 = vpop.eup %22703 }
0x11f6   :  { %v4643_v48 = vadd.f32 1.0, %v22704_v32  ;;  %v22706_v3 = vpop.eup %22705 }
0x11f7   :  { %v4719_v55 = vadd.f32 1.0, %v22706_v3 }
0x11f8   :  { %22707 = vrcp.f32 %v4643_v48 }
0x11f9   :  { %22709 = vrcp.f32 %v4719_v55 }
0x1202   :  { %v22708_v39 = vpop.eup %22707 }
0x1203   :  { %v4867_v5 = vmul.f32 %v22708_v39, %v4864_v63  ;;  %v22710_v9 = vpop.eup %22709 }
0x1204   :  { %v4870_v11 = vsub.f32 1.0, %v22710_v9  ;;  %v4872_v19 = vmul.f32 %v22710_v9, %v24024_v49  ;;  %v24184_v49 = vld [vmem:[%s26027_s5 + $0x8] sm:$0xf] }
0x1205   :  { %v4868_v10 = vadd.f32 %v4867_v5, %v4792_v61 }
0x1207   :  { %22711 = vtanh.f32 %v4868_v10 }
0x1211   :  { %v22712_v58 = vpop.eup %22711 }
0x1212   :  { %v4871_v42 = vmul.f32 %v22712_v58, %v4870_v11 }
0x1214   :  { %v24153_v33 = vadd.f32 %v4872_v19, %v4871_v42 }
0x1216   :  { %4945 = vrot.lane.b32.xlu1 %v24153_v33, %s23051_s30 }
0x1288   :  { %v4946_v51 = vpop.permute.xlu1 %4945 }
0x1289   :  { %v4948_v59 = vsel %vm281_vm2, %v4940_v30, %v4946_v51 }
0x128a   :  { %19253 = vmatmul.mubr.msk.f32.vlgmr.msra.gmra.mrb[50].mxu0 %vm283_vm3, %v4948_v59  ;;  %19272 = vmatmul.mubr.msk.f32.vlgmr.msra.gmra.mrb[62].mxu1 %vm283_vm3, %v4948_v59 }
0x128b   :  { %21569 = vmatpush3.bf16.msra.mxu0 %v23309_v34  ;;  %21575 = vmatpush3.bf16.msra.mxu1 %v23317_v38 }
0x128c   :  { %21570 = vmatprep.subr.bf16.mxu0 %v23052_v7  ;;  %21576 = vmatprep.subr.bf16.mxu1 %v23052_v7 }
0x128d   :  { %19282 = vmatprep.mubr.msk.f32.mxu0 %vm23050_vm1, %v23049_v0  ;;  %19293 = vmatprep.mubr.msk.f32.mxu1 %vm23050_vm1, %v23049_v0 }
0x128f   :  { %21572 = vmatpush3.bf16.msra.mxu0 %v23329_v43  ;;  %21578 = vmatpush3.bf16.msra.mxu1 %v23335_v44 }
0x1290   :  { %19306 = vmatprep.subr.mxu1 %v23049_v0  ;;  %19296 = vmatprep.subr.mxu0 %v23049_v0 }
0x1292   :  { %19283 = vmatmul.mubr.msk.f32.vlgmr.msra.gmra.mrb[52].mxu0 %vm281_vm2, %v4940_v30  ;;  %19294 = vmatmul.mubr.msk.f32.vlgmr.msra.gmra.mrb[64].mxu1 %vm281_vm2, %v24153_v33 }
0x1293   :  { %19307 = vmatpush3.msra.mxu1 %v24078_v4  ;;  %19308 = vmatprep.mubr.msk.f32.mxu1 %vm23050_vm1, %v23049_v0 }
0x1294   :  { %19298 = vmatprep.mubr.msk.f32.mxu0 %vm23050_vm1, %v23049_v0  ;;  %21579 = vmatprep.subr.bf16.mxu1 %v23052_v7 }
0x1296   :  { %19309 = vmatmul.mubr.msk.f32.vlgmr.msra.gmra.mrb[66].mxu1 %vm203_vm0, %v24184_v49 }
0x1297   :  { %21581 = vmatpush3.bf16.msra.mxu1 %v23221_v8  ;;  %19327 = vmatprep.mubr.msk.f32.mxu1 %vm23050_vm1, %v23049_v0 }
0x1298   :  { %21582 = vmatprep.subr.bf16.mxu1 %v23052_v7 }
0x129b   :  { %21584 = vmatpush3.bf16.msra.mxu1 %v23244_v15 }
0x129c   :  { %21585 = vmatprep.subr.bf16.mxu1 %v23052_v7 }
0x129f   :  { %21587 = vmatpush3.bf16.msra.mxu1 %v23266_v21 }
0x12a0   :  { %21588 = vmatprep.subr.bf16.mxu1 %v23052_v7 }
0x12a3   :  { %21590 = vmatpush3.bf16.msra.mxu1 %v23286_v27 }
0x12a4   :  { %21603 = vmatprep.subr.bf16.mxu1 %v23052_v7 }
0x135d   :  { %v5018_v62 = vpop.f32.mrb[50].mxu0  ;;  %v5094_v14 = vpop.f32.mrb[62].mxu1 }
0x135e   :  { %v5019_v57 = vadd.f32 %v23948_v17, %v5018_v62  ;;  %v19254_v1 = vpop.f32.mrb[51].mxu0  ;;  %v19273_v2 = vpop.f32.mrb[63].mxu1  ;;  %v5095_v24 = vadd.f32 %v23954_v60, %v5094_v14  ;;  %v24213_v62 = vld [vmem:[%s25990_s1 + $0x8] sm:$0xff]  ;;  %v24227_v14 = vld [vmem:[%s25990_s1] sm:$0xff] }
0x135f   :  { %v24268_v1 = vld [vmem:[%s26027_s5 + $0xc] sm:$0xf] }
0x1360   :  { %v17030_v20 = vmul.f32 -1.442695, %v5019_v57  ;;  %v17032_v45 = vmul.f32 -1.442695, %v5095_v24 }
0x1362   :  { %22713 = vpow2.f32 %v17030_v20 }
0x1363   :  { %22715 = vpow2.f32 %v17032_v45 }
0x1365   :  { %v5173_v25 = vpop.f32.mrb[52].mxu0  ;;  %v5245_v29 = vpop.f32.mrb[64].mxu1 }
0x1366   :  { %v19284_v46 = vpop.f32.mrb[53].mxu0  ;;  %v19295_v30 = vpop.f32.mrb[65].mxu1  ;;  %v5246_v39 = vadd.f32 %v23960_v50, %v5245_v29  ;;  %v5174_v5 = vadd.f32 %v23966_v37, %v5173_v25 }
0x1369   :  { %v5467_v31 = vpop.f32.mrb[66].mxu1 }
0x136a   :  { %v19310_v32 = vpop.f32.mrb[67].mxu1 }
0x136c   :  { %v22714_v48 = vpop.eup %22713 }
0x136d   :  { %v5025_v3 = vadd.f32 1.0, %v22714_v48  ;;  %v22716_v55 = vpop.eup %22715 }
0x136e   :  { %v5101_v63 = vadd.f32 1.0, %v22716_v55 }
0x136f   :  { %22717 = vrcp.f32 %v5025_v3 }
0x1370   :  { %22719 = vrcp.f32 %v5101_v63 }
0x1379   :  { %v22718_v61 = vpop.eup %22717 }
0x137a   :  { %v5249_v10 = vmul.f32 %v22718_v61, %v5246_v39  ;;  %v22720_v11 = vpop.eup %22719 }
0x137b   :  { %v5252_v58 = vsub.f32 1.0, %v22720_v11  ;;  %v5254_v51 = vmul.f32 %v22720_v11, %v24153_v33 }
0x137c   :  { %v5250_v9 = vadd.f32 %v5249_v10, %v5174_v5 }
0x137e   :  { %22721 = vtanh.f32 %v5250_v9 }
0x1388   :  { %v22722_v42 = vpop.eup %22721 }
0x1389   :  { %v5253_v19 = vmul.f32 %v22722_v42, %v5252_v58 }
0x138b   :  { %v24203_v59 = vadd.f32 %v5254_v51, %v5253_v19 }
0x138d   :  { %5471 = vrot.lane.b32.xlu0 %v24203_v59, %s23051_s30  ;;  %19297 = vmatpush3.msk.msra.mxu0 %vm980_vm4, %v24203_v59 }
0x138e   :  { %19301 = vmatprep.subr.mxu0 %v23049_v0  ;;  %19299 = vmatmul.mubr.msk.f32.vlgmr.msra.gmra.mrb[54].mxu0 %vm976_vm5, %v24213_v62 }
0x138f   :  { %19302 = vmatpush3.msk.msra.mxu0 %vm980_vm4, %v24153_v33  ;;  %19303 = vmatprep.mubr.msk.f32.mxu0 %vm23050_vm1, %v23049_v0 }
0x1390   :  { %21591 = vmatprep.subr.bf16.mxu0 %v23052_v7 }
0x1391   :  { %6312 = vrot.lane.b32.xlu0 %v24078_v4, %s23051_s30 }
0x1396   :  { %19304 = vmatmul.mubr.msk.f32.vlgmr.msra.gmra.mrb[54].mxu0 %vm976_vm5, %v24227_v14 }
0x1397   :  { %21593 = vmatpush3.bf16.msra.mxu0 %v23233_v12  ;;  %19346 = vmatprep.mubr.msk.f32.mxu0 %vm23050_vm1, %v23049_v0 }
0x1398   :  { %21594 = vmatprep.subr.bf16.mxu0 %v23052_v7 }
0x139b   :  { %21596 = vmatpush3.bf16.msra.mxu0 %v23250_v16 }
0x139c   :  { %21597 = vmatprep.subr.bf16.mxu0 %v23052_v7 }
0x139f   :  { %21599 = vmatpush3.bf16.msra.mxu0 %v23270_v22 }
0x13a0   :  { %21600 = vmatprep.subr.bf16.mxu0 %v23052_v7 }
0x13a3   :  { %21602 = vmatpush3.bf16.msra.mxu0 %v23290_v28 }
0x13a4   :  { %21609 = vmatprep.subr.bf16.mxu0 %v23052_v7 }
0x13ff   :  { %v5472_v33 = vpop.permute.xlu0 %5471 }
0x1400   :  { %v5474_v57 = vsel %vm281_vm2, %v5467_v31, %v5472_v33 }
0x1401   :  { %19328 = vmatmul.mubr.msk.f32.vlgmr.msra.gmra.mrb[68].mxu1 %vm283_vm3, %v5474_v57  ;;  %19347 = vmatmul.mubr.msk.f32.vlgmr.msra.gmra.mrb[56].mxu0 %vm283_vm3, %v5474_v57 }
0x1402   :  { %21605 = vmatpush3.bf16.msra.mxu1 %v23309_v34  ;;  %21611 = vmatpush3.bf16.msra.mxu0 %v23317_v38 }
0x1403   :  { %21606 = vmatprep.subr.bf16.mxu1 %v23052_v7  ;;  %21612 = vmatprep.subr.bf16.mxu0 %v23052_v7 }
0x1404   :  { %19357 = vmatprep.mubr.msk.f32.mxu1 %vm23050_vm1, %v23049_v0  ;;  %19368 = vmatprep.mubr.msk.f32.mxu0 %vm23050_vm1, %v23049_v0 }
0x1406   :  { %21608 = vmatpush3.bf16.msra.mxu1 %v23329_v43  ;;  %21614 = vmatpush3.bf16.msra.mxu0 %v23335_v44 }
0x1407   :  { %19376 = vmatprep.subr.mxu1 %v23049_v0  ;;  %19371 = vmatprep.subr.mxu0 %v23049_v0 }
0x1409   :  { %19358 = vmatmul.mubr.msk.f32.vlgmr.msra.gmra.mrb[70].mxu1 %vm281_vm2, %v5467_v31  ;;  %19369 = vmatmul.mubr.msk.f32.vlgmr.msra.gmra.mrb[58].mxu0 %vm281_vm2, %v24203_v59 }
0x140a   :  { %19377 = vmatpush3.msra.mxu1 %v24078_v4  ;;  %19378 = vmatprep.mubr.msk.f32.mxu1 %vm23050_vm1, %v23049_v0 }
0x140b   :  { %19373 = vmatprep.mubr.msk.f32.mxu0 %vm23050_vm1, %v23049_v0  ;;  %21615 = vmatprep.subr.bf16.mxu1 %v23052_v7 }
0x140d   :  { %19379 = vmatmul.mubr.msk.f32.vlgmr.msra.gmra.mrb[72].mxu1 %vm203_vm0, %v24268_v1 }
0x140e   :  { %21617 = vmatpush3.bf16.msra.mxu1 %v23221_v8  ;;  %19397 = vmatprep.mubr.msk.f32.mxu1 %vm23050_vm1, %v23049_v0 }
0x140f   :  { %21618 = vmatprep.subr.bf16.mxu1 %v23052_v7 }
0x1412   :  { %21620 = vmatpush3.bf16.msra.mxu1 %v23244_v15 }
0x1413   :  { %21621 = vmatprep.subr.bf16.mxu1 %v23052_v7 }
0x1416   :  { %21623 = vmatpush3.bf16.msra.mxu1 %v23266_v21 }
0x1417   :  { %21624 = vmatprep.subr.bf16.mxu1 %v23052_v7 }
0x141a   :  { %21626 = vmatpush3.bf16.msra.mxu1 %v23286_v27 }
0x141b   :  { %21639 = vmatprep.subr.bf16.mxu1 %v23052_v7 }
0x14d4   :  { %v5544_v2 = vpop.f32.mrb[68].mxu1  ;;  %v5620_v20 = vpop.f32.mrb[56].mxu0 }
0x14d5   :  { %v5545_v24 = vadd.f32 %v23948_v17, %v5544_v2  ;;  %v19329_v45 = vpop.f32.mrb[69].mxu1  ;;  %v19348_v25 = vpop.f32.mrb[57].mxu0  ;;  %v5621_v46 = vadd.f32 %v23954_v60, %v5620_v20 }
0x14d6   :  { %v24297_v45 = vld [vmem:[%s25990_s1 + $0x10] sm:$0xff] }
0x14d7   :  { %v17041_v29 = vmul.f32 -1.442695, %v5545_v24  ;;  %v17043_v30 = vmul.f32 -1.442695, %v5621_v46 }
0x14d9   :  { %22723 = vpow2.f32 %v17041_v29 }
0x14da   :  { %22725 = vpow2.f32 %v17043_v30 }
0x14dc   :  { %v5699_v31 = vpop.f32.mrb[70].mxu1  ;;  %v5771_v32 = vpop.f32.mrb[58].mxu0 }
0x14dd   :  { %v19359_v48 = vpop.f32.mrb[71].mxu1  ;;  %v19370_v3 = vpop.f32.mrb[59].mxu0  ;;  %v5772_v9 = vadd.f32 %v23960_v50, %v5771_v32  ;;  %v5700_v58 = vadd.f32 %v23966_v37, %v5699_v31 }
0x14e0   :  { %v5922_v55 = vpop.f32.mrb[72].mxu1 }
0x14e1   :  { %v19380_v63 = vpop.f32.mrb[73].mxu1 }
0x14e3   :  { %v22724_v39 = vpop.eup %22723 }
0x14e4   :  { %v5551_v61 = vadd.f32 1.0, %v22724_v39  ;;  %v22726_v5 = vpop.eup %22725 }
0x14e5   :  { %v5627_v10 = vadd.f32 1.0, %v22726_v5 }
0x14e6   :  { %22727 = vrcp.f32 %v5551_v61 }
0x14e7   :  { %22729 = vrcp.f32 %v5627_v10 }
0x14f0   :  { %v22728_v11 = vpop.eup %22727 }
0x14f1   :  { %v5775_v42 = vmul.f32 %v22728_v11, %v5772_v9  ;;  %v22730_v51 = vpop.eup %22729 }
0x14f2   :  { %v5778_v33 = vsub.f32 1.0, %v22730_v51  ;;  %v5780_v20 = vmul.f32 %v22730_v51, %v24203_v59 }
0x14f3   :  { %v5776_v19 = vadd.f32 %v5775_v42, %v5700_v58 }
0x14f5   :  { %22731 = vtanh.f32 %v5776_v19 }
0x14ff   :  { %v22732_v57 = vpop.eup %22731 }
0x1500   :  { %v5779_v2 = vmul.f32 %v22732_v57, %v5778_v33 }
0x1502   :  { %v24287_v24 = vadd.f32 %v5780_v20, %v5779_v2 }
0x1504   :  { %5926 = vrot.lane.b32.xlu1 %v24287_v24, %s23051_s30  ;;  %19372 = vmatpush3.msk.msra.mxu0 %vm980_vm4, %v24287_v24 }
0x1505   :  { %21627 = vmatprep.subr.bf16.mxu0 %v23052_v7  ;;  %19374 = vmatmul.mubr.msk.f32.vlgmr.msra.gmra.mrb[54].mxu0 %vm976_vm5, %v24297_v45 }
0x1506   :  { %21629 = vmatpush3.bf16.msra.mxu0 %v23233_v12  ;;  %19416 = vmatprep.mubr.msk.f32.mxu0 %vm23050_vm1, %v23049_v0 }
0x1507   :  { %21630 = vmatprep.subr.bf16.mxu0 %v23052_v7 }
0x150a   :  { %21632 = vmatpush3.bf16.msra.mxu0 %v23250_v16 }
0x150b   :  { %21633 = vmatprep.subr.bf16.mxu0 %v23052_v7 }
0x150e   :  { %21635 = vmatpush3.bf16.msra.mxu0 %v23270_v22 }
0x150f   :  { %21636 = vmatprep.subr.bf16.mxu0 %v23052_v7 }
0x1512   :  { %21638 = vmatpush3.bf16.msra.mxu0 %v23290_v28 }
0x1513   :  { %21645 = vmatprep.subr.bf16.mxu0 %v23052_v7 }
0x1576   :  { %v5927_v59 = vpop.permute.xlu1 %5926 }
0x1577   :  { %v5929_v25 = vsel %vm281_vm2, %v5922_v55, %v5927_v59 }
0x1578   :  { %19398 = vmatmul.mubr.msk.f32.vlgmr.msra.gmra.mrb[74].mxu1 %vm283_vm3, %v5929_v25  ;;  %19417 = vmatmul.mubr.msk.f32.vlgmr.msra.gmra.mrb[60].mxu0 %vm283_vm3, %v5929_v25 }
0x1579   :  { %21641 = vmatpush3.bf16.msra.mxu1 %v23309_v34  ;;  %21647 = vmatpush3.bf16.msra.mxu0 %v23317_v38 }
0x157a   :  { %21642 = vmatprep.subr.bf16.mxu1 %v23052_v7  ;;  %21648 = vmatprep.subr.bf16.mxu0 %v23052_v7 }
0x157b   :  { %19427 = vmatprep.mubr.msk.f32.mxu1 %vm23050_vm1, %v23049_v0  ;;  %19438 = vmatprep.mubr.msk.f32.mxu0 %vm23050_vm1, %v23049_v0 }
0x157d   :  { %21644 = vmatpush3.bf16.msra.mxu1 %v23329_v43  ;;  %21650 = vmatpush3.bf16.msra.mxu0 %v23335_v44 }
0x157e   :  { %19441 = vmatprep.subr.mxu0 %v23049_v0  ;;  %21651 = vmatprep.subr.bf16.mxu1 %v23052_v7 }
0x1580   :  { %19428 = vmatmul.mubr.msk.f32.vlgmr.msra.gmra.mrb[76].mxu1 %vm281_vm2, %v5922_v55  ;;  %19439 = vmatmul.mubr.msk.f32.vlgmr.msra.gmra.mrb[62].mxu0 %vm281_vm2, %v24287_v24 }
0x1581   :  { %19443 = vmatprep.mubr.msk.f32.mxu0 %vm23050_vm1, %v23049_v0  ;;  %21653 = vmatpush3.bf16.msra.mxu1 %v23593_v40 }
0x1582   :  { %21654 = vmatprep.subr.bf16.mxu1 %v23052_v7  ;;  %19462 = vmatprep.mubr.msk.f32.mxu1 %vm23050_vm1, %v23049_v0 }
0x1585   :  { %21656 = vmatpush3.bf16.msra.mxu1 %v23602_v47 }
0x1586   :  { %21657 = vmatprep.subr.bf16.mxu1 %v23052_v7 }
0x1589   :  { %21659 = vmatpush3.bf16.msra.mxu1 %v23615_v54 }
0x158a   :  { %21660 = vmatprep.subr.bf16.mxu1 %v23052_v7 }
0x158d   :  { %21662 = vmatpush3.bf16.msra.mxu1 %v23638_v13 }
0x158e   :  { %21675 = vmatprep.subr.bf16.mxu1 %v23052_v7 }
0x164b   :  { %v5999_v29 = vpop.f32.mrb[74].mxu1  ;;  %v6075_v46 = vpop.f32.mrb[60].mxu0 }
0x164c   :  { %v6000_v30 = vadd.f32 %v23948_v17, %v5999_v29  ;;  %v19399_v31 = vpop.f32.mrb[75].mxu1  ;;  %v19418_v32 = vpop.f32.mrb[61].mxu0  ;;  %v6076_v3 = vadd.f32 %v23954_v60, %v6075_v46 }
0x164d   :  { %v24403_v32 = vld [vmem:[%s25995_s16] ss:$0 sm:$0xff] }
0x164e   :  { %v17050_v48 = vmul.f32 -1.442695, %v6000_v30  ;;  %v17052_v55 = vmul.f32 -1.442695, %v6076_v3 }
0x1650   :  { %22733 = vpow2.f32 %v17050_v48 }
0x1651   :  { %22735 = vpow2.f32 %v17052_v55 }
0x1653   :  { %v6154_v63 = vpop.f32.mrb[76].mxu1  ;;  %v6226_v39 = vpop.f32.mrb[62].mxu0 }
0x1654   :  { %v19429_v61 = vpop.f32.mrb[77].mxu1  ;;  %v19440_v5 = vpop.f32.mrb[63].mxu0  ;;  %v6227_v42 = vadd.f32 %v23960_v50, %v6226_v39  ;;  %v6155_v19 = vadd.f32 %v23966_v37, %v6154_v63  ;;  %v24355_v50 = vld [vmem:[%s25990_s1 + $0x18] sm:$0xff]  ;;  %v24409_v39 = vld [vmem:[%s25996_s17] ss:$0 sm:$0xff] }
0x1655   :  { %v6313_v37 = vpop.permute.xlu0 %6312 }
0x165a   :  { %v22734_v10 = vpop.eup %22733 }
0x165b   :  { %v6006_v9 = vadd.f32 1.0, %v22734_v10  ;;  %v22736_v11 = vpop.eup %22735 }
0x165c   :  { %v6082_v58 = vadd.f32 1.0, %v22736_v11 }
0x165d   :  { %22737 = vrcp.f32 %v6006_v9 }
0x165e   :  { %22739 = vrcp.f32 %v6082_v58 }
0x1667   :  { %v22738_v17 = vpop.eup %22737 }
0x1668   :  { %v6230_v51 = vmul.f32 %v22738_v17, %v6227_v42  ;;  %v22740_v33 = vpop.eup %22739 }
0x1669   :  { %v6233_v57 = vsub.f32 1.0, %v22740_v33  ;;  %v6235_v59 = vmul.f32 %v22740_v33, %v24287_v24 }
0x166a   :  { %v6231_v60 = vadd.f32 %v6230_v51, %v6155_v19 }
0x166c   :  { %22741 = vtanh.f32 %v6231_v60  ;;  %v24415_v60 = vld [vmem:[%s25997_s19] ss:$0 sm:$0xff] }
0x1676   :  { %v22742_v2 = vpop.eup %22741 }
0x1677   :  { %v6234_v20 = vmul.f32 %v22742_v2, %v6233_v57  ;;  %v24421_v2 = vld [vmem:[%s25998_s18] ss:$0 sm:$0xff] }
0x1679   :  { %v24346_v25 = vadd.f32 %v6235_v59, %v6234_v20 }
0x167b   :  { %6693 = vrot.lane.b32.xlu1 %v24346_v25, %s23051_s30  ;;  %19442 = vmatpush3.msk.msra.mxu0 %vm980_vm4, %v24346_v25 }
0x167c   :  { %19444 = vmatmul.mubr.msk.f32.vlgmr.msra.gmra.mrb[54].mxu0 %vm976_vm5, %v24355_v50  ;;  %21663 = vmatprep.subr.bf16.mxu0 %v23052_v7 }
0x167d   :  { %21665 = vmatpush3.bf16.msra.mxu0 %v23635_v6  ;;  %19481 = vmatprep.mubr.msk.f32.mxu0 %vm23050_vm1, %v23049_v0 }
0x167e   :  { %21666 = vmatprep.subr.bf16.mxu0 %v23052_v7 }
0x1681   :  { %21668 = vmatpush3.bf16.msra.mxu0 %v23655_v18 }
0x1682   :  { %21669 = vmatprep.subr.bf16.mxu0 %v23052_v7 }
0x1685   :  { %21671 = vmatpush3.bf16.msra.mxu0 %v23669_v23 }
0x1686   :  { %21672 = vmatprep.subr.bf16.mxu0 %v23052_v7 }
0x1689   :  { %21674 = vmatpush3.bf16.msra.mxu0 %v23679_v26 }
0x168a   :  { %21681 = vmatprep.subr.bf16.mxu0 %v23052_v7 }
0x174f   :  { %v6306_v24 = vpop.f32.mrb[54].mxu0 }
0x1750   :  { %v6315_v29 = vsel %vm281_vm2, %v6306_v24, %v6313_v37  ;;  %v19445_v46 = vpop.f32.mrb[55].mxu0 }
0x1751   :  { %19463 = vmatmul.mubr.msk.f32.vlgmr.msra.gmra.mrb[78].mxu1 %vm283_vm3, %v6315_v29  ;;  %19482 = vmatmul.mubr.msk.f32.vlgmr.msra.gmra.mrb[64].mxu0 %vm283_vm3, %v6315_v29 }
0x1752   :  { %21677 = vmatpush3.bf16.msra.mxu1 %v23696_v35  ;;  %21683 = vmatpush3.bf16.msra.mxu0 %v23704_v41 }
0x1753   :  { %21678 = vmatprep.subr.bf16.mxu1 %v23052_v7  ;;  %21684 = vmatprep.subr.bf16.mxu0 %v23052_v7 }
0x1754   :  { %19492 = vmatprep.mubr.msk.f32.mxu1 %vm23050_vm1, %v23049_v0  ;;  %19503 = vmatprep.mubr.msk.f32.mxu0 %vm23050_vm1, %v23049_v0 }
0x1756   :  { %21680 = vmatpush3.bf16.msra.mxu1 %v23716_v52  ;;  %21686 = vmatpush3.bf16.msra.mxu0 %v23722_v53 }
0x1757   :  { %19506 = vmatprep.subr.mxu1 %v23049_v0  ;;  %21699 = vmatprep.subr.bf16.mxu0 %v23052_v7 }
0x1759   :  { %19493 = vmatmul.mubr.msk.f32.vlgmr.msra.gmra.mrb[80].mxu1 %vm281_vm2, %v6306_v24  ;;  %19504 = vmatmul.mubr.msk.f32.vlgmr.msra.gmra.mrb[66].mxu0 %vm281_vm2, %v24078_v4 }
0x175a   :  { %19508 = vmatprep.mubr.msk.f32.mxu1 %vm23050_vm1, %v23049_v0  ;;  %21701 = vmatpush3.bf16.msra.mxu0 %v23233_v12 }
0x175b   :  { %21702 = vmatprep.subr.bf16.mxu0 %v23052_v7  ;;  %19546 = vmatprep.mubr.msk.f32.mxu0 %vm23050_vm1, %v23049_v0 }
0x175e   :  { %21704 = vmatpush3.bf16.msra.mxu0 %v23250_v16 }
0x175f   :  { %21705 = vmatprep.subr.bf16.mxu0 %v23052_v7 }
0x1762   :  { %21707 = vmatpush3.bf16.msra.mxu0 %v23270_v22 }
0x1763   :  { %21708 = vmatprep.subr.bf16.mxu0 %v23052_v7 }
0x1766   :  { %21710 = vmatpush3.bf16.msra.mxu0 %v23290_v28 }
0x1767   :  { %21717 = vmatprep.subr.bf16.mxu0 %v23052_v7 }
0x1824   :  { %v6385_v30 = vpop.f32.mrb[78].mxu1  ;;  %v6461_v31 = vpop.f32.mrb[64].mxu0 }
0x1825   :  { %v6386_v48 = vadd.f32 %v24403_v32, %v6385_v30  ;;  %v19464_v3 = vpop.f32.mrb[79].mxu1  ;;  %v19483_v55 = vpop.f32.mrb[65].mxu0  ;;  %v6462_v61 = vadd.f32 %v24409_v39, %v6461_v31 }
0x1827   :  { %v17058_v63 = vmul.f32 -1.442695, %v6386_v48  ;;  %v17060_v5 = vmul.f32 -1.442695, %v6462_v61  ;;  %v24488_v61 = vld [vmem:[%s26033_s28] ss:$0 sm:$0xff] }
0x1829   :  { %22743 = vpow2.f32 %v17058_v63 }
0x182a   :  { %22745 = vpow2.f32 %v17060_v5 }
0x182c   :  { %v6540_v10 = vpop.f32.mrb[80].mxu1  ;;  %v6612_v9 = vpop.f32.mrb[66].mxu0 }
0x182d   :  { %v19494_v11 = vpop.f32.mrb[81].mxu1  ;;  %v19505_v58 = vpop.f32.mrb[67].mxu0  ;;  %v6613_v33 = vadd.f32 %v24415_v60, %v6612_v9  ;;  %v6541_v20 = vadd.f32 %v24421_v2, %v6540_v10 }
0x182e   :  { %v24494_v58 = vld [vmem:[%s26034_s2] ss:$0 sm:$0xff] }
0x1833   :  { %v22744_v42 = vpop.eup %22743 }
0x1834   :  { %v6392_v17 = vadd.f32 1.0, %v22744_v42  ;;  %v22746_v19 = vpop.eup %22745 }
0x1835   :  { %v6468_v51 = vadd.f32 1.0, %v22746_v19 }
0x1836   :  { %22747 = vrcp.f32 %v6392_v17 }
0x1837   :  { %22749 = vrcp.f32 %v6468_v51 }
0x1840   :  { %v22748_v57 = vpop.eup %22747 }
0x1841   :  { %v6616_v59 = vmul.f32 %v22748_v57, %v6613_v33  ;;  %v22750_v24 = vpop.eup %22749 }
0x1842   :  { %v6619_v29 = vsub.f32 1.0, %v22750_v24  ;;  %v6621_v30 = vmul.f32 %v22750_v24, %v24078_v4  ;;  %v6694_v4 = vpop.permute.xlu1 %6693 }
0x1843   :  { %v6617_v37 = vadd.f32 %v6616_v59, %v6541_v20 }
0x1845   :  { %22751 = vtanh.f32 %v6617_v37 }
0x184f   :  { %v22752_v46 = vpop.eup %22751 }
0x1850   :  { %v6620_v31 = vmul.f32 %v22752_v46, %v6619_v29 }
0x1852   :  { %v24425_v48 = vadd.f32 %v6621_v30, %v6620_v31  ;;  %v24500_v30 = vld [vmem:[%s26035_s3] ss:$0 sm:$0xff] }
0x1854   :  { %19507 = vmatpush3.msra.mxu1 %v24425_v48 }
0x1855   :  { %19509 = vmatmul.mubr.msk.f32.vlgmr.msra.gmra.mrb[82].mxu1 %vm203_vm0, %v24084_v36  ;;  %21687 = vmatprep.subr.bf16.mxu1 %v23052_v7 }
0x1856   :  { %21689 = vmatpush3.bf16.msra.mxu1 %v23221_v8  ;;  %19527 = vmatprep.mubr.msk.f32.mxu1 %vm23050_vm1, %v23049_v0 }
0x1857   :  { %21690 = vmatprep.subr.bf16.mxu1 %v23052_v7 }
0x185a   :  { %21692 = vmatpush3.bf16.msra.mxu1 %v23244_v15 }
0x185b   :  { %21693 = vmatprep.subr.bf16.mxu1 %v23052_v7 }
0x185e   :  { %21695 = vmatpush3.bf16.msra.mxu1 %v23266_v21 }
0x185f   :  { %21696 = vmatprep.subr.bf16.mxu1 %v23052_v7 }
0x1862   :  { %21698 = vmatpush3.bf16.msra.mxu1 %v23286_v27 }
0x1863   :  { %21711 = vmatprep.subr.bf16.mxu1 %v23052_v7 }
0x1928   :  { %v6689_v36 = vpop.f32.mrb[82].mxu1 }
0x1929   :  { %v6696_v3 = vsel %vm281_vm2, %v6689_v36, %v6694_v4  ;;  %v19510_v55 = vpop.f32.mrb[83].mxu1 }
0x192a   :  { %19528 = vmatmul.mubr.msk.f32.vlgmr.msra.gmra.mrb[84].mxu1 %vm283_vm3, %v6696_v3  ;;  %19547 = vmatmul.mubr.msk.f32.vlgmr.msra.gmra.mrb[68].mxu0 %vm283_vm3, %v6696_v3 }
0x192b   :  { %21713 = vmatpush3.bf16.msra.mxu1 %v23309_v34  ;;  %21719 = vmatpush3.bf16.msra.mxu0 %v23317_v38 }
0x192c   :  { %21714 = vmatprep.subr.bf16.mxu1 %v23052_v7  ;;  %21720 = vmatprep.subr.bf16.mxu0 %v23052_v7 }
0x192d   :  { %19557 = vmatprep.mubr.msk.f32.mxu1 %vm23050_vm1, %v23049_v0  ;;  %19568 = vmatprep.mubr.msk.f32.mxu0 %vm23050_vm1, %v23049_v0 }
0x192f   :  { %21716 = vmatpush3.bf16.msra.mxu1 %v23329_v43  ;;  %21722 = vmatpush3.bf16.msra.mxu0 %v23335_v44 }
0x1930   :  { %19571 = vmatprep.subr.mxu1 %v23049_v0  ;;  %21723 = vmatprep.subr.bf16.mxu0 %v23052_v7 }
0x1932   :  { %19558 = vmatmul.mubr.msk.f32.vlgmr.msra.gmra.mrb[86].mxu1 %vm281_vm2, %v6689_v36  ;;  %19569 = vmatmul.mubr.msk.f32.vlgmr.msra.gmra.mrb[70].mxu0 %vm281_vm2, %v24346_v25  ;;  %v24506_v36 = vld [vmem:[%s26036_s11] ss:$0 sm:$0xff] }
0x1933   :  { %19572 = vmatpush3.msra.mxu1 %v24425_v48  ;;  %19573 = vmatprep.mubr.msk.f32.mxu1 %vm23050_vm1, %v23049_v0 }
0x1934   :  { %21735 = vmatprep.subr.bf16.mxu1 %v23052_v7  ;;  %21725 = vmatpush3.bf16.msra.mxu0 %v23221_v8 }
0x1935   :  { %21726 = vmatprep.subr.bf16.mxu0 %v23052_v7  ;;  %19592 = vmatprep.mubr.msk.f32.mxu0 %vm23050_vm1, %v23049_v0 }
0x1936   :  { %19574 = vmatmul.mubr.msk.f32.vlgmr.msra.gmra.mrb[88].mxu1 %vm203_vm0, %v24128_v56 }
0x1937   :  { %21737 = vmatpush3.bf16.msra.mxu1 %v23233_v12  ;;  %19611 = vmatprep.mubr.msk.f32.mxu1 %vm23050_vm1, %v23049_v0 }
0x1938   :  { %21738 = vmatprep.subr.bf16.mxu1 %v23052_v7  ;;  %21728 = vmatpush3.bf16.msra.mxu0 %v23244_v15 }
0x1939   :  { %21729 = vmatprep.subr.bf16.mxu0 %v23052_v7 }
0x193b   :  { %21740 = vmatpush3.bf16.msra.mxu1 %v23250_v16 }
0x193c   :  { %21741 = vmatprep.subr.bf16.mxu1 %v23052_v7  ;;  %21731 = vmatpush3.bf16.msra.mxu0 %v23266_v21 }
0x193d   :  { %21732 = vmatprep.subr.bf16.mxu0 %v23052_v7 }
0x193f   :  { %21743 = vmatpush3.bf16.msra.mxu1 %v23270_v22 }
0x1940   :  { %21744 = vmatprep.subr.bf16.mxu1 %v23052_v7  ;;  %21734 = vmatpush3.bf16.msra.mxu0 %v23286_v27 }
0x1941   :  { %21747 = vmatprep.subr.bf16.mxu0 %v23052_v7 }
0x1943   :  { %21746 = vmatpush3.bf16.msra.mxu1 %v23290_v28 }
0x1944   :  { %21753 = vmatprep.subr.bf16.mxu1 %v23052_v7 }
0x19fd   :  { %v6766_v56 = vpop.f32.mrb[84].mxu1  ;;  %v6842_v63 = vpop.f32.mrb[68].mxu0 }
0x19fe   :  { %v6767_v5 = vadd.f32 %v24488_v61, %v6766_v56  ;;  %v19529_v10 = vpop.f32.mrb[85].mxu1  ;;  %v19548_v9 = vpop.f32.mrb[69].mxu0  ;;  %v6843_v42 = vadd.f32 %v24494_v58, %v6842_v63 }
0x1a00   :  { %v17065_v11 = vmul.f32 -1.442695, %v6767_v5  ;;  %v17067_v17 = vmul.f32 -1.442695, %v6843_v42 }
0x1a02   :  { %22753 = vpow2.f32 %v17065_v11 }
0x1a03   :  { %22755 = vpow2.f32 %v17067_v17 }
0x1a05   :  { %v6921_v19 = vpop.f32.mrb[86].mxu1  ;;  %v6993_v51 = vpop.f32.mrb[70].mxu0 }
0x1a06   :  { %v19559_v33 = vpop.f32.mrb[87].mxu1  ;;  %v19570_v57 = vpop.f32.mrb[71].mxu0  ;;  %v6994_v31 = vadd.f32 %v24500_v30, %v6993_v51  ;;  %v6922_v3 = vadd.f32 %v24506_v36, %v6921_v19 }
0x1a09   :  { %v7070_v20 = vpop.f32.mrb[88].mxu1 }
0x1a0a   :  { %v19575_v59 = vpop.f32.mrb[89].mxu1 }
0x1a0c   :  { %v22754_v37 = vpop.eup %22753 }
0x1a0d   :  { %v6773_v24 = vadd.f32 1.0, %v22754_v37  ;;  %v22756_v29 = vpop.eup %22755 }
0x1a0e   :  { %v6849_v46 = vadd.f32 1.0, %v22756_v29 }
0x1a0f   :  { %22757 = vrcp.f32 %v6773_v24 }
0x1a10   :  { %22759 = vrcp.f32 %v6849_v46 }
0x1a19   :  { %v22758_v4 = vpop.eup %22757 }
0x1a1a   :  { %v6997_v55 = vmul.f32 %v22758_v4, %v6994_v31  ;;  %v22760_v63 = vpop.eup %22759 }
0x1a1b   :  { %v7000_v5 = vsub.f32 1.0, %v22760_v63  ;;  %v7002_v11 = vmul.f32 %v22760_v63, %v24346_v25 }
0x1a1c   :  { %v6998_v56 = vadd.f32 %v6997_v55, %v6922_v3 }
0x1a1e   :  { %22761 = vtanh.f32 %v6998_v56 }
0x1a28   :  { %v22762_v10 = vpop.eup %22761 }
0x1a29   :  { %v7001_v9 = vmul.f32 %v22762_v10, %v7000_v5 }
0x1a2b   :  { %v24510_v42 = vadd.f32 %v7002_v11, %v7001_v9 }
0x1a2d   :  { %7075 = vrot.lane.b32.xlu0 %v24510_v42, %s23051_s30 }
0x1a9f   :  { %v7076_v17 = vpop.permute.xlu0 %7075 }
0x1aa0   :  { %v7078_v51 = vsel %vm281_vm2, %v7070_v20, %v7076_v17 }
0x1aa1   :  { %19593 = vmatmul.mubr.msk.f32.vlgmr.msra.gmra.mrb[72].mxu0 %vm283_vm3, %v7078_v51  ;;  %19612 = vmatmul.mubr.msk.f32.vlgmr.msra.gmra.mrb[90].mxu1 %vm283_vm3, %v7078_v51 }
0x1aa2   :  { %21749 = vmatpush3.bf16.msra.mxu0 %v23309_v34  ;;  %21755 = vmatpush3.bf16.msra.mxu1 %v23317_v38 }
0x1aa3   :  { %21750 = vmatprep.subr.bf16.mxu0 %v23052_v7  ;;  %21756 = vmatprep.subr.bf16.mxu1 %v23052_v7 }
0x1aa4   :  { %19622 = vmatprep.mubr.msk.f32.mxu0 %vm23050_vm1, %v23049_v0  ;;  %19633 = vmatprep.mubr.msk.f32.mxu1 %vm23050_vm1, %v23049_v0 }
0x1aa6   :  { %21752 = vmatpush3.bf16.msra.mxu0 %v23329_v43  ;;  %21758 = vmatpush3.bf16.msra.mxu1 %v23335_v44 }
0x1aa7   :  { %19646 = vmatprep.subr.mxu1 %v23049_v0  ;;  %19636 = vmatprep.subr.mxu0 %v23049_v0 }
0x1aa9   :  { %19623 = vmatmul.mubr.msk.f32.vlgmr.msra.gmra.mrb[74].mxu0 %vm281_vm2, %v7070_v20  ;;  %19634 = vmatmul.mubr.msk.f32.vlgmr.msra.gmra.mrb[92].mxu1 %vm281_vm2, %v24510_v42 }
0x1aaa   :  { %19647 = vmatpush3.msra.mxu1 %v24425_v48  ;;  %19648 = vmatprep.mubr.msk.f32.mxu1 %vm23050_vm1, %v23049_v0 }
0x1aab   :  { %19638 = vmatprep.mubr.msk.f32.mxu0 %vm23050_vm1, %v23049_v0  ;;  %21759 = vmatprep.subr.bf16.mxu1 %v23052_v7 }
0x1aad   :  { %19649 = vmatmul.mubr.msk.f32.vlgmr.msra.gmra.mrb[94].mxu1 %vm203_vm0, %v24184_v49 }
0x1aae   :  { %21761 = vmatpush3.bf16.msra.mxu1 %v23221_v8  ;;  %19667 = vmatprep.mubr.msk.f32.mxu1 %vm23050_vm1, %v23049_v0 }
0x1aaf   :  { %21762 = vmatprep.subr.bf16.mxu1 %v23052_v7 }
0x1ab2   :  { %21764 = vmatpush3.bf16.msra.mxu1 %v23244_v15 }
0x1ab3   :  { %21765 = vmatprep.subr.bf16.mxu1 %v23052_v7 }
0x1ab6   :  { %21767 = vmatpush3.bf16.msra.mxu1 %v23266_v21 }
0x1ab7   :  { %21768 = vmatprep.subr.bf16.mxu1 %v23052_v7 }
0x1aba   :  { %21770 = vmatpush3.bf16.msra.mxu1 %v23286_v27 }
0x1abb   :  { %21783 = vmatprep.subr.bf16.mxu1 %v23052_v7 }
0x1b74   :  { %v7148_v49 = vpop.f32.mrb[72].mxu0  ;;  %v7224_v25 = vpop.f32.mrb[90].mxu1 }
0x1b75   :  { %v7149_v19 = vadd.f32 %v24488_v61, %v7148_v49  ;;  %v19594_v33 = vpop.f32.mrb[73].mxu0  ;;  %v19613_v57 = vpop.f32.mrb[91].mxu1  ;;  %v7225_v59 = vadd.f32 %v24494_v58, %v7224_v25 }
0x1b77   :  { %v17072_v20 = vmul.f32 -1.442695, %v7149_v19  ;;  %v17074_v37 = vmul.f32 -1.442695, %v7225_v59 }
0x1b79   :  { %22763 = vpow2.f32 %v17072_v20 }
0x1b7a   :  { %22765 = vpow2.f32 %v17074_v37 }
0x1b7c   :  { %v7303_v24 = vpop.f32.mrb[74].mxu0  ;;  %v7375_v29 = vpop.f32.mrb[92].mxu1 }
0x1b7d   :  { %v19624_v46 = vpop.f32.mrb[75].mxu0  ;;  %v19635_v31 = vpop.f32.mrb[93].mxu1  ;;  %v7376_v10 = vadd.f32 %v24500_v30, %v7375_v29  ;;  %v7304_v11 = vadd.f32 %v24506_v36, %v7303_v24 }
0x1b80   :  { %v7597_v4 = vpop.f32.mrb[94].mxu1 }
0x1b81   :  { %v19650_v3 = vpop.f32.mrb[95].mxu1 }
0x1b83   :  { %v22764_v55 = vpop.eup %22763 }
0x1b84   :  { %v7155_v56 = vadd.f32 1.0, %v22764_v55  ;;  %v22766_v63 = vpop.eup %22765 }
0x1b85   :  { %v7231_v5 = vadd.f32 1.0, %v22766_v63 }
0x1b86   :  { %22767 = vrcp.f32 %v7155_v56 }
0x1b87   :  { %22769 = vrcp.f32 %v7231_v5 }
0x1b90   :  { %v22768_v9 = vpop.eup %22767 }
0x1b91   :  { %v7379_v17 = vmul.f32 %v22768_v9, %v7376_v10  ;;  %v22770_v49 = vpop.eup %22769 }
0x1b92   :  { %v7382_v25 = vsub.f32 1.0, %v22770_v49  ;;  %v7384_v57 = vmul.f32 %v22770_v49, %v24510_v42 }
0x1b93   :  { %v7380_v51 = vadd.f32 %v7379_v17, %v7304_v11 }
0x1b95   :  { %22771 = vtanh.f32 %v7380_v51 }
0x1b9f   :  { %v22772_v19 = vpop.eup %22771 }
0x1ba0   :  { %v7383_v33 = vmul.f32 %v22772_v19, %v7382_v25 }
0x1ba2   :  { %v24555_v20 = vadd.f32 %v7384_v57, %v7383_v33 }
0x1ba4   :  { %7601 = vrot.lane.b32.xlu1 %v24555_v20, %s23051_s30  ;;  %19637 = vmatpush3.msk.msra.mxu0 %vm980_vm4, %v24555_v20 }
0x1ba5   :  { %19641 = vmatprep.subr.mxu0 %v23049_v0  ;;  %19639 = vmatmul.mubr.msk.f32.vlgmr.msra.gmra.mrb[76].mxu0 %vm976_vm5, %v24213_v62 }
0x1ba6   :  { %19642 = vmatpush3.msk.msra.mxu0 %vm980_vm4, %v24510_v42  ;;  %19643 = vmatprep.mubr.msk.f32.mxu0 %vm23050_vm1, %v23049_v0 }
0x1ba7   :  { %21771 = vmatprep.subr.bf16.mxu0 %v23052_v7 }
0x1ba8   :  { %8442 = vrot.lane.b32.xlu1 %v24425_v48, %s23051_s30 }
0x1bad   :  { %19644 = vmatmul.mubr.msk.f32.vlgmr.msra.gmra.mrb[76].mxu0 %vm976_vm5, %v24227_v14 }
0x1bae   :  { %21773 = vmatpush3.bf16.msra.mxu0 %v23233_v12  ;;  %19686 = vmatprep.mubr.msk.f32.mxu0 %vm23050_vm1, %v23049_v0 }
0x1baf   :  { %21774 = vmatprep.subr.bf16.mxu0 %v23052_v7 }
0x1bb2   :  { %21776 = vmatpush3.bf16.msra.mxu0 %v23250_v16 }
0x1bb3   :  { %21777 = vmatprep.subr.bf16.mxu0 %v23052_v7 }
0x1bb6   :  { %21779 = vmatpush3.bf16.msra.mxu0 %v23270_v22 }
0x1bb7   :  { %21780 = vmatprep.subr.bf16.mxu0 %v23052_v7 }
0x1bba   :  { %21782 = vmatpush3.bf16.msra.mxu0 %v23290_v28 }
0x1bbb   :  { %21789 = vmatprep.subr.bf16.mxu0 %v23052_v7 }
0x1c16   :  { %v7602_v62 = vpop.permute.xlu1 %7601 }
0x1c17   :  { %v7604_v14 = vsel %vm281_vm2, %v7597_v4, %v7602_v62 }
0x1c18   :  { %19668 = vmatmul.mubr.msk.f32.vlgmr.msra.gmra.mrb[96].mxu1 %vm283_vm3, %v7604_v14  ;;  %19687 = vmatmul.mubr.msk.f32.vlgmr.msra.gmra.mrb[78].mxu0 %vm283_vm3, %v7604_v14 }
0x1c19   :  { %21785 = vmatpush3.bf16.msra.mxu1 %v23309_v34  ;;  %21791 = vmatpush3.bf16.msra.mxu0 %v23317_v38 }
0x1c1a   :  { %21786 = vmatprep.subr.bf16.mxu1 %v23052_v7  ;;  %21792 = vmatprep.subr.bf16.mxu0 %v23052_v7 }
0x1c1b   :  { %19697 = vmatprep.mubr.msk.f32.mxu1 %vm23050_vm1, %v23049_v0  ;;  %19708 = vmatprep.mubr.msk.f32.mxu0 %vm23050_vm1, %v23049_v0 }
0x1c1d   :  { %21788 = vmatpush3.bf16.msra.mxu1 %v23329_v43  ;;  %21794 = vmatpush3.bf16.msra.mxu0 %v23335_v44 }
0x1c1e   :  { %19716 = vmatprep.subr.mxu1 %v23049_v0  ;;  %19711 = vmatprep.subr.mxu0 %v23049_v0 }
0x1c20   :  { %19698 = vmatmul.mubr.msk.f32.vlgmr.msra.gmra.mrb[98].mxu1 %vm281_vm2, %v7597_v4  ;;  %19709 = vmatmul.mubr.msk.f32.vlgmr.msra.gmra.mrb[80].mxu0 %vm281_vm2, %v24555_v20 }
0x1c21   :  { %19717 = vmatpush3.msra.mxu1 %v24425_v48  ;;  %19718 = vmatprep.mubr.msk.f32.mxu1 %vm23050_vm1, %v23049_v0 }
0x1c22   :  { %19713 = vmatprep.mubr.msk.f32.mxu0 %vm23050_vm1, %v23049_v0  ;;  %21795 = vmatprep.subr.bf16.mxu1 %v23052_v7 }
0x1c24   :  { %19719 = vmatmul.mubr.msk.f32.vlgmr.msra.gmra.mrb[100].mxu1 %vm203_vm0, %v24268_v1 }
0x1c25   :  { %21797 = vmatpush3.bf16.msra.mxu1 %v23221_v8  ;;  %19737 = vmatprep.mubr.msk.f32.mxu1 %vm23050_vm1, %v23049_v0 }
0x1c26   :  { %21798 = vmatprep.subr.bf16.mxu1 %v23052_v7 }
0x1c29   :  { %21800 = vmatpush3.bf16.msra.mxu1 %v23244_v15 }
0x1c2a   :  { %21801 = vmatprep.subr.bf16.mxu1 %v23052_v7 }
0x1c2d   :  { %21803 = vmatpush3.bf16.msra.mxu1 %v23266_v21 }
0x1c2e   :  { %21804 = vmatprep.subr.bf16.mxu1 %v23052_v7 }
0x1c31   :  { %21806 = vmatpush3.bf16.msra.mxu1 %v23286_v27 }
0x1c32   :  { %21819 = vmatprep.subr.bf16.mxu1 %v23052_v7 }
0x1ceb   :  { %v7674_v1 = vpop.f32.mrb[96].mxu1  ;;  %v7750_v42 = vpop.f32.mrb[78].mxu0 }
0x1cec   :  { %v7675_v59 = vadd.f32 %v24488_v61, %v7674_v1  ;;  %v19669_v37 = vpop.f32.mrb[97].mxu1  ;;  %v19688_v24 = vpop.f32.mrb[79].mxu0  ;;  %v7751_v46 = vadd.f32 %v24494_v58, %v7750_v42 }
0x1cee   :  { %v17083_v29 = vmul.f32 -1.442695, %v7675_v59  ;;  %v17085_v31 = vmul.f32 -1.442695, %v7751_v46 }
0x1cf0   :  { %22773 = vpow2.f32 %v17083_v29 }
0x1cf1   :  { %22775 = vpow2.f32 %v17085_v31 }
0x1cf3   :  { %v7829_v4 = vpop.f32.mrb[98].mxu1  ;;  %v7901_v3 = vpop.f32.mrb[80].mxu0 }
0x1cf4   :  { %v19699_v55 = vpop.f32.mrb[99].mxu1  ;;  %v19710_v56 = vpop.f32.mrb[81].mxu0  ;;  %v7902_v51 = vadd.f32 %v24500_v30, %v7901_v3  ;;  %v7830_v25 = vadd.f32 %v24506_v36, %v7829_v4 }
0x1cf7   :  { %v8052_v63 = vpop.f32.mrb[100].mxu1 }
0x1cf8   :  { %v19720_v5 = vpop.f32.mrb[101].mxu1 }
0x1cfa   :  { %v22774_v10 = vpop.eup %22773 }
0x1cfb   :  { %v7681_v9 = vadd.f32 1.0, %v22774_v10  ;;  %v22776_v11 = vpop.eup %22775 }
0x1cfc   :  { %v7757_v17 = vadd.f32 1.0, %v22776_v11 }
0x1cfd   :  { %22777 = vrcp.f32 %v7681_v9 }
0x1cfe   :  { %22779 = vrcp.f32 %v7757_v17 }
0x1d07   :  { %v22778_v49 = vpop.eup %22777 }
0x1d08   :  { %v7905_v19 = vmul.f32 %v22778_v49, %v7902_v51  ;;  %v22780_v57 = vpop.eup %22779 }
0x1d09   :  { %v7908_v62 = vsub.f32 1.0, %v22780_v57  ;;  %v7910_v42 = vmul.f32 %v22780_v57, %v24555_v20 }
0x1d0a   :  { %v7906_v33 = vadd.f32 %v7905_v19, %v7830_v25 }
0x1d0c   :  { %22781 = vtanh.f32 %v7906_v33 }
0x1d16   :  { %v22782_v14 = vpop.eup %22781 }
0x1d17   :  { %v7909_v1 = vmul.f32 %v22782_v14, %v7908_v62 }
0x1d19   :  { %v24624_v59 = vadd.f32 %v7910_v42, %v7909_v1 }
0x1d1b   :  { %8056 = vrot.lane.b32.xlu0 %v24624_v59, %s23051_s30  ;;  %19712 = vmatpush3.msk.msra.mxu0 %vm980_vm4, %v24624_v59 }
0x1d1c   :  { %21807 = vmatprep.subr.bf16.mxu0 %v23052_v7  ;;  %19714 = vmatmul.mubr.msk.f32.vlgmr.msra.gmra.mrb[76].mxu0 %vm976_vm5, %v24297_v45 }
0x1d1d   :  { %21809 = vmatpush3.bf16.msra.mxu0 %v23233_v12  ;;  %19756 = vmatprep.mubr.msk.f32.mxu0 %vm23050_vm1, %v23049_v0 }
0x1d1e   :  { %21810 = vmatprep.subr.bf16.mxu0 %v23052_v7 }
0x1d21   :  { %21812 = vmatpush3.bf16.msra.mxu0 %v23250_v16 }
0x1d22   :  { %21813 = vmatprep.subr.bf16.mxu0 %v23052_v7 }
0x1d25   :  { %21815 = vmatpush3.bf16.msra.mxu0 %v23270_v22 }
0x1d26   :  { %21816 = vmatprep.subr.bf16.mxu0 %v23052_v7 }
0x1d29   :  { %21818 = vmatpush3.bf16.msra.mxu0 %v23290_v28 }
0x1d2a   :  { %21825 = vmatprep.subr.bf16.mxu0 %v23052_v7 }
0x1d8d   :  { %v8057_v45 = vpop.permute.xlu0 %8056 }
0x1d8e   :  { %v8059_v20 = vsel %vm281_vm2, %v8052_v63, %v8057_v45 }
0x1d8f   :  { %19738 = vmatmul.mubr.msk.f32.vlgmr.msra.gmra.mrb[102].mxu1 %vm283_vm3, %v8059_v20  ;;  %19757 = vmatmul.mubr.msk.f32.vlgmr.msra.gmra.mrb[82].mxu0 %vm283_vm3, %v8059_v20 }
0x1d90   :  { %21821 = vmatpush3.bf16.msra.mxu1 %v23309_v34  ;;  %21827 = vmatpush3.bf16.msra.mxu0 %v23317_v38 }
0x1d91   :  { %21822 = vmatprep.subr.bf16.mxu1 %v23052_v7  ;;  %21828 = vmatprep.subr.bf16.mxu0 %v23052_v7 }
0x1d92   :  { %19767 = vmatprep.mubr.msk.f32.mxu1 %vm23050_vm1, %v23049_v0  ;;  %19778 = vmatprep.mubr.msk.f32.mxu0 %vm23050_vm1, %v23049_v0 }
0x1d94   :  { %21824 = vmatpush3.bf16.msra.mxu1 %v23329_v43  ;;  %21830 = vmatpush3.bf16.msra.mxu0 %v23335_v44 }
0x1d95   :  { %19781 = vmatprep.subr.mxu0 %v23049_v0  ;;  %21831 = vmatprep.subr.bf16.mxu1 %v23052_v7 }
0x1d97   :  { %19768 = vmatmul.mubr.msk.f32.vlgmr.msra.gmra.mrb[104].mxu1 %vm281_vm2, %v8052_v63  ;;  %19779 = vmatmul.mubr.msk.f32.vlgmr.msra.gmra.mrb[84].mxu0 %vm281_vm2, %v24624_v59 }
0x1d98   :  { %19783 = vmatprep.mubr.msk.f32.mxu0 %vm23050_vm1, %v23049_v0  ;;  %21833 = vmatpush3.bf16.msra.mxu1 %v23593_v40 }
0x1d99   :  { %21834 = vmatprep.subr.bf16.mxu1 %v23052_v7  ;;  %19802 = vmatprep.mubr.msk.f32.mxu1 %vm23050_vm1, %v23049_v0 }
0x1d9c   :  { %21836 = vmatpush3.bf16.msra.mxu1 %v23602_v47 }
0x1d9d   :  { %21837 = vmatprep.subr.bf16.mxu1 %v23052_v7 }
0x1da0   :  { %21839 = vmatpush3.bf16.msra.mxu1 %v23615_v54 }
0x1da1   :  { %21840 = vmatprep.subr.bf16.mxu1 %v23052_v7 }
0x1da4   :  { %21842 = vmatpush3.bf16.msra.mxu1 %v23638_v13 }
0x1da5   :  { %21855 = vmatprep.subr.bf16.mxu1 %v23052_v7 }
0x1e62   :  { %v8129_v37 = vpop.f32.mrb[102].mxu1  ;;  %v8205_v24 = vpop.f32.mrb[82].mxu0 }
0x1e63   :  { %v8130_v29 = vadd.f32 %v24488_v61, %v8129_v37  ;;  %v19739_v46 = vpop.f32.mrb[103].mxu1  ;;  %v19758_v31 = vpop.f32.mrb[83].mxu0  ;;  %v8206_v3 = vadd.f32 %v24494_v58, %v8205_v24 }
0x1e65   :  { %v17092_v4 = vmul.f32 -1.442695, %v8130_v29  ;;  %v17094_v55 = vmul.f32 -1.442695, %v8206_v3 }
0x1e67   :  { %22783 = vpow2.f32 %v17092_v4 }
0x1e68   :  { %22785 = vpow2.f32 %v17094_v55 }
0x1e6a   :  { %v8284_v56 = vpop.f32.mrb[104].mxu1  ;;  %v8356_v63 = vpop.f32.mrb[84].mxu0 }
0x1e6b   :  { %v19769_v5 = vpop.f32.mrb[105].mxu1  ;;  %v19780_v10 = vpop.f32.mrb[85].mxu0  ;;  %v8357_v49 = vadd.f32 %v24500_v30, %v8356_v63  ;;  %v8285_v19 = vadd.f32 %v24506_v36, %v8284_v56 }
0x1e71   :  { %v22784_v9 = vpop.eup %22783 }
0x1e72   :  { %v8136_v11 = vadd.f32 1.0, %v22784_v9  ;;  %v22786_v17 = vpop.eup %22785 }
0x1e73   :  { %v8212_v51 = vadd.f32 1.0, %v22786_v17 }
0x1e74   :  { %22787 = vrcp.f32 %v8136_v11 }
0x1e75   :  { %22789 = vrcp.f32 %v8212_v51 }
0x1e7e   :  { %v22788_v25 = vpop.eup %22787 }
0x1e7f   :  { %v8360_v33 = vmul.f32 %v22788_v25, %v8357_v49  ;;  %v22790_v62 = vpop.eup %22789 }
0x1e80   :  { %v8363_v14 = vsub.f32 1.0, %v22790_v62  ;;  %v8365_v45 = vmul.f32 %v22790_v62, %v24624_v59 }
0x1e81   :  { %v8361_v57 = vadd.f32 %v8360_v33, %v8285_v19 }
0x1e83   :  { %22791 = vtanh.f32 %v8361_v57 }
0x1e8d   :  { %v22792_v1 = vpop.eup %22791 }
0x1e8e   :  { %v8364_v42 = vmul.f32 %v22792_v1, %v8363_v14 }
0x1e90   :  { %v24678_v20 = vadd.f32 %v8365_v45, %v8364_v42 }
0x1e92   :  { %8823 = vrot.lane.b32.xlu0 %v24678_v20, %s23051_s30  ;;  %19782 = vmatpush3.msk.msra.mxu0 %vm980_vm4, %v24678_v20 }
0x1e93   :  { %19784 = vmatmul.mubr.msk.f32.vlgmr.msra.gmra.mrb[76].mxu0 %vm976_vm5, %v24355_v50  ;;  %21843 = vmatprep.subr.bf16.mxu0 %v23052_v7  ;;  %v8443_v50 = vpop.permute.xlu1 %8442 }
0x1e94   :  { %21845 = vmatpush3.bf16.msra.mxu0 %v23635_v6  ;;  %19821 = vmatprep.mubr.msk.f32.mxu0 %vm23050_vm1, %v23049_v0 }
0x1e95   :  { %21846 = vmatprep.subr.bf16.mxu0 %v23052_v7 }
0x1e98   :  { %21848 = vmatpush3.bf16.msra.mxu0 %v23655_v18 }
0x1e99   :  { %21849 = vmatprep.subr.bf16.mxu0 %v23052_v7 }
0x1e9c   :  { %21851 = vmatpush3.bf16.msra.mxu0 %v23669_v23 }
0x1e9d   :  { %21852 = vmatprep.subr.bf16.mxu0 %v23052_v7 }
0x1ea0   :  { %21854 = vmatpush3.bf16.msra.mxu0 %v23679_v26 }
0x1ea1   :  { %21861 = vmatprep.subr.bf16.mxu0 %v23052_v7 }
0x1f66   :  { %v8436_v59 = vpop.f32.mrb[76].mxu0 }
0x1f67   :  { %v8445_v37 = vsel %vm281_vm2, %v8436_v59, %v8443_v50  ;;  %v19785_v24 = vpop.f32.mrb[77].mxu0 }
0x1f68   :  { %19803 = vmatmul.mubr.msk.f32.vlgmr.msra.gmra.mrb[106].mxu1 %vm283_vm3, %v8445_v37  ;;  %19822 = vmatmul.mubr.msk.f32.vlgmr.msra.gmra.mrb[86].mxu0 %vm283_vm3, %v8445_v37  ;;  %v24782_v24 = vld [vmem:[%s26027_s5 + $0x4] sm:$0xf] }
0x1f69   :  { %21857 = vmatpush3.bf16.msra.mxu1 %v23696_v35  ;;  %21863 = vmatpush3.bf16.msra.mxu0 %v23704_v41 }
0x1f6a   :  { %21858 = vmatprep.subr.bf16.mxu1 %v23052_v7  ;;  %21864 = vmatprep.subr.bf16.mxu0 %v23052_v7 }
0x1f6b   :  { %19832 = vmatprep.mubr.msk.f32.mxu1 %vm23050_vm1, %v23049_v0  ;;  %19843 = vmatprep.mubr.msk.f32.mxu0 %vm23050_vm1, %v23049_v0 }
0x1f6d   :  { %21860 = vmatpush3.bf16.msra.mxu1 %v23716_v52  ;;  %21866 = vmatpush3.bf16.msra.mxu0 %v23722_v53 }
0x1f6e   :  { %19846 = vmatprep.subr.mxu1 %v23049_v0  ;;  %21879 = vmatprep.subr.bf16.mxu0 %v23052_v7 }
0x1f70   :  { %19833 = vmatmul.mubr.msk.f32.vlgmr.msra.gmra.mrb[108].mxu1 %vm281_vm2, %v8436_v59  ;;  %19844 = vmatmul.mubr.msk.f32.vlgmr.msra.gmra.mrb[88].mxu0 %vm281_vm2, %v24425_v48 }
0x1f71   :  { %19848 = vmatprep.mubr.msk.f32.mxu1 %vm23050_vm1, %v23049_v0  ;;  %21881 = vmatpush3.bf16.msra.mxu0 %v23233_v12 }
0x1f72   :  { %21882 = vmatprep.subr.bf16.mxu0 %v23052_v7  ;;  %19886 = vmatprep.mubr.msk.f32.mxu0 %vm23050_vm1, %v23049_v0 }
0x1f75   :  { %21884 = vmatpush3.bf16.msra.mxu0 %v23250_v16 }
0x1f76   :  { %21885 = vmatprep.subr.bf16.mxu0 %v23052_v7 }
0x1f79   :  { %21887 = vmatpush3.bf16.msra.mxu0 %v23270_v22 }
0x1f7a   :  { %21888 = vmatprep.subr.bf16.mxu0 %v23052_v7 }
0x1f7d   :  { %21890 = vmatpush3.bf16.msra.mxu0 %v23290_v28 }
0x1f7e   :  { %21897 = vmatprep.subr.bf16.mxu0 %v23052_v7 }
0x203b   :  { %v8515_v29 = vpop.f32.mrb[106].mxu1  ;;  %v8591_v46 = vpop.f32.mrb[86].mxu0 }
0x203c   :  { %v8516_v31 = vadd.f32 %v24403_v32, %v8515_v29  ;;  %v19804_v4 = vpop.f32.mrb[107].mxu1  ;;  %v19823_v3 = vpop.f32.mrb[87].mxu0  ;;  %v8592_v56 = vadd.f32 %v24409_v39, %v8591_v46 }
0x203e   :  { %v17100_v55 = vmul.f32 -1.442695, %v8516_v31  ;;  %v17102_v63 = vmul.f32 -1.442695, %v8592_v56 }
0x2040   :  { %22793 = vpow2.f32 %v17100_v55 }
0x2041   :  { %22795 = vpow2.f32 %v17102_v63 }
0x2043   :  { %v8670_v5 = vpop.f32.mrb[108].mxu1  ;;  %v8742_v10 = vpop.f32.mrb[88].mxu0 }
0x2044   :  { %v19834_v9 = vpop.f32.mrb[109].mxu1  ;;  %v19845_v11 = vpop.f32.mrb[89].mxu0  ;;  %v8743_v19 = vadd.f32 %v24415_v60, %v8742_v10  ;;  %v8671_v33 = vadd.f32 %v24421_v2, %v8670_v5  ;;  %v24738_v60 = vld [vmem:[%s26027_s5] sm:$0xf] }
0x2045   :  { %v8824_v2 = vpop.permute.xlu0 %8823 }
0x204a   :  { %v22794_v17 = vpop.eup %22793 }
0x204b   :  { %v8522_v51 = vadd.f32 1.0, %v22794_v17  ;;  %v22796_v49 = vpop.eup %22795 }
0x204c   :  { %v8598_v25 = vadd.f32 1.0, %v22796_v49 }
0x204d   :  { %22797 = vrcp.f32 %v8522_v51 }
0x204e   :  { %22799 = vrcp.f32 %v8598_v25 }
0x2057   :  { %v22798_v32 = vpop.eup %22797 }
0x2058   :  { %v8746_v57 = vmul.f32 %v22798_v32, %v8743_v19  ;;  %v22800_v62 = vpop.eup %22799 }
0x2059   :  { %v8749_v14 = vsub.f32 1.0, %v22800_v62  ;;  %v8751_v42 = vmul.f32 %v22800_v62, %v24425_v48 }
0x205a   :  { %v8747_v39 = vadd.f32 %v8746_v57, %v8671_v33 }
0x205c   :  { %22801 = vtanh.f32 %v8747_v39 }
0x2066   :  { %v22802_v1 = vpop.eup %22801 }
0x2067   :  { %v8750_v45 = vmul.f32 %v22802_v1, %v8749_v14 }
0x2069   :  { %v24732_v50 = vadd.f32 %v8751_v42, %v8750_v45 }
0x206b   :  { %19847 = vmatpush3.msra.mxu1 %v24732_v50 }
0x206c   :  { %19849 = vmatmul.mubr.msk.f32.vlgmr.msra.gmra.mrb[110].mxu1 %vm203_vm0, %v24738_v60  ;;  %21867 = vmatprep.subr.bf16.mxu1 %v23052_v7 }
0x206d   :  { %21869 = vmatpush3.bf16.msra.mxu1 %v23221_v8  ;;  %19867 = vmatprep.mubr.msk.f32.mxu1 %vm23050_vm1, %v23049_v0 }
0x206e   :  { %21870 = vmatprep.subr.bf16.mxu1 %v23052_v7 }
0x2071   :  { %21872 = vmatpush3.bf16.msra.mxu1 %v23244_v15 }
0x2072   :  { %21873 = vmatprep.subr.bf16.mxu1 %v23052_v7 }
0x2075   :  { %21875 = vmatpush3.bf16.msra.mxu1 %v23266_v21 }
0x2076   :  { %21876 = vmatprep.subr.bf16.mxu1 %v23052_v7 }
0x2079   :  { %21878 = vmatpush3.bf16.msra.mxu1 %v23286_v27 }
0x207a   :  { %21891 = vmatprep.subr.bf16.mxu1 %v23052_v7 }
0x213f   :  { %v8819_v48 = vpop.f32.mrb[110].mxu1 }
0x2140   :  { %v8826_v59 = vsel %vm281_vm2, %v8819_v48, %v8824_v2  ;;  %v19850_v37 = vpop.f32.mrb[111].mxu1 }
0x2141   :  { %19868 = vmatmul.mubr.msk.f32.vlgmr.msra.gmra.mrb[112].mxu1 %vm283_vm3, %v8826_v59  ;;  %19887 = vmatmul.mubr.msk.f32.vlgmr.msra.gmra.mrb[90].mxu0 %vm283_vm3, %v8826_v59 }
0x2142   :  { %21893 = vmatpush3.bf16.msra.mxu1 %v23309_v34  ;;  %21899 = vmatpush3.bf16.msra.mxu0 %v23317_v38 }
0x2143   :  { %21894 = vmatprep.subr.bf16.mxu1 %v23052_v7  ;;  %21900 = vmatprep.subr.bf16.mxu0 %v23052_v7 }
0x2144   :  { %19897 = vmatprep.mubr.msk.f32.mxu1 %vm23050_vm1, %v23049_v0  ;;  %19908 = vmatprep.mubr.msk.f32.mxu0 %vm23050_vm1, %v23049_v0 }
0x2146   :  { %21896 = vmatpush3.bf16.msra.mxu1 %v23329_v43  ;;  %21902 = vmatpush3.bf16.msra.mxu0 %v23335_v44 }
0x2147   :  { %19911 = vmatprep.subr.mxu1 %v23049_v0  ;;  %21903 = vmatprep.subr.bf16.mxu0 %v23052_v7 }
0x2149   :  { %19898 = vmatmul.mubr.msk.f32.vlgmr.msra.gmra.mrb[114].mxu1 %vm281_vm2, %v8819_v48  ;;  %19909 = vmatmul.mubr.msk.f32.vlgmr.msra.gmra.mrb[92].mxu0 %vm281_vm2, %v24678_v20 }
0x214a   :  { %19912 = vmatpush3.msra.mxu1 %v24732_v50  ;;  %19913 = vmatprep.mubr.msk.f32.mxu1 %vm23050_vm1, %v23049_v0 }
0x214b   :  { %21915 = vmatprep.subr.bf16.mxu1 %v23052_v7  ;;  %21905 = vmatpush3.bf16.msra.mxu0 %v23221_v8 }
0x214c   :  { %21906 = vmatprep.subr.bf16.mxu0 %v23052_v7  ;;  %19932 = vmatprep.mubr.msk.f32.mxu0 %vm23050_vm1, %v23049_v0 }
0x214d   :  { %19914 = vmatmul.mubr.msk.f32.vlgmr.msra.gmra.mrb[116].mxu1 %vm203_vm0, %v24782_v24 }
0x214e   :  { %21917 = vmatpush3.bf16.msra.mxu1 %v23233_v12  ;;  %19951 = vmatprep.mubr.msk.f32.mxu1 %vm23050_vm1, %v23049_v0 }
0x214f   :  { %21918 = vmatprep.subr.bf16.mxu1 %v23052_v7  ;;  %21908 = vmatpush3.bf16.msra.mxu0 %v23244_v15 }
0x2150   :  { %21909 = vmatprep.subr.bf16.mxu0 %v23052_v7 }
0x2152   :  { %21920 = vmatpush3.bf16.msra.mxu1 %v23250_v16 }
0x2153   :  { %21921 = vmatprep.subr.bf16.mxu1 %v23052_v7  ;;  %21911 = vmatpush3.bf16.msra.mxu0 %v23266_v21 }
0x2154   :  { %21912 = vmatprep.subr.bf16.mxu0 %v23052_v7 }
0x2156   :  { %21923 = vmatpush3.bf16.msra.mxu1 %v23270_v22 }
0x2157   :  { %21924 = vmatprep.subr.bf16.mxu1 %v23052_v7  ;;  %21914 = vmatpush3.bf16.msra.mxu0 %v23286_v27 }
0x2158   :  { %21927 = vmatprep.subr.bf16.mxu0 %v23052_v7 }
0x215a   :  { %21926 = vmatpush3.bf16.msra.mxu1 %v23290_v28 }
0x215b   :  { %21933 = vmatprep.subr.bf16.mxu1 %v23052_v7 }
0x2214   :  { %v8896_v29 = vpop.f32.mrb[112].mxu1  ;;  %v8972_v46 = vpop.f32.mrb[90].mxu0 }
0x2215   :  { %v8897_v31 = vadd.f32 %v24488_v61, %v8896_v29  ;;  %v19869_v4 = vpop.f32.mrb[113].mxu1  ;;  %v19888_v3 = vpop.f32.mrb[91].mxu0  ;;  %v8973_v56 = vadd.f32 %v24494_v58, %v8972_v46 }
0x2217   :  { %v17107_v55 = vmul.f32 -1.442695, %v8897_v31  ;;  %v17109_v63 = vmul.f32 -1.442695, %v8973_v56 }
0x2219   :  { %22803 = vpow2.f32 %v17107_v55 }
0x221a   :  { %22805 = vpow2.f32 %v17109_v63 }
0x221c   :  { %v9051_v5 = vpop.f32.mrb[114].mxu1  ;;  %v9123_v10 = vpop.f32.mrb[92].mxu0 }
0x221d   :  { %v19899_v9 = vpop.f32.mrb[115].mxu1  ;;  %v19910_v11 = vpop.f32.mrb[93].mxu0  ;;  %v9124_v33 = vadd.f32 %v24500_v30, %v9123_v10  ;;  %v9052_v39 = vadd.f32 %v24506_v36, %v9051_v5 }
0x2220   :  { %v9200_v17 = vpop.f32.mrb[116].mxu1 }
0x2221   :  { %v19915_v51 = vpop.f32.mrb[117].mxu1 }
0x2223   :  { %v22804_v49 = vpop.eup %22803 }
0x2224   :  { %v8903_v25 = vadd.f32 1.0, %v22804_v49  ;;  %v22806_v19 = vpop.eup %22805 }
0x2225   :  { %v8979_v32 = vadd.f32 1.0, %v22806_v19 }
0x2226   :  { %22807 = vrcp.f32 %v8903_v25 }
0x2227   :  { %22809 = vrcp.f32 %v8979_v32 }
0x2230   :  { %v22808_v57 = vpop.eup %22807 }
0x2231   :  { %v9127_v62 = vmul.f32 %v22808_v57, %v9124_v33  ;;  %v22810_v1 = vpop.eup %22809 }
0x2232   :  { %v9130_v42 = vsub.f32 1.0, %v22810_v1  ;;  %v9132_v48 = vmul.f32 %v22810_v1, %v24678_v20  ;;  %v24838_v20 = vld [vmem:[%s26027_s5 + $0x8] sm:$0xf] }
0x2233   :  { %v9128_v14 = vadd.f32 %v9127_v62, %v9052_v39 }
0x2235   :  { %22811 = vtanh.f32 %v9128_v14 }
0x223f   :  { %v22812_v45 = vpop.eup %22811 }
0x2240   :  { %v9131_v2 = vmul.f32 %v22812_v45, %v9130_v42 }
0x2242   :  { %v24807_v59 = vadd.f32 %v9132_v48, %v9131_v2 }
0x2244   :  { %9205 = vrot.lane.b32.xlu1 %v24807_v59, %s23051_s30 }
0x22b6   :  { %v9206_v37 = vpop.permute.xlu1 %9205 }
0x22b7   :  { %v9208_v29 = vsel %vm281_vm2, %v9200_v17, %v9206_v37 }
0x22b8   :  { %19933 = vmatmul.mubr.msk.f32.vlgmr.msra.gmra.mrb[94].mxu0 %vm283_vm3, %v9208_v29  ;;  %19952 = vmatmul.mubr.msk.f32.vlgmr.msra.gmra.mrb[118].mxu1 %vm283_vm3, %v9208_v29  ;;  %v24922_v29 = vld [vmem:[%s26027_s5 + $0xc] sm:$0xf] }
0x22b9   :  { %21929 = vmatpush3.bf16.msra.mxu0 %v23309_v34  ;;  %21935 = vmatpush3.bf16.msra.mxu1 %v23317_v38 }
0x22ba   :  { %21930 = vmatprep.subr.bf16.mxu0 %v23052_v7  ;;  %21936 = vmatprep.subr.bf16.mxu1 %v23052_v7 }
0x22bb   :  { %19962 = vmatprep.mubr.msk.f32.mxu0 %vm23050_vm1, %v23049_v0  ;;  %19973 = vmatprep.mubr.msk.f32.mxu1 %vm23050_vm1, %v23049_v0 }
0x22bd   :  { %21932 = vmatpush3.bf16.msra.mxu0 %v23329_v43  ;;  %21938 = vmatpush3.bf16.msra.mxu1 %v23335_v44 }
0x22be   :  { %19986 = vmatprep.subr.mxu1 %v23049_v0  ;;  %19976 = vmatprep.subr.mxu0 %v23049_v0 }
0x22c0   :  { %19963 = vmatmul.mubr.msk.f32.vlgmr.msra.gmra.mrb[96].mxu0 %vm281_vm2, %v9200_v17  ;;  %19974 = vmatmul.mubr.msk.f32.vlgmr.msra.gmra.mrb[120].mxu1 %vm281_vm2, %v24807_v59 }
0x22c1   :  { %19987 = vmatpush3.msra.mxu1 %v24732_v50  ;;  %19988 = vmatprep.mubr.msk.f32.mxu1 %vm23050_vm1, %v23049_v0 }
0x22c2   :  { %19978 = vmatprep.mubr.msk.f32.mxu0 %vm23050_vm1, %v23049_v0  ;;  %21939 = vmatprep.subr.bf16.mxu1 %v23052_v7 }
0x22c4   :  { %19989 = vmatmul.mubr.msk.f32.vlgmr.msra.gmra.mrb[122].mxu1 %vm203_vm0, %v24838_v20 }
0x22c5   :  { %21941 = vmatpush3.bf16.msra.mxu1 %v23221_v8  ;;  %20007 = vmatprep.mubr.msk.f32.mxu1 %vm23050_vm1, %v23049_v0 }
0x22c6   :  { %21942 = vmatprep.subr.bf16.mxu1 %v23052_v7 }
0x22c9   :  { %21944 = vmatpush3.bf16.msra.mxu1 %v23244_v15 }
0x22ca   :  { %21945 = vmatprep.subr.bf16.mxu1 %v23052_v7 }
0x22cd   :  { %21947 = vmatpush3.bf16.msra.mxu1 %v23266_v21 }
0x22ce   :  { %21948 = vmatprep.subr.bf16.mxu1 %v23052_v7 }
0x22d1   :  { %21950 = vmatpush3.bf16.msra.mxu1 %v23286_v27 }
0x22d2   :  { %21963 = vmatprep.subr.bf16.mxu1 %v23052_v7 }
0x238b   :  { %v9278_v46 = vpop.f32.mrb[94].mxu0  ;;  %v9354_v31 = vpop.f32.mrb[118].mxu1 }
0x238c   :  { %v9279_v4 = vadd.f32 %v24488_v61, %v9278_v46  ;;  %v19934_v3 = vpop.f32.mrb[95].mxu0  ;;  %v19953_v55 = vpop.f32.mrb[119].mxu1  ;;  %v9355_v63 = vadd.f32 %v24494_v58, %v9354_v31 }
0x238e   :  { %v17114_v56 = vmul.f32 -1.442695, %v9279_v4  ;;  %v17116_v5 = vmul.f32 -1.442695, %v9355_v63  ;;  %v24939_v4 = vld [vmem:[%s26033_s28] ss:$0 sm:$0xff] }
0x2390   :  { %22813 = vpow2.f32 %v17114_v56 }
0x2391   :  { %22815 = vpow2.f32 %v17116_v5  ;;  %v24945_v5 = vld [vmem:[%s26034_s2] ss:$0 sm:$0xff] }
0x2393   :  { %v9433_v10 = vpop.f32.mrb[96].mxu0  ;;  %v9505_v9 = vpop.f32.mrb[120].mxu1 }
0x2394   :  { %v19964_v11 = vpop.f32.mrb[97].mxu0  ;;  %v19975_v17 = vpop.f32.mrb[121].mxu1  ;;  %v9506_v61 = vadd.f32 %v24500_v30, %v9505_v9  ;;  %v9434_v58 = vadd.f32 %v24506_v36, %v9433_v10  ;;  %v24867_v30 = vld [vmem:[%s25990_s1 + $0x8] sm:$0xff]  ;;  %v24881_v36 = vld [vmem:[%s25990_s1] sm:$0xff] }
0x2397   :  { %v9727_v51 = vpop.f32.mrb[122].mxu1 }
0x2398   :  { %v19990_v49 = vpop.f32.mrb[123].mxu1 }
0x239a   :  { %v22814_v25 = vpop.eup %22813 }
0x239b   :  { %v9285_v19 = vadd.f32 1.0, %v22814_v25  ;;  %v22816_v32 = vpop.eup %22815 }
0x239c   :  { %v9361_v33 = vadd.f32 1.0, %v22816_v32 }
0x239d   :  { %22817 = vrcp.f32 %v9285_v19 }
0x239e   :  { %22819 = vrcp.f32 %v9361_v33 }
0x23a7   :  { %v22818_v57 = vpop.eup %22817 }
0x23a8   :  { %v9509_v39 = vmul.f32 %v22818_v57, %v9506_v61  ;;  %v22820_v14 = vpop.eup %22819 }
0x23a9   :  { %v9512_v1 = vsub.f32 1.0, %v22820_v14  ;;  %v9514_v2 = vmul.f32 %v22820_v14, %v24807_v59  ;;  %v24957_v14 = vld [vmem:[%s26036_s11] ss:$0 sm:$0xff] }
0x23aa   :  { %v9510_v62 = vadd.f32 %v9509_v39, %v9434_v58  ;;  %v24951_v58 = vld [vmem:[%s26035_s3] ss:$0 sm:$0xff] }
0x23ac   :  { %22821 = vtanh.f32 %v9510_v62 }
0x23b6   :  { %v22822_v42 = vpop.eup %22821 }
0x23b7   :  { %v9513_v45 = vmul.f32 %v22822_v42, %v9512_v1 }
0x23b9   :  { %v24857_v48 = vadd.f32 %v9514_v2, %v9513_v45 }
0x23bb   :  { %9731 = vrot.lane.b32.xlu0 %v24857_v48, %s23051_s30  ;;  %19977 = vmatpush3.msk.msra.mxu0 %vm980_vm4, %v24857_v48 }
0x23bc   :  { %19981 = vmatprep.subr.mxu0 %v23049_v0  ;;  %19979 = vmatmul.mubr.msk.f32.vlgmr.msra.gmra.mrb[98].mxu0 %vm976_vm5, %v24867_v30 }
0x23bd   :  { %19982 = vmatpush3.msk.msra.mxu0 %vm980_vm4, %v24807_v59  ;;  %19983 = vmatprep.mubr.msk.f32.mxu0 %vm23050_vm1, %v23049_v0 }
0x23be   :  { %21951 = vmatprep.subr.bf16.mxu0 %v23052_v7 }
0x23bf   :  { %10572 = vrot.lane.b32.xlu0 %v24732_v50, %s23051_s30 }
0x23c4   :  { %19984 = vmatmul.mubr.msk.f32.vlgmr.msra.gmra.mrb[98].mxu0 %vm976_vm5, %v24881_v36 }
0x23c5   :  { %21953 = vmatpush3.bf16.msra.mxu0 %v23233_v12  ;;  %20026 = vmatprep.mubr.msk.f32.mxu0 %vm23050_vm1, %v23049_v0 }
0x23c6   :  { %21954 = vmatprep.subr.bf16.mxu0 %v23052_v7 }
0x23c9   :  { %21956 = vmatpush3.bf16.msra.mxu0 %v23250_v16 }
0x23ca   :  { %21957 = vmatprep.subr.bf16.mxu0 %v23052_v7 }
0x23cd   :  { %21959 = vmatpush3.bf16.msra.mxu0 %v23270_v22 }
0x23ce   :  { %21960 = vmatprep.subr.bf16.mxu0 %v23052_v7 }
0x23d1   :  { %21962 = vmatpush3.bf16.msra.mxu0 %v23290_v28 }
0x23d2   :  { %21969 = vmatprep.subr.bf16.mxu0 %v23052_v7 }
0x242d   :  { %v9732_v59 = vpop.permute.xlu0 %9731 }
0x242e   :  { %v9734_v37 = vsel %vm281_vm2, %v9727_v51, %v9732_v59 }
0x242f   :  { %20008 = vmatmul.mubr.msk.f32.vlgmr.msra.gmra.mrb[124].mxu1 %vm283_vm3, %v9734_v37  ;;  %20027 = vmatmul.mubr.msk.f32.vlgmr.msra.gmra.mrb[100].mxu0 %vm283_vm3, %v9734_v37 }
0x2430   :  { %21965 = vmatpush3.bf16.msra.mxu1 %v23309_v34  ;;  %21971 = vmatpush3.bf16.msra.mxu0 %v23317_v38 }
0x2431   :  { %21966 = vmatprep.subr.bf16.mxu1 %v23052_v7  ;;  %21972 = vmatprep.subr.bf16.mxu0 %v23052_v7 }
0x2432   :  { %20037 = vmatprep.mubr.msk.f32.mxu1 %vm23050_vm1, %v23049_v0  ;;  %20048 = vmatprep.mubr.msk.f32.mxu0 %vm23050_vm1, %v23049_v0 }
0x2434   :  { %21968 = vmatpush3.bf16.msra.mxu1 %v23329_v43  ;;  %21974 = vmatpush3.bf16.msra.mxu0 %v23335_v44 }
0x2435   :  { %20056 = vmatprep.subr.mxu1 %v23049_v0  ;;  %20051 = vmatprep.subr.mxu0 %v23049_v0 }
0x2437   :  { %20038 = vmatmul.mubr.msk.f32.vlgmr.msra.gmra.mrb[126].mxu1 %vm281_vm2, %v9727_v51  ;;  %20049 = vmatmul.mubr.msk.f32.vlgmr.msra.gmra.mrb[102].mxu0 %vm281_vm2, %v24857_v48 }
0x2438   :  { %20057 = vmatpush3.msra.mxu1 %v24732_v50  ;;  %20058 = vmatprep.mubr.msk.f32.mxu1 %vm23050_vm1, %v23049_v0 }
0x2439   :  { %20053 = vmatprep.mubr.msk.f32.mxu0 %vm23050_vm1, %v23049_v0  ;;  %21975 = vmatprep.subr.bf16.mxu1 %v23052_v7 }
0x243b   :  { %20059 = vmatmul.mubr.msk.f32.vlgmr.msra.gmra.mrb[128].mxu1 %vm203_vm0, %v24922_v29 }
0x243c   :  { %21977 = vmatpush3.bf16.msra.mxu1 %v23221_v8  ;;  %20077 = vmatprep.mubr.msk.f32.mxu1 %vm23050_vm1, %v23049_v0 }
0x243d   :  { %21978 = vmatprep.subr.bf16.mxu1 %v23052_v7 }
0x2440   :  { %21980 = vmatpush3.bf16.msra.mxu1 %v23244_v15 }
0x2441   :  { %21981 = vmatprep.subr.bf16.mxu1 %v23052_v7 }
0x2444   :  { %21983 = vmatpush3.bf16.msra.mxu1 %v23266_v21 }
0x2445   :  { %21984 = vmatprep.subr.bf16.mxu1 %v23052_v7 }
0x2448   :  { %21986 = vmatpush3.bf16.msra.mxu1 %v23286_v27 }
0x2449   :  { %21999 = vmatprep.subr.bf16.mxu1 %v23052_v7 }
0x2502   :  { %v9804_v46 = vpop.f32.mrb[124].mxu1  ;;  %v9880_v31 = vpop.f32.mrb[100].mxu0 }
0x2503   :  { %v9805_v3 = vadd.f32 %v24939_v4, %v9804_v46  ;;  %v20009_v55 = vpop.f32.mrb[125].mxu1  ;;  %v20028_v56 = vpop.f32.mrb[101].mxu0  ;;  %v9881_v10 = vadd.f32 %v24945_v5, %v9880_v31 }
0x2504   :  { %v24971_v55 = vld [vmem:[%s25990_s1 + $0x10] sm:$0xff] }
0x2505   :  { %v17125_v63 = vmul.f32 -1.442695, %v9805_v3  ;;  %v17127_v9 = vmul.f32 -1.442695, %v9881_v10 }
0x2507   :  { %22823 = vpow2.f32 %v17125_v63 }
0x2508   :  { %22825 = vpow2.f32 %v17127_v9 }
0x250a   :  { %v9959_v11 = vpop.f32.mrb[126].mxu1  ;;  %v10031_v17 = vpop.f32.mrb[102].mxu0 }
0x250b   :  { %v20039_v51 = vpop.f32.mrb[127].mxu1  ;;  %v20050_v49 = vpop.f32.mrb[103].mxu0  ;;  %v10032_v39 = vadd.f32 %v24951_v58, %v10031_v17  ;;  %v9960_v1 = vadd.f32 %v24957_v14, %v9959_v11 }
0x250e   :  { %v10182_v25 = vpop.f32.mrb[128].mxu1 }
0x250f   :  { %v20060_v19 = vpop.f32.mrb[129].mxu1 }
0x2511   :  { %v22824_v32 = vpop.eup %22823 }
0x2512   :  { %v9811_v33 = vadd.f32 1.0, %v22824_v32  ;;  %v22826_v61 = vpop.eup %22825 }
0x2513   :  { %v9887_v57 = vadd.f32 1.0, %v22826_v61 }
0x2514   :  { %22827 = vrcp.f32 %v9811_v33 }
0x2515   :  { %22829 = vrcp.f32 %v9887_v57 }
0x251e   :  { %v22828_v62 = vpop.eup %22827 }
0x251f   :  { %v10035_v42 = vmul.f32 %v22828_v62, %v10032_v39  ;;  %v22830_v2 = vpop.eup %22829 }
0x2520   :  { %v10038_v59 = vsub.f32 1.0, %v22830_v2  ;;  %v10040_v31 = vmul.f32 %v22830_v2, %v24857_v48 }
0x2521   :  { %v10036_v45 = vadd.f32 %v10035_v42, %v9960_v1 }
0x2523   :  { %22831 = vtanh.f32 %v10036_v45 }
0x252d   :  { %v22832_v37 = vpop.eup %22831 }
0x252e   :  { %v10039_v46 = vmul.f32 %v22832_v37, %v10038_v59 }
0x2530   :  { %v24961_v3 = vadd.f32 %v10040_v31, %v10039_v46 }
0x2532   :  { %10186 = vrot.lane.b32.xlu1 %v24961_v3, %s23051_s30  ;;  %20052 = vmatpush3.msk.msra.mxu0 %vm980_vm4, %v24961_v3 }
0x2533   :  { %21987 = vmatprep.subr.bf16.mxu0 %v23052_v7  ;;  %20054 = vmatmul.mubr.msk.f32.vlgmr.msra.gmra.mrb[98].mxu0 %vm976_vm5, %v24971_v55 }
0x2534   :  { %21989 = vmatpush3.bf16.msra.mxu0 %v23233_v12  ;;  %20096 = vmatprep.mubr.msk.f32.mxu0 %vm23050_vm1, %v23049_v0 }
0x2535   :  { %21990 = vmatprep.subr.bf16.mxu0 %v23052_v7 }
0x2538   :  { %21992 = vmatpush3.bf16.msra.mxu0 %v23250_v16 }
0x2539   :  { %21993 = vmatprep.subr.bf16.mxu0 %v23052_v7 }
0x253c   :  { %21995 = vmatpush3.bf16.msra.mxu0 %v23270_v22 }
0x253d   :  { %21996 = vmatprep.subr.bf16.mxu0 %v23052_v7 }
0x2540   :  { %21998 = vmatpush3.bf16.msra.mxu0 %v23290_v28 }
0x2541   :  { %22005 = vmatprep.subr.bf16.mxu0 %v23052_v7 }
0x25a4   :  { %v10187_v48 = vpop.permute.xlu1 %10186 }
0x25a5   :  { %v10189_v56 = vsel %vm281_vm2, %v10182_v25, %v10187_v48 }
0x25a6   :  { %20078 = vmatmul.mubr.msk.f32.vlgmr.msra.gmra.mrb[130].mxu1 %vm283_vm3, %v10189_v56  ;;  %20097 = vmatmul.mubr.msk.f32.vlgmr.msra.gmra.mrb[104].mxu0 %vm283_vm3, %v10189_v56 }
0x25a7   :  { %22001 = vmatpush3.bf16.msra.mxu1 %v23309_v34  ;;  %22007 = vmatpush3.bf16.msra.mxu0 %v23317_v38 }
0x25a8   :  { %22002 = vmatprep.subr.bf16.mxu1 %v23052_v7  ;;  %22008 = vmatprep.subr.bf16.mxu0 %v23052_v7 }
0x25a9   :  { %20107 = vmatprep.mubr.msk.f32.mxu1 %vm23050_vm1, %v23049_v0  ;;  %20118 = vmatprep.mubr.msk.f32.mxu0 %vm23050_vm1, %v23049_v0 }
0x25ab   :  { %22004 = vmatpush3.bf16.msra.mxu1 %v23329_v43  ;;  %22010 = vmatpush3.bf16.msra.mxu0 %v23335_v44 }
0x25ac   :  { %20121 = vmatprep.subr.mxu0 %v23049_v0  ;;  %22011 = vmatprep.subr.bf16.mxu1 %v23052_v7 }
0x25ae   :  { %20108 = vmatmul.mubr.msk.f32.vlgmr.msra.gmra.mrb[132].mxu1 %vm281_vm2, %v10182_v25  ;;  %20119 = vmatmul.mubr.msk.f32.vlgmr.msra.gmra.mrb[106].mxu0 %vm281_vm2, %v24961_v3 }
0x25af   :  { %20123 = vmatprep.mubr.msk.f32.mxu0 %vm23050_vm1, %v23049_v0  ;;  %22013 = vmatpush3.bf16.msra.mxu1 %v23593_v40 }
0x25b0   :  { %22014 = vmatprep.subr.bf16.mxu1 %v23052_v7  ;;  %20142 = vmatprep.mubr.msk.f32.mxu1 %vm23050_vm1, %v23049_v0 }
0x25b3   :  { %22016 = vmatpush3.bf16.msra.mxu1 %v23602_v47 }
0x25b4   :  { %22017 = vmatprep.subr.bf16.mxu1 %v23052_v7 }
0x25b7   :  { %22019 = vmatpush3.bf16.msra.mxu1 %v23615_v54 }
0x25b8   :  { %22020 = vmatprep.subr.bf16.mxu1 %v23052_v7 }
0x25bb   :  { %22022 = vmatpush3.bf16.msra.mxu1 %v23638_v13 }
0x25bc   :  { %22035 = vmatprep.subr.bf16.mxu1 %v23052_v7 }
0x2679   :  { %v10259_v63 = vpop.f32.mrb[130].mxu1  ;;  %v10335_v10 = vpop.f32.mrb[104].mxu0 }
0x267a   :  { %v10260_v9 = vadd.f32 %v24939_v4, %v10259_v63  ;;  %v20079_v11 = vpop.f32.mrb[131].mxu1  ;;  %v20098_v17 = vpop.f32.mrb[105].mxu0  ;;  %v10336_v49 = vadd.f32 %v24945_v5, %v10335_v10 }
0x267c   :  { %v17134_v51 = vmul.f32 -1.442695, %v10260_v9  ;;  %v17136_v25 = vmul.f32 -1.442695, %v10336_v49  ;;  %v25029_v9 = vld [vmem:[%s25990_s1 + $0x18] sm:$0xff] }
0x267e   :  { %22833 = vpow2.f32 %v17134_v51 }
0x267f   :  { %22835 = vpow2.f32 %v17136_v25 }
0x2681   :  { %v10414_v19 = vpop.f32.mrb[132].mxu1  ;;  %v10486_v32 = vpop.f32.mrb[106].mxu0 }
0x2682   :  { %v20109_v33 = vpop.f32.mrb[133].mxu1  ;;  %v20120_v61 = vpop.f32.mrb[107].mxu0  ;;  %v10487_v42 = vadd.f32 %v24951_v58, %v10486_v32  ;;  %v10415_v2 = vadd.f32 %v24957_v14, %v10414_v19  ;;  %v25077_v19 = vld [vmem:[%s25995_s16] ss:$0 sm:$0xff] }
0x2688   :  { %v22834_v57 = vpop.eup %22833 }
0x2689   :  { %v10266_v39 = vadd.f32 1.0, %v22834_v57  ;;  %v22836_v62 = vpop.eup %22835 }
0x268a   :  { %v10342_v1 = vadd.f32 1.0, %v22836_v62 }
0x268b   :  { %22837 = vrcp.f32 %v10266_v39  ;;  %v25083_v39 = vld [vmem:[%s25996_s17] ss:$0 sm:$0xff] }
0x268c   :  { %22839 = vrcp.f32 %v10342_v1 }
0x2695   :  { %v22838_v45 = vpop.eup %22837 }
0x2696   :  { %v10490_v59 = vmul.f32 %v22838_v45, %v10487_v42  ;;  %v22840_v46 = vpop.eup %22839 }
0x2697   :  { %v10493_v31 = vsub.f32 1.0, %v22840_v46  ;;  %v10495_v63 = vmul.f32 %v22840_v46, %v24961_v3  ;;  %v10573_v3 = vpop.permute.xlu0 %10572 }
0x2698   :  { %v10491_v37 = vadd.f32 %v10490_v59, %v10415_v2 }
0x269a   :  { %22841 = vtanh.f32 %v10491_v37 }
0x26a4   :  { %v22842_v48 = vpop.eup %22841 }
0x26a5   :  { %v10494_v56 = vmul.f32 %v22842_v48, %v10493_v31 }
0x26a7   :  { %v25020_v10 = vadd.f32 %v10495_v63, %v10494_v56  ;;  %v25089_v56 = vld [vmem:[%s25997_s19] ss:$0 sm:$0xff] }
0x26a9   :  { %10953 = vrot.lane.b32.xlu1 %v25020_v10, %s23051_s30  ;;  %20122 = vmatpush3.msk.msra.mxu0 %vm980_vm4, %v25020_v10 }
0x26aa   :  { %20124 = vmatmul.mubr.msk.f32.vlgmr.msra.gmra.mrb[98].mxu0 %vm976_vm5, %v25029_v9  ;;  %22023 = vmatprep.subr.bf16.mxu0 %v23052_v7 }
0x26ab   :  { %22025 = vmatpush3.bf16.msra.mxu0 %v23635_v6  ;;  %20161 = vmatprep.mubr.msk.f32.mxu0 %vm23050_vm1, %v23049_v0 }
0x26ac   :  { %22026 = vmatprep.subr.bf16.mxu0 %v23052_v7 }
0x26af   :  { %22028 = vmatpush3.bf16.msra.mxu0 %v23655_v18 }
0x26b0   :  { %22029 = vmatprep.subr.bf16.mxu0 %v23052_v7 }
0x26b3   :  { %22031 = vmatpush3.bf16.msra.mxu0 %v23669_v23 }
0x26b4   :  { %22032 = vmatprep.subr.bf16.mxu0 %v23052_v7 }
0x26b7   :  { %22034 = vmatpush3.bf16.msra.mxu0 %v23679_v26 }
0x26b8   :  { %22041 = vmatprep.subr.bf16.mxu0 %v23052_v7 }
0x277d   :  { %v10566_v11 = vpop.f32.mrb[98].mxu0 }
0x277e   :  { %v10575_v17 = vsel %vm281_vm2, %v10566_v11, %v10573_v3  ;;  %v20125_v51 = vpop.f32.mrb[99].mxu0 }
0x277f   :  { %20143 = vmatmul.mubr.msk.f32.vlgmr.msra.gmra.mrb[134].mxu1 %vm283_vm3, %v10575_v17  ;;  %20162 = vmatmul.mubr.msk.f32.vlgmr.msra.gmra.mrb[108].mxu0 %vm283_vm3, %v10575_v17 }
0x2780   :  { %22037 = vmatpush3.bf16.msra.mxu1 %v23696_v35  ;;  %22043 = vmatpush3.bf16.msra.mxu0 %v23704_v41 }
0x2781   :  { %22038 = vmatprep.subr.bf16.mxu1 %v23052_v7  ;;  %22044 = vmatprep.subr.bf16.mxu0 %v23052_v7 }
0x2782   :  { %20172 = vmatprep.mubr.msk.f32.mxu1 %vm23050_vm1, %v23049_v0  ;;  %20183 = vmatprep.mubr.msk.f32.mxu0 %vm23050_vm1, %v23049_v0 }
0x2784   :  { %22040 = vmatpush3.bf16.msra.mxu1 %v23716_v52  ;;  %22046 = vmatpush3.bf16.msra.mxu0 %v23722_v53 }
0x2785   :  { %20186 = vmatprep.subr.mxu1 %v23049_v0  ;;  %22059 = vmatprep.subr.bf16.mxu0 %v23052_v7 }
0x2787   :  { %20173 = vmatmul.mubr.msk.f32.vlgmr.msra.gmra.mrb[136].mxu1 %vm281_vm2, %v10566_v11  ;;  %20184 = vmatmul.mubr.msk.f32.vlgmr.msra.gmra.mrb[110].mxu0 %vm281_vm2, %v24732_v50  ;;  %v25095_v11 = vld [vmem:[%s25998_s18] ss:$0 sm:$0xff] }
0x2788   :  { %20188 = vmatprep.mubr.msk.f32.mxu1 %vm23050_vm1, %v23049_v0  ;;  %22061 = vmatpush3.bf16.msra.mxu0 %v23233_v12 }
0x2789   :  { %22062 = vmatprep.subr.bf16.mxu0 %v23052_v7  ;;  %20226 = vmatprep.mubr.msk.f32.mxu0 %vm23050_vm1, %v23049_v0 }
0x278c   :  { %22064 = vmatpush3.bf16.msra.mxu0 %v23250_v16 }
0x278d   :  { %22065 = vmatprep.subr.bf16.mxu0 %v23052_v7 }
0x2790   :  { %22067 = vmatpush3.bf16.msra.mxu0 %v23270_v22 }
0x2791   :  { %22068 = vmatprep.subr.bf16.mxu0 %v23052_v7 }
0x2794   :  { %22070 = vmatpush3.bf16.msra.mxu0 %v23290_v28 }
0x2795   :  { %22077 = vmatprep.subr.bf16.mxu0 %v23052_v7 }
0x2852   :  { %v10645_v49 = vpop.f32.mrb[134].mxu1  ;;  %v10721_v25 = vpop.f32.mrb[108].mxu0 }
0x2853   :  { %v10646_v32 = vadd.f32 %v25077_v19, %v10645_v49  ;;  %v20144_v33 = vpop.f32.mrb[135].mxu1  ;;  %v20163_v61 = vpop.f32.mrb[109].mxu0  ;;  %v10722_v62 = vadd.f32 %v25083_v39, %v10721_v25 }
0x2855   :  { %v17142_v57 = vmul.f32 -1.442695, %v10646_v32  ;;  %v17144_v1 = vmul.f32 -1.442695, %v10722_v62 }
0x2857   :  { %22843 = vpow2.f32 %v17142_v57 }
0x2858   :  { %22845 = vpow2.f32 %v17144_v1 }
0x285a   :  { %v10800_v42 = vpop.f32.mrb[136].mxu1  ;;  %v10872_v45 = vpop.f32.mrb[110].mxu0 }
0x285b   :  { %v20174_v2 = vpop.f32.mrb[137].mxu1  ;;  %v20185_v59 = vpop.f32.mrb[111].mxu0  ;;  %v10873_v63 = vadd.f32 %v25089_v56, %v10872_v45  ;;  %v10801_v17 = vadd.f32 %v25095_v11, %v10800_v42 }
0x2861   :  { %v22844_v37 = vpop.eup %22843 }
0x2862   :  { %v10652_v46 = vadd.f32 1.0, %v22844_v37  ;;  %v22846_v31 = vpop.eup %22845 }
0x2863   :  { %v10728_v48 = vadd.f32 1.0, %v22846_v31 }
0x2864   :  { %22847 = vrcp.f32 %v10652_v46 }
0x2865   :  { %22849 = vrcp.f32 %v10728_v48 }
0x286e   :  { %v22848_v3 = vpop.eup %22847 }
0x286f   :  { %v10876_v51 = vmul.f32 %v22848_v3, %v10873_v63  ;;  %v22850_v25 = vpop.eup %22849 }
0x2870   :  { %v10879_v32 = vsub.f32 1.0, %v22850_v25  ;;  %v10881_v61 = vmul.f32 %v22850_v25, %v24732_v50  ;;  %v10954_v50 = vpop.permute.xlu1 %10953 }
0x2871   :  { %v10877_v49 = vadd.f32 %v10876_v51, %v10801_v17 }
0x2873   :  { %22851 = vtanh.f32 %v10877_v49 }
0x287d   :  { %v22852_v33 = vpop.eup %22851 }
0x287e   :  { %v10880_v57 = vmul.f32 %v22852_v33, %v10879_v32 }
0x2880   :  { %v25099_v62 = vadd.f32 %v10881_v61, %v10880_v57 }
0x2882   :  { %20187 = vmatpush3.msra.mxu1 %v25099_v62 }
0x2883   :  { %20189 = vmatmul.mubr.msk.f32.vlgmr.msra.gmra.mrb[138].mxu1 %vm203_vm0, %v24738_v60  ;;  %22047 = vmatprep.subr.bf16.mxu1 %v23052_v7 }
0x2884   :  { %22049 = vmatpush3.bf16.msra.mxu1 %v23221_v8  ;;  %20207 = vmatprep.mubr.msk.f32.mxu1 %vm23050_vm1, %v23049_v0 }
0x2885   :  { %22050 = vmatprep.subr.bf16.mxu1 %v23052_v7 }
0x2888   :  { %22052 = vmatpush3.bf16.msra.mxu1 %v23244_v15 }
0x2889   :  { %22053 = vmatprep.subr.bf16.mxu1 %v23052_v7 }
0x288c   :  { %22055 = vmatpush3.bf16.msra.mxu1 %v23266_v21 }
0x288d   :  { %22056 = vmatprep.subr.bf16.mxu1 %v23052_v7 }
0x2890   :  { %22058 = vmatpush3.bf16.msra.mxu1 %v23286_v27 }
0x2891   :  { %22071 = vmatprep.subr.bf16.mxu1 %v23052_v7 }
0x2956   :  { %v10949_v60 = vpop.f32.mrb[138].mxu1 }
0x2957   :  { %v10956_v1 = vsel %vm281_vm2, %v10949_v60, %v10954_v50  ;;  %v20190_v42 = vpop.f32.mrb[139].mxu1 }
0x2958   :  { %20208 = vmatmul.mubr.msk.f32.vlgmr.msra.gmra.mrb[140].mxu1 %vm283_vm3, %v10956_v1  ;;  %20227 = vmatmul.mubr.msk.f32.vlgmr.msra.gmra.mrb[112].mxu0 %vm283_vm3, %v10956_v1 }
0x2959   :  { %22073 = vmatpush3.bf16.msra.mxu1 %v23309_v34  ;;  %22079 = vmatpush3.bf16.msra.mxu0 %v23317_v38 }
0x295a   :  { %22074 = vmatprep.subr.bf16.mxu1 %v23052_v7  ;;  %22080 = vmatprep.subr.bf16.mxu0 %v23052_v7 }
0x295b   :  { %20237 = vmatprep.mubr.msk.f32.mxu1 %vm23050_vm1, %v23049_v0  ;;  %20248 = vmatprep.mubr.msk.f32.mxu0 %vm23050_vm1, %v23049_v0 }
0x295d   :  { %22076 = vmatpush3.bf16.msra.mxu1 %v23329_v43  ;;  %22082 = vmatpush3.bf16.msra.mxu0 %v23335_v44 }
0x295e   :  { %20251 = vmatprep.subr.mxu1 %v23049_v0  ;;  %22083 = vmatprep.subr.bf16.mxu0 %v23052_v7 }
0x2960   :  { %20238 = vmatmul.mubr.msk.f32.vlgmr.msra.gmra.mrb[142].mxu1 %vm281_vm2, %v10949_v60  ;;  %20249 = vmatmul.mubr.msk.f32.vlgmr.msra.gmra.mrb[114].mxu0 %vm281_vm2, %v25020_v10 }
0x2961   :  { %20252 = vmatpush3.msra.mxu1 %v25099_v62  ;;  %20253 = vmatprep.mubr.msk.f32.mxu1 %vm23050_vm1, %v23049_v0 }
0x2962   :  { %22095 = vmatprep.subr.bf16.mxu1 %v23052_v7  ;;  %22085 = vmatpush3.bf16.msra.mxu0 %v23221_v8 }
0x2963   :  { %22086 = vmatprep.subr.bf16.mxu0 %v23052_v7  ;;  %20272 = vmatprep.mubr.msk.f32.mxu0 %vm23050_vm1, %v23049_v0 }
0x2964   :  { %20254 = vmatmul.mubr.msk.f32.vlgmr.msra.gmra.mrb[144].mxu1 %vm203_vm0, %v24782_v24 }
0x2965   :  { %22097 = vmatpush3.bf16.msra.mxu1 %v23233_v12  ;;  %20291 = vmatprep.mubr.msk.f32.mxu1 %vm23050_vm1, %v23049_v0 }
0x2966   :  { %22098 = vmatprep.subr.bf16.mxu1 %v23052_v7  ;;  %22088 = vmatpush3.bf16.msra.mxu0 %v23244_v15 }
0x2967   :  { %22089 = vmatprep.subr.bf16.mxu0 %v23052_v7 }
0x2969   :  { %22100 = vmatpush3.bf16.msra.mxu1 %v23250_v16 }
0x296a   :  { %22101 = vmatprep.subr.bf16.mxu1 %v23052_v7  ;;  %22091 = vmatpush3.bf16.msra.mxu0 %v23266_v21 }
0x296b   :  { %22092 = vmatprep.subr.bf16.mxu0 %v23052_v7 }
0x296d   :  { %22103 = vmatpush3.bf16.msra.mxu1 %v23270_v22 }
0x296e   :  { %22104 = vmatprep.subr.bf16.mxu1 %v23052_v7  ;;  %22094 = vmatpush3.bf16.msra.mxu0 %v23286_v27 }
0x296f   :  { %22107 = vmatprep.subr.bf16.mxu0 %v23052_v7 }
0x2971   :  { %22106 = vmatpush3.bf16.msra.mxu1 %v23290_v28 }
0x2972   :  { %22113 = vmatprep.subr.bf16.mxu1 %v23052_v7 }
0x2a2b   :  { %v11026_v24 = vpop.f32.mrb[140].mxu1  ;;  %v11102_v45 = vpop.f32.mrb[112].mxu0 }
0x2a2c   :  { %v11027_v2 = vadd.f32 %v24939_v4, %v11026_v24  ;;  %v20209_v59 = vpop.f32.mrb[141].mxu1  ;;  %v20228_v37 = vpop.f32.mrb[113].mxu0  ;;  %v11103_v31 = vadd.f32 %v24945_v5, %v11102_v45 }
0x2a2e   :  { %v17149_v46 = vmul.f32 -1.442695, %v11027_v2  ;;  %v17151_v48 = vmul.f32 -1.442695, %v11103_v31 }
0x2a30   :  { %22853 = vpow2.f32 %v17149_v46 }
0x2a31   :  { %22855 = vpow2.f32 %v17151_v48 }
0x2a33   :  { %v11181_v63 = vpop.f32.mrb[142].mxu1  ;;  %v11253_v3 = vpop.f32.mrb[114].mxu0 }
0x2a34   :  { %v20239_v17 = vpop.f32.mrb[143].mxu1  ;;  %v20250_v51 = vpop.f32.mrb[115].mxu0  ;;  %v11254_v50 = vadd.f32 %v24951_v58, %v11253_v3  ;;  %v11182_v1 = vadd.f32 %v24957_v14, %v11181_v63 }
0x2a37   :  { %v11330_v49 = vpop.f32.mrb[144].mxu1 }
0x2a38   :  { %v20255_v25 = vpop.f32.mrb[145].mxu1 }
0x2a3a   :  { %v22854_v32 = vpop.eup %22853 }
0x2a3b   :  { %v11033_v33 = vadd.f32 1.0, %v22854_v32  ;;  %v22856_v61 = vpop.eup %22855 }
0x2a3c   :  { %v11109_v57 = vadd.f32 1.0, %v22856_v61 }
0x2a3d   :  { %22857 = vrcp.f32 %v11033_v33 }
0x2a3e   :  { %22859 = vrcp.f32 %v11109_v57 }
0x2a47   :  { %v22858_v60 = vpop.eup %22857 }
0x2a48   :  { %v11257_v42 = vmul.f32 %v22858_v60, %v11254_v50  ;;  %v22860_v45 = vpop.eup %22859 }
0x2a49   :  { %v11260_v2 = vsub.f32 1.0, %v22860_v45  ;;  %v11262_v46 = vmul.f32 %v22860_v45, %v25020_v10 }
0x2a4a   :  { %v11258_v24 = vadd.f32 %v11257_v42, %v11182_v1 }
0x2a4c   :  { %22861 = vtanh.f32 %v11258_v24 }
0x2a56   :  { %v22862_v59 = vpop.eup %22861 }
0x2a57   :  { %v11261_v37 = vmul.f32 %v22862_v59, %v11260_v2 }
0x2a59   :  { %v25164_v31 = vadd.f32 %v11262_v46, %v11261_v37 }
0x2a5b   :  { %11335 = vrot.lane.b32.xlu0 %v25164_v31, %s23051_s30 }
0x2acd   :  { %v11336_v48 = vpop.permute.xlu0 %11335 }
0x2ace   :  { %v11338_v3 = vsel %vm281_vm2, %v11330_v49, %v11336_v48 }
0x2acf   :  { %20273 = vmatmul.mubr.msk.f32.vlgmr.msra.gmra.mrb[116].mxu0 %vm283_vm3, %v11338_v3  ;;  %20292 = vmatmul.mubr.msk.f32.vlgmr.msra.gmra.mrb[146].mxu1 %vm283_vm3, %v11338_v3 }
0x2ad0   :  { %22109 = vmatpush3.bf16.msra.mxu0 %v23309_v34  ;;  %22115 = vmatpush3.bf16.msra.mxu1 %v23317_v38 }
0x2ad1   :  { %22110 = vmatprep.subr.bf16.mxu0 %v23052_v7  ;;  %22116 = vmatprep.subr.bf16.mxu1 %v23052_v7 }
0x2ad2   :  { %20302 = vmatprep.mubr.msk.f32.mxu0 %vm23050_vm1, %v23049_v0  ;;  %20313 = vmatprep.mubr.msk.f32.mxu1 %vm23050_vm1, %v23049_v0 }
0x2ad4   :  { %22112 = vmatpush3.bf16.msra.mxu0 %v23329_v43  ;;  %22118 = vmatpush3.bf16.msra.mxu1 %v23335_v44 }
0x2ad5   :  { %20326 = vmatprep.subr.mxu1 %v23049_v0  ;;  %20316 = vmatprep.subr.mxu0 %v23049_v0 }
0x2ad7   :  { %20303 = vmatmul.mubr.msk.f32.vlgmr.msra.gmra.mrb[118].mxu0 %vm281_vm2, %v11330_v49  ;;  %20314 = vmatmul.mubr.msk.f32.vlgmr.msra.gmra.mrb[148].mxu1 %vm281_vm2, %v25164_v31 }
0x2ad8   :  { %20327 = vmatpush3.msra.mxu1 %v25099_v62  ;;  %20328 = vmatprep.mubr.msk.f32.mxu1 %vm23050_vm1, %v23049_v0 }
0x2ad9   :  { %20318 = vmatprep.mubr.msk.f32.mxu0 %vm23050_vm1, %v23049_v0  ;;  %22119 = vmatprep.subr.bf16.mxu1 %v23052_v7 }
0x2adb   :  { %20329 = vmatmul.mubr.msk.f32.vlgmr.msra.gmra.mrb[150].mxu1 %vm203_vm0, %v24838_v20 }
0x2adc   :  { %22121 = vmatpush3.bf16.msra.mxu1 %v23221_v8  ;;  %20347 = vmatprep.mubr.msk.f32.mxu1 %vm23050_vm1, %v23049_v0 }
0x2add   :  { %22122 = vmatprep.subr.bf16.mxu1 %v23052_v7 }
0x2ae0   :  { %22124 = vmatpush3.bf16.msra.mxu1 %v23244_v15 }
0x2ae1   :  { %22125 = vmatprep.subr.bf16.mxu1 %v23052_v7 }
0x2ae4   :  { %22127 = vmatpush3.bf16.msra.mxu1 %v23266_v21 }
0x2ae5   :  { %22128 = vmatprep.subr.bf16.mxu1 %v23052_v7 }
0x2ae8   :  { %22130 = vmatpush3.bf16.msra.mxu1 %v23286_v27 }
0x2ae9   :  { %22143 = vmatprep.subr.bf16.mxu1 %v23052_v7 }
0x2ba2   :  { %v11408_v20 = vpop.f32.mrb[116].mxu0  ;;  %v11484_v10 = vpop.f32.mrb[146].mxu1 }
0x2ba3   :  { %v11409_v63 = vadd.f32 %v24939_v4, %v11408_v20  ;;  %v20274_v17 = vpop.f32.mrb[117].mxu0  ;;  %v20293_v51 = vpop.f32.mrb[147].mxu1  ;;  %v11485_v25 = vadd.f32 %v24945_v5, %v11484_v10 }
0x2ba5   :  { %v17156_v49 = vmul.f32 -1.442695, %v11409_v63  ;;  %v17158_v32 = vmul.f32 -1.442695, %v11485_v25 }
0x2ba7   :  { %22863 = vpow2.f32 %v17156_v49 }
0x2ba8   :  { %22865 = vpow2.f32 %v17158_v32 }
0x2baa   :  { %v11563_v33 = vpop.f32.mrb[118].mxu0  ;;  %v11635_v61 = vpop.f32.mrb[148].mxu1 }
0x2bab   :  { %v20304_v57 = vpop.f32.mrb[119].mxu0  ;;  %v20315_v50 = vpop.f32.mrb[149].mxu1  ;;  %v11636_v59 = vadd.f32 %v24951_v58, %v11635_v61  ;;  %v11564_v46 = vadd.f32 %v24957_v14, %v11563_v33 }
0x2bae   :  { %v11857_v60 = vpop.f32.mrb[150].mxu1 }
0x2baf   :  { %v20330_v1 = vpop.f32.mrb[151].mxu1 }
0x2bb1   :  { %v22864_v42 = vpop.eup %22863 }
0x2bb2   :  { %v11415_v24 = vadd.f32 1.0, %v22864_v42  ;;  %v22866_v45 = vpop.eup %22865 }
0x2bb3   :  { %v11491_v2 = vadd.f32 1.0, %v22866_v45 }
0x2bb4   :  { %22867 = vrcp.f32 %v11415_v24 }
0x2bb5   :  { %22869 = vrcp.f32 %v11491_v2 }
0x2bbe   :  { %v22868_v37 = vpop.eup %22867 }
0x2bbf   :  { %v11639_v48 = vmul.f32 %v22868_v37, %v11636_v59  ;;  %v22870_v20 = vpop.eup %22869 }
0x2bc0   :  { %v11642_v10 = vsub.f32 1.0, %v22870_v20  ;;  %v11644_v51 = vmul.f32 %v22870_v20, %v25164_v31 }
0x2bc1   :  { %v11640_v3 = vadd.f32 %v11639_v48, %v11564_v46 }
0x2bc3   :  { %22871 = vtanh.f32 %v11640_v3 }
0x2bcd   :  { %v22872_v63 = vpop.eup %22871 }
0x2bce   :  { %v11643_v17 = vmul.f32 %v22872_v63, %v11642_v10 }
0x2bd0   :  { %v25209_v49 = vadd.f32 %v11644_v51, %v11643_v17 }
0x2bd2   :  { %11861 = vrot.lane.b32.xlu1 %v25209_v49, %s23051_s30  ;;  %20317 = vmatpush3.msk.msra.mxu0 %vm980_vm4, %v25209_v49 }
0x2bd3   :  { %20321 = vmatprep.subr.mxu0 %v23049_v0  ;;  %20319 = vmatmul.mubr.msk.f32.vlgmr.msra.gmra.mrb[120].mxu0 %vm976_vm5, %v24867_v30 }
0x2bd4   :  { %20322 = vmatpush3.msk.msra.mxu0 %vm980_vm4, %v25164_v31  ;;  %20323 = vmatprep.mubr.msk.f32.mxu0 %vm23050_vm1, %v23049_v0 }
0x2bd5   :  { %22131 = vmatprep.subr.bf16.mxu0 %v23052_v7 }
0x2bd6   :  { %12702 = vrot.lane.b32.xlu1 %v25099_v62, %s23051_s30 }
0x2bdb   :  { %20324 = vmatmul.mubr.msk.f32.vlgmr.msra.gmra.mrb[120].mxu0 %vm976_vm5, %v24881_v36 }
0x2bdc   :  { %22133 = vmatpush3.bf16.msra.mxu0 %v23233_v12  ;;  %20366 = vmatprep.mubr.msk.f32.mxu0 %vm23050_vm1, %v23049_v0 }
0x2bdd   :  { %22134 = vmatprep.subr.bf16.mxu0 %v23052_v7 }
0x2be0   :  { %22136 = vmatpush3.bf16.msra.mxu0 %v23250_v16 }
0x2be1   :  { %22137 = vmatprep.subr.bf16.mxu0 %v23052_v7 }
0x2be4   :  { %22139 = vmatpush3.bf16.msra.mxu0 %v23270_v22 }
0x2be5   :  { %22140 = vmatprep.subr.bf16.mxu0 %v23052_v7 }
0x2be8   :  { %22142 = vmatpush3.bf16.msra.mxu0 %v23290_v28 }
0x2be9   :  { %22149 = vmatprep.subr.bf16.mxu0 %v23052_v7 }
0x2c44   :  { %v11862_v30 = vpop.permute.xlu1 %11861 }
0x2c45   :  { %v11864_v36 = vsel %vm281_vm2, %v11857_v60, %v11862_v30 }
0x2c46   :  { %20348 = vmatmul.mubr.msk.f32.vlgmr.msra.gmra.mrb[152].mxu1 %vm283_vm3, %v11864_v36  ;;  %20367 = vmatmul.mubr.msk.f32.vlgmr.msra.gmra.mrb[122].mxu0 %vm283_vm3, %v11864_v36 }
0x2c47   :  { %22145 = vmatpush3.bf16.msra.mxu1 %v23309_v34  ;;  %22151 = vmatpush3.bf16.msra.mxu0 %v23317_v38 }
0x2c48   :  { %22146 = vmatprep.subr.bf16.mxu1 %v23052_v7  ;;  %22152 = vmatprep.subr.bf16.mxu0 %v23052_v7 }
0x2c49   :  { %20377 = vmatprep.mubr.msk.f32.mxu1 %vm23050_vm1, %v23049_v0  ;;  %20388 = vmatprep.mubr.msk.f32.mxu0 %vm23050_vm1, %v23049_v0 }
0x2c4b   :  { %22148 = vmatpush3.bf16.msra.mxu1 %v23329_v43  ;;  %22154 = vmatpush3.bf16.msra.mxu0 %v23335_v44 }
0x2c4c   :  { %20396 = vmatprep.subr.mxu1 %v23049_v0  ;;  %20391 = vmatprep.subr.mxu0 %v23049_v0 }
0x2c4e   :  { %20378 = vmatmul.mubr.msk.f32.vlgmr.msra.gmra.mrb[154].mxu1 %vm281_vm2, %v11857_v60  ;;  %20389 = vmatmul.mubr.msk.f32.vlgmr.msra.gmra.mrb[124].mxu0 %vm281_vm2, %v25209_v49 }
0x2c4f   :  { %20397 = vmatpush3.msra.mxu1 %v25099_v62  ;;  %20398 = vmatprep.mubr.msk.f32.mxu1 %vm23050_vm1, %v23049_v0 }
0x2c50   :  { %20393 = vmatprep.mubr.msk.f32.mxu0 %vm23050_vm1, %v23049_v0  ;;  %22155 = vmatprep.subr.bf16.mxu1 %v23052_v7 }
0x2c52   :  { %20399 = vmatmul.mubr.msk.f32.vlgmr.msra.gmra.mrb[156].mxu1 %vm203_vm0, %v24922_v29 }
0x2c53   :  { %22157 = vmatpush3.bf16.msra.mxu1 %v23221_v8  ;;  %20417 = vmatprep.mubr.msk.f32.mxu1 %vm23050_vm1, %v23049_v0 }
0x2c54   :  { %22158 = vmatprep.subr.bf16.mxu1 %v23052_v7 }
0x2c57   :  { %22160 = vmatpush3.bf16.msra.mxu1 %v23244_v15 }
0x2c58   :  { %22161 = vmatprep.subr.bf16.mxu1 %v23052_v7 }
0x2c5b   :  { %22163 = vmatpush3.bf16.msra.mxu1 %v23266_v21 }
0x2c5c   :  { %22164 = vmatprep.subr.bf16.mxu1 %v23052_v7 }
0x2c5f   :  { %22166 = vmatpush3.bf16.msra.mxu1 %v23286_v27 }
0x2c60   :  { %22179 = vmatprep.subr.bf16.mxu1 %v23052_v7 }
0x2d19   :  { %v11934_v29 = vpop.f32.mrb[152].mxu1  ;;  %v12010_v31 = vpop.f32.mrb[122].mxu0 }
0x2d1a   :  { %v11935_v25 = vadd.f32 %v24939_v4, %v11934_v29  ;;  %v20349_v32 = vpop.f32.mrb[153].mxu1  ;;  %v20368_v33 = vpop.f32.mrb[123].mxu0  ;;  %v12011_v57 = vadd.f32 %v24945_v5, %v12010_v31 }
0x2d1c   :  { %v17167_v61 = vmul.f32 -1.442695, %v11935_v25  ;;  %v17169_v50 = vmul.f32 -1.442695, %v12011_v57 }
0x2d1e   :  { %22873 = vpow2.f32 %v17167_v61 }
0x2d1f   :  { %22875 = vpow2.f32 %v17169_v50 }
0x2d21   :  { %v12089_v60 = vpop.f32.mrb[154].mxu1  ;;  %v12161_v1 = vpop.f32.mrb[124].mxu0 }
0x2d22   :  { %v20379_v42 = vpop.f32.mrb[155].mxu1  ;;  %v20390_v24 = vpop.f32.mrb[125].mxu0  ;;  %v12162_v3 = vadd.f32 %v24951_v58, %v12161_v1  ;;  %v12090_v10 = vadd.f32 %v24957_v14, %v12089_v60 }
0x2d25   :  { %v12312_v45 = vpop.f32.mrb[156].mxu1 }
0x2d26   :  { %v20400_v2 = vpop.f32.mrb[157].mxu1 }
0x2d28   :  { %v22874_v59 = vpop.eup %22873 }
0x2d29   :  { %v11941_v37 = vadd.f32 1.0, %v22874_v59  ;;  %v22876_v46 = vpop.eup %22875 }
0x2d2a   :  { %v12017_v48 = vadd.f32 1.0, %v22876_v46 }
0x2d2b   :  { %22877 = vrcp.f32 %v11941_v37 }
0x2d2c   :  { %22879 = vrcp.f32 %v12017_v48 }
0x2d35   :  { %v22878_v20 = vpop.eup %22877 }
0x2d36   :  { %v12165_v63 = vmul.f32 %v22878_v20, %v12162_v3  ;;  %v22880_v51 = vpop.eup %22879 }
0x2d37   :  { %v12168_v30 = vsub.f32 1.0, %v22880_v51  ;;  %v12170_v31 = vmul.f32 %v22880_v51, %v25209_v49 }
0x2d38   :  { %v12166_v17 = vadd.f32 %v12165_v63, %v12090_v10 }
0x2d3a   :  { %22881 = vtanh.f32 %v12166_v17 }
0x2d44   :  { %v22882_v36 = vpop.eup %22881 }
0x2d45   :  { %v12169_v29 = vmul.f32 %v22882_v36, %v12168_v30 }
0x2d47   :  { %v25278_v25 = vadd.f32 %v12170_v31, %v12169_v29 }
0x2d49   :  { %12316 = vrot.lane.b32.xlu0 %v25278_v25, %s23051_s30  ;;  %20392 = vmatpush3.msk.msra.mxu0 %vm980_vm4, %v25278_v25 }
0x2d4a   :  { %22167 = vmatprep.subr.bf16.mxu0 %v23052_v7  ;;  %20394 = vmatmul.mubr.msk.f32.vlgmr.msra.gmra.mrb[120].mxu0 %vm976_vm5, %v24971_v55 }
0x2d4b   :  { %22169 = vmatpush3.bf16.msra.mxu0 %v23233_v12  ;;  %20436 = vmatprep.mubr.msk.f32.mxu0 %vm23050_vm1, %v23049_v0 }
0x2d4c   :  { %22170 = vmatprep.subr.bf16.mxu0 %v23052_v7 }
0x2d4f   :  { %22172 = vmatpush3.bf16.msra.mxu0 %v23250_v16 }
0x2d50   :  { %22173 = vmatprep.subr.bf16.mxu0 %v23052_v7 }
0x2d53   :  { %22175 = vmatpush3.bf16.msra.mxu0 %v23270_v22 }
0x2d54   :  { %22176 = vmatprep.subr.bf16.mxu0 %v23052_v7 }
0x2d57   :  { %22178 = vmatpush3.bf16.msra.mxu0 %v23290_v28 }
0x2d58   :  { %22185 = vmatprep.subr.bf16.mxu0 %v23052_v7 }
0x2dbb   :  { %v12317_v55 = vpop.permute.xlu0 %12316 }
0x2dbc   :  { %v12319_v49 = vsel %vm281_vm2, %v12312_v45, %v12317_v55 }
0x2dbd   :  { %20418 = vmatmul.mubr.msk.f32.vlgmr.msra.gmra.mrb[158].mxu1 %vm283_vm3, %v12319_v49  ;;  %20437 = vmatmul.mubr.msk.f32.vlgmr.msra.gmra.mrb[126].mxu0 %vm283_vm3, %v12319_v49 }
0x2dbe   :  { %22181 = vmatpush3.bf16.msra.mxu1 %v23309_v34  ;;  %22187 = vmatpush3.bf16.msra.mxu0 %v23317_v38 }
0x2dbf   :  { %22182 = vmatprep.subr.bf16.mxu1 %v23052_v7  ;;  %22188 = vmatprep.subr.bf16.mxu0 %v23052_v7 }
0x2dc0   :  { %20447 = vmatprep.mubr.msk.f32.mxu1 %vm23050_vm1, %v23049_v0  ;;  %20458 = vmatprep.mubr.msk.f32.mxu0 %vm23050_vm1, %v23049_v0 }
0x2dc2   :  { %22184 = vmatpush3.bf16.msra.mxu1 %v23329_v43  ;;  %22190 = vmatpush3.bf16.msra.mxu0 %v23335_v44 }
0x2dc3   :  { %20461 = vmatprep.subr.mxu0 %v23049_v0  ;;  %22191 = vmatprep.subr.bf16.mxu1 %v23052_v7 }
0x2dc5   :  { %20448 = vmatmul.mubr.msk.f32.vlgmr.msra.gmra.mrb[160].mxu1 %vm281_vm2, %v12312_v45  ;;  %20459 = vmatmul.mubr.msk.f32.vlgmr.msra.gmra.mrb[128].mxu0 %vm281_vm2, %v25278_v25 }
0x2dc6   :  { %20463 = vmatprep.mubr.msk.f32.mxu0 %vm23050_vm1, %v23049_v0  ;;  %22193 = vmatpush3.bf16.msra.mxu1 %v23593_v40 }
0x2dc7   :  { %22194 = vmatprep.subr.bf16.mxu1 %v23052_v7  ;;  %20482 = vmatprep.mubr.msk.f32.mxu1 %vm23050_vm1, %v23049_v0 }
0x2dca   :  { %22196 = vmatpush3.bf16.msra.mxu1 %v23602_v47 }
0x2dcb   :  { %22197 = vmatprep.subr.bf16.mxu1 %v23052_v7 }
0x2dce   :  { %22199 = vmatpush3.bf16.msra.mxu1 %v23615_v54 }
0x2dcf   :  { %22200 = vmatprep.subr.bf16.mxu1 %v23052_v7 }
0x2dd2   :  { %22202 = vmatpush3.bf16.msra.mxu1 %v23638_v13 }
0x2dd3   :  { %22215 = vmatprep.subr.bf16.mxu1 %v23052_v7 }
0x2e90   :  { %v12389_v32 = vpop.f32.mrb[158].mxu1  ;;  %v12465_v33 = vpop.f32.mrb[126].mxu0 }
0x2e91   :  { %v12390_v61 = vadd.f32 %v24939_v4, %v12389_v32  ;;  %v20419_v57 = vpop.f32.mrb[159].mxu1  ;;  %v20438_v50 = vpop.f32.mrb[127].mxu0  ;;  %v12466_v1 = vadd.f32 %v24945_v5, %v12465_v33 }
0x2e93   :  { %v17176_v60 = vmul.f32 -1.442695, %v12390_v61  ;;  %v17178_v42 = vmul.f32 -1.442695, %v12466_v1 }
0x2e95   :  { %22883 = vpow2.f32 %v17176_v60 }
0x2e96   :  { %22885 = vpow2.f32 %v17178_v42 }
0x2e98   :  { %v12544_v24 = vpop.f32.mrb[160].mxu1  ;;  %v12616_v45 = vpop.f32.mrb[128].mxu0 }
0x2e99   :  { %v20449_v2 = vpop.f32.mrb[161].mxu1  ;;  %v20460_v59 = vpop.f32.mrb[129].mxu0  ;;  %v12617_v20 = vadd.f32 %v24951_v58, %v12616_v45  ;;  %v12545_v10 = vadd.f32 %v24957_v14, %v12544_v24 }
0x2e9a   :  { %v12703_v58 = vpop.permute.xlu1 %12702 }
0x2e9f   :  { %v22884_v37 = vpop.eup %22883 }
0x2ea0   :  { %v12396_v46 = vadd.f32 1.0, %v22884_v37  ;;  %v22886_v48 = vpop.eup %22885 }
0x2ea1   :  { %v12472_v3 = vadd.f32 1.0, %v22886_v48 }
0x2ea2   :  { %22887 = vrcp.f32 %v12396_v46 }
0x2ea3   :  { %22889 = vrcp.f32 %v12472_v3 }
0x2eac   :  { %v22888_v4 = vpop.eup %22887 }
0x2ead   :  { %v12620_v63 = vmul.f32 %v22888_v4, %v12617_v20  ;;  %v22890_v17 = vpop.eup %22889 }
0x2eae   :  { %v12623_v51 = vsub.f32 1.0, %v22890_v17  ;;  %v12625_v29 = vmul.f32 %v22890_v17, %v25278_v25 }
0x2eaf   :  { %v12621_v5 = vadd.f32 %v12620_v63, %v12545_v10 }
0x2eb1   :  { %22891 = vtanh.f32 %v12621_v5 }
0x2ebb   :  { %v22892_v30 = vpop.eup %22891 }
0x2ebc   :  { %v12624_v36 = vmul.f32 %v22892_v30, %v12623_v51 }
0x2ebe   :  { %v25332_v31 = vadd.f32 %v12625_v29, %v12624_v36  ;;  %v25436_v29 = vld [vmem:[%s26027_s5 + $0x4] sm:$0xf] }
0x2ec0   :  { %13083 = vrot.lane.b32.xlu0 %v25332_v31, %s23051_s30  ;;  %20462 = vmatpush3.msk.msra.mxu0 %vm980_vm4, %v25332_v31 }
0x2ec1   :  { %20464 = vmatmul.mubr.msk.f32.vlgmr.msra.gmra.mrb[120].mxu0 %vm976_vm5, %v25029_v9  ;;  %22203 = vmatprep.subr.bf16.mxu0 %v23052_v7 }
0x2ec2   :  { %22205 = vmatpush3.bf16.msra.mxu0 %v23635_v6  ;;  %20501 = vmatprep.mubr.msk.f32.mxu0 %vm23050_vm1, %v23049_v0 }
0x2ec3   :  { %22206 = vmatprep.subr.bf16.mxu0 %v23052_v7 }
0x2ec6   :  { %22208 = vmatpush3.bf16.msra.mxu0 %v23655_v18 }
0x2ec7   :  { %22209 = vmatprep.subr.bf16.mxu0 %v23052_v7 }
0x2eca   :  { %22211 = vmatpush3.bf16.msra.mxu0 %v23669_v23 }
0x2ecb   :  { %22212 = vmatprep.subr.bf16.mxu0 %v23052_v7 }
0x2ece   :  { %22214 = vmatpush3.bf16.msra.mxu0 %v23679_v26 }
0x2ecf   :  { %22221 = vmatprep.subr.bf16.mxu0 %v23052_v7 }
0x2f94   :  { %v12696_v14 = vpop.f32.mrb[120].mxu0 }
0x2f95   :  { %v12705_v9 = vsel %vm281_vm2, %v12696_v14, %v12703_v58  ;;  %v20465_v25 = vpop.f32.mrb[121].mxu0 }
0x2f96   :  { %20483 = vmatmul.mubr.msk.f32.vlgmr.msra.gmra.mrb[162].mxu1 %vm283_vm3, %v12705_v9  ;;  %20502 = vmatmul.mubr.msk.f32.vlgmr.msra.gmra.mrb[130].mxu0 %vm283_vm3, %v12705_v9  ;;  %v25459_v9 = vld [vmem:[%s26033_s28] ss:$0 sm:$0xff] }
0x2f97   :  { %22217 = vmatpush3.bf16.msra.mxu1 %v23696_v35  ;;  %22223 = vmatpush3.bf16.msra.mxu0 %v23704_v41 }
0x2f98   :  { %22218 = vmatprep.subr.bf16.mxu1 %v23052_v7  ;;  %22224 = vmatprep.subr.bf16.mxu0 %v23052_v7 }
0x2f99   :  { %20512 = vmatprep.mubr.msk.f32.mxu1 %vm23050_vm1, %v23049_v0  ;;  %20523 = vmatprep.mubr.msk.f32.mxu0 %vm23050_vm1, %v23049_v0 }
0x2f9b   :  { %22220 = vmatpush3.bf16.msra.mxu1 %v23716_v52  ;;  %22226 = vmatpush3.bf16.msra.mxu0 %v23722_v53 }
0x2f9c   :  { %20526 = vmatprep.subr.mxu1 %v23049_v0  ;;  %22239 = vmatprep.subr.bf16.mxu0 %v23052_v7 }
0x2f9e   :  { %20513 = vmatmul.mubr.msk.f32.vlgmr.msra.gmra.mrb[164].mxu1 %vm281_vm2, %v12696_v14  ;;  %20524 = vmatmul.mubr.msk.f32.vlgmr.msra.gmra.mrb[132].mxu0 %vm281_vm2, %v25099_v62 }
0x2f9f   :  { %20528 = vmatprep.mubr.msk.f32.mxu1 %vm23050_vm1, %v23049_v0  ;;  %22241 = vmatpush3.bf16.msra.mxu0 %v23233_v12 }
0x2fa0   :  { %22242 = vmatprep.subr.bf16.mxu0 %v23052_v7  ;;  %20566 = vmatprep.mubr.msk.f32.mxu0 %vm23050_vm1, %v23049_v0 }
0x2fa3   :  { %22244 = vmatpush3.bf16.msra.mxu0 %v23250_v16 }
0x2fa4   :  { %22245 = vmatprep.subr.bf16.mxu0 %v23052_v7 }
0x2fa7   :  { %22247 = vmatpush3.bf16.msra.mxu0 %v23270_v22 }
0x2fa8   :  { %22248 = vmatprep.subr.bf16.mxu0 %v23052_v7 }
0x2fab   :  { %22250 = vmatpush3.bf16.msra.mxu0 %v23290_v28 }
0x2fac   :  { %22257 = vmatprep.subr.bf16.mxu0 %v23052_v7 }
0x3069   :  { %v12775_v55 = vpop.f32.mrb[162].mxu1  ;;  %v12851_v49 = vpop.f32.mrb[130].mxu0 }
0x306a   :  { %v12776_v32 = vadd.f32 %v25077_v19, %v12775_v55  ;;  %v20484_v33 = vpop.f32.mrb[163].mxu1  ;;  %v20503_v61 = vpop.f32.mrb[131].mxu0  ;;  %v12852_v50 = vadd.f32 %v25083_v39, %v12851_v49 }
0x306b   :  { %v25465_v33 = vld [vmem:[%s26034_s2] ss:$0 sm:$0xff] }
0x306c   :  { %v17184_v57 = vmul.f32 -1.442695, %v12776_v32  ;;  %v17186_v60 = vmul.f32 -1.442695, %v12852_v50 }
0x306e   :  { %22893 = vpow2.f32 %v17184_v57 }
0x306f   :  { %22895 = vpow2.f32 %v17186_v60 }
0x3071   :  { %v12930_v1 = vpop.f32.mrb[164].mxu1  ;;  %v13002_v42 = vpop.f32.mrb[132].mxu0 }
0x3072   :  { %v20514_v24 = vpop.f32.mrb[165].mxu1  ;;  %v20525_v45 = vpop.f32.mrb[133].mxu0  ;;  %v13003_v48 = vadd.f32 %v25089_v56, %v13002_v42  ;;  %v12931_v3 = vadd.f32 %v25095_v11, %v12930_v1  ;;  %v25392_v56 = vld [vmem:[%s26027_s5] sm:$0xf] }
0x3073   :  { %v13084_v11 = vpop.permute.xlu0 %13083 }
0x3078   :  { %v22894_v2 = vpop.eup %22893 }
0x3079   :  { %v12782_v59 = vadd.f32 1.0, %v22894_v2  ;;  %v22896_v37 = vpop.eup %22895 }
0x307a   :  { %v12858_v46 = vadd.f32 1.0, %v22896_v37 }
0x307b   :  { %22897 = vrcp.f32 %v12782_v59 }
0x307c   :  { %22899 = vrcp.f32 %v12858_v46 }
0x3085   :  { %v22898_v19 = vpop.eup %22897 }
0x3086   :  { %v13006_v20 = vmul.f32 %v22898_v19, %v13003_v48  ;;  %v22900_v4 = vpop.eup %22899  ;;  %v25471_v48 = vld [vmem:[%s26035_s3] ss:$0 sm:$0xff] }
0x3087   :  { %v13009_v10 = vsub.f32 1.0, %v22900_v4  ;;  %v13011_v5 = vmul.f32 %v22900_v4, %v25099_v62 }
0x3088   :  { %v13007_v39 = vadd.f32 %v13006_v20, %v12931_v3  ;;  %v25477_v20 = vld [vmem:[%s26036_s11] ss:$0 sm:$0xff] }
0x308a   :  { %22901 = vtanh.f32 %v13007_v39 }
0x3094   :  { %v22902_v63 = vpop.eup %22901 }
0x3095   :  { %v13010_v17 = vmul.f32 %v22902_v63, %v13009_v10 }
0x3097   :  { %v25386_v51 = vadd.f32 %v13011_v5, %v13010_v17 }
0x3099   :  { %20527 = vmatpush3.msra.mxu1 %v25386_v51 }
0x309a   :  { %20529 = vmatmul.mubr.msk.f32.vlgmr.msra.gmra.mrb[166].mxu1 %vm203_vm0, %v25392_v56  ;;  %22227 = vmatprep.subr.bf16.mxu1 %v23052_v7 }
0x309b   :  { %22229 = vmatpush3.bf16.msra.mxu1 %v23221_v8  ;;  %20547 = vmatprep.mubr.msk.f32.mxu1 %vm23050_vm1, %v23049_v0 }
0x309c   :  { %22230 = vmatprep.subr.bf16.mxu1 %v23052_v7 }
0x309f   :  { %22232 = vmatpush3.bf16.msra.mxu1 %v23244_v15 }
0x30a0   :  { %22233 = vmatprep.subr.bf16.mxu1 %v23052_v7 }
0x30a3   :  { %22235 = vmatpush3.bf16.msra.mxu1 %v23266_v21 }
0x30a4   :  { %22236 = vmatprep.subr.bf16.mxu1 %v23052_v7 }
0x30a7   :  { %22238 = vmatpush3.bf16.msra.mxu1 %v23286_v27 }
0x30a8   :  { %22251 = vmatprep.subr.bf16.mxu1 %v23052_v7 }
0x316d   :  { %v13079_v62 = vpop.f32.mrb[166].mxu1 }
0x316e   :  { %v13086_v30 = vsel %vm281_vm2, %v13079_v62, %v13084_v11  ;;  %v20530_v36 = vpop.f32.mrb[167].mxu1 }
0x316f   :  { %20548 = vmatmul.mubr.msk.f32.vlgmr.msra.gmra.mrb[168].mxu1 %vm283_vm3, %v13086_v30  ;;  %20567 = vmatmul.mubr.msk.f32.vlgmr.msra.gmra.mrb[134].mxu0 %vm283_vm3, %v13086_v30 }
0x3170   :  { %22253 = vmatpush3.bf16.msra.mxu1 %v23309_v34  ;;  %22259 = vmatpush3.bf16.msra.mxu0 %v23317_v38 }
0x3171   :  { %22254 = vmatprep.subr.bf16.mxu1 %v23052_v7  ;;  %22260 = vmatprep.subr.bf16.mxu0 %v23052_v7 }
0x3172   :  { %20577 = vmatprep.mubr.msk.f32.mxu1 %vm23050_vm1, %v23049_v0  ;;  %20588 = vmatprep.mubr.msk.f32.mxu0 %vm23050_vm1, %v23049_v0 }
0x3174   :  { %22256 = vmatpush3.bf16.msra.mxu1 %v23329_v43  ;;  %22262 = vmatpush3.bf16.msra.mxu0 %v23335_v44 }
0x3175   :  { %20591 = vmatprep.subr.mxu1 %v23049_v0  ;;  %22263 = vmatprep.subr.bf16.mxu0 %v23052_v7 }
0x3177   :  { %20578 = vmatmul.mubr.msk.f32.vlgmr.msra.gmra.mrb[170].mxu1 %vm281_vm2, %v13079_v62  ;;  %20589 = vmatmul.mubr.msk.f32.vlgmr.msra.gmra.mrb[136].mxu0 %vm281_vm2, %v25332_v31 }
0x3178   :  { %20592 = vmatpush3.msra.mxu1 %v25386_v51  ;;  %20593 = vmatprep.mubr.msk.f32.mxu1 %vm23050_vm1, %v23049_v0 }
0x3179   :  { %22275 = vmatprep.subr.bf16.mxu1 %v23052_v7  ;;  %22265 = vmatpush3.bf16.msra.mxu0 %v23221_v8 }
0x317a   :  { %22266 = vmatprep.subr.bf16.mxu0 %v23052_v7  ;;  %20612 = vmatprep.mubr.msk.f32.mxu0 %vm23050_vm1, %v23049_v0 }
0x317b   :  { %20594 = vmatmul.mubr.msk.f32.vlgmr.msra.gmra.mrb[172].mxu1 %vm203_vm0, %v25436_v29 }
0x317c   :  { %22277 = vmatpush3.bf16.msra.mxu1 %v23233_v12  ;;  %20631 = vmatprep.mubr.msk.f32.mxu1 %vm23050_vm1, %v23049_v0 }
0x317d   :  { %22278 = vmatprep.subr.bf16.mxu1 %v23052_v7  ;;  %22268 = vmatpush3.bf16.msra.mxu0 %v23244_v15 }
0x317e   :  { %22269 = vmatprep.subr.bf16.mxu0 %v23052_v7 }
0x3180   :  { %22280 = vmatpush3.bf16.msra.mxu1 %v23250_v16 }
0x3181   :  { %22281 = vmatprep.subr.bf16.mxu1 %v23052_v7  ;;  %22271 = vmatpush3.bf16.msra.mxu0 %v23266_v21 }
0x3182   :  { %22272 = vmatprep.subr.bf16.mxu0 %v23052_v7 }
0x3184   :  { %22283 = vmatpush3.bf16.msra.mxu1 %v23270_v22 }
0x3185   :  { %22284 = vmatprep.subr.bf16.mxu1 %v23052_v7  ;;  %22274 = vmatpush3.bf16.msra.mxu0 %v23286_v27 }
0x3186   :  { %22287 = vmatprep.subr.bf16.mxu0 %v23052_v7 }
0x3188   :  { %22286 = vmatpush3.bf16.msra.mxu1 %v23290_v28 }
0x3189   :  { %22293 = vmatprep.subr.bf16.mxu1 %v23052_v7 }
0x3242   :  { %v13156_v58 = vpop.f32.mrb[168].mxu1  ;;  %v13232_v14 = vpop.f32.mrb[134].mxu0 }
0x3243   :  { %v13157_v25 = vadd.f32 %v25459_v9, %v13156_v58  ;;  %v20549_v55 = vpop.f32.mrb[169].mxu1  ;;  %v20568_v49 = vpop.f32.mrb[135].mxu0  ;;  %v13233_v61 = vadd.f32 %v25465_v33, %v13232_v14 }
0x3245   :  { %v17191_v32 = vmul.f32 -1.442695, %v13157_v25  ;;  %v17193_v57 = vmul.f32 -1.442695, %v13233_v61 }
0x3247   :  { %22903 = vpow2.f32 %v17191_v32 }
0x3248   :  { %22905 = vpow2.f32 %v17193_v57 }
0x324a   :  { %v13311_v50 = vpop.f32.mrb[170].mxu1  ;;  %v13383_v60 = vpop.f32.mrb[136].mxu0 }
0x324b   :  { %v20579_v1 = vpop.f32.mrb[171].mxu1  ;;  %v20590_v42 = vpop.f32.mrb[137].mxu0  ;;  %v13384_v19 = vadd.f32 %v25471_v48, %v13383_v60  ;;  %v13312_v39 = vadd.f32 %v25477_v20, %v13311_v50 }
0x324e   :  { %v13460_v24 = vpop.f32.mrb[172].mxu1 }
0x324f   :  { %v20595_v45 = vpop.f32.mrb[173].mxu1 }
0x3251   :  { %v22904_v2 = vpop.eup %22903 }
0x3252   :  { %v13163_v59 = vadd.f32 1.0, %v22904_v2  ;;  %v22906_v37 = vpop.eup %22905 }
0x3253   :  { %v13239_v46 = vadd.f32 1.0, %v22906_v37 }
0x3254   :  { %22907 = vrcp.f32 %v13163_v59 }
0x3255   :  { %22909 = vrcp.f32 %v13239_v46 }
0x325e   :  { %v22908_v3 = vpop.eup %22907 }
0x325f   :  { %v13387_v4 = vmul.f32 %v22908_v3, %v13384_v19  ;;  %v22910_v63 = vpop.eup %22909 }
0x3260   :  { %v13390_v5 = vsub.f32 1.0, %v22910_v63  ;;  %v13392_v62 = vmul.f32 %v22910_v63, %v25332_v31  ;;  %v25512_v31 = vld [vmem:[%s26027_s5 + $0x8] sm:$0xf] }
0x3261   :  { %v13388_v10 = vadd.f32 %v13387_v4, %v13312_v39 }
0x3263   :  { %22911 = vtanh.f32 %v13388_v10 }
0x326d   :  { %v22912_v17 = vpop.eup %22911 }
0x326e   :  { %v13391_v11 = vmul.f32 %v22912_v17, %v13390_v5 }
0x3270   :  { %v25481_v30 = vadd.f32 %v13392_v62, %v13391_v11 }
0x3272   :  { %13465 = vrot.lane.b32.xlu1 %v25481_v30, %s23051_s30 }
0x32e4   :  { %v13466_v36 = vpop.permute.xlu1 %13465 }
0x32e5   :  { %v13468_v58 = vsel %vm281_vm2, %v13460_v24, %v13466_v36 }
0x32e6   :  { %20613 = vmatmul.mubr.msk.f32.vlgmr.msra.gmra.mrb[138].mxu0 %vm283_vm3, %v13468_v58  ;;  %20632 = vmatmul.mubr.msk.f32.vlgmr.msra.gmra.mrb[174].mxu1 %vm283_vm3, %v13468_v58 }
0x32e7   :  { %22289 = vmatpush3.bf16.msra.mxu0 %v23309_v34  ;;  %22295 = vmatpush3.bf16.msra.mxu1 %v23317_v38 }
0x32e8   :  { %22290 = vmatprep.subr.bf16.mxu0 %v23052_v7  ;;  %22296 = vmatprep.subr.bf16.mxu1 %v23052_v7 }
0x32e9   :  { %20642 = vmatprep.mubr.msk.f32.mxu0 %vm23050_vm1, %v23049_v0  ;;  %20653 = vmatprep.mubr.msk.f32.mxu1 %vm23050_vm1, %v23049_v0 }
0x32eb   :  { %22292 = vmatpush3.bf16.msra.mxu0 %v23329_v43  ;;  %22298 = vmatpush3.bf16.msra.mxu1 %v23335_v44 }
0x32ec   :  { %20666 = vmatprep.subr.mxu1 %v23049_v0  ;;  %20656 = vmatprep.subr.mxu0 %v23049_v0 }
0x32ee   :  { %20643 = vmatmul.mubr.msk.f32.vlgmr.msra.gmra.mrb[140].mxu0 %vm281_vm2, %v13460_v24  ;;  %20654 = vmatmul.mubr.msk.f32.vlgmr.msra.gmra.mrb[176].mxu1 %vm281_vm2, %v25481_v30 }
0x32ef   :  { %20667 = vmatpush3.msra.mxu1 %v25386_v51  ;;  %20668 = vmatprep.mubr.msk.f32.mxu1 %vm23050_vm1, %v23049_v0 }
0x32f0   :  { %20658 = vmatprep.mubr.msk.f32.mxu0 %vm23050_vm1, %v23049_v0  ;;  %22299 = vmatprep.subr.bf16.mxu1 %v23052_v7 }
0x32f2   :  { %20669 = vmatmul.mubr.msk.f32.vlgmr.msra.gmra.mrb[178].mxu1 %vm203_vm0, %v25512_v31 }
0x32f3   :  { %22301 = vmatpush3.bf16.msra.mxu1 %v23221_v8  ;;  %20687 = vmatprep.mubr.msk.f32.mxu1 %vm23050_vm1, %v23049_v0 }
0x32f4   :  { %22302 = vmatprep.subr.bf16.mxu1 %v23052_v7 }
0x32f7   :  { %22304 = vmatpush3.bf16.msra.mxu1 %v23244_v15 }
0x32f8   :  { %22305 = vmatprep.subr.bf16.mxu1 %v23052_v7 }
0x32fb   :  { %22307 = vmatpush3.bf16.msra.mxu1 %v23266_v21 }
0x32fc   :  { %22308 = vmatprep.subr.bf16.mxu1 %v23052_v7 }
0x32ff   :  { %22310 = vmatpush3.bf16.msra.mxu1 %v23286_v27 }
0x3300   :  { %22323 = vmatprep.subr.bf16.mxu1 %v23052_v7 }
0x33b9   :  { %v13538_v14 = vpop.f32.mrb[138].mxu0  ;;  %v13614_v25 = vpop.f32.mrb[174].mxu1 }
0x33ba   :  { %v13539_v55 = vadd.f32 %v25459_v9, %v13538_v14  ;;  %v20614_v49 = vpop.f32.mrb[139].mxu0  ;;  %v20633_v32 = vpop.f32.mrb[175].mxu1  ;;  %v13615_v57 = vadd.f32 %v25465_v33, %v13614_v25  ;;  %v23036_v14 = vld [vmem:[%s25990_s1 + $0x8] sm:$0xff]  ;;  %v23037_v25 = vld [vmem:[%s25990_s1] sm:$0xff] }
0x33bb   :  { %v25590_v49 = vld [vmem:[%s26027_s5 + $0xc] sm:$0xf] }
0x33bc   :  { %v17198_v61 = vmul.f32 -1.442695, %v13539_v55  ;;  %v17200_v50 = vmul.f32 -1.442695, %v13615_v57 }
0x33be   :  { %22913 = vpow2.f32 %v17198_v61 }
0x33bf   :  { %22915 = vpow2.f32 %v17200_v50 }
0x33c1   :  { %v13693_v60 = vpop.f32.mrb[140].mxu0  ;;  %v13765_v1 = vpop.f32.mrb[176].mxu1 }
0x33c2   :  { %v20644_v42 = vpop.f32.mrb[141].mxu0  ;;  %v20655_v24 = vpop.f32.mrb[177].mxu1  ;;  %v13766_v3 = vadd.f32 %v25471_v48, %v13765_v1  ;;  %v13694_v4 = vadd.f32 %v25477_v20, %v13693_v60 }
0x33c5   :  { %v13987_v45 = vpop.f32.mrb[178].mxu1 }
0x33c6   :  { %v20670_v2 = vpop.f32.mrb[179].mxu1 }
0x33c8   :  { %v22914_v59 = vpop.eup %22913 }
0x33c9   :  { %v13545_v37 = vadd.f32 1.0, %v22914_v59  ;;  %v22916_v46 = vpop.eup %22915 }
0x33ca   :  { %v13621_v19 = vadd.f32 1.0, %v22916_v46 }
0x33cb   :  { %22917 = vrcp.f32 %v13545_v37 }
0x33cc   :  { %22919 = vrcp.f32 %v13621_v19 }
0x33d5   :  { %v22918_v39 = vpop.eup %22917 }
0x33d6   :  { %v13769_v10 = vmul.f32 %v22918_v39, %v13766_v3  ;;  %v22920_v5 = vpop.eup %22919 }
0x33d7   :  { %v13772_v17 = vsub.f32 1.0, %v22920_v5  ;;  %v13774_v36 = vmul.f32 %v22920_v5, %v25481_v30 }
0x33d8   :  { %v13770_v63 = vadd.f32 %v13769_v10, %v13694_v4 }
0x33da   :  { %22921 = vtanh.f32 %v13770_v63 }
0x33e4   :  { %v22922_v11 = vpop.eup %22921 }
0x33e5   :  { %v13773_v62 = vmul.f32 %v22922_v11, %v13772_v17 }
0x33e7   :  { %v25531_v58 = vadd.f32 %v13774_v36, %v13773_v62 }
0x33e9   :  { %13991 = vrot.lane.b32.xlu0 %v25531_v58, %s23051_s30  ;;  %20657 = vmatpush3.msk.msra.mxu0 %vm980_vm4, %v25531_v58 }
0x33ea   :  { %20661 = vmatprep.subr.mxu0 %v23049_v0  ;;  %20659 = vmatmul.mubr.msk.f32.vlgmr.msra.gmra.mrb[142].mxu0 %vm976_vm5, %v23036_v14 }
0x33eb   :  { %20662 = vmatpush3.msk.msra.mxu0 %vm980_vm4, %v25481_v30  ;;  %20663 = vmatprep.mubr.msk.f32.mxu0 %vm23050_vm1, %v23049_v0 }
0x33ec   :  { %22311 = vmatprep.subr.bf16.mxu0 %v23052_v7 }
0x33ed   :  { %14832 = vrot.lane.b32.xlu0 %v25386_v51, %s23051_s30 }
0x33f2   :  { %20664 = vmatmul.mubr.msk.f32.vlgmr.msra.gmra.mrb[142].mxu0 %vm976_vm5, %v23037_v25 }
0x33f3   :  { %22313 = vmatpush3.bf16.msra.mxu0 %v23233_v12  ;;  %20706 = vmatprep.mubr.msk.f32.mxu0 %vm23050_vm1, %v23049_v0 }
0x33f4   :  { %22314 = vmatprep.subr.bf16.mxu0 %v23052_v7 }
0x33f7   :  { %22316 = vmatpush3.bf16.msra.mxu0 %v23250_v16 }
0x33f8   :  { %22317 = vmatprep.subr.bf16.mxu0 %v23052_v7 }
0x33fb   :  { %22319 = vmatpush3.bf16.msra.mxu0 %v23270_v22 }
0x33fc   :  { %22320 = vmatprep.subr.bf16.mxu0 %v23052_v7 }
0x33ff   :  { %22322 = vmatpush3.bf16.msra.mxu0 %v23290_v28 }
0x3400   :  { %22329 = vmatprep.subr.bf16.mxu0 %v23052_v7 }
0x345b   :  { %v13992_v30 = vpop.permute.xlu0 %13991 }
0x345c   :  { %v13994_v55 = vsel %vm281_vm2, %v13987_v45, %v13992_v30 }
0x345d   :  { %20688 = vmatmul.mubr.msk.f32.vlgmr.msra.gmra.mrb[180].mxu1 %vm283_vm3, %v13994_v55  ;;  %20707 = vmatmul.mubr.msk.f32.vlgmr.msra.gmra.mrb[144].mxu0 %vm283_vm3, %v13994_v55 }
0x345e   :  { %22325 = vmatpush3.bf16.msra.mxu1 %v23309_v34  ;;  %22331 = vmatpush3.bf16.msra.mxu0 %v23317_v38 }
0x345f   :  { %22326 = vmatprep.subr.bf16.mxu1 %v23052_v7  ;;  %22332 = vmatprep.subr.bf16.mxu0 %v23052_v7 }
0x3460   :  { %20717 = vmatprep.mubr.msk.f32.mxu1 %vm23050_vm1, %v23049_v0  ;;  %20728 = vmatprep.mubr.msk.f32.mxu0 %vm23050_vm1, %v23049_v0 }
0x3462   :  { %22328 = vmatpush3.bf16.msra.mxu1 %v23329_v43  ;;  %22334 = vmatpush3.bf16.msra.mxu0 %v23335_v44 }
0x3463   :  { %20736 = vmatprep.subr.mxu1 %v23049_v0  ;;  %20731 = vmatprep.subr.mxu0 %v23049_v0 }
0x3465   :  { %20718 = vmatmul.mubr.msk.f32.vlgmr.msra.gmra.mrb[182].mxu1 %vm281_vm2, %v13987_v45  ;;  %20729 = vmatmul.mubr.msk.f32.vlgmr.msra.gmra.mrb[146].mxu0 %vm281_vm2, %v25531_v58 }
0x3466   :  { %20737 = vmatpush3.msra.mxu1 %v25386_v51  ;;  %20738 = vmatprep.mubr.msk.f32.mxu1 %vm23050_vm1, %v23049_v0 }
0x3467   :  { %20733 = vmatprep.mubr.msk.f32.mxu0 %vm23050_vm1, %v23049_v0  ;;  %22335 = vmatprep.subr.bf16.mxu1 %v23052_v7 }
0x3469   :  { %20739 = vmatmul.mubr.msk.f32.vlgmr.msra.gmra.mrb[184].mxu1 %vm203_vm0, %v25590_v49 }
0x346a   :  { %22337 = vmatpush3.bf16.msra.mxu1 %v23221_v8  ;;  %20757 = vmatprep.mubr.msk.f32.mxu1 %vm23050_vm1, %v23049_v0 }
0x346b   :  { %22338 = vmatprep.subr.bf16.mxu1 %v23052_v7 }
0x346e   :  { %22340 = vmatpush3.bf16.msra.mxu1 %v23244_v15 }
0x346f   :  { %22341 = vmatprep.subr.bf16.mxu1 %v23052_v7 }
0x3472   :  { %22343 = vmatpush3.bf16.msra.mxu1 %v23266_v21 }
0x3473   :  { %22344 = vmatprep.subr.bf16.mxu1 %v23052_v7 }
0x3476   :  { %22346 = vmatpush3.bf16.msra.mxu1 %v23286_v27 }
0x3477   :  { %22359 = vmatprep.subr.bf16.mxu1 %v23052_v7 }
0x3530   :  { %v14064_v32 = vpop.f32.mrb[180].mxu1  ;;  %v14140_v61 = vpop.f32.mrb[144].mxu0 }
0x3531   :  { %v14065_v57 = vadd.f32 %v25459_v9, %v14064_v32  ;;  %v20689_v50 = vpop.f32.mrb[181].mxu1  ;;  %v20708_v60 = vpop.f32.mrb[145].mxu0  ;;  %v14141_v42 = vadd.f32 %v25465_v33, %v14140_v61  ;;  %v23039_v61 = vld [vmem:[%s25990_s1 + $0x10] sm:$0xff] }
0x3533   :  { %v17209_v1 = vmul.f32 -1.442695, %v14065_v57  ;;  %v17211_v24 = vmul.f32 -1.442695, %v14141_v42 }
0x3535   :  { %22923 = vpow2.f32 %v17209_v1 }
0x3536   :  { %22925 = vpow2.f32 %v17211_v24 }
0x3538   :  { %v14219_v45 = vpop.f32.mrb[182].mxu1  ;;  %v14291_v2 = vpop.f32.mrb[146].mxu0 }
0x3539   :  { %v20719_v59 = vpop.f32.mrb[183].mxu1  ;;  %v20730_v37 = vpop.f32.mrb[147].mxu0  ;;  %v14292_v63 = vadd.f32 %v25471_v48, %v14291_v2  ;;  %v14220_v17 = vadd.f32 %v25477_v20, %v14219_v45 }
0x353c   :  { %v14442_v46 = vpop.f32.mrb[184].mxu1 }
0x353d   :  { %v20740_v19 = vpop.f32.mrb[185].mxu1 }
0x353f   :  { %v22924_v3 = vpop.eup %22923 }
0x3540   :  { %v14071_v39 = vadd.f32 1.0, %v22924_v3  ;;  %v22926_v4 = vpop.eup %22925 }
0x3541   :  { %v14147_v10 = vadd.f32 1.0, %v22926_v4 }
0x3542   :  { %22927 = vrcp.f32 %v14071_v39 }
0x3543   :  { %22929 = vrcp.f32 %v14147_v10 }
0x354c   :  { %v22928_v5 = vpop.eup %22927 }
0x354d   :  { %v14295_v11 = vmul.f32 %v22928_v5, %v14292_v63  ;;  %v22930_v36 = vpop.eup %22929 }
0x354e   :  { %v14298_v14 = vsub.f32 1.0, %v22930_v36  ;;  %v14300_v55 = vmul.f32 %v22930_v36, %v25531_v58 }
0x354f   :  { %v14296_v62 = vadd.f32 %v14295_v11, %v14220_v17 }
0x3551   :  { %22931 = vtanh.f32 %v14296_v62 }
0x355b   :  { %v22932_v25 = vpop.eup %22931 }
0x355c   :  { %v14299_v30 = vmul.f32 %v22932_v25, %v14298_v14 }
0x355e   :  { %v25609_v32 = vadd.f32 %v14300_v55, %v14299_v30  ;;  %v23040_v30 = vld [vmem:[%s25990_s1 + $0x18] sm:$0xff]  ;;  %v14833_v55 = vpop.permute.xlu0 %14832 }
0x3560   :  { %14446 = vrot.lane.b32.xlu1 %v25609_v32, %s23051_s30  ;;  %20732 = vmatpush3.msk.msra.mxu0 %vm980_vm4, %v25609_v32 }
0x3561   :  { %22347 = vmatprep.subr.bf16.mxu0 %v23052_v7  ;;  %20734 = vmatmul.mubr.msk.f32.vlgmr.msra.gmra.mrb[142].mxu0 %vm976_vm5, %v23039_v61 }
0x3562   :  { %22349 = vmatpush3.bf16.msra.mxu0 %v23233_v12  ;;  %20776 = vmatprep.mubr.msk.f32.mxu0 %vm23050_vm1, %v23049_v0 }
0x3563   :  { %22350 = vmatprep.subr.bf16.mxu0 %v23052_v7 }
0x3566   :  { %22352 = vmatpush3.bf16.msra.mxu0 %v23250_v16 }
0x3567   :  { %22353 = vmatprep.subr.bf16.mxu0 %v23052_v7 }
0x356a   :  { %22355 = vmatpush3.bf16.msra.mxu0 %v23270_v22 }
0x356b   :  { %22356 = vmatprep.subr.bf16.mxu0 %v23052_v7 }
0x356e   :  { %22358 = vmatpush3.bf16.msra.mxu0 %v23290_v28 }
0x356f   :  { %22365 = vmatprep.subr.bf16.mxu0 %v23052_v7 }
0x35d2   :  { %v14447_v58 = vpop.permute.xlu1 %14446 }
0x35d3   :  { %v14449_v57 = vsel %vm281_vm2, %v14442_v46, %v14447_v58  ;;  %v23042_v58 = vld [vmem:[%s25996_s17] ss:$0 sm:$0xff] }
0x35d4   :  { %20758 = vmatmul.mubr.msk.f32.vlgmr.msra.gmra.mrb[186].mxu1 %vm283_vm3, %v14449_v57  ;;  %20777 = vmatmul.mubr.msk.f32.vlgmr.msra.gmra.mrb[148].mxu0 %vm283_vm3, %v14449_v57 }
0x35d5   :  { %22361 = vmatpush3.bf16.msra.mxu1 %v23309_v34  ;;  %22367 = vmatpush3.bf16.msra.mxu0 %v23317_v38 }
0x35d6   :  { %22362 = vmatprep.subr.bf16.mxu1 %v23052_v7  ;;  %22368 = vmatprep.subr.bf16.mxu0 %v23052_v7 }
0x35d7   :  { %20787 = vmatprep.mubr.msk.f32.mxu1 %vm23050_vm1, %v23049_v0  ;;  %20798 = vmatprep.mubr.msk.f32.mxu0 %vm23050_vm1, %v23049_v0 }
0x35d9   :  { %22364 = vmatpush3.bf16.msra.mxu1 %v23329_v43  ;;  %22370 = vmatpush3.bf16.msra.mxu0 %v23335_v44 }
0x35da   :  { %20801 = vmatprep.subr.mxu0 %v23049_v0  ;;  %22371 = vmatprep.subr.bf16.mxu1 %v23052_v7 }
0x35dc   :  { %20788 = vmatmul.mubr.msk.f32.vlgmr.msra.gmra.mrb[188].mxu1 %vm281_vm2, %v14442_v46  ;;  %20799 = vmatmul.mubr.msk.f32.vlgmr.msra.gmra.mrb[150].mxu0 %vm281_vm2, %v25609_v32 }
0x35dd   :  { %20803 = vmatprep.mubr.msk.f32.mxu0 %vm23050_vm1, %v23049_v0  ;;  %22373 = vmatpush3.bf16.msra.mxu1 %v23593_v40 }
0x35de   :  { %22374 = vmatprep.subr.bf16.mxu1 %v23052_v7  ;;  %20822 = vmatprep.mubr.msk.f32.mxu1 %vm23050_vm1, %v23049_v0 }
0x35e1   :  { %22376 = vmatpush3.bf16.msra.mxu1 %v23602_v47 }
0x35e2   :  { %22377 = vmatprep.subr.bf16.mxu1 %v23052_v7 }
0x35e5   :  { %22379 = vmatpush3.bf16.msra.mxu1 %v23615_v54 }
0x35e6   :  { %22380 = vmatprep.subr.bf16.mxu1 %v23052_v7 }
0x35e9   :  { %22382 = vmatpush3.bf16.msra.mxu1 %v23638_v13 }
0x35ea   :  { %22395 = vmatprep.subr.bf16.mxu1 %v23052_v7 }
0x36a7   :  { %v14519_v50 = vpop.f32.mrb[186].mxu1  ;;  %v14595_v60 = vpop.f32.mrb[148].mxu0 }
0x36a8   :  { %v14520_v40 = vadd.f32 %v25459_v9, %v14519_v50  ;;  %v20759_v1 = vpop.f32.mrb[187].mxu1  ;;  %v20778_v42 = vpop.f32.mrb[149].mxu0  ;;  %v14596_v45 = vadd.f32 %v25465_v33, %v14595_v60 }
0x36aa   :  { %v17218_v24 = vmul.f32 -1.442695, %v14520_v40  ;;  %v17220_v47 = vmul.f32 -1.442695, %v14596_v45 }
0x36ac   :  { %22933 = vpow2.f32 %v17218_v24 }
0x36ad   :  { %22935 = vpow2.f32 %v17220_v47 }
0x36af   :  { %v14674_v2 = vpop.f32.mrb[188].mxu1  ;;  %v14746_v59 = vpop.f32.mrb[150].mxu0 }
0x36b0   :  { %v20789_v54 = vpop.f32.mrb[189].mxu1  ;;  %v20800_v37 = vpop.f32.mrb[151].mxu0  ;;  %v14747_v39 = vadd.f32 %v25471_v48, %v14746_v59  ;;  %v14675_v10 = vadd.f32 %v25477_v20, %v14674_v2  ;;  %v23043_v59 = vld [vmem:[%s25997_s19] ss:$0 sm:$0xff] }
0x36b6   :  { %v22934_v46 = vpop.eup %22933 }
0x36b7   :  { %v14526_v13 = vadd.f32 1.0, %v22934_v46  ;;  %v22936_v19 = vpop.eup %22935  ;;  %v23044_v46 = vld [vmem:[%s25998_s18] ss:$0 sm:$0xff] }
0x36b8   :  { %v14602_v3 = vadd.f32 1.0, %v22936_v19 }
0x36b9   :  { %22937 = vrcp.f32 %v14526_v13 }
0x36ba   :  { %22939 = vrcp.f32 %v14602_v3 }
0x36c3   :  { %v22938_v4 = vpop.eup %22937 }
0x36c4   :  { %v14750_v63 = vmul.f32 %v22938_v4, %v14747_v39  ;;  %v22940_v17 = vpop.eup %22939 }
0x36c5   :  { %v14753_v11 = vsub.f32 1.0, %v22940_v17  ;;  %v14755_v14 = vmul.f32 %v22940_v17, %v25609_v32 }
0x36c6   :  { %v14751_v5 = vadd.f32 %v14750_v63, %v14675_v10 }
0x36c8   :  { %22941 = vtanh.f32 %v14751_v5 }
0x36d2   :  { %v22942_v62 = vpop.eup %22941 }
0x36d3   :  { %v14754_v36 = vmul.f32 %v22942_v62, %v14753_v11 }
0x36d5   :  { %v25665_v25 = vadd.f32 %v14755_v14, %v14754_v36 }
0x36d7   :  { %15213 = vrot.lane.b32.xlu1 %v25665_v25, %s23051_s30  ;;  %20802 = vmatpush3.msk.msra.mxu0 %vm980_vm4, %v25665_v25 }
0x36d8   :  { %20804 = vmatmul.mubr.msk.f32.vlgmr.msra.gmra.mrb[142].mxu0 %vm976_vm5, %v23040_v30  ;;  %22383 = vmatprep.subr.bf16.mxu0 %v23052_v7 }
0x36d9   :  { %22385 = vmatpush3.bf16.msra.mxu0 %v23635_v6  ;;  %20841 = vmatprep.mubr.msk.f32.mxu0 %vm23050_vm1, %v23049_v0 }
0x36da   :  { %22386 = vmatprep.subr.bf16.mxu0 %v23052_v7 }
0x36dd   :  { %22388 = vmatpush3.bf16.msra.mxu0 %v23655_v18 }
0x36de   :  { %22389 = vmatprep.subr.bf16.mxu0 %v23052_v7 }
0x36e1   :  { %22391 = vmatpush3.bf16.msra.mxu0 %v23669_v23 }
0x36e2   :  { %22392 = vmatprep.subr.bf16.mxu0 %v23052_v7 }
0x36e5   :  { %22394 = vmatpush3.bf16.msra.mxu0 %v23679_v26  ;;  %v23041_v26 = vld [vmem:[%s25995_s16] ss:$0 sm:$0xff] }
0x36e6   :  { %22401 = vmatprep.subr.bf16.mxu0 %v23052_v7 }
0x37ab   :  { %v14826_v32 = vpop.f32.mrb[142].mxu0 }
0x37ac   :  { %v14835_v6 = vsel %vm281_vm2, %v14826_v32, %v14833_v55  ;;  %v20805_v61 = vpop.f32.mrb[143].mxu0 }
0x37ad   :  { %20823 = vmatmul.mubr.msk.f32.vlgmr.msra.gmra.mrb[190].mxu1 %vm283_vm3, %v14835_v6  ;;  %20842 = vmatmul.mubr.msk.f32.vlgmr.msra.gmra.mrb[152].mxu0 %vm283_vm3, %v14835_v6 }
0x37ae   :  { %22397 = vmatpush3.bf16.msra.mxu1 %v23696_v35  ;;  %22403 = vmatpush3.bf16.msra.mxu0 %v23704_v41 }
0x37af   :  { %22398 = vmatprep.subr.bf16.mxu1 %v23052_v7  ;;  %22404 = vmatprep.subr.bf16.mxu0 %v23052_v7 }
0x37b0   :  { %20852 = vmatprep.mubr.msk.f32.mxu1 %vm23050_vm1, %v23049_v0  ;;  %20863 = vmatprep.mubr.msk.f32.mxu0 %vm23050_vm1, %v23049_v0 }
0x37b2   :  { %22400 = vmatpush3.bf16.msra.mxu1 %v23716_v52  ;;  %22406 = vmatpush3.bf16.msra.mxu0 %v23722_v53 }
0x37b3   :  { %20866 = vmatprep.subr.mxu1 %v23049_v0  ;;  %22419 = vmatprep.subr.bf16.mxu0 %v23052_v7 }
0x37b5   :  { %20853 = vmatmul.mubr.msk.f32.vlgmr.msra.gmra.mrb[192].mxu1 %vm281_vm2, %v14826_v32  ;;  %20864 = vmatmul.mubr.msk.f32.vlgmr.msra.gmra.mrb[154].mxu0 %vm281_vm2, %v25386_v51 }
0x37b6   :  { %20868 = vmatprep.mubr.msk.f32.mxu1 %vm23050_vm1, %v23049_v0  ;;  %22421 = vmatpush3.bf16.msra.mxu0 %v23233_v12 }
0x37b7   :  { %22422 = vmatprep.subr.bf16.mxu0 %v23052_v7  ;;  %20906 = vmatprep.mubr.msk.f32.mxu0 %vm23050_vm1, %v23049_v0 }
0x37ba   :  { %22424 = vmatpush3.bf16.msra.mxu0 %v23250_v16 }
0x37bb   :  { %22425 = vmatprep.subr.bf16.mxu0 %v23052_v7 }
0x37be   :  { %22427 = vmatpush3.bf16.msra.mxu0 %v23270_v22 }
0x37bf   :  { %22428 = vmatprep.subr.bf16.mxu0 %v23052_v7 }
0x37c2   :  { %22430 = vmatpush3.bf16.msra.mxu0 %v23290_v28 }
0x37c3   :  { %22437 = vmatprep.subr.bf16.mxu0 %v23052_v7 }
0x3880   :  { %v14905_v18 = vpop.f32.mrb[190].mxu1  ;;  %v14981_v23 = vpop.f32.mrb[152].mxu0 }
0x3881   :  { %v14906_v35 = vadd.f32 %v23041_v26, %v14905_v18  ;;  %v20824_v41 = vpop.f32.mrb[191].mxu1  ;;  %v20843_v52 = vpop.f32.mrb[153].mxu0  ;;  %v14982_v57 = vadd.f32 %v23042_v58, %v14981_v23 }
0x3883   :  { %v17226_v53 = vmul.f32 -1.442695, %v14906_v35  ;;  %v17228_v50 = vmul.f32 -1.442695, %v14982_v57 }
0x3885   :  { %22943 = vpow2.f32 %v17226_v53 }
0x3886   :  { %22945 = vpow2.f32 %v17228_v50 }
0x3888   :  { %v15060_v60 = vpop.f32.mrb[192].mxu1  ;;  %v15132_v40 = vpop.f32.mrb[154].mxu0 }
0x3889   :  { %v20854_v1 = vpop.f32.mrb[193].mxu1  ;;  %v20865_v42 = vpop.f32.mrb[155].mxu0  ;;  %v15133_v54 = vadd.f32 %v23043_v59, %v15132_v40  ;;  %v15061_v13 = vadd.f32 %v23044_v46, %v15060_v60 }
0x388f   :  { %v22944_v24 = vpop.eup %22943 }
0x3890   :  { %v14912_v45 = vadd.f32 1.0, %v22944_v24  ;;  %v22946_v47 = vpop.eup %22945 }
0x3891   :  { %v14988_v2 = vadd.f32 1.0, %v22946_v47 }
0x3892   :  { %22947 = vrcp.f32 %v14912_v45 }
0x3893   :  { %22949 = vrcp.f32 %v14988_v2 }
0x389c   :  { %v22948_v37 = vpop.eup %22947 }
0x389d   :  { %v15136_v19 = vmul.f32 %v22948_v37, %v15133_v54  ;;  %v22950_v39 = vpop.eup %22949 }
0x389e   :  { %v15139_v4 = vsub.f32 1.0, %v22950_v39  ;;  %v15141_v5 = vmul.f32 %v22950_v39, %v25386_v51  ;;  %v15214_v51 = vpop.permute.xlu1 %15213 }
0x389f   :  { %v15137_v3 = vadd.f32 %v15136_v19, %v15061_v13 }
0x38a1   :  { %22951 = vtanh.f32 %v15137_v3 }
0x38ab   :  { %v22952_v10 = vpop.eup %22951 }
0x38ac   :  { %v15140_v63 = vmul.f32 %v22952_v10, %v15139_v4 }
0x38ae   :  { %v25729_v17 = vadd.f32 %v15141_v5, %v15140_v63 }
0x38b0   :  { %20867 = vmatpush3.msra.mxu1 %v25729_v17 }
0x38b1   :  { %20869 = vmatmul.mubr.msk.f32.vlgmr.msra.gmra.mrb[194].mxu1 %vm203_vm0, %v25392_v56  ;;  %22407 = vmatprep.subr.bf16.mxu1 %v23052_v7 }
0x38b2   :  { %22409 = vmatpush3.bf16.msra.mxu1 %v23221_v8  ;;  %20887 = vmatprep.mubr.msk.f32.mxu1 %vm23050_vm1, %v23049_v0 }
0x38b3   :  { %22410 = vmatprep.subr.bf16.mxu1 %v23052_v7 }
0x38b6   :  { %22412 = vmatpush3.bf16.msra.mxu1 %v23244_v15 }
0x38b7   :  { %22413 = vmatprep.subr.bf16.mxu1 %v23052_v7 }
0x38ba   :  { %22415 = vmatpush3.bf16.msra.mxu1 %v23266_v21 }
0x38bb   :  { %22416 = vmatprep.subr.bf16.mxu1 %v23052_v7 }
0x38be   :  { %22418 = vmatpush3.bf16.msra.mxu1 %v23286_v27 }
0x38bf   :  { %22431 = vmatprep.subr.bf16.mxu1 %v23052_v7 }
0x3984   :  { %v15209_v56 = vpop.f32.mrb[194].mxu1 }
0x3985   :  { %v15216_v11 = vsel %vm281_vm2, %v15209_v56, %v15214_v51  ;;  %v20870_v62 = vpop.f32.mrb[195].mxu1 }
0x3986   :  { %20888 = vmatmul.mubr.msk.f32.vlgmr.msra.gmra.mrb[196].mxu1 %vm283_vm3, %v15216_v11  ;;  %20907 = vmatmul.mubr.msk.f32.vlgmr.msra.gmra.mrb[156].mxu0 %vm283_vm3, %v15216_v11 }
0x3987   :  { %22433 = vmatpush3.bf16.msra.mxu1 %v23309_v34  ;;  %22439 = vmatpush3.bf16.msra.mxu0 %v23317_v38 }
0x3988   :  { %22434 = vmatprep.subr.bf16.mxu1 %v23052_v7  ;;  %22440 = vmatprep.subr.bf16.mxu0 %v23052_v7 }
0x3989   :  { %20917 = vmatprep.mubr.msk.f32.mxu1 %vm23050_vm1, %v23049_v0  ;;  %20928 = vmatprep.mubr.msk.f32.mxu0 %vm23050_vm1, %v23049_v0 }
0x398b   :  { %22436 = vmatpush3.bf16.msra.mxu1 %v23329_v43  ;;  %22442 = vmatpush3.bf16.msra.mxu0 %v23335_v44 }
0x398c   :  { %20931 = vmatprep.subr.mxu1 %v23049_v0  ;;  %22443 = vmatprep.subr.bf16.mxu0 %v23052_v7 }
0x398e   :  { %20918 = vmatmul.mubr.msk.f32.vlgmr.msra.gmra.mrb[198].mxu1 %vm281_vm2, %v15209_v56  ;;  %20929 = vmatmul.mubr.msk.f32.vlgmr.msra.gmra.mrb[158].mxu0 %vm281_vm2, %v25665_v25 }
0x398f   :  { %20932 = vmatpush3.msra.mxu1 %v25729_v17  ;;  %20933 = vmatprep.mubr.msk.f32.mxu1 %vm23050_vm1, %v23049_v0 }
0x3990   :  { %22455 = vmatprep.subr.bf16.mxu1 %v23052_v7  ;;  %22445 = vmatpush3.bf16.msra.mxu0 %v23221_v8 }
0x3991   :  { %22446 = vmatprep.subr.bf16.mxu0 %v23052_v7  ;;  %20952 = vmatprep.mubr.msk.f32.mxu0 %vm23050_vm1, %v23049_v0 }
0x3992   :  { %20934 = vmatmul.mubr.msk.f32.vlgmr.msra.gmra.mrb[200].mxu1 %vm203_vm0, %v25436_v29 }
0x3993   :  { %22457 = vmatpush3.bf16.msra.mxu1 %v23233_v12  ;;  %20971 = vmatprep.mubr.msk.f32.mxu1 %vm23050_vm1, %v23049_v0 }
0x3994   :  { %22458 = vmatprep.subr.bf16.mxu1 %v23052_v7  ;;  %22448 = vmatpush3.bf16.msra.mxu0 %v23244_v15 }
0x3995   :  { %22449 = vmatprep.subr.bf16.mxu0 %v23052_v7 }
0x3997   :  { %22460 = vmatpush3.bf16.msra.mxu1 %v23250_v16 }
0x3998   :  { %22461 = vmatprep.subr.bf16.mxu1 %v23052_v7  ;;  %22451 = vmatpush3.bf16.msra.mxu0 %v23266_v21 }
0x3999   :  { %22452 = vmatprep.subr.bf16.mxu0 %v23052_v7 }
0x399b   :  { %22463 = vmatpush3.bf16.msra.mxu1 %v23270_v22 }
0x399c   :  { %22464 = vmatprep.subr.bf16.mxu1 %v23052_v7  ;;  %22454 = vmatpush3.bf16.msra.mxu0 %v23286_v27 }
0x399d   :  { %22467 = vmatprep.subr.bf16.mxu0 %v23052_v7 }
0x399f   :  { %22466 = vmatpush3.bf16.msra.mxu1 %v23290_v28 }
0x39a0   :  { %22473 = vmatprep.subr.bf16.mxu1 %v23052_v7 }
0x3a59   :  { %v15286_v29 = vpop.f32.mrb[196].mxu1  ;;  %v15362_v36 = vpop.f32.mrb[156].mxu0 }
0x3a5a   :  { %v15287_v14 = vadd.f32 %v25459_v9, %v15286_v29  ;;  %v20889_v30 = vpop.f32.mrb[197].mxu1  ;;  %v20908_v55 = vpop.f32.mrb[157].mxu0  ;;  %v15363_v6 = vadd.f32 %v25465_v33, %v15362_v36 }
0x3a5c   :  { %v17233_v32 = vmul.f32 -1.442695, %v15287_v14  ;;  %v17235_v61 = vmul.f32 -1.442695, %v15363_v6 }
0x3a5e   :  { %22953 = vpow2.f32 %v17233_v32 }
0x3a5f   :  { %22955 = vpow2.f32 %v17235_v61 }
0x3a61   :  { %v15441_v18 = vpop.f32.mrb[198].mxu1  ;;  %v15513_v23 = vpop.f32.mrb[158].mxu0 }
0x3a62   :  { %v20919_v26 = vpop.f32.mrb[199].mxu1  ;;  %v20930_v35 = vpop.f32.mrb[159].mxu0  ;;  %v15514_v60 = vadd.f32 %v25471_v48, %v15513_v23  ;;  %v15442_v1 = vadd.f32 %v25477_v20, %v15441_v18 }
0x3a65   :  { %v15590_v41 = vpop.f32.mrb[200].mxu1 }
0x3a66   :  { %v20935_v52 = vpop.f32.mrb[201].mxu1 }
0x3a68   :  { %v22954_v53 = vpop.eup %22953 }
0x3a69   :  { %v15293_v58 = vadd.f32 1.0, %v22954_v53  ;;  %v22956_v57 = vpop.eup %22955 }
0x3a6a   :  { %v15369_v50 = vadd.f32 1.0, %v22956_v57 }
0x3a6b   :  { %22957 = vrcp.f32 %v15293_v58 }
0x3a6c   :  { %22959 = vrcp.f32 %v15369_v50 }
0x3a75   :  { %v22958_v40 = vpop.eup %22957 }
0x3a76   :  { %v15517_v42 = vmul.f32 %v22958_v40, %v15514_v60  ;;  %v22960_v45 = vpop.eup %22959 }
0x3a77   :  { %v15520_v47 = vsub.f32 1.0, %v22960_v45  ;;  %v15522_v54 = vmul.f32 %v22960_v45, %v25665_v25 }
0x3a78   :  { %v15518_v24 = vadd.f32 %v15517_v42, %v15442_v1 }
0x3a7a   :  { %22961 = vtanh.f32 %v15518_v24 }
0x3a84   :  { %v22962_v2 = vpop.eup %22961 }
0x3a85   :  { %v15521_v59 = vmul.f32 %v22962_v2, %v15520_v47  ;;  %v25910_v47 = vld [vmem:[%s26035_s3] ss:$0 sm:$0xff] }
0x3a87   :  { %v25794_v37 = vadd.f32 %v15522_v54, %v15521_v59  ;;  %v23048_v54 = vld [vmem:[%s26036_s11] ss:$0 sm:$0xff] }
0x3a89   :  { %15595 = vrot.lane.b32.xlu0 %v25794_v37, %s23051_s30 }
0x3afb   :  { %v15596_v46 = vpop.permute.xlu0 %15595 }
0x3afc   :  { %v15598_v13 = vsel %vm281_vm2, %v15590_v41, %v15596_v46 }
0x3afd   :  { %20953 = vmatmul.mubr.msk.f32.vlgmr.msra.gmra.mrb[160].mxu0 %vm283_vm3, %v15598_v13  ;;  %20972 = vmatmul.mubr.msk.f32.vlgmr.msra.gmra.mrb[202].mxu1 %vm283_vm3, %v15598_v13 }
0x3afe   :  { %22469 = vmatpush3.bf16.msra.mxu0 %v23309_v34  ;;  %22475 = vmatpush3.bf16.msra.mxu1 %v23317_v38 }
0x3aff   :  { %22470 = vmatprep.subr.bf16.mxu0 %v23052_v7  ;;  %22476 = vmatprep.subr.bf16.mxu1 %v23052_v7 }
0x3b00   :  { %20982 = vmatprep.mubr.msk.f32.mxu0 %vm23050_vm1, %v23049_v0  ;;  %20993 = vmatprep.mubr.msk.f32.mxu1 %vm23050_vm1, %v23049_v0 }
0x3b02   :  { %22472 = vmatpush3.bf16.msra.mxu0 %v23329_v43  ;;  %22478 = vmatpush3.bf16.msra.mxu1 %v23335_v44 }
0x3b03   :  { %20996 = vmatprep.subr.mxu0 %v23049_v0  ;;  %22479 = vmatprep.subr.bf16.mxu1 %v23052_v7 }
0x3b05   :  { %20983 = vmatmul.mubr.msk.f32.vlgmr.msra.gmra.mrb[162].mxu0 %vm281_vm2, %v15590_v41  ;;  %20994 = vmatmul.mubr.msk.f32.vlgmr.msra.gmra.mrb[204].mxu1 %vm281_vm2, %v25794_v37 }
0x3b06   :  { %20997 = vmatpush3.msra.mxu0 %v25729_v17  ;;  %20998 = vmatprep.mubr.msk.f32.mxu0 %vm23050_vm1, %v23049_v0 }
0x3b07   :  { %22491 = vmatprep.subr.bf16.mxu0 %v23052_v7  ;;  %22481 = vmatpush3.bf16.msra.mxu1 %v23221_v8 }
0x3b08   :  { %22482 = vmatprep.subr.bf16.mxu1 %v23052_v7  ;;  %21017 = vmatprep.mubr.msk.f32.mxu1 %vm23050_vm1, %v23049_v0 }
0x3b09   :  { %20999 = vmatmul.mubr.msk.f32.vlgmr.msra.gmra.mrb[164].mxu0 %vm203_vm0, %v25512_v31 }
0x3b0a   :  { %22493 = vmatpush3.bf16.msra.mxu0 %v23233_v12  ;;  %21036 = vmatprep.mubr.msk.f32.mxu0 %vm23050_vm1, %v23049_v0 }
0x3b0b   :  { %22494 = vmatprep.subr.bf16.mxu0 %v23052_v7  ;;  %22484 = vmatpush3.bf16.msra.mxu1 %v23244_v15 }
0x3b0c   :  { %22485 = vmatprep.subr.bf16.mxu1 %v23052_v7 }
0x3b0e   :  { %22496 = vmatpush3.bf16.msra.mxu0 %v23250_v16 }
0x3b0f   :  { %22497 = vmatprep.subr.bf16.mxu0 %v23052_v7  ;;  %22487 = vmatpush3.bf16.msra.mxu1 %v23266_v21 }
0x3b10   :  { %22488 = vmatprep.subr.bf16.mxu1 %v23052_v7 }
0x3b12   :  { %22499 = vmatpush3.bf16.msra.mxu0 %v23270_v22 }
0x3b13   :  { %22500 = vmatprep.subr.bf16.mxu0 %v23052_v7  ;;  %22490 = vmatpush3.bf16.msra.mxu1 %v23286_v27 }
0x3b14   :  { %22503 = vmatprep.subr.bf16.mxu1 %v23052_v7 }
0x3b16   :  { %22502 = vmatpush3.bf16.msra.mxu0 %v23290_v28 }
0x3b17   :  { %22509 = vmatprep.subr.bf16.mxu0 %v23052_v7 }
0x3bd0   :  { %v15668_v31 = vpop.f32.mrb[160].mxu0  ;;  %v15744_v25 = vpop.f32.mrb[202].mxu1 }
0x3bd1   :  { %v15669_v19 = vadd.f32 %v25459_v9, %v15668_v31  ;;  %v20954_v3 = vpop.f32.mrb[161].mxu0  ;;  %v20973_v39 = vpop.f32.mrb[203].mxu1  ;;  %v15745_v10 = vadd.f32 %v25465_v33, %v15744_v25 }
0x3bd3   :  { %v17240_v4 = vmul.f32 -1.442695, %v15669_v19  ;;  %v17242_v63 = vmul.f32 -1.442695, %v15745_v10 }
0x3bd5   :  { %22963 = vpow2.f32 %v17240_v4 }
0x3bd6   :  { %22965 = vpow2.f32 %v17242_v63 }
0x3bd8   :  { %v15823_v5 = vpop.f32.mrb[162].mxu0  ;;  %v15895_v51 = vpop.f32.mrb[204].mxu1 }
0x3bd9   :  { %v20984_v56 = vpop.f32.mrb[163].mxu0  ;;  %v20995_v11 = vpop.f32.mrb[205].mxu1  ;;  %v15896_v30 = vadd.f32 %v25471_v48, %v15895_v51  ;;  %v15824_v55 = vadd.f32 %v25477_v20, %v15823_v5  ;;  %v16673_v5 = vld [vmem:[%s25999_s20 + $0x18] sm:$0xff] }
0x3bdc   :  { %v15972_v6 = vpop.f32.mrb[164].mxu0 }
0x3bdd   :  { %v21000_v61 = vpop.f32.mrb[165].mxu0 }
0x3bdf   :  { %v22964_v62 = vpop.eup %22963 }
0x3be0   :  { %v15675_v29 = vadd.f32 1.0, %v22964_v62  ;;  %v22966_v36 = vpop.eup %22965 }
0x3be1   :  { %v15751_v14 = vadd.f32 1.0, %v22966_v36 }
0x3be2   :  { %22967 = vrcp.f32 %v15675_v29 }
0x3be3   :  { %22969 = vrcp.f32 %v15751_v14 }
0x3bec   :  { %v22968_v9 = vpop.eup %22967 }
0x3bed   :  { %v15899_v32 = vmul.f32 %v22968_v9, %v15896_v30  ;;  %v22970_v18 = vpop.eup %22969 }
0x3bee   :  { %v15902_v23 = vsub.f32 1.0, %v22970_v18  ;;  %v15904_v41 = vmul.f32 %v22970_v18, %v25794_v37 }
0x3bef   :  { %v15900_v33 = vadd.f32 %v15899_v32, %v15824_v55 }
0x3bf1   :  { %22971 = vtanh.f32 %v15900_v33 }
0x3bfb   :  { %v22972_v26 = vpop.eup %22971 }
0x3bfc   :  { %v15903_v35 = vmul.f32 %v22972_v26, %v15902_v23 }
0x3bfe   :  { %v25847_v52 = vadd.f32 %v15904_v41, %v15903_v35 }
0x3c00   :  { %15977 = vrot.lane.b32.xlu1 %v25847_v52, %s23051_s30 }
0x3c72   :  { %v15978_v48 = vpop.permute.xlu1 %15977 }
0x3c73   :  { %v15980_v53 = vsel %vm281_vm2, %v15972_v6, %v15978_v48 }
0x3c74   :  { %21018 = vmatmul.mubr.msk.f32.vlgmr.msra.gmra.mrb[206].mxu1 %vm283_vm3, %v15980_v53  ;;  %21037 = vmatmul.mubr.msk.f32.vlgmr.msra.gmra.mrb[166].mxu0 %vm283_vm3, %v15980_v53 }
0x3c75   :  { %22505 = vmatpush3.bf16.msra.mxu1 %v23309_v34  ;;  %22511 = vmatpush3.bf16.msra.mxu0 %v23317_v38 }
0x3c76   :  { %22506 = vmatprep.subr.bf16.mxu1 %v23052_v7  ;;  %22512 = vmatprep.subr.bf16.mxu0 %v23052_v7 }
0x3c77   :  { %21047 = vmatprep.mubr.msk.f32.mxu1 %vm23050_vm1, %v23049_v0  ;;  %21058 = vmatprep.mubr.msk.f32.mxu0 %vm23050_vm1, %v23049_v0 }
0x3c79   :  { %22508 = vmatpush3.bf16.msra.mxu1 %v23329_v43  ;;  %22514 = vmatpush3.bf16.msra.mxu0 %v23335_v44 }
0x3c7a   :  { %21061 = vmatprep.subr.mxu1 %v23049_v0  ;;  %22515 = vmatprep.subr.bf16.mxu0 %v23052_v7 }
0x3c7c   :  { %21048 = vmatmul.mubr.msk.f32.vlgmr.msra.gmra.mrb[208].mxu1 %vm281_vm2, %v15972_v6  ;;  %21059 = vmatmul.mubr.msk.f32.vlgmr.msra.gmra.mrb[168].mxu0 %vm281_vm2, %v25847_v52 }
0x3c7d   :  { %21062 = vmatpush3.msra.mxu1 %v25729_v17  ;;  %21063 = vmatprep.mubr.msk.f32.mxu1 %vm23050_vm1, %v23049_v0 }
0x3c7e   :  { %22527 = vmatprep.subr.bf16.mxu1 %v23052_v7  ;;  %22517 = vmatpush3.bf16.msra.mxu0 %v23221_v8 }
0x3c7f   :  { %22518 = vmatprep.subr.bf16.mxu0 %v23052_v7  ;;  %21082 = vmatprep.mubr.msk.f32.mxu0 %vm23050_vm1, %v23049_v0 }
0x3c80   :  { %21064 = vmatmul.mubr.msk.f32.vlgmr.msra.gmra.mrb[210].mxu1 %vm203_vm0, %v25590_v49 }
0x3c81   :  { %22529 = vmatpush3.bf16.msra.mxu1 %v23233_v12  ;;  %21101 = vmatprep.mubr.msk.f32.mxu1 %vm23050_vm1, %v23049_v0 }
0x3c82   :  { %22530 = vmatprep.subr.bf16.mxu1 %v23052_v7  ;;  %22520 = vmatpush3.bf16.msra.mxu0 %v23244_v15  ;;  %v25898_v15 = vld [vmem:[%s26033_s28] ss:$0 sm:$0xff] }
0x3c83   :  { %22521 = vmatprep.subr.bf16.mxu0 %v23052_v7 }
0x3c85   :  { %22532 = vmatpush3.bf16.msra.mxu1 %v23250_v16 }
0x3c86   :  { %22533 = vmatprep.subr.bf16.mxu1 %v23052_v7  ;;  %22523 = vmatpush3.bf16.msra.mxu0 %v23266_v21 }
0x3c87   :  { %22524 = vmatprep.subr.bf16.mxu0 %v23052_v7 }
0x3c89   :  { %22535 = vmatpush3.bf16.msra.mxu1 %v23270_v22 }
0x3c8a   :  { %22536 = vmatprep.subr.bf16.mxu1 %v23052_v7  ;;  %22526 = vmatpush3.bf16.msra.mxu0 %v23286_v27  ;;  %v25904_v27 = vld [vmem:[%s26034_s2] ss:$0 sm:$0xff] }
0x3c8b   :  { %22539 = vmatprep.subr.bf16.mxu0 %v23052_v7 }
0x3c8d   :  { %22538 = vmatpush3.bf16.msra.mxu1 %v23290_v28 }
0x3c8e   :  { %22545 = vmatprep.subr.bf16.mxu1 %v23052_v7 }
0x3d47   :  { %v16050_v8 = vpop.f32.mrb[206].mxu1  ;;  %v16126_v12 = vpop.f32.mrb[166].mxu0 }
0x3d48   :  { %v16051_v16 = vadd.f32 %v25898_v15, %v16050_v8  ;;  %v21019_v21 = vpop.f32.mrb[207].mxu1  ;;  %v21038_v22 = vpop.f32.mrb[167].mxu0  ;;  %v16127_v28 = vadd.f32 %v25904_v27, %v16126_v12 }
0x3d49   :  { %v16755_v22 = vld [vmem:[%s26000_s22] sm:$0xff] }
0x3d4a   :  { %v17247_v20 = vmul.f32 -1.442695, %v16051_v16  ;;  %v17249_v49 = vmul.f32 -1.442695, %v16127_v28 }
0x3d4c   :  { %22973 = vpow2.f32 %v17247_v20  ;;  %v17259_v20 = vld [vmem:[%s26001_s21] ss:$0 sm:$0xff] }
0x3d4d   :  { %22975 = vpow2.f32 %v17249_v49 }
0x3d4f   :  { %v16205_v17 = vpop.f32.mrb[208].mxu1  ;;  %v16277_v58 = vpop.f32.mrb[168].mxu0 }
0x3d50   :  { %v21049_v57 = vpop.f32.mrb[209].mxu1  ;;  %v21060_v50 = vpop.f32.mrb[169].mxu0  ;;  %v16278_v2 = vadd.f32 %v25910_v47, %v16277_v58  ;;  %v16206_v37 = vadd.f32 %v23048_v54, %v16205_v17  ;;  %v16837_v58 = vld [vmem:[%s26002_s24] sm:$0xff] }
0x3d51   :  { %v17261_v57 = vld [vmem:[%s26003_s23] ss:$0 sm:$0xff] }
0x3d53   :  { %v16354_v60 = vpop.f32.mrb[210].mxu1 }
0x3d54   :  { %v21065_v40 = vpop.f32.mrb[211].mxu1 }
0x3d56   :  { %v22974_v1 = vpop.eup %22973 }
0x3d57   :  { %v16057_v42 = vadd.f32 1.0, %v22974_v1  ;;  %v22976_v24 = vpop.eup %22975 }
0x3d58   :  { %v16133_v45 = vadd.f32 1.0, %v22976_v24 }
0x3d59   :  { %22977 = vrcp.f32 %v16057_v42  ;;  %v17263_v42 = vld [vmem:[%s26004_s25] ss:$0 sm:$0xff] }
0x3d5a   :  { %22979 = vrcp.f32 %v16133_v45 }
0x3d63   :  { %v22978_v59 = vpop.eup %22977 }
0x3d64   :  { %v16281_v46 = vmul.f32 %v22978_v59, %v16278_v2  ;;  %v22980_v31 = vpop.eup %22979 }
0x3d65   :  { %v16284_v25 = vsub.f32 1.0, %v22980_v31  ;;  %v16286_v39 = vmul.f32 %v22980_v31, %v25847_v52 }
0x3d66   :  { %v16282_v13 = vadd.f32 %v16281_v46, %v16206_v37 }
0x3d68   :  { %22981 = vtanh.f32 %v16282_v13 }
0x3d72   :  { %v22982_v19 = vpop.eup %22981 }
0x3d73   :  { %v16285_v3 = vmul.f32 %v22982_v19, %v16284_v25 }
0x3d75   :  { %v16287_v4 = vadd.f32 %v16286_v39, %v16285_v3 }
0x3d77   :  { %16359 = vrot.lane.b32.xlu0 %v16287_v4, %s23051_s30 }
0x3de9   :  { %v16360_v10 = vpop.permute.xlu0 %16359 }
0x3dea   :  { %v16362_v63 = vsel %vm281_vm2, %v16354_v60, %v16360_v10 }
0x3deb   :  { %21083 = vmatmul.mubr.msk.f32.vlgmr.msra.gmra.mrb[170].mxu0 %vm283_vm3, %v16362_v63  ;;  %21102 = vmatmul.mubr.msk.f32.vlgmr.msra.gmra.mrb[212].mxu1 %vm283_vm3, %v16362_v63 }
0x3dec   :  { %22541 = vmatpush3.bf16.msra.mxu0 %v23309_v34  ;;  %22547 = vmatpush3.bf16.msra.mxu1 %v23317_v38  ;;  %v16670_v34 = vld [vmem:[%s25999_s20] sm:$0xff]  ;;  %v16671_v38 = vld [vmem:[%s25999_s20 + $0x8] sm:$0xff] }
0x3ded   :  { %22542 = vmatprep.subr.bf16.mxu0 %v23052_v7  ;;  %22548 = vmatprep.subr.bf16.mxu1 %v23052_v7 }
0x3dee   :  { %21112 = vmatprep.mubr.msk.f32.mxu0 %vm23050_vm1, %v23049_v0  ;;  %21123 = vmatprep.mubr.msk.f32.mxu1 %vm23050_vm1, %v23049_v0 }
0x3df0   :  { %22544 = vmatpush3.bf16.msra.mxu0 %v23329_v43  ;;  %22550 = vmatpush3.bf16.msra.mxu1 %v23335_v44  ;;  %v16672_v43 = vld [vmem:[%s25999_s20 + $0x10] sm:$0xff]  ;;  %v22552_v44 = vpack.c.bf16 %v16671_v38, %v16670_v34 }
0x3df1   :  { %22551 = vmatprep.subr.bf16.mxu0 %v23052_v7  ;;  %21137 = vmatprep.subr.mxu1 %v23049_v0  ;;  %v22555_v51 = vpack.c.bf16 %v16673_v5, %v16672_v43 }
0x3df3   :  { %21113 = vmatmul.mubr.msk.f32.vlgmr.msra.gmra.mrb[172].mxu0 %vm281_vm2, %v16354_v60  ;;  %21124 = vmatmul.mubr.msk.f32.vlgmr.msra.gmra.mrb[214].mxu1 %vm281_vm2, %v16287_v4 }
0x3df4   :  { %21134 = vmatprep.mubr.msk.f32.mxu0 %vm23050_vm1, %v23049_v0  ;;  %21139 = vmatprep.mubr.msk.f32.mxu1 %vm23050_vm1, %v23049_v0 }
0x3df5   :  { %22553 = vmatpush3.bf16.msra.mxu0 %v22552_v44  ;;  %21138 = vmatpush3.msra.mxu1 %v16755_v22 }
0x3df6   :  { %22554 = vmatprep.subr.bf16.mxu0 %v23052_v7  ;;  %21142 = vmatprep.subr.mxu1 %v23049_v0 }
0x3df9   :  { %22556 = vmatpush3.bf16.msra.mxu0 %v22555_v51 }
0x3ebe   :  { %v16432_v56 = vpop.f32.mrb[170].mxu0  ;;  %v16508_v11 = vpop.f32.mrb[212].mxu1 }
0x3ebf   :  { %v16433_v62 = vadd.f32 %v25898_v15, %v16432_v56  ;;  %v21084_v29 = vpop.f32.mrb[171].mxu0  ;;  %v21103_v36 = vpop.f32.mrb[213].mxu1  ;;  %v16509_v30 = vadd.f32 %v25904_v27, %v16508_v11 }
0x3ec1   :  { %v17254_v14 = vmul.f32 -1.442695, %v16433_v62  ;;  %v17256_v9 = vmul.f32 -1.442695, %v16509_v30 }
0x3ec3   :  { %22983 = vpow2.f32 %v17254_v14 }
0x3ec4   :  { %22985 = vpow2.f32 %v17256_v9 }
0x3ec6   :  { %v16587_v55 = vpop.f32.mrb[172].mxu0  ;;  %v16659_v32 = vpop.f32.mrb[214].mxu1 }
0x3ec7   :  { %v21114_v33 = vpop.f32.mrb[173].mxu0  ;;  %v21125_v6 = vpop.f32.mrb[215].mxu1  ;;  %v16660_v26 = vadd.f32 %v25910_v47, %v16659_v32  ;;  %v16588_v41 = vadd.f32 %v23048_v54, %v16587_v55 }
0x3ecd   :  { %v22984_v61 = vpop.eup %22983 }
0x3ece   :  { %v16439_v18 = vadd.f32 1.0, %v22984_v61  ;;  %v22986_v7 = vpop.eup %22985 }
0x3ecf   :  { %v16515_v23 = vadd.f32 1.0, %v22986_v7 }
0x3ed0   :  { %22987 = vrcp.f32 %v16439_v18 }
0x3ed1   :  { %22989 = vrcp.f32 %v16515_v23 }
0x3eda   :  { %v22988_v35 = vpop.eup %22987 }
0x3edb   :  { %v16663_v52 = vmul.f32 %v22988_v35, %v16660_v26  ;;  %v22990_v53 = vpop.eup %22989 }
0x3edc   :  { %v16666_v8 = vsub.f32 1.0, %v22990_v53  ;;  %v16668_v16 = vmul.f32 %v22990_v53, %v16287_v4 }
0x3edd   :  { %v16664_v48 = vadd.f32 %v16663_v52, %v16588_v41 }
0x3edf   :  { %22991 = vtanh.f32 %v16664_v48 }
0x3ee9   :  { %v22992_v12 = vpop.eup %22991 }
0x3eea   :  { %v16667_v15 = vmul.f32 %v22992_v12, %v16666_v8 }
0x3eec   :  { %v16669_v21 = vadd.f32 %v16668_v16, %v16667_v15 }
0x3eee   :  { %21135 = vmatmul.mubr.msk.f32.vlgmr.msra.gmra.mrb[174].mxu0 %vm281_vm2, %v16669_v21 }
0x3fc1   :  { %v16750_v27 = vpop.f32.mrb[174].mxu0 }
0x3fc2   :  { %v16751_v28 = vadd.f32 %v17259_v20, %v16750_v27  ;;  %v21136_v49 = vpop.f32.mrb[175].mxu0 }
0x3fc4   :  { %v16754_v17 = vmax.f32 %v16751_v28, 0.0 }
0x3fc6   :  { %21140 = vmatmul.mubr.msk.f32.vlgmr.msra.gmra.mrb[216].mxu1 %vm203_vm0, %v16754_v17 }
0x3fc7   :  { %21144 = vmatprep.mubr.msk.f32.mxu1 %vm23050_vm1, %v23049_v0  ;;  %21143 = vmatpush3.msra.mxu1 %v16837_v58 }
0x4099   :  { %v16832_v50 = vpop.f32.mrb[216].mxu1 }
0x409a   :  { %v16833_v60 = vadd.f32 %v17261_v57, %v16832_v50  ;;  %v21141_v40 = vpop.f32.mrb[217].mxu1 }
0x409c   :  { %v16836_v1 = vmax.f32 %v16833_v60, 0.0 }
0x409e   :  { %21145 = vmatmul.mubr.msk.f32.vlgmr.msra.gmra.mrb[218].mxu1 %vm203_vm0, %v16836_v1 }
0x4171   :  { %v16914_v0 = vpop.f32.mrb[218].mxu1 }
0x4172   :  { %v16915_v24 = vadd.f32 %v17263_v42, %v16914_v0  ;;  %v21146_v45 = vpop.f32.mrb[219].mxu1 }
0x4174   :  { %16918 = vst [vmem:[%s26005_s26] sm:$0xf] %v16915_v24 }

</bundles_post_ra>
